<compile_context>
chip_gen: v7x
topology: tpu7x:2x2x1
jax: 0.10.0
libtpu: 0.0.40
codegen_flags: <defaults>
</compile_context>

<pallas_src>
import functools
import jax
import jax.numpy as jnp
from jax.experimental import pallas as pl
from jax.experimental.pallas import tpu as pltpu

F32 = jnp.float32
MXU_DTYPE = jnp.bfloat16
ATTN_PAD = 128            # 81 attention logits padded to one lane-dense width
NEG_BIG = -1e30           # -inf stand-in for max-pool padding / logit padding


def _round_up(x, m):
    return (x + m - 1) // m * m


def _tpu_plan():
    """(tm, tn, tk) caps for the fu matmul + scoped-VMEM limit per generation.
    Unknown / AOT / mocked targets fall back to the conservative 128x128 set."""
    try:
        kind = jax.devices()[0].device_kind.lower()
    except Exception:
        kind = ""
    if "v6" in kind:
        return (512, 256, 512), 96 * 1024 * 1024      # 128 MiB physical VMEM
    if "v7" in kind or "7x" in kind:
        return (256, 256, 512), 48 * 1024 * 1024      # 64 MiB physical VMEM
    return (128, 128, 512), 32 * 1024 * 1024          # v5e/v4/unknown


# ------------- fused v_pj + attn + softmax + PV + fold + pools + combine -------------

def _attn_stem_kernel(x_ref, xt_ref, wv_ref, bv_ref, wa_ref, ba_ref,
                      xb_ref, x2_ref, buf_ref, acc_ref, *, S, Cp):
    L = S * S

    # ---- v_pj on the spatially-transposed image: gives v^T (vt) directly ----
    xt_img = xt_ref[0]                                               # (S,S,Cp) f32
    vt = jnp.dot(xt_img.reshape(L, Cp).astype(MXU_DTYPE), wv_ref[...],
                 preferred_element_type=jnp.float32) + bv_ref[...]   # (L,Cp)
    buf_ref[...] = jnp.zeros_like(buf_ref)            # zero halo (unfold pad=1)
    buf_ref[1:S + 1, 1:S + 1, :] = vt.reshape(S, S, Cp)

    # ---- attention logits + grouped softmax (9 groups of 9 lanes) ----
    lg = jnp.dot(x_ref[0].reshape(L, Cp), wa_ref[...],
                 preferred_element_type=jnp.float32) + ba_ref[...]   # (L,128)
    lg = lg - jnp.max(lg, axis=-1, keepdims=True)  # per-row shift == per-group shift
    e = jnp.exp(lg)                                # padded cols: exp(~-1e30) == 0

    # ---- PV product + 3x3 fold overlap-add: 81 unrolled lane-dense FMAs ----
    vsl = [buf_ref[dw:dw + S, dh:dh + S, :].reshape(L, Cp)
           for dw in range(3) for dh in range(3)]
    acc_ref[...] = jnp.zeros_like(acc_ref)
    for p in range(9):
        kh, kw = divmod(p, 3)
        den = e[:, 9 * p:9 * p + 1]
        for q in range(1, 9):
            den = den + e[:, 9 * p + q:9 * p + q + 1]
        inv_d = 1.0 / den                              # exact softmax denominator
        out_p = None
        for q in range(9):
            w = e[:, 9 * p + q:9 * p + q + 1] * inv_d  # (L,1) softmax weight
            t = w * vsl[q]                             # lane-dense (L,Cp) FMA
            out_p = t if out_p is None else out_p + t
        acc_ref[kh:kh + S, kw:kw + S, :] += out_p.reshape(S, S, Cp)
    x4 = acc_ref[1:S + 1, 1:S + 1, :]     # fold centre == x4 already in output order

    # ---- separable 3x3 / 5x5 max-pools of x_t  (pool5 = pool3 o pool3) ----
    buf_ref[...] = jnp.full(buf_ref.shape, NEG_BIG, dtype=buf_ref.dtype)
    buf_ref[1:S + 1, 1:S + 1, :] = xt_img
    h = jnp.maximum(jnp.maximum(buf_ref[1:S + 1, 0:S, :],
                                buf_ref[1:S + 1, 1:S + 1, :]),
                    buf_ref[1:S + 1, 2:S + 2, :])
    buf_ref[1:S + 1, 1:S + 1, :] = h
    p3 = jnp.maximum(jnp.maximum(buf_ref[0:S, 1:S + 1, :],
                                 buf_ref[1:S + 1, 1:S + 1, :]),
                     buf_ref[2:S + 2, 1:S + 1, :])
    buf_ref[1:S + 1, 1:S + 1, :] = p3
    h = jnp.maximum(jnp.maximum(buf_ref[1:S + 1, 0:S, :],
                                buf_ref[1:S + 1, 1:S + 1, :]),
                    buf_ref[1:S + 1, 2:S + 2, :])
    buf_ref[1:S + 1, 1:S + 1, :] = h
    p5 = jnp.maximum(jnp.maximum(buf_ref[0:S, 1:S + 1, :],
                                 buf_ref[1:S + 1, 1:S + 1, :]),
                     buf_ref[2:S + 2, 1:S + 1, :])

    # ---- ReLU / add / ReLU branch combine (reference x, x2 before concat) ----
    xb = jnp.maximum(jnp.maximum(x4, 0.0) + p3, 0.0)
    x2 = jnp.maximum(xb + p5, 0.0)
    xb_ref[0] = xb.astype(xb_ref.dtype)
    x2_ref[0] = x2.astype(x2_ref.dtype)


def attention_stem_pallas(x_bf, x_t, wv, bv, wa, ba, vmem_limit):
    """One grid step per image; weights stay VMEM-resident across steps.
    TODO(synk): for very large S*C, row-tile each image (halo index_map) so
    blocks + scratch stay within v7x's 64 MiB VMEM."""
    B, S, _, Cp = x_t.shape
    img = lambda b: (b, 0, 0, 0)
    cst = lambda b: (0, 0)
    out_sds = jax.ShapeDtypeStruct((B, S, S, Cp), MXU_DTYPE)
    return pl.pallas_call(
        functools.partial(_attn_stem_kernel, S=S, Cp=Cp),
        out_shape=(out_sds, out_sds),
        grid=(B,),
        in_specs=[pl.BlockSpec((1, S, S, Cp), img),      # x  (bf16, original order)
                  pl.BlockSpec((1, S, S, Cp), img),      # x_t (f32, transposed order)
                  pl.BlockSpec((Cp, Cp), cst),           # v_pj weight (bf16)
                  pl.BlockSpec((1, Cp), cst),            # v_pj bias
                  pl.BlockSpec((Cp, ATTN_PAD), cst),     # attn weight (bf16)
                  pl.BlockSpec((1, ATTN_PAD), cst)],     # attn bias (pad = -1e30)
        out_specs=(pl.BlockSpec((1, S, S, Cp), img),
                   pl.BlockSpec((1, S, S, Cp), img)),
        scratch_shapes=[pltpu.VMEM((S + 2, S + 2, Cp), jnp.float32),   # halo / pool buf
                        pltpu.VMEM((S + 2, S + 2, Cp), jnp.float32)],  # fold accumulator
        compiler_params=pltpu.CompilerParams(
            dimension_semantics=("parallel",), vmem_limit_bytes=vmem_limit),
        cost_estimate=pl.CostEstimate(
            flops=2 * B * S * S * Cp * (Cp + ATTN_PAD + 81) + 24 * B * S * S * Cp,
            transcendentals=B * S * S * ATTN_PAD,
            bytes_accessed=B * S * S * Cp * (2 + 4 + 2 + 2)
                           + 2 * Cp * (Cp + ATTN_PAD)),
    )(x_bf, x_t, wv, bv, wa, ba)


# ---------- fused fu linear + bias + ReLU + residual + bn1(eval) affine ----------

def _fu_bn_kernel(xb_ref, x2_ref, w1_ref, w2_ref, b_ref, r_ref, sc_ref, sh_ref,
                  o_ref, acc_ref, *, nk):
    @pl.when(pl.program_id(2) == 0)
    def _init():
        acc_ref[...] = jnp.zeros_like(acc_ref)

    acc_ref[...] += (
        jnp.dot(xb_ref[...], w1_ref[...], preferred_element_type=jnp.float32) +
        jnp.dot(x2_ref[...], w2_ref[...], preferred_element_type=jnp.float32))

    @pl.when(pl.program_id(2) == nk - 1)
    def _fini():
        y = jnp.maximum(acc_ref[...] + b_ref[...], 0.0)   # fu bias + ReLU
        y = y + r_ref[...]                                # residual (x3)
        o_ref[...] = y * sc_ref[...] + sh_ref[...]        # bn1 affine (eval)


def fu_residual_bn_pallas(xb, x2, fu_w, fu_b, res, scale, shift, vmem_limit, tiles):
    """bn_affine(res + relu(concat([xb, x2], -1) @ fu_w + fu_b)).  The concat is
    never materialized: fu_w is split into its two K halves sharing one f32
    accumulator; xb / x2 arrive channel-padded bf16 straight from the attention
    kernel (no f32 round-trip)."""
    B, S1, S2, Cp = xb.shape
    C = fu_w.shape[1]
    M, K = B * S1 * S2, Cp
    tm_c, tn_c, tk_c = tiles
    Mr = _round_up(M, 16)                          # bf16 activations: 16-row sublane tile
    tm, tn, tk = min(tm_c, Mr), min(tn_c, Cp), min(tk_c, K)
    Mp, Np, Kp = _round_up(Mr, tm), _round_up(Cp, tn), _round_up(K, tk)

    def pad_act(a):
        return jnp.pad(a.reshape(M, K), ((0, Mp - M), (0, Kp - K)))

    def pad_w(wh):
        return jnp.pad(wh.astype(MXU_DTYPE), ((0, Kp - C), (0, Np - C)))

    xbp, x2p = pad_act(xb), pad_act(x2)
    w1p, w2p = pad_w(fu_w[:C]), pad_w(fu_w[C:])
    bp = jnp.pad(fu_b.astype(F32), (0, Np - C)).reshape(1, Np)
    scp = jnp.pad(scale.astype(F32), (0, Np - C)).reshape(1, Np)
    shp = jnp.pad(shift.astype(F32), (0, Np - C)).reshape(1, Np)
    rp = jnp.pad(res.reshape(M, Cp).astype(F32), ((0, Mp - M), (0, Np - Cp)))

    nk = Kp // tk
    act_spec = pl.BlockSpec((tm, tk), lambda i, j, k: (i, k))
    w_spec = pl.BlockSpec((tk, tn), lambda i, j, k: (k, j))
    row_spec = pl.BlockSpec((1, tn), lambda i, j, k: (0, j))
    out = pl.pallas_call(
        functools.partial(_fu_bn_kernel, nk=nk),
        out_shape=jax.ShapeDtypeStruct((Mp, Np), F32),
        grid=(Mp // tm, Np // tn, nk),
        in_specs=[act_spec, act_spec, w_spec, w_spec, row_spec,
                  pl.BlockSpec((tm, tn), lambda i, j, k: (i, j)),
                  row_spec, row_spec],
        out_specs=pl.BlockSpec((tm, tn), lambda i, j, k: (i, j)),
        scratch_shapes=[pltpu.VMEM((tm, tn), jnp.float32)],
        compiler_params=pltpu.CompilerParams(
            dimension_semantics=("parallel", "parallel", "arbitrary"),
            vmem_limit_bytes=vmem_limit),
        cost_estimate=pl.CostEstimate(
            flops=4 * Mp * Np * Kp, transcendentals=0,
            bytes_accessed=4 * Mp * Kp + 4 * Kp * Np + 8 * Mp * Np),
    )(xbp, x2p, w1p, w2p, bp, rp, scp, shp)
    return out[:M, :C].reshape(B, S1, S2, C)


# -------------------------------- MOA forward --------------------------------

def moa_forward(p, x):
    """MOA.forward (eval mode).  x: (B, H, W, hidden), H == W.
    The dead 5x5 attention branch / Dropout / bn2 do not affect the reference
    output and are not computed."""
    B, H, W, C = x.shape
    assert H == W, "reference MOA shape algebra requires H == W"
    S = H
    Cp = _round_up(C, 128)
    tiles, vmem = _tpu_plan()

    x = x.astype(F32)
    xpad = jnp.pad(x, ((0, 0), (0, 0), (0, 0), (0, Cp - C)))
    # TODO(synk): this single HBM relayout could also be folded into a spatially
    # tiled BlockSpec index_map (swap grid axes) at production sizes.
    x_t = jnp.transpose(xpad, (0, 2, 1, 3))        # pipeline runs in this order
    x_bf = xpad.astype(MXU_DTYPE)                  # original order, logits operand

    wv = jnp.pad(p['v_pj_w'].astype(MXU_DTYPE), ((0, Cp - C), (0, Cp - C)))
    bv = jnp.pad(p['v_pj_b'].astype(F32), (0, Cp - C)).reshape(1, Cp)
    wa = jnp.pad(p['attn_w'].astype(MXU_DTYPE), ((0, Cp - C), (0, ATTN_PAD - 81)))
    ba = jnp.pad(p['attn_b'].astype(F32), (0, ATTN_PAD - 81),
                 constant_values=NEG_BIG).reshape(1, ATTN_PAD)

    xb, x2 = attention_stem_pallas(x_bf, x_t, wv, bv, wa, ba, vmem)

    eps = 1e-5
    scale = p['bn1_gamma'] * jax.lax.rsqrt(p['bn1_var'] + eps)
    shift = p['bn1_beta'] - p['bn1_mean'] * scale
    # The result lands directly in the reference's final permute(0,2,1,3) order:
    # no output transpose needed.
    return fu_residual_bn_pallas(xb, x2, p['fu_w'], p['fu_b'], x_t,
                                 scale, shift, vmem, tiles)


# --------------------------------- params ---------------------------------

def init_moa_params(key, hidden_dim):
    ks = iter(jax.random.split(key, 8))

    def w(shape, s=0.05):
        return jax.random.normal(next(ks), shape, F32) * s

    C = hidden_dim
    return dict(
        v_pj_w=w((C, C)), v_pj_b=w((C,)),
        attn_w=w((C, 3 ** 4)), attn_b=w((3 ** 4,)),
        # attn2 / unfold2 / fold2 params omitted: that branch's fold result is
        # discarded by the reference (`x2 = self.relu(x)` overwrites it).
        fu_w=w((2 * C, C)), fu_b=w((C,)),
        bn1_gamma=jnp.ones((C,), F32), bn1_beta=jnp.zeros((C,), F32),
        bn1_mean=jnp.zeros((C,), F32), bn1_var=jnp.ones((C,), F32),
    )


if __name__ == "__main__":
    B, S, C = 2, 8, 32                      # (batch, H=W, hidden_dim)
    key = jax.random.PRNGKey(0)
    kp, kx = jax.random.split(key)
    params = init_moa_params(kp, C)
    x = jax.random.normal(kx, (B, S, S, C), F32)

    out = jax.jit(moa_forward)(params, x)
    out = jax.block_until_ready(out)
    assert out.shape == (B, S, S, C)
    assert bool(jnp.all(jnp.isfinite(out)))
    print("KERNEL_OK")
</pallas_src>

<mosaic_0001>
module attributes {stable_mosaic.version = 11 : i64} {
  func.func @_fu_bn_kernel(%arg0: i32, %arg1: i32, %arg2: i32, %arg3: memref<128x128xbf16, #tpu.memory_space<vmem>>, %arg4: memref<128x128xbf16, #tpu.memory_space<vmem>>, %arg5: memref<128x128xbf16, #tpu.memory_space<vmem>>, %arg6: memref<128x128xbf16, #tpu.memory_space<vmem>>, %arg7: memref<1x128xf32, #tpu.memory_space<vmem>>, %arg8: memref<128x128xf32, #tpu.memory_space<vmem>>, %arg9: memref<1x128xf32, #tpu.memory_space<vmem>>, %arg10: memref<1x128xf32, #tpu.memory_space<vmem>>, %arg11: memref<128x128xf32, #tpu.memory_space<vmem>>, %arg12: memref<128x128xf32, #tpu.memory_space<vmem>>) attributes {dimension_semantics = [#tpu.dimension_semantics<parallel>, #tpu.dimension_semantics<parallel>, #tpu.dimension_semantics<arbitrary>], iteration_bounds = array<i64: 1, 1, 1>, scalar_prefetch = 0 : i64, scratch_operands = 1 : i64, tpu.core_type = #tpu.core_type<tc>, window_params = [{transform_indices = @transform_0, window_bounds = array<i64: 128, 128>}, {transform_indices = @transform_1, window_bounds = array<i64: 128, 128>}, {transform_indices = @transform_2, window_bounds = array<i64: 128, 128>}, {transform_indices = @transform_3, window_bounds = array<i64: 128, 128>}, {transform_indices = @transform_4, window_bounds = array<i64: 1, 128>}, {transform_indices = @transform_5, window_bounds = array<i64: 128, 128>}, {transform_indices = @transform_6, window_bounds = array<i64: 1, 128>}, {transform_indices = @transform_7, window_bounds = array<i64: 1, 128>}, {transform_indices = @transform_8, window_bounds = array<i64: 128, 128>}]} {
    %c0_i32 = arith.constant 0 : i32
    %0 = arith.cmpi eq, %arg2, %c0_i32 : i32
    %1 = arith.extui %0 : i1 to i32
    %c0_i32_0 = arith.constant 0 : i32
    %2 = arith.cmpi ne, %1, %c0_i32_0 : i32
    scf.if %2 {
      %cst_15 = arith.constant 0.000000e+00 : f32
      %16 = vector.broadcast %cst_15 : f32 to vector<128x128xf32>
      %c0_16 = arith.constant 0 : index
      %c0_17 = arith.constant 0 : index
      %17 = vector.load %arg12[%c0_16, %c0_17] : memref<128x128xf32, #tpu.memory_space<vmem>>, vector<128x128xf32>
      tpu.vector_store %arg12[%c0_16, %c0_17], %16 {strides = array<i32>} : memref<128x128xf32, #tpu.memory_space<vmem>>, vector<128x128xf32>,
    } else {
    }
    %c0 = arith.constant 0 : index
    %c0_1 = arith.constant 0 : index
    %3 = vector.load %arg12[%c0, %c0_1] : memref<128x128xf32, #tpu.memory_space<vmem>>, vector<128x128xf32>
    %c0_2 = arith.constant 0 : index
    %c0_3 = arith.constant 0 : index
    %4 = vector.load %arg3[%c0_2, %c0_3] : memref<128x128xbf16, #tpu.memory_space<vmem>>, vector<128x128xbf16>
    %c0_4 = arith.constant 0 : index
    %c0_5 = arith.constant 0 : index
    %5 = vector.load %arg5[%c0_4, %c0_5] : memref<128x128xbf16, #tpu.memory_space<vmem>>, vector<128x128xbf16>
    %cst = arith.constant dense<0.000000e+00> : vector<128x128xf32>
    %6 = tpu.matmul %4, %5, %cst {dimension_numbers = #tpu.dot_dimension_numbers<[1], [0], [0], [1], [0, 0, 1, 1], [], []>} : vector<128x128xbf16>, vector<128x128xbf16>, vector<128x128xf32> -> vector<128x128xf32>
    %c0_6 = arith.constant 0 : index
    %c0_7 = arith.constant 0 : index
    %7 = vector.load %arg4[%c0_6, %c0_7] : memref<128x128xbf16, #tpu.memory_space<vmem>>, vector<128x128xbf16>
    %c0_8 = arith.constant 0 : index
    %c0_9 = arith.constant 0 : index
    %8 = vector.load %arg6[%c0_8, %c0_9] : memref<128x128xbf16, #tpu.memory_space<vmem>>, vector<128x128xbf16>
    %cst_10 = arith.constant dense<0.000000e+00> : vector<128x128xf32>
    %9 = tpu.matmul %7, %8, %cst_10 {dimension_numbers = #tpu.dot_dimension_numbers<[1], [0], [0], [1], [0, 0, 1, 1], [], []>} : vector<128x128xbf16>, vector<128x128xbf16>, vector<128x128xf32> -> vector<128x128xf32>
    %10 = arith.addf %6, %9 : vector<128x128xf32>
    %11 = arith.addf %3, %10 : vector<128x128xf32>
    %c0_11 = arith.constant 0 : index
    %c0_12 = arith.constant 0 : index
    %12 = vector.load %arg12[%c0_11, %c0_12] : memref<128x128xf32, #tpu.memory_space<vmem>>, vector<128x128xf32>
    tpu.vector_store %arg12[%c0_11, %c0_12], %11 {strides = array<i32>} : memref<128x128xf32, #tpu.memory_space<vmem>>, vector<128x128xf32>,
    %c0_i32_13 = arith.constant 0 : i32
    %13 = arith.cmpi eq, %arg2, %c0_i32_13 : i32
    %14 = arith.extui %13 : i1 to i32
    %c0_i32_14 = arith.constant 0 : i32
    %15 = arith.cmpi ne, %14, %c0_i32_14 : i32
    scf.if %15 {
      %c0_15 = arith.constant 0 : index
      %c0_16 = arith.constant 0 : index
      %16 = vector.load %arg12[%c0_15, %c0_16] : memref<128x128xf32, #tpu.memory_space<vmem>>, vector<128x128xf32>
      %c0_17 = arith.constant 0 : index
      %c0_18 = arith.constant 0 : index
      %17 = vector.load %arg7[%c0_17, %c0_18] : memref<1x128xf32, #tpu.memory_space<vmem>>, vector<1x128xf32>
      %18 = vector.broadcast %17 : vector<1x128xf32> to vector<128x128xf32>
      %19 = arith.addf %16, %18 : vector<128x128xf32>
      %cst_19 = arith.constant 0.000000e+00 : f32
      %20 = vector.broadcast %cst_19 : f32 to vector<128x128xf32>
      %21 = arith.maximumf %19, %20 : vector<128x128xf32>
      %c0_20 = arith.constant 0 : index
      %c0_21 = arith.constant 0 : index
      %22 = vector.load %arg8[%c0_20, %c0_21] : memref<128x128xf32, #tpu.memory_space<vmem>>, vector<128x128xf32>
      %23 = arith.addf %21, %22 : vector<128x128xf32>
      %c0_22 = arith.constant 0 : index
      %c0_23 = arith.constant 0 : index
      %24 = vector.load %arg9[%c0_22, %c0_23] : memref<1x128xf32, #tpu.memory_space<vmem>>, vector<1x128xf32>
      %25 = vector.broadcast %24 : vector<1x128xf32> to vector<128x128xf32>
      %26 = arith.mulf %23, %25 : vector<128x128xf32>
      %c0_24 = arith.constant 0 : index
      %c0_25 = arith.constant 0 : index
      %27 = vector.load %arg10[%c0_24, %c0_25] : memref<1x128xf32, #tpu.memory_space<vmem>>, vector<1x128xf32>
      %28 = vector.broadcast %27 : vector<1x128xf32> to vector<128x128xf32>
      %29 = arith.addf %26, %28 : vector<128x128xf32>
      %c0_26 = arith.constant 0 : index
      %c0_27 = arith.constant 0 : index
      %30 = vector.load %arg11[%c0_26, %c0_27] : memref<128x128xf32, #tpu.memory_space<vmem>>, vector<128x128xf32>
      tpu.vector_store %arg11[%c0_26, %c0_27], %29 {strides = array<i32>} : memref<128x128xf32, #tpu.memory_space<vmem>>, vector<128x128xf32>,
    } else {
    }
    return
  }
  func.func @transform_0(%arg0: i32, %arg1: i32, %arg2: i32) -> (i32, i32) {
    %c0_i32 = arith.constant 0 : i32
    return %arg0, %arg2 : i32, i32
  }
  func.func @transform_1(%arg0: i32, %arg1: i32, %arg2: i32) -> (i32, i32) {
    %c0_i32 = arith.constant 0 : i32
    return %arg0, %arg2 : i32, i32
  }
  func.func @transform_2(%arg0: i32, %arg1: i32, %arg2: i32) -> (i32, i32) {
    %c0_i32 = arith.constant 0 : i32
    return %arg2, %arg1 : i32, i32
  }
  func.func @transform_3(%arg0: i32, %arg1: i32, %arg2: i32) -> (i32, i32) {
    %c0_i32 = arith.constant 0 : i32
    return %arg2, %arg1 : i32, i32
  }
  func.func @transform_4(%arg0: i32, %arg1: i32, %arg2: i32) -> (i32, i32) {
    %c0_i32 = arith.constant 0 : i32
    %c0_i32_0 = arith.constant 0 : i32
    return %c0_i32, %arg1 : i32, i32
  }
  func.func @transform_5(%arg0: i32, %arg1: i32, %arg2: i32) -> (i32, i32) {
    %c0_i32 = arith.constant 0 : i32
    return %arg0, %arg1 : i32, i32
  }
  func.func @transform_6(%arg0: i32, %arg1: i32, %arg2: i32) -> (i32, i32) {
    %c0_i32 = arith.constant 0 : i32
    %c0_i32_0 = arith.constant 0 : i32
    return %c0_i32, %arg1 : i32, i32
  }
  func.func @transform_7(%arg0: i32, %arg1: i32, %arg2: i32) -> (i32, i32) {
    %c0_i32 = arith.constant 0 : i32
    %c0_i32_0 = arith.constant 0 : i32
    return %c0_i32, %arg1 : i32, i32
  }
  func.func @transform_8(%arg0: i32, %arg1: i32, %arg2: i32) -> (i32, i32) {
    %c0_i32 = arith.constant 0 : i32
    return %arg0, %arg1 : i32, i32
  }
}

module attributes {stable_mosaic.version = 11 : i64} {
  func.func @_attn_stem_kernel(%arg0: i32, %arg1: memref<1x8x8x128xbf16, #tpu.memory_space<vmem>>, %arg2: memref<1x8x8x128xf32, #tpu.memory_space<vmem>>, %arg3: memref<128x128xbf16, #tpu.memory_space<vmem>>, %arg4: memref<1x128xf32, #tpu.memory_space<vmem>>, %arg5: memref<128x128xbf16, #tpu.memory_space<vmem>>, %arg6: memref<1x128xf32, #tpu.memory_space<vmem>>, %arg7: memref<1x8x8x128xbf16, #tpu.memory_space<vmem>>, %arg8: memref<1x8x8x128xbf16, #tpu.memory_space<vmem>>, %arg9: memref<10x10x128xf32, #tpu.memory_space<vmem>>, %arg10: memref<10x10x128xf32, #tpu.memory_space<vmem>>) attributes {dimension_semantics = [#tpu.dimension_semantics<parallel>], iteration_bounds = array<i64: 2>, scalar_prefetch = 0 : i64, scratch_operands = 2 : i64, tpu.core_type = #tpu.core_type<tc>, window_params = [{transform_indices = @transform_0, window_bounds = array<i64: 1, 8, 8, 128>}, {transform_indices = @transform_1, window_bounds = array<i64: 1, 8, 8, 128>}, {pipeline_mode = #tpu.pipeline_mode<synchronous>, transform_indices = @transform_2, window_bounds = array<i64: 128, 128>}, {pipeline_mode = #tpu.pipeline_mode<synchronous>, transform_indices = @transform_3, window_bounds = array<i64: 1, 128>}, {pipeline_mode = #tpu.pipeline_mode<synchronous>, transform_indices = @transform_4, window_bounds = array<i64: 128, 128>}, {pipeline_mode = #tpu.pipeline_mode<synchronous>, transform_indices = @transform_5, window_bounds = array<i64: 1, 128>}, {transform_indices = @transform_6, window_bounds = array<i64: 1, 8, 8, 128>}, {transform_indices = @transform_7, window_bounds = array<i64: 1, 8, 8, 128>}]} {
    %c0 = arith.constant 0 : index
    %c0_0 = arith.constant 0 : index
    %c0_1 = arith.constant 0 : index
    %c0_2 = arith.constant 0 : index
    %0 = vector.load %arg2[%c0, %c0_0, %c0_1, %c0_2] : memref<1x8x8x128xf32, #tpu.memory_space<vmem>>, vector<1x8x8x128xf32>
    %1 = vector.shape_cast %0 : vector<1x8x8x128xf32> to vector<8x8x128xf32>
    %2 = vector.shape_cast %1 : vector<8x8x128xf32> to vector<64x128xf32>
    %3 = arith.truncf %2 : vector<64x128xf32> to vector<64x128xbf16>
    %c0_3 = arith.constant 0 : index
    %c0_4 = arith.constant 0 : index
    %4 = vector.load %arg3[%c0_3, %c0_4] : memref<128x128xbf16, #tpu.memory_space<vmem>>, vector<128x128xbf16>
    %cst = arith.constant dense<0.000000e+00> : vector<64x128xf32>
    %5 = tpu.matmul %3, %4, %cst {dimension_numbers = #tpu.dot_dimension_numbers<[1], [0], [0], [1], [0, 0, 1, 1], [], []>} : vector<64x128xbf16>, vector<128x128xbf16>, vector<64x128xf32> -> vector<64x128xf32>
    %c0_5 = arith.constant 0 : index
    %c0_6 = arith.constant 0 : index
    %6 = vector.load %arg4[%c0_5, %c0_6] : memref<1x128xf32, #tpu.memory_space<vmem>>, vector<1x128xf32>
    %7 = vector.broadcast %6 : vector<1x128xf32> to vector<64x128xf32>
    %8 = arith.addf %5, %7 : vector<64x128xf32>
    %cst_7 = arith.constant 0.000000e+00 : f32
    %9 = vector.broadcast %cst_7 : f32 to vector<10x10x128xf32>
    %c0_8 = arith.constant 0 : index
    %c0_9 = arith.constant 0 : index
    %c0_10 = arith.constant 0 : index
    %10 = vector.load %arg9[%c0_8, %c0_9, %c0_10] : memref<10x10x128xf32, #tpu.memory_space<vmem>>, vector<10x10x128xf32>
    tpu.vector_store %arg9[%c0_8, %c0_9, %c0_10], %9 {strides = array<i32>} : memref<10x10x128xf32, #tpu.memory_space<vmem>>, vector<10x10x128xf32>,
    %11 = vector.shape_cast %8 : vector<64x128xf32> to vector<8x8x128xf32>
    %c1 = arith.constant 1 : index
    %c1_11 = arith.constant 1 : index
    %c0_12 = arith.constant 0 : index
    %12 = vector.load %arg9[%c1, %c1_11, %c0_12] : memref<10x10x128xf32, #tpu.memory_space<vmem>>, vector<8x8x128xf32>
    tpu.vector_store %arg9[%c1, %c1_11, %c0_12], %11 {strides = array<i32>} : memref<10x10x128xf32, #tpu.memory_space<vmem>>, vector<8x8x128xf32>,
    %c0_13 = arith.constant 0 : index
    %c0_14 = arith.constant 0 : index
    %c0_15 = arith.constant 0 : index
    %c0_16 = arith.constant 0 : index
    %13 = vector.load %arg1[%c0_13, %c0_14, %c0_15, %c0_16] : memref<1x8x8x128xbf16, #tpu.memory_space<vmem>>, vector<1x8x8x128xbf16>
    %14 = vector.shape_cast %13 : vector<1x8x8x128xbf16> to vector<8x8x128xbf16>
    %15 = vector.shape_cast %14 : vector<8x8x128xbf16> to vector<64x128xbf16>
    %c0_17 = arith.constant 0 : index
    %c0_18 = arith.constant 0 : index
    %16 = vector.load %arg5[%c0_17, %c0_18] : memref<128x128xbf16, #tpu.memory_space<vmem>>, vector<128x128xbf16>
    %cst_19 = arith.constant dense<0.000000e+00> : vector<64x128xf32>
    %17 = tpu.matmul %15, %16, %cst_19 {dimension_numbers = #tpu.dot_dimension_numbers<[1], [0], [0], [1], [0, 0, 1, 1], [], []>} : vector<64x128xbf16>, vector<128x128xbf16>, vector<64x128xf32> -> vector<64x128xf32>
    %c0_20 = arith.constant 0 : index
    %c0_21 = arith.constant 0 : index
    %18 = vector.load %arg6[%c0_20, %c0_21] : memref<1x128xf32, #tpu.memory_space<vmem>>, vector<1x128xf32>
    %19 = vector.broadcast %18 : vector<1x128xf32> to vector<64x128xf32>
    %20 = arith.addf %17, %19 : vector<64x128xf32>
    %cst_22 = arith.constant dense<0xFF800000> : vector<64xf32>
    %21 = vector.multi_reduction <maximumf>, %20, %cst_22 [1] : vector<64x128xf32> to vector<64xf32>
    %22 = vector.shape_cast %21 : vector<64xf32> to vector<64x1xf32>
    %23 = vector.broadcast %22 : vector<64x1xf32> to vector<64x128xf32>
    %24 = arith.subf %20, %23 : vector<64x128xf32>
    %25 = math.exp %24 : vector<64x128xf32>
    %c0_23 = arith.constant 0 : index
    %c0_24 = arith.constant 0 : index
    %c0_25 = arith.constant 0 : index
    %26 = vector.load %arg9[%c0_23, %c0_24, %c0_25] : memref<10x10x128xf32, #tpu.memory_space<vmem>>, vector<8x8x128xf32>
    %27 = vector.shape_cast %26 : vector<8x8x128xf32> to vector<64x128xf32>
    %c0_26 = arith.constant 0 : index
    %c1_27 = arith.constant 1 : index
    %c0_28 = arith.constant 0 : index
    %28 = vector.load %arg9[%c0_26, %c1_27, %c0_28] : memref<10x10x128xf32, #tpu.memory_space<vmem>>, vector<8x8x128xf32>
    %29 = vector.shape_cast %28 : vector<8x8x128xf32> to vector<64x128xf32>
    %c0_29 = arith.constant 0 : index
    %c2 = arith.constant 2 : index
    %c0_30 = arith.constant 0 : index
    %30 = vector.load %arg9[%c0_29, %c2, %c0_30] : memref<10x10x128xf32, #tpu.memory_space<vmem>>, vector<8x8x128xf32>
    %31 = vector.shape_cast %30 : vector<8x8x128xf32> to vector<64x128xf32>
    %c1_31 = arith.constant 1 : index
    %c0_32 = arith.constant 0 : index
    %c0_33 = arith.constant 0 : index
    %32 = vector.load %arg9[%c1_31, %c0_32, %c0_33] : memref<10x10x128xf32, #tpu.memory_space<vmem>>, vector<8x8x128xf32>
    %33 = vector.shape_cast %32 : vector<8x8x128xf32> to vector<64x128xf32>
    %c1_34 = arith.constant 1 : index
    %c1_35 = arith.constant 1 : index
    %c0_36 = arith.constant 0 : index
    %34 = vector.load %arg9[%c1_34, %c1_35, %c0_36] : memref<10x10x128xf32, #tpu.memory_space<vmem>>, vector<8x8x128xf32>
    %35 = vector.shape_cast %34 : vector<8x8x128xf32> to vector<64x128xf32>
    %c1_37 = arith.constant 1 : index
    %c2_38 = arith.constant 2 : index
    %c0_39 = arith.constant 0 : index
    %36 = vector.load %arg9[%c1_37, %c2_38, %c0_39] : memref<10x10x128xf32, #tpu.memory_space<vmem>>, vector<8x8x128xf32>
    %37 = vector.shape_cast %36 : vector<8x8x128xf32> to vector<64x128xf32>
    %c2_40 = arith.constant 2 : index
    %c0_41 = arith.constant 0 : index
    %c0_42 = arith.constant 0 : index
    %38 = vector.load %arg9[%c2_40, %c0_41, %c0_42] : memref<10x10x128xf32, #tpu.memory_space<vmem>>, vector<8x8x128xf32>
    %39 = vector.shape_cast %38 : vector<8x8x128xf32> to vector<64x128xf32>
    %c2_43 = arith.constant 2 : index
    %c1_44 = arith.constant 1 : index
    %c0_45 = arith.constant 0 : index
    %40 = vector.load %arg9[%c2_43, %c1_44, %c0_45] : memref<10x10x128xf32, #tpu.memory_space<vmem>>, vector<8x8x128xf32>
    %41 = vector.shape_cast %40 : vector<8x8x128xf32> to vector<64x128xf32>
    %c2_46 = arith.constant 2 : index
    %c2_47 = arith.constant 2 : index
    %c0_48 = arith.constant 0 : index
    %42 = vector.load %arg9[%c2_46, %c2_47, %c0_48] : memref<10x10x128xf32, #tpu.memory_space<vmem>>, vector<8x8x128xf32>
    %43 = vector.shape_cast %42 : vector<8x8x128xf32> to vector<64x128xf32>
    %cst_49 = arith.constant 0.000000e+00 : f32
    %44 = vector.broadcast %cst_49 : f32 to vector<10x10x128xf32>
    %c0_50 = arith.constant 0 : index
    %c0_51 = arith.constant 0 : index
    %c0_52 = arith.constant 0 : index
    %45 = vector.load %arg10[%c0_50, %c0_51, %c0_52] : memref<10x10x128xf32, #tpu.memory_space<vmem>>, vector<10x10x128xf32>
    tpu.vector_store %arg10[%c0_50, %c0_51, %c0_52], %44 {strides = array<i32>} : memref<10x10x128xf32, #tpu.memory_space<vmem>>, vector<10x10x128xf32>,
    %46 = vector.extract_strided_slice %25 {offsets = [0, 0], sizes = [64, 1], strides = [1, 1]} : vector<64x128xf32> to vector<64x1xf32>
    %47 = vector.extract_strided_slice %25 {offsets = [0, 1], sizes = [64, 1], strides = [1, 1]} : vector<64x128xf32> to vector<64x1xf32>
    %48 = arith.addf %46, %47 : vector<64x1xf32>
    %49 = vector.extract_strided_slice %25 {offsets = [0, 2], sizes = [64, 1], strides = [1, 1]} : vector<64x128xf32> to vector<64x1xf32>
    %50 = arith.addf %48, %49 : vector<64x1xf32>
    %51 = vector.extract_strided_slice %25 {offsets = [0, 3], sizes = [64, 1], strides = [1, 1]} : vector<64x128xf32> to vector<64x1xf32>
    %52 = arith.addf %50, %51 : vector<64x1xf32>
    %53 = vector.extract_strided_slice %25 {offsets = [0, 4], sizes = [64, 1], strides = [1, 1]} : vector<64x128xf32> to vector<64x1xf32>
    %54 = arith.addf %52, %53 : vector<64x1xf32>
    %55 = vector.extract_strided_slice %25 {offsets = [0, 5], sizes = [64, 1], strides = [1, 1]} : vector<64x128xf32> to vector<64x1xf32>
    %56 = arith.addf %54, %55 : vector<64x1xf32>
    %57 = vector.extract_strided_slice %25 {offsets = [0, 6], sizes = [64, 1], strides = [1, 1]} : vector<64x128xf32> to vector<64x1xf32>
    %58 = arith.addf %56, %57 : vector<64x1xf32>
    %59 = vector.extract_strided_slice %25 {offsets = [0, 7], sizes = [64, 1], strides = [1, 1]} : vector<64x128xf32> to vector<64x1xf32>
    %60 = arith.addf %58, %59 : vector<64x1xf32>
    %61 = vector.extract_strided_slice %25 {offsets = [0, 8], sizes = [64, 1], strides = [1, 1]} : vector<64x128xf32> to vector<64x1xf32>
    %62 = arith.addf %60, %61 : vector<64x1xf32>
    %cst_53 = arith.constant 1.000000e+00 : f32
    %63 = vector.broadcast %cst_53 : f32 to vector<64x1xf32>
    %64 = arith.divf %63, %62 : vector<64x1xf32>
    %65 = vector.extract_strided_slice %25 {offsets = [0, 0], sizes = [64, 1], strides = [1, 1]} : vector<64x128xf32> to vector<64x1xf32>
    %66 = arith.mulf %65, %64 : vector<64x1xf32>
    %67 = vector.broadcast %66 : vector<64x1xf32> to vector<64x128xf32>
    %68 = arith.mulf %67, %27 : vector<64x128xf32>
    %69 = vector.extract_strided_slice %25 {offsets = [0, 1], sizes = [64, 1], strides = [1, 1]} : vector<64x128xf32> to vector<64x1xf32>
    %70 = arith.mulf %69, %64 : vector<64x1xf32>
    %71 = vector.broadcast %70 : vector<64x1xf32> to vector<64x128xf32>
    %72 = arith.mulf %71, %29 : vector<64x128xf32>
    %73 = arith.addf %68, %72 : vector<64x128xf32>
    %74 = vector.extract_strided_slice %25 {offsets = [0, 2], sizes = [64, 1], strides = [1, 1]} : vector<64x128xf32> to vector<64x1xf32>
    %75 = arith.mulf %74, %64 : vector<64x1xf32>
    %76 = vector.broadcast %75 : vector<64x1xf32> to vector<64x128xf32>
    %77 = arith.mulf %76, %31 : vector<64x128xf32>
    %78 = arith.addf %73, %77 : vector<64x128xf32>
    %79 = vector.extract_strided_slice %25 {offsets = [0, 3], sizes = [64, 1], strides = [1, 1]} : vector<64x128xf32> to vector<64x1xf32>
    %80 = arith.mulf %79, %64 : vector<64x1xf32>
    %81 = vector.broadcast %80 : vector<64x1xf32> to vector<64x128xf32>
    %82 = arith.mulf %81, %33 : vector<64x128xf32>
    %83 = arith.addf %78, %82 : vector<64x128xf32>
    %84 = vector.extract_strided_slice %25 {offsets = [0, 4], sizes = [64, 1], strides = [1, 1]} : vector<64x128xf32> to vector<64x1xf32>
    %85 = arith.mulf %84, %64 : vector<64x1xf32>
    %86 = vector.broadcast %85 : vector<64x1xf32> to vector<64x128xf32>
    %87 = arith.mulf %86, %35 : vector<64x128xf32>
    %88 = arith.addf %83, %87 : vector<64x128xf32>
    %89 = vector.extract_strided_slice %25 {offsets = [0, 5], sizes = [64, 1], strides = [1, 1]} : vector<64x128xf32> to vector<64x1xf32>
    %90 = arith.mulf %89, %64 : vector<64x1xf32>
    %91 = vector.broadcast %90 : vector<64x1xf32> to vector<64x128xf32>
    %92 = arith.mulf %91, %37 : vector<64x128xf32>
    %93 = arith.addf %88, %92 : vector<64x128xf32>
    %94 = vector.extract_strided_slice %25 {offsets = [0, 6], sizes = [64, 1], strides = [1, 1]} : vector<64x128xf32> to vector<64x1xf32>
    %95 = arith.mulf %94, %64 : vector<64x1xf32>
    %96 = vector.broadcast %95 : vector<64x1xf32> to vector<64x128xf32>
    %97 = arith.mulf %96, %39 : vector<64x128xf32>
    %98 = arith.addf %93, %97 : vector<64x128xf32>
    %99 = vector.extract_strided_slice %25 {offsets = [0, 7], sizes = [64, 1], strides = [1, 1]} : vector<64x128xf32> to vector<64x1xf32>
    %100 = arith.mulf %99, %64 : vector<64x1xf32>
    %101 = vector.broadcast %100 : vector<64x1xf32> to vector<64x128xf32>
    %102 = arith.mulf %101, %41 : vector<64x128xf32>
    %103 = arith.addf %98, %102 : vector<64x128xf32>
    %104 = vector.extract_strided_slice %25 {offsets = [0, 8], sizes = [64, 1], strides = [1, 1]} : vector<64x128xf32> to vector<64x1xf32>
    %105 = arith.mulf %104, %64 : vector<64x1xf32>
    %106 = vector.broadcast %105 : vector<64x1xf32> to vector<64x128xf32>
    %107 = arith.mulf %106, %43 : vector<64x128xf32>
    %108 = arith.addf %103, %107 : vector<64x128xf32>
    %c0_54 = arith.constant 0 : index
    %c0_55 = arith.constant 0 : index
    %c0_56 = arith.constant 0 : index
    %109 = vector.load %arg10[%c0_54, %c0_55, %c0_56] : memref<10x10x128xf32, #tpu.memory_space<vmem>>, vector<8x8x128xf32>
    %110 = vector.shape_cast %108 : vector<64x128xf32> to vector<8x8x128xf32>
    %111 = arith.addf %109, %110 : vector<8x8x128xf32>
    %c0_57 = arith.constant 0 : index
    %c0_58 = arith.constant 0 : index
    %c0_59 = arith.constant 0 : index
    %112 = vector.load %arg10[%c0_57, %c0_58, %c0_59] : memref<10x10x128xf32, #tpu.memory_space<vmem>>, vector<8x8x128xf32>
    tpu.vector_store %arg10[%c0_57, %c0_58, %c0_59], %111 {strides = array<i32>} : memref<10x10x128xf32, #tpu.memory_space<vmem>>, vector<8x8x128xf32>,
    %113 = vector.extract_strided_slice %25 {offsets = [0, 9], sizes = [64, 1], strides = [1, 1]} : vector<64x128xf32> to vector<64x1xf32>
    %114 = vector.extract_strided_slice %25 {offsets = [0, 10], sizes = [64, 1], strides = [1, 1]} : vector<64x128xf32> to vector<64x1xf32>
    %115 = arith.addf %113, %114 : vector<64x1xf32>
    %116 = vector.extract_strided_slice %25 {offsets = [0, 11], sizes = [64, 1], strides = [1, 1]} : vector<64x128xf32> to vector<64x1xf32>
    %117 = arith.addf %115, %116 : vector<64x1xf32>
    %118 = vector.extract_strided_slice %25 {offsets = [0, 12], sizes = [64, 1], strides = [1, 1]} : vector<64x128xf32> to vector<64x1xf32>
    %119 = arith.addf %117, %118 : vector<64x1xf32>
    %120 = vector.extract_strided_slice %25 {offsets = [0, 13], sizes = [64, 1], strides = [1, 1]} : vector<64x128xf32> to vector<64x1xf32>
    %121 = arith.addf %119, %120 : vector<64x1xf32>
    %122 = vector.extract_strided_slice %25 {offsets = [0, 14], sizes = [64, 1], strides = [1, 1]} : vector<64x128xf32> to vector<64x1xf32>
    %123 = arith.addf %121, %122 : vector<64x1xf32>
    %124 = vector.extract_strided_slice %25 {offsets = [0, 15], sizes = [64, 1], strides = [1, 1]} : vector<64x128xf32> to vector<64x1xf32>
    %125 = arith.addf %123, %124 : vector<64x1xf32>
    %126 = vector.extract_strided_slice %25 {offsets = [0, 16], sizes = [64, 1], strides = [1, 1]} : vector<64x128xf32> to vector<64x1xf32>
    %127 = arith.addf %125, %126 : vector<64x1xf32>
    %128 = vector.extract_strided_slice %25 {offsets = [0, 17], sizes = [64, 1], strides = [1, 1]} : vector<64x128xf32> to vector<64x1xf32>
    %129 = arith.addf %127, %128 : vector<64x1xf32>
    %cst_60 = arith.constant 1.000000e+00 : f32
    %130 = vector.broadcast %cst_60 : f32 to vector<64x1xf32>
    %131 = arith.divf %130, %129 : vector<64x1xf32>
    %132 = vector.extract_strided_slice %25 {offsets = [0, 9], sizes = [64, 1], strides = [1, 1]} : vector<64x128xf32> to vector<64x1xf32>
    %133 = arith.mulf %132, %131 : vector<64x1xf32>
    %134 = vector.broadcast %133 : vector<64x1xf32> to vector<64x128xf32>
    %135 = arith.mulf %134, %27 : vector<64x128xf32>
    %136 = vector.extract_strided_slice %25 {offsets = [0, 10], sizes = [64, 1], strides = [1, 1]} : vector<64x128xf32> to vector<64x1xf32>
    %137 = arith.mulf %136, %131 : vector<64x1xf32>
    %138 = vector.broadcast %137 : vector<64x1xf32> to vector<64x128xf32>
    %139 = arith.mulf %138, %29 : vector<64x128xf32>
    %140 = arith.addf %135, %139 : vector<64x128xf32>
    %141 = vector.extract_strided_slice %25 {offsets = [0, 11], sizes = [64, 1], strides = [1, 1]} : vector<64x128xf32> to vector<64x1xf32>
    %142 = arith.mulf %141, %131 : vector<64x1xf32>
    %143 = vector.broadcast %142 : vector<64x1xf32> to vector<64x128xf32>
    %144 = arith.mulf %143, %31 : vector<64x128xf32>
    %145 = arith.addf %140, %144 : vector<64x128xf32>
    %146 = vector.extract_strided_slice %25 {offsets = [0, 12], sizes = [64, 1], strides = [1, 1]} : vector<64x128xf32> to vector<64x1xf32>
    %147 = arith.mulf %146, %131 : vector<64x1xf32>
    %148 = vector.broadcast %147 : vector<64x1xf32> to vector<64x128xf32>
    %149 = arith.mulf %148, %33 : vector<64x128xf32>
    %150 = arith.addf %145, %149 : vector<64x128xf32>
    %151 = vector.extract_strided_slice %25 {offsets = [0, 13], sizes = [64, 1], strides = [1, 1]} : vector<64x128xf32> to vector<64x1xf32>
    %152 = arith.mulf %151, %131 : vector<64x1xf32>
    %153 = vector.broadcast %152 : vector<64x1xf32> to vector<64x128xf32>
    %154 = arith.mulf %153, %35 : vector<64x128xf32>
    %155 = arith.addf %150, %154 : vector<64x128xf32>
    %156 = vector.extract_strided_slice %25 {offsets = [0, 14], sizes = [64, 1], strides = [1, 1]} : vector<64x128xf32> to vector<64x1xf32>
    %157 = arith.mulf %156, %131 : vector<64x1xf32>
    %158 = vector.broadcast %157 : vector<64x1xf32> to vector<64x128xf32>
    %159 = arith.mulf %158, %37 : vector<64x128xf32>
    %160 = arith.addf %155, %159 : vector<64x128xf32>
    %161 = vector.extract_strided_slice %25 {offsets = [0, 15], sizes = [64, 1], strides = [1, 1]} : vector<64x128xf32> to vector<64x1xf32>
    %162 = arith.mulf %161, %131 : vector<64x1xf32>
    %163 = vector.broadcast %162 : vector<64x1xf32> to vector<64x128xf32>
    %164 = arith.mulf %163, %39 : vector<64x128xf32>
    %165 = arith.addf %160, %164 : vector<64x128xf32>
    %166 = vector.extract_strided_slice %25 {offsets = [0, 16], sizes = [64, 1], strides = [1, 1]} : vector<64x128xf32> to vector<64x1xf32>
    %167 = arith.mulf %166, %131 : vector<64x1xf32>
    %168 = vector.broadcast %167 : vector<64x1xf32> to vector<64x128xf32>
    %169 = arith.mulf %168, %41 : vector<64x128xf32>
    %170 = arith.addf %165, %169 : vector<64x128xf32>
    %171 = vector.extract_strided_slice %25 {offsets = [0, 17], sizes = [64, 1], strides = [1, 1]} : vector<64x128xf32> to vector<64x1xf32>
    %172 = arith.mulf %171, %131 : vector<64x1xf32>
    %173 = vector.broadcast %172 : vector<64x1xf32> to vector<64x128xf32>
    %174 = arith.mulf %173, %43 : vector<64x128xf32>
    %175 = arith.addf %170, %174 : vector<64x128xf32>
    %c0_61 = arith.constant 0 : index
    %c1_62 = arith.constant 1 : index
    %c0_63 = arith.constant 0 : index
    %176 = vector.load %arg10[%c0_61, %c1_62, %c0_63] : memref<10x10x128xf32, #tpu.memory_space<vmem>>, vector<8x8x128xf32>
    %177 = vector.shape_cast %175 : vector<64x128xf32> to vector<8x8x128xf32>
    %178 = arith.addf %176, %177 : vector<8x8x128xf32>
    %c0_64 = arith.constant 0 : index
    %c1_65 = arith.constant 1 : index
    %c0_66 = arith.constant 0 : index
    %179 = vector.load %arg10[%c0_64, %c1_65, %c0_66] : memref<10x10x128xf32, #tpu.memory_space<vmem>>, vector<8x8x128xf32>
    tpu.vector_store %arg10[%c0_64, %c1_65, %c0_66], %178 {strides = array<i32>} : memref<10x10x128xf32, #tpu.memory_space<vmem>>, vector<8x8x128xf32>,
    %180 = vector.extract_strided_slice %25 {offsets = [0, 18], sizes = [64, 1], strides = [1, 1]} : vector<64x128xf32> to vector<64x1xf32>
    %181 = vector.extract_strided_slice %25 {offsets = [0, 19], sizes = [64, 1], strides = [1, 1]} : vector<64x128xf32> to vector<64x1xf32>
    %182 = arith.addf %180, %181 : vector<64x1xf32>
    %183 = vector.extract_strided_slice %25 {offsets = [0, 20], sizes = [64, 1], strides = [1, 1]} : vector<64x128xf32> to vector<64x1xf32>
    %184 = arith.addf %182, %183 : vector<64x1xf32>
    %185 = vector.extract_strided_slice %25 {offsets = [0, 21], sizes = [64, 1], strides = [1, 1]} : vector<64x128xf32> to vector<64x1xf32>
    %186 = arith.addf %184, %185 : vector<64x1xf32>
    %187 = vector.extract_strided_slice %25 {offsets = [0, 22], sizes = [64, 1], strides = [1, 1]} : vector<64x128xf32> to vector<64x1xf32>
    %188 = arith.addf %186, %187 : vector<64x1xf32>
    %189 = vector.extract_strided_slice %25 {offsets = [0, 23], sizes = [64, 1], strides = [1, 1]} : vector<64x128xf32> to vector<64x1xf32>
    %190 = arith.addf %188, %189 : vector<64x1xf32>
    %191 = vector.extract_strided_slice %25 {offsets = [0, 24], sizes = [64, 1], strides = [1, 1]} : vector<64x128xf32> to vector<64x1xf32>
    %192 = arith.addf %190, %191 : vector<64x1xf32>
    %193 = vector.extract_strided_slice %25 {offsets = [0, 25], sizes = [64, 1], strides = [1, 1]} : vector<64x128xf32> to vector<64x1xf32>
    %194 = arith.addf %192, %193 : vector<64x1xf32>
    %195 = vector.extract_strided_slice %25 {offsets = [0, 26], sizes = [64, 1], strides = [1, 1]} : vector<64x128xf32> to vector<64x1xf32>
    %196 = arith.addf %194, %195 : vector<64x1xf32>
    %cst_67 = arith.constant 1.000000e+00 : f32
    %197 = vector.broadcast %cst_67 : f32 to vector<64x1xf32>
    %198 = arith.divf %197, %196 : vector<64x1xf32>
    %199 = vector.extract_strided_slice %25 {offsets = [0, 18], sizes = [64, 1], strides = [1, 1]} : vector<64x128xf32> to vector<64x1xf32>
    %200 = arith.mulf %199, %198 : vector<64x1xf32>
    %201 = vector.broadcast %200 : vector<64x1xf32> to vector<64x128xf32>
    %202 = arith.mulf %201, %27 : vector<64x128xf32>
    %203 = vector.extract_strided_slice %25 {offsets = [0, 19], sizes = [64, 1], strides = [1, 1]} : vector<64x128xf32> to vector<64x1xf32>
    %204 = arith.mulf %203, %198 : vector<64x1xf32>
    %205 = vector.broadcast %204 : vector<64x1xf32> to vector<64x128xf32>
    %206 = arith.mulf %205, %29 : vector<64x128xf32>
    %207 = arith.addf %202, %206 : vector<64x128xf32>
    %208 = vector.extract_strided_slice %25 {offsets = [0, 20], sizes = [64, 1], strides = [1, 1]} : vector<64x128xf32> to vector<64x1xf32>
    %209 = arith.mulf %208, %198 : vector<64x1xf32>
    %210 = vector.broadcast %209 : vector<64x1xf32> to vector<64x128xf32>
    %211 = arith.mulf %210, %31 : vector<64x128xf32>
    %212 = arith.addf %207, %211 : vector<64x128xf32>
    %213 = vector.extract_strided_slice %25 {offsets = [0, 21], sizes = [64, 1], strides = [1, 1]} : vector<64x128xf32> to vector<64x1xf32>
    %214 = arith.mulf %213, %198 : vector<64x1xf32>
    %215 = vector.broadcast %214 : vector<64x1xf32> to vector<64x128xf32>
    %216 = arith.mulf %215, %33 : vector<64x128xf32>
    %217 = arith.addf %212, %216 : vector<64x128xf32>
    %218 = vector.extract_strided_slice %25 {offsets = [0, 22], sizes = [64, 1], strides = [1, 1]} : vector<64x128xf32> to vector<64x1xf32>
    %219 = arith.mulf %218, %198 : vector<64x1xf32>
    %220 = vector.broadcast %219 : vector<64x1xf32> to vector<64x128xf32>
    %221 = arith.mulf %220, %35 : vector<64x128xf32>
    %222 = arith.addf %217, %221 : vector<64x128xf32>
    %223 = vector.extract_strided_slice %25 {offsets = [0, 23], sizes = [64, 1], strides = [1, 1]} : vector<64x128xf32> to vector<64x1xf32>
    %224 = arith.mulf %223, %198 : vector<64x1xf32>
    %225 = vector.broadcast %224 : vector<64x1xf32> to vector<64x128xf32>
    %226 = arith.mulf %225, %37 : vector<64x128xf32>
    %227 = arith.addf %222, %226 : vector<64x128xf32>
    %228 = vector.extract_strided_slice %25 {offsets = [0, 24], sizes = [64, 1], strides = [1, 1]} : vector<64x128xf32> to vector<64x1xf32>
    %229 = arith.mulf %228, %198 : vector<64x1xf32>
    %230 = vector.broadcast %229 : vector<64x1xf32> to vector<64x128xf32>
    %231 = arith.mulf %230, %39 : vector<64x128xf32>
    %232 = arith.addf %227, %231 : vector<64x128xf32>
    %233 = vector.extract_strided_slice %25 {offsets = [0, 25], sizes = [64, 1], strides = [1, 1]} : vector<64x128xf32> to vector<64x1xf32>
    %234 = arith.mulf %233, %198 : vector<64x1xf32>
    %235 = vector.broadcast %234 : vector<64x1xf32> to vector<64x128xf32>
    %236 = arith.mulf %235, %41 : vector<64x128xf32>
    %237 = arith.addf %232, %236 : vector<64x128xf32>
    %238 = vector.extract_strided_slice %25 {offsets = [0, 26], sizes = [64, 1], strides = [1, 1]} : vector<64x128xf32> to vector<64x1xf32>
    %239 = arith.mulf %238, %198 : vector<64x1xf32>
    %240 = vector.broadcast %239 : vector<64x1xf32> to vector<64x128xf32>
    %241 = arith.mulf %240, %43 : vector<64x128xf32>
    %242 = arith.addf %237, %241 : vector<64x128xf32>
    %c0_68 = arith.constant 0 : index
    %c2_69 = arith.constant 2 : index
    %c0_70 = arith.constant 0 : index
    %243 = vector.load %arg10[%c0_68, %c2_69, %c0_70] : memref<10x10x128xf32, #tpu.memory_space<vmem>>, vector<8x8x128xf32>
    %244 = vector.shape_cast %242 : vector<64x128xf32> to vector<8x8x128xf32>
    %245 = arith.addf %243, %244 : vector<8x8x128xf32>
    %c0_71 = arith.constant 0 : index
    %c2_72 = arith.constant 2 : index
    %c0_73 = arith.constant 0 : index
    %246 = vector.load %arg10[%c0_71, %c2_72, %c0_73] : memref<10x10x128xf32, #tpu.memory_space<vmem>>, vector<8x8x128xf32>
    tpu.vector_store %arg10[%c0_71, %c2_72, %c0_73], %245 {strides = array<i32>} : memref<10x10x128xf32, #tpu.memory_space<vmem>>, vector<8x8x128xf32>,
    %247 = vector.extract_strided_slice %25 {offsets = [0, 27], sizes = [64, 1], strides = [1, 1]} : vector<64x128xf32> to vector<64x1xf32>
    %248 = vector.extract_strided_slice %25 {offsets = [0, 28], sizes = [64, 1], strides = [1, 1]} : vector<64x128xf32> to vector<64x1xf32>
    %249 = arith.addf %247, %248 : vector<64x1xf32>
    %250 = vector.extract_strided_slice %25 {offsets = [0, 29], sizes = [64, 1], strides = [1, 1]} : vector<64x128xf32> to vector<64x1xf32>
    %251 = arith.addf %249, %250 : vector<64x1xf32>
    %252 = vector.extract_strided_slice %25 {offsets = [0, 30], sizes = [64, 1], strides = [1, 1]} : vector<64x128xf32> to vector<64x1xf32>
    %253 = arith.addf %251, %252 : vector<64x1xf32>
    %254 = vector.extract_strided_slice %25 {offsets = [0, 31], sizes = [64, 1], strides = [1, 1]} : vector<64x128xf32> to vector<64x1xf32>
    %255 = arith.addf %253, %254 : vector<64x1xf32>
    %256 = vector.extract_strided_slice %25 {offsets = [0, 32], sizes = [64, 1], strides = [1, 1]} : vector<64x128xf32> to vector<64x1xf32>
    %257 = arith.addf %255, %256 : vector<64x1xf32>
    %258 = vector.extract_strided_slice %25 {offsets = [0, 33], sizes = [64, 1], strides = [1, 1]} : vector<64x128xf32> to vector<64x1xf32>
    %259 = arith.addf %257, %258 : vector<64x1xf32>
    %260 = vector.extract_strided_slice %25 {offsets = [0, 34], sizes = [64, 1], strides = [1, 1]} : vector<64x128xf32> to vector<64x1xf32>
    %261 = arith.addf %259, %260 : vector<64x1xf32>
    %262 = vector.extract_strided_slice %25 {offsets = [0, 35], sizes = [64, 1], strides = [1, 1]} : vector<64x128xf32> to vector<64x1xf32>
    %263 = arith.addf %261, %262 : vector<64x1xf32>
    %cst_74 = arith.constant 1.000000e+00 : f32
    %264 = vector.broadcast %cst_74 : f32 to vector<64x1xf32>
    %265 = arith.divf %264, %263 : vector<64x1xf32>
    %266 = vector.extract_strided_slice %25 {offsets = [0, 27], sizes = [64, 1], strides = [1, 1]} : vector<64x128xf32> to vector<64x1xf32>
    %267 = arith.mulf %266, %265 : vector<64x1xf32>
    %268 = vector.broadcast %267 : vector<64x1xf32> to vector<64x128xf32>
    %269 = arith.mulf %268, %27 : vector<64x128xf32>
    %270 = vector.extract_strided_slice %25 {offsets = [0, 28], sizes = [64, 1], strides = [1, 1]} : vector<64x128xf32> to vector<64x1xf32>
    %271 = arith.mulf %270, %265 : vector<64x1xf32>
    %272 = vector.broadcast %271 : vector<64x1xf32> to vector<64x128xf32>
    %273 = arith.mulf %272, %29 : vector<64x128xf32>
    %274 = arith.addf %269, %273 : vector<64x128xf32>
    %275 = vector.extract_strided_slice %25 {offsets = [0, 29], sizes = [64, 1], strides = [1, 1]} : vector<64x128xf32> to vector<64x1xf32>
    %276 = arith.mulf %275, %265 : vector<64x1xf32>
    %277 = vector.broadcast %276 : vector<64x1xf32> to vector<64x128xf32>
    %278 = arith.mulf %277, %31 : vector<64x128xf32>
    %279 = arith.addf %274, %278 : vector<64x128xf32>
    %280 = vector.extract_strided_slice %25 {offsets = [0, 30], sizes = [64, 1], strides = [1, 1]} : vector<64x128xf32> to vector<64x1xf32>
    %281 = arith.mulf %280, %265 : vector<64x1xf32>
    %282 = vector.broadcast %281 : vector<64x1xf32> to vector<64x128xf32>
    %283 = arith.mulf %282, %33 : vector<64x128xf32>
    %284 = arith.addf %279, %283 : vector<64x128xf32>
    %285 = vector.extract_strided_slice %25 {offsets = [0, 31], sizes = [64, 1], strides = [1, 1]} : vector<64x128xf32> to vector<64x1xf32>
    %286 = arith.mulf %285, %265 : vector<64x1xf32>
    %287 = vector.broadcast %286 : vector<64x1xf32> to vector<64x128xf32>
    %288 = arith.mulf %287, %35 : vector<64x128xf32>
    %289 = arith.addf %284, %288 : vector<64x128xf32>
    %290 = vector.extract_strided_slice %25 {offsets = [0, 32], sizes = [64, 1], strides = [1, 1]} : vector<64x128xf32> to vector<64x1xf32>
    %291 = arith.mulf %290, %265 : vector<64x1xf32>
    %292 = vector.broadcast %291 : vector<64x1xf32> to vector<64x128xf32>
    %293 = arith.mulf %292, %37 : vector<64x128xf32>
    %294 = arith.addf %289, %293 : vector<64x128xf32>
    %295 = vector.extract_strided_slice %25 {offsets = [0, 33], sizes = [64, 1], strides = [1, 1]} : vector<64x128xf32> to vector<64x1xf32>
    %296 = arith.mulf %295, %265 : vector<64x1xf32>
    %297 = vector.broadcast %296 : vector<64x1xf32> to vector<64x128xf32>
    %298 = arith.mulf %297, %39 : vector<64x128xf32>
    %299 = arith.addf %294, %298 : vector<64x128xf32>
    %300 = vector.extract_strided_slice %25 {offsets = [0, 34], sizes = [64, 1], strides = [1, 1]} : vector<64x128xf32> to vector<64x1xf32>
    %301 = arith.mulf %300, %265 : vector<64x1xf32>
    %302 = vector.broadcast %301 : vector<64x1xf32> to vector<64x128xf32>
    %303 = arith.mulf %302, %41 : vector<64x128xf32>
    %304 = arith.addf %299, %303 : vector<64x128xf32>
    %305 = vector.extract_strided_slice %25 {offsets = [0, 35], sizes = [64, 1], strides = [1, 1]} : vector<64x128xf32> to vector<64x1xf32>
    %306 = arith.mulf %305, %265 : vector<64x1xf32>
    %307 = vector.broadcast %306 : vector<64x1xf32> to vector<64x128xf32>
    %308 = arith.mulf %307, %43 : vector<64x128xf32>
    %309 = arith.addf %304, %308 : vector<64x128xf32>
    %c1_75 = arith.constant 1 : index
    %c0_76 = arith.constant 0 : index
    %c0_77 = arith.constant 0 : index
    %310 = vector.load %arg10[%c1_75, %c0_76, %c0_77] : memref<10x10x128xf32, #tpu.memory_space<vmem>>, vector<8x8x128xf32>
    %311 = vector.shape_cast %309 : vector<64x128xf32> to vector<8x8x128xf32>
    %312 = arith.addf %310, %311 : vector<8x8x128xf32>
    %c1_78 = arith.constant 1 : index
    %c0_79 = arith.constant 0 : index
    %c0_80 = arith.constant 0 : index
    %313 = vector.load %arg10[%c1_78, %c0_79, %c0_80] : memref<10x10x128xf32, #tpu.memory_space<vmem>>, vector<8x8x128xf32>
    tpu.vector_store %arg10[%c1_78, %c0_79, %c0_80], %312 {strides = array<i32>} : memref<10x10x128xf32, #tpu.memory_space<vmem>>, vector<8x8x128xf32>,
    %314 = vector.extract_strided_slice %25 {offsets = [0, 36], sizes = [64, 1], strides = [1, 1]} : vector<64x128xf32> to vector<64x1xf32>
    %315 = vector.extract_strided_slice %25 {offsets = [0, 37], sizes = [64, 1], strides = [1, 1]} : vector<64x128xf32> to vector<64x1xf32>
    %316 = arith.addf %314, %315 : vector<64x1xf32>
    %317 = vector.extract_strided_slice %25 {offsets = [0, 38], sizes = [64, 1], strides = [1, 1]} : vector<64x128xf32> to vector<64x1xf32>
    %318 = arith.addf %316, %317 : vector<64x1xf32>
    %319 = vector.extract_strided_slice %25 {offsets = [0, 39], sizes = [64, 1], strides = [1, 1]} : vector<64x128xf32> to vector<64x1xf32>
    %320 = arith.addf %318, %319 : vector<64x1xf32>
    %321 = vector.extract_strided_slice %25 {offsets = [0, 40], sizes = [64, 1], strides = [1, 1]} : vector<64x128xf32> to vector<64x1xf32>
    %322 = arith.addf %320, %321 : vector<64x1xf32>
    %323 = vector.extract_strided_slice %25 {offsets = [0, 41], sizes = [64, 1], strides = [1, 1]} : vector<64x128xf32> to vector<64x1xf32>
    %324 = arith.addf %322, %323 : vector<64x1xf32>
    %325 = vector.extract_strided_slice %25 {offsets = [0, 42], sizes = [64, 1], strides = [1, 1]} : vector<64x128xf32> to vector<64x1xf32>
    %326 = arith.addf %324, %325 : vector<64x1xf32>
    %327 = vector.extract_strided_slice %25 {offsets = [0, 43], sizes = [64, 1], strides = [1, 1]} : vector<64x128xf32> to vector<64x1xf32>
    %328 = arith.addf %326, %327 : vector<64x1xf32>
    %329 = vector.extract_strided_slice %25 {offsets = [0, 44], sizes = [64, 1], strides = [1, 1]} : vector<64x128xf32> to vector<64x1xf32>
    %330 = arith.addf %328, %329 : vector<64x1xf32>
    %cst_81 = arith.constant 1.000000e+00 : f32
    %331 = vector.broadcast %cst_81 : f32 to vector<64x1xf32>
    %332 = arith.divf %331, %330 : vector<64x1xf32>
    %333 = vector.extract_strided_slice %25 {offsets = [0, 36], sizes = [64, 1], strides = [1, 1]} : vector<64x128xf32> to vector<64x1xf32>
    %334 = arith.mulf %333, %332 : vector<64x1xf32>
    %335 = vector.broadcast %334 : vector<64x1xf32> to vector<64x128xf32>
    %336 = arith.mulf %335, %27 : vector<64x128xf32>
    %337 = vector.extract_strided_slice %25 {offsets = [0, 37], sizes = [64, 1], strides = [1, 1]} : vector<64x128xf32> to vector<64x1xf32>
    %338 = arith.mulf %337, %332 : vector<64x1xf32>
    %339 = vector.broadcast %338 : vector<64x1xf32> to vector<64x128xf32>
    %340 = arith.mulf %339, %29 : vector<64x128xf32>
    %341 = arith.addf %336, %340 : vector<64x128xf32>
    %342 = vector.extract_strided_slice %25 {offsets = [0, 38], sizes = [64, 1], strides = [1, 1]} : vector<64x128xf32> to vector<64x1xf32>
    %343 = arith.mulf %342, %332 : vector<64x1xf32>
    %344 = vector.broadcast %343 : vector<64x1xf32> to vector<64x128xf32>
    %345 = arith.mulf %344, %31 : vector<64x128xf32>
    %346 = arith.addf %341, %345 : vector<64x128xf32>
    %347 = vector.extract_strided_slice %25 {offsets = [0, 39], sizes = [64, 1], strides = [1, 1]} : vector<64x128xf32> to vector<64x1xf32>
    %348 = arith.mulf %347, %332 : vector<64x1xf32>
    %349 = vector.broadcast %348 : vector<64x1xf32> to vector<64x128xf32>
    %350 = arith.mulf %349, %33 : vector<64x128xf32>
    %351 = arith.addf %346, %350 : vector<64x128xf32>
    %352 = vector.extract_strided_slice %25 {offsets = [0, 40], sizes = [64, 1], strides = [1, 1]} : vector<64x128xf32> to vector<64x1xf32>
    %353 = arith.mulf %352, %332 : vector<64x1xf32>
    %354 = vector.broadcast %353 : vector<64x1xf32> to vector<64x128xf32>
    %355 = arith.mulf %354, %35 : vector<64x128xf32>
    %356 = arith.addf %351, %355 : vector<64x128xf32>
    %357 = vector.extract_strided_slice %25 {offsets = [0, 41], sizes = [64, 1], strides = [1, 1]} : vector<64x128xf32> to vector<64x1xf32>
    %358 = arith.mulf %357, %332 : vector<64x1xf32>
    %359 = vector.broadcast %358 : vector<64x1xf32> to vector<64x128xf32>
    %360 = arith.mulf %359, %37 : vector<64x128xf32>
    %361 = arith.addf %356, %360 : vector<64x128xf32>
    %362 = vector.extract_strided_slice %25 {offsets = [0, 42], sizes = [64, 1], strides = [1, 1]} : vector<64x128xf32> to vector<64x1xf32>
    %363 = arith.mulf %362, %332 : vector<64x1xf32>
    %364 = vector.broadcast %363 : vector<64x1xf32> to vector<64x128xf32>
    %365 = arith.mulf %364, %39 : vector<64x128xf32>
    %366 = arith.addf %361, %365 : vector<64x128xf32>
    %367 = vector.extract_strided_slice %25 {offsets = [0, 43], sizes = [64, 1], strides = [1, 1]} : vector<64x128xf32> to vector<64x1xf32>
    %368 = arith.mulf %367, %332 : vector<64x1xf32>
    %369 = vector.broadcast %368 : vector<64x1xf32> to vector<64x128xf32>
    %370 = arith.mulf %369, %41 : vector<64x128xf32>
    %371 = arith.addf %366, %370 : vector<64x128xf32>
    %372 = vector.extract_strided_slice %25 {offsets = [0, 44], sizes = [64, 1], strides = [1, 1]} : vector<64x128xf32> to vector<64x1xf32>
    %373 = arith.mulf %372, %332 : vector<64x1xf32>
    %374 = vector.broadcast %373 : vector<64x1xf32> to vector<64x128xf32>
    %375 = arith.mulf %374, %43 : vector<64x128xf32>
    %376 = arith.addf %371, %375 : vector<64x128xf32>
    %c1_82 = arith.constant 1 : index
    %c1_83 = arith.constant 1 : index
    %c0_84 = arith.constant 0 : index
    %377 = vector.load %arg10[%c1_82, %c1_83, %c0_84] : memref<10x10x128xf32, #tpu.memory_space<vmem>>, vector<8x8x128xf32>
    %378 = vector.shape_cast %376 : vector<64x128xf32> to vector<8x8x128xf32>
    %379 = arith.addf %377, %378 : vector<8x8x128xf32>
    %c1_85 = arith.constant 1 : index
    %c1_86 = arith.constant 1 : index
    %c0_87 = arith.constant 0 : index
    %380 = vector.load %arg10[%c1_85, %c1_86, %c0_87] : memref<10x10x128xf32, #tpu.memory_space<vmem>>, vector<8x8x128xf32>
    tpu.vector_store %arg10[%c1_85, %c1_86, %c0_87], %379 {strides = array<i32>} : memref<10x10x128xf32, #tpu.memory_space<vmem>>, vector<8x8x128xf32>,
    %381 = vector.extract_strided_slice %25 {offsets = [0, 45], sizes = [64, 1], strides = [1, 1]} : vector<64x128xf32> to vector<64x1xf32>
    %382 = vector.extract_strided_slice %25 {offsets = [0, 46], sizes = [64, 1], strides = [1, 1]} : vector<64x128xf32> to vector<64x1xf32>
    %383 = arith.addf %381, %382 : vector<64x1xf32>
    %384 = vector.extract_strided_slice %25 {offsets = [0, 47], sizes = [64, 1], strides = [1, 1]} : vector<64x128xf32> to vector<64x1xf32>
    %385 = arith.addf %383, %384 : vector<64x1xf32>
    %386 = vector.extract_strided_slice %25 {offsets = [0, 48], sizes = [64, 1], strides = [1, 1]} : vector<64x128xf32> to vector<64x1xf32>
    %387 = arith.addf %385, %386 : vector<64x1xf32>
    %388 = vector.extract_strided_slice %25 {offsets = [0, 49], sizes = [64, 1], strides = [1, 1]} : vector<64x128xf32> to vector<64x1xf32>
    %389 = arith.addf %387, %388 : vector<64x1xf32>
    %390 = vector.extract_strided_slice %25 {offsets = [0, 50], sizes = [64, 1], strides = [1, 1]} : vector<64x128xf32> to vector<64x1xf32>
    %391 = arith.addf %389, %390 : vector<64x1xf32>
    %392 = vector.extract_strided_slice %25 {offsets = [0, 51], sizes = [64, 1], strides = [1, 1]} : vector<64x128xf32> to vector<64x1xf32>
    %393 = arith.addf %391, %392 : vector<64x1xf32>
    %394 = vector.extract_strided_slice %25 {offsets = [0, 52], sizes = [64, 1], strides = [1, 1]} : vector<64x128xf32> to vector<64x1xf32>
    %395 = arith.addf %393, %394 : vector<64x1xf32>
    %396 = vector.extract_strided_slice %25 {offsets = [0, 53], sizes = [64, 1], strides = [1, 1]} : vector<64x128xf32> to vector<64x1xf32>
    %397 = arith.addf %395, %396 : vector<64x1xf32>
    %cst_88 = arith.constant 1.000000e+00 : f32
    %398 = vector.broadcast %cst_88 : f32 to vector<64x1xf32>
    %399 = arith.divf %398, %397 : vector<64x1xf32>
    %400 = vector.extract_strided_slice %25 {offsets = [0, 45], sizes = [64, 1], strides = [1, 1]} : vector<64x128xf32> to vector<64x1xf32>
    %401 = arith.mulf %400, %399 : vector<64x1xf32>
    %402 = vector.broadcast %401 : vector<64x1xf32> to vector<64x128xf32>
    %403 = arith.mulf %402, %27 : vector<64x128xf32>
    %404 = vector.extract_strided_slice %25 {offsets = [0, 46], sizes = [64, 1], strides = [1, 1]} : vector<64x128xf32> to vector<64x1xf32>
    %405 = arith.mulf %404, %399 : vector<64x1xf32>
    %406 = vector.broadcast %405 : vector<64x1xf32> to vector<64x128xf32>
    %407 = arith.mulf %406, %29 : vector<64x128xf32>
    %408 = arith.addf %403, %407 : vector<64x128xf32>
    %409 = vector.extract_strided_slice %25 {offsets = [0, 47], sizes = [64, 1], strides = [1, 1]} : vector<64x128xf32> to vector<64x1xf32>
    %410 = arith.mulf %409, %399 : vector<64x1xf32>
    %411 = vector.broadcast %410 : vector<64x1xf32> to vector<64x128xf32>
    %412 = arith.mulf %411, %31 : vector<64x128xf32>
    %413 = arith.addf %408, %412 : vector<64x128xf32>
    %414 = vector.extract_strided_slice %25 {offsets = [0, 48], sizes = [64, 1], strides = [1, 1]} : vector<64x128xf32> to vector<64x1xf32>
    %415 = arith.mulf %414, %399 : vector<64x1xf32>
    %416 = vector.broadcast %415 : vector<64x1xf32> to vector<64x128xf32>
    %417 = arith.mulf %416, %33 : vector<64x128xf32>
    %418 = arith.addf %413, %417 : vector<64x128xf32>
    %419 = vector.extract_strided_slice %25 {offsets = [0, 49], sizes = [64, 1], strides = [1, 1]} : vector<64x128xf32> to vector<64x1xf32>
    %420 = arith.mulf %419, %399 : vector<64x1xf32>
    %421 = vector.broadcast %420 : vector<64x1xf32> to vector<64x128xf32>
    %422 = arith.mulf %421, %35 : vector<64x128xf32>
    %423 = arith.addf %418, %422 : vector<64x128xf32>
    %424 = vector.extract_strided_slice %25 {offsets = [0, 50], sizes = [64, 1], strides = [1, 1]} : vector<64x128xf32> to vector<64x1xf32>
    %425 = arith.mulf %424, %399 : vector<64x1xf32>
    %426 = vector.broadcast %425 : vector<64x1xf32> to vector<64x128xf32>
    %427 = arith.mulf %426, %37 : vector<64x128xf32>
    %428 = arith.addf %423, %427 : vector<64x128xf32>
    %429 = vector.extract_strided_slice %25 {offsets = [0, 51], sizes = [64, 1], strides = [1, 1]} : vector<64x128xf32> to vector<64x1xf32>
    %430 = arith.mulf %429, %399 : vector<64x1xf32>
    %431 = vector.broadcast %430 : vector<64x1xf32> to vector<64x128xf32>
    %432 = arith.mulf %431, %39 : vector<64x128xf32>
    %433 = arith.addf %428, %432 : vector<64x128xf32>
    %434 = vector.extract_strided_slice %25 {offsets = [0, 52], sizes = [64, 1], strides = [1, 1]} : vector<64x128xf32> to vector<64x1xf32>
    %435 = arith.mulf %434, %399 : vector<64x1xf32>
    %436 = vector.broadcast %435 : vector<64x1xf32> to vector<64x128xf32>
    %437 = arith.mulf %436, %41 : vector<64x128xf32>
    %438 = arith.addf %433, %437 : vector<64x128xf32>
    %439 = vector.extract_strided_slice %25 {offsets = [0, 53], sizes = [64, 1], strides = [1, 1]} : vector<64x128xf32> to vector<64x1xf32>
    %440 = arith.mulf %439, %399 : vector<64x1xf32>
    %441 = vector.broadcast %440 : vector<64x1xf32> to vector<64x128xf32>
    %442 = arith.mulf %441, %43 : vector<64x128xf32>
    %443 = arith.addf %438, %442 : vector<64x128xf32>
    %c1_89 = arith.constant 1 : index
    %c2_90 = arith.constant 2 : index
    %c0_91 = arith.constant 0 : index
    %444 = vector.load %arg10[%c1_89, %c2_90, %c0_91] : memref<10x10x128xf32, #tpu.memory_space<vmem>>, vector<8x8x128xf32>
    %445 = vector.shape_cast %443 : vector<64x128xf32> to vector<8x8x128xf32>
    %446 = arith.addf %444, %445 : vector<8x8x128xf32>
    %c1_92 = arith.constant 1 : index
    %c2_93 = arith.constant 2 : index
    %c0_94 = arith.constant 0 : index
    %447 = vector.load %arg10[%c1_92, %c2_93, %c0_94] : memref<10x10x128xf32, #tpu.memory_space<vmem>>, vector<8x8x128xf32>
    tpu.vector_store %arg10[%c1_92, %c2_93, %c0_94], %446 {strides = array<i32>} : memref<10x10x128xf32, #tpu.memory_space<vmem>>, vector<8x8x128xf32>,
    %448 = vector.extract_strided_slice %25 {offsets = [0, 54], sizes = [64, 1], strides = [1, 1]} : vector<64x128xf32> to vector<64x1xf32>
    %449 = vector.extract_strided_slice %25 {offsets = [0, 55], sizes = [64, 1], strides = [1, 1]} : vector<64x128xf32> to vector<64x1xf32>
    %450 = arith.addf %448, %449 : vector<64x1xf32>
    %451 = vector.extract_strided_slice %25 {offsets = [0, 56], sizes = [64, 1], strides = [1, 1]} : vector<64x128xf32> to vector<64x1xf32>
    %452 = arith.addf %450, %451 : vector<64x1xf32>
    %453 = vector.extract_strided_slice %25 {offsets = [0, 57], sizes = [64, 1], strides = [1, 1]} : vector<64x128xf32> to vector<64x1xf32>
    %454 = arith.addf %452, %453 : vector<64x1xf32>
    %455 = vector.extract_strided_slice %25 {offsets = [0, 58], sizes = [64, 1], strides = [1, 1]} : vector<64x128xf32> to vector<64x1xf32>
    %456 = arith.addf %454, %455 : vector<64x1xf32>
    %457 = vector.extract_strided_slice %25 {offsets = [0, 59], sizes = [64, 1], strides = [1, 1]} : vector<64x128xf32> to vector<64x1xf32>
    %458 = arith.addf %456, %457 : vector<64x1xf32>
    %459 = vector.extract_strided_slice %25 {offsets = [0, 60], sizes = [64, 1], strides = [1, 1]} : vector<64x128xf32> to vector<64x1xf32>
    %460 = arith.addf %458, %459 : vector<64x1xf32>
    %461 = vector.extract_strided_slice %25 {offsets = [0, 61], sizes = [64, 1], strides = [1, 1]} : vector<64x128xf32> to vector<64x1xf32>
    %462 = arith.addf %460, %461 : vector<64x1xf32>
    %463 = vector.extract_strided_slice %25 {offsets = [0, 62], sizes = [64, 1], strides = [1, 1]} : vector<64x128xf32> to vector<64x1xf32>
    %464 = arith.addf %462, %463 : vector<64x1xf32>
    %cst_95 = arith.constant 1.000000e+00 : f32
    %465 = vector.broadcast %cst_95 : f32 to vector<64x1xf32>
    %466 = arith.divf %465, %464 : vector<64x1xf32>
    %467 = vector.extract_strided_slice %25 {offsets = [0, 54], sizes = [64, 1], strides = [1, 1]} : vector<64x128xf32> to vector<64x1xf32>
    %468 = arith.mulf %467, %466 : vector<64x1xf32>
    %469 = vector.broadcast %468 : vector<64x1xf32> to vector<64x128xf32>
    %470 = arith.mulf %469, %27 : vector<64x128xf32>
    %471 = vector.extract_strided_slice %25 {offsets = [0, 55], sizes = [64, 1], strides = [1, 1]} : vector<64x128xf32> to vector<64x1xf32>
    %472 = arith.mulf %471, %466 : vector<64x1xf32>
    %473 = vector.broadcast %472 : vector<64x1xf32> to vector<64x128xf32>
    %474 = arith.mulf %473, %29 : vector<64x128xf32>
    %475 = arith.addf %470, %474 : vector<64x128xf32>
    %476 = vector.extract_strided_slice %25 {offsets = [0, 56], sizes = [64, 1], strides = [1, 1]} : vector<64x128xf32> to vector<64x1xf32>
    %477 = arith.mulf %476, %466 : vector<64x1xf32>
    %478 = vector.broadcast %477 : vector<64x1xf32> to vector<64x128xf32>
    %479 = arith.mulf %478, %31 : vector<64x128xf32>
    %480 = arith.addf %475, %479 : vector<64x128xf32>
    %481 = vector.extract_strided_slice %25 {offsets = [0, 57], sizes = [64, 1], strides = [1, 1]} : vector<64x128xf32> to vector<64x1xf32>
    %482 = arith.mulf %481, %466 : vector<64x1xf32>
    %483 = vector.broadcast %482 : vector<64x1xf32> to vector<64x128xf32>
    %484 = arith.mulf %483, %33 : vector<64x128xf32>
    %485 = arith.addf %480, %484 : vector<64x128xf32>
    %486 = vector.extract_strided_slice %25 {offsets = [0, 58], sizes = [64, 1], strides = [1, 1]} : vector<64x128xf32> to vector<64x1xf32>
    %487 = arith.mulf %486, %466 : vector<64x1xf32>
    %488 = vector.broadcast %487 : vector<64x1xf32> to vector<64x128xf32>
    %489 = arith.mulf %488, %35 : vector<64x128xf32>
    %490 = arith.addf %485, %489 : vector<64x128xf32>
    %491 = vector.extract_strided_slice %25 {offsets = [0, 59], sizes = [64, 1], strides = [1, 1]} : vector<64x128xf32> to vector<64x1xf32>
    %492 = arith.mulf %491, %466 : vector<64x1xf32>
    %493 = vector.broadcast %492 : vector<64x1xf32> to vector<64x128xf32>
    %494 = arith.mulf %493, %37 : vector<64x128xf32>
    %495 = arith.addf %490, %494 : vector<64x128xf32>
    %496 = vector.extract_strided_slice %25 {offsets = [0, 60], sizes = [64, 1], strides = [1, 1]} : vector<64x128xf32> to vector<64x1xf32>
    %497 = arith.mulf %496, %466 : vector<64x1xf32>
    %498 = vector.broadcast %497 : vector<64x1xf32> to vector<64x128xf32>
    %499 = arith.mulf %498, %39 : vector<64x128xf32>
    %500 = arith.addf %495, %499 : vector<64x128xf32>
    %501 = vector.extract_strided_slice %25 {offsets = [0, 61], sizes = [64, 1], strides = [1, 1]} : vector<64x128xf32> to vector<64x1xf32>
    %502 = arith.mulf %501, %466 : vector<64x1xf32>
    %503 = vector.broadcast %502 : vector<64x1xf32> to vector<64x128xf32>
    %504 = arith.mulf %503, %41 : vector<64x128xf32>
    %505 = arith.addf %500, %504 : vector<64x128xf32>
    %506 = vector.extract_strided_slice %25 {offsets = [0, 62], sizes = [64, 1], strides = [1, 1]} : vector<64x128xf32> to vector<64x1xf32>
    %507 = arith.mulf %506, %466 : vector<64x1xf32>
    %508 = vector.broadcast %507 : vector<64x1xf32> to vector<64x128xf32>
    %509 = arith.mulf %508, %43 : vector<64x128xf32>
    %510 = arith.addf %505, %509 : vector<64x128xf32>
    %c2_96 = arith.constant 2 : index
    %c0_97 = arith.constant 0 : index
    %c0_98 = arith.constant 0 : index
    %511 = vector.load %arg10[%c2_96, %c0_97, %c0_98] : memref<10x10x128xf32, #tpu.memory_space<vmem>>, vector<8x8x128xf32>
    %512 = vector.shape_cast %510 : vector<64x128xf32> to vector<8x8x128xf32>
    %513 = arith.addf %511, %512 : vector<8x8x128xf32>
    %c2_99 = arith.constant 2 : index
    %c0_100 = arith.constant 0 : index
    %c0_101 = arith.constant 0 : index
    %514 = vector.load %arg10[%c2_99, %c0_100, %c0_101] : memref<10x10x128xf32, #tpu.memory_space<vmem>>, vector<8x8x128xf32>
    tpu.vector_store %arg10[%c2_99, %c0_100, %c0_101], %513 {strides = array<i32>} : memref<10x10x128xf32, #tpu.memory_space<vmem>>, vector<8x8x128xf32>,
    %515 = vector.extract_strided_slice %25 {offsets = [0, 63], sizes = [64, 1], strides = [1, 1]} : vector<64x128xf32> to vector<64x1xf32>
    %516 = vector.extract_strided_slice %25 {offsets = [0, 64], sizes = [64, 1], strides = [1, 1]} : vector<64x128xf32> to vector<64x1xf32>
    %517 = arith.addf %515, %516 : vector<64x1xf32>
    %518 = vector.extract_strided_slice %25 {offsets = [0, 65], sizes = [64, 1], strides = [1, 1]} : vector<64x128xf32> to vector<64x1xf32>
    %519 = arith.addf %517, %518 : vector<64x1xf32>
    %520 = vector.extract_strided_slice %25 {offsets = [0, 66], sizes = [64, 1], strides = [1, 1]} : vector<64x128xf32> to vector<64x1xf32>
    %521 = arith.addf %519, %520 : vector<64x1xf32>
    %522 = vector.extract_strided_slice %25 {offsets = [0, 67], sizes = [64, 1], strides = [1, 1]} : vector<64x128xf32> to vector<64x1xf32>
    %523 = arith.addf %521, %522 : vector<64x1xf32>
    %524 = vector.extract_strided_slice %25 {offsets = [0, 68], sizes = [64, 1], strides = [1, 1]} : vector<64x128xf32> to vector<64x1xf32>
    %525 = arith.addf %523, %524 : vector<64x1xf32>
    %526 = vector.extract_strided_slice %25 {offsets = [0, 69], sizes = [64, 1], strides = [1, 1]} : vector<64x128xf32> to vector<64x1xf32>
    %527 = arith.addf %525, %526 : vector<64x1xf32>
    %528 = vector.extract_strided_slice %25 {offsets = [0, 70], sizes = [64, 1], strides = [1, 1]} : vector<64x128xf32> to vector<64x1xf32>
    %529 = arith.addf %527, %528 : vector<64x1xf32>
    %530 = vector.extract_strided_slice %25 {offsets = [0, 71], sizes = [64, 1], strides = [1, 1]} : vector<64x128xf32> to vector<64x1xf32>
    %531 = arith.addf %529, %530 : vector<64x1xf32>
    %cst_102 = arith.constant 1.000000e+00 : f32
    %532 = vector.broadcast %cst_102 : f32 to vector<64x1xf32>
    %533 = arith.divf %532, %531 : vector<64x1xf32>
    %534 = vector.extract_strided_slice %25 {offsets = [0, 63], sizes = [64, 1], strides = [1, 1]} : vector<64x128xf32> to vector<64x1xf32>
    %535 = arith.mulf %534, %533 : vector<64x1xf32>
    %536 = vector.broadcast %535 : vector<64x1xf32> to vector<64x128xf32>
    %537 = arith.mulf %536, %27 : vector<64x128xf32>
    %538 = vector.extract_strided_slice %25 {offsets = [0, 64], sizes = [64, 1], strides = [1, 1]} : vector<64x128xf32> to vector<64x1xf32>
    %539 = arith.mulf %538, %533 : vector<64x1xf32>
    %540 = vector.broadcast %539 : vector<64x1xf32> to vector<64x128xf32>
    %541 = arith.mulf %540, %29 : vector<64x128xf32>
    %542 = arith.addf %537, %541 : vector<64x128xf32>
    %543 = vector.extract_strided_slice %25 {offsets = [0, 65], sizes = [64, 1], strides = [1, 1]} : vector<64x128xf32> to vector<64x1xf32>
    %544 = arith.mulf %543, %533 : vector<64x1xf32>
    %545 = vector.broadcast %544 : vector<64x1xf32> to vector<64x128xf32>
    %546 = arith.mulf %545, %31 : vector<64x128xf32>
    %547 = arith.addf %542, %546 : vector<64x128xf32>
    %548 = vector.extract_strided_slice %25 {offsets = [0, 66], sizes = [64, 1], strides = [1, 1]} : vector<64x128xf32> to vector<64x1xf32>
    %549 = arith.mulf %548, %533 : vector<64x1xf32>
    %550 = vector.broadcast %549 : vector<64x1xf32> to vector<64x128xf32>
    %551 = arith.mulf %550, %33 : vector<64x128xf32>
    %552 = arith.addf %547, %551 : vector<64x128xf32>
    %553 = vector.extract_strided_slice %25 {offsets = [0, 67], sizes = [64, 1], strides = [1, 1]} : vector<64x128xf32> to vector<64x1xf32>
    %554 = arith.mulf %553, %533 : vector<64x1xf32>
    %555 = vector.broadcast %554 : vector<64x1xf32> to vector<64x128xf32>
    %556 = arith.mulf %555, %35 : vector<64x128xf32>
    %557 = arith.addf %552, %556 : vector<64x128xf32>
    %558 = vector.extract_strided_slice %25 {offsets = [0, 68], sizes = [64, 1], strides = [1, 1]} : vector<64x128xf32> to vector<64x1xf32>
    %559 = arith.mulf %558, %533 : vector<64x1xf32>
    %560 = vector.broadcast %559 : vector<64x1xf32> to vector<64x128xf32>
    %561 = arith.mulf %560, %37 : vector<64x128xf32>
    %562 = arith.addf %557, %561 : vector<64x128xf32>
    %563 = vector.extract_strided_slice %25 {offsets = [0, 69], sizes = [64, 1], strides = [1, 1]} : vector<64x128xf32> to vector<64x1xf32>
    %564 = arith.mulf %563, %533 : vector<64x1xf32>
    %565 = vector.broadcast %564 : vector<64x1xf32> to vector<64x128xf32>
    %566 = arith.mulf %565, %39 : vector<64x128xf32>
    %567 = arith.addf %562, %566 : vector<64x128xf32>
    %568 = vector.extract_strided_slice %25 {offsets = [0, 70], sizes = [64, 1], strides = [1, 1]} : vector<64x128xf32> to vector<64x1xf32>
    %569 = arith.mulf %568, %533 : vector<64x1xf32>
    %570 = vector.broadcast %569 : vector<64x1xf32> to vector<64x128xf32>
    %571 = arith.mulf %570, %41 : vector<64x128xf32>
    %572 = arith.addf %567, %571 : vector<64x128xf32>
    %573 = vector.extract_strided_slice %25 {offsets = [0, 71], sizes = [64, 1], strides = [1, 1]} : vector<64x128xf32> to vector<64x1xf32>
    %574 = arith.mulf %573, %533 : vector<64x1xf32>
    %575 = vector.broadcast %574 : vector<64x1xf32> to vector<64x128xf32>
    %576 = arith.mulf %575, %43 : vector<64x128xf32>
    %577 = arith.addf %572, %576 : vector<64x128xf32>
    %c2_103 = arith.constant 2 : index
    %c1_104 = arith.constant 1 : index
    %c0_105 = arith.constant 0 : index
    %578 = vector.load %arg10[%c2_103, %c1_104, %c0_105] : memref<10x10x128xf32, #tpu.memory_space<vmem>>, vector<8x8x128xf32>
    %579 = vector.shape_cast %577 : vector<64x128xf32> to vector<8x8x128xf32>
    %580 = arith.addf %578, %579 : vector<8x8x128xf32>
    %c2_106 = arith.constant 2 : index
    %c1_107 = arith.constant 1 : index
    %c0_108 = arith.constant 0 : index
    %581 = vector.load %arg10[%c2_106, %c1_107, %c0_108] : memref<10x10x128xf32, #tpu.memory_space<vmem>>, vector<8x8x128xf32>
    tpu.vector_store %arg10[%c2_106, %c1_107, %c0_108], %580 {strides = array<i32>} : memref<10x10x128xf32, #tpu.memory_space<vmem>>, vector<8x8x128xf32>,
    %582 = vector.extract_strided_slice %25 {offsets = [0, 72], sizes = [64, 1], strides = [1, 1]} : vector<64x128xf32> to vector<64x1xf32>
    %583 = vector.extract_strided_slice %25 {offsets = [0, 73], sizes = [64, 1], strides = [1, 1]} : vector<64x128xf32> to vector<64x1xf32>
    %584 = arith.addf %582, %583 : vector<64x1xf32>
    %585 = vector.extract_strided_slice %25 {offsets = [0, 74], sizes = [64, 1], strides = [1, 1]} : vector<64x128xf32> to vector<64x1xf32>
    %586 = arith.addf %584, %585 : vector<64x1xf32>
    %587 = vector.extract_strided_slice %25 {offsets = [0, 75], sizes = [64, 1], strides = [1, 1]} : vector<64x128xf32> to vector<64x1xf32>
    %588 = arith.addf %586, %587 : vector<64x1xf32>
    %589 = vector.extract_strided_slice %25 {offsets = [0, 76], sizes = [64, 1], strides = [1, 1]} : vector<64x128xf32> to vector<64x1xf32>
    %590 = arith.addf %588, %589 : vector<64x1xf32>
    %591 = vector.extract_strided_slice %25 {offsets = [0, 77], sizes = [64, 1], strides = [1, 1]} : vector<64x128xf32> to vector<64x1xf32>
    %592 = arith.addf %590, %591 : vector<64x1xf32>
    %593 = vector.extract_strided_slice %25 {offsets = [0, 78], sizes = [64, 1], strides = [1, 1]} : vector<64x128xf32> to vector<64x1xf32>
    %594 = arith.addf %592, %593 : vector<64x1xf32>
    %595 = vector.extract_strided_slice %25 {offsets = [0, 79], sizes = [64, 1], strides = [1, 1]} : vector<64x128xf32> to vector<64x1xf32>
    %596 = arith.addf %594, %595 : vector<64x1xf32>
    %597 = vector.extract_strided_slice %25 {offsets = [0, 80], sizes = [64, 1], strides = [1, 1]} : vector<64x128xf32> to vector<64x1xf32>
    %598 = arith.addf %596, %597 : vector<64x1xf32>
    %cst_109 = arith.constant 1.000000e+00 : f32
    %599 = vector.broadcast %cst_109 : f32 to vector<64x1xf32>
    %600 = arith.divf %599, %598 : vector<64x1xf32>
    %601 = vector.extract_strided_slice %25 {offsets = [0, 72], sizes = [64, 1], strides = [1, 1]} : vector<64x128xf32> to vector<64x1xf32>
    %602 = arith.mulf %601, %600 : vector<64x1xf32>
    %603 = vector.broadcast %602 : vector<64x1xf32> to vector<64x128xf32>
    %604 = arith.mulf %603, %27 : vector<64x128xf32>
    %605 = vector.extract_strided_slice %25 {offsets = [0, 73], sizes = [64, 1], strides = [1, 1]} : vector<64x128xf32> to vector<64x1xf32>
    %606 = arith.mulf %605, %600 : vector<64x1xf32>
    %607 = vector.broadcast %606 : vector<64x1xf32> to vector<64x128xf32>
    %608 = arith.mulf %607, %29 : vector<64x128xf32>
    %609 = arith.addf %604, %608 : vector<64x128xf32>
    %610 = vector.extract_strided_slice %25 {offsets = [0, 74], sizes = [64, 1], strides = [1, 1]} : vector<64x128xf32> to vector<64x1xf32>
    %611 = arith.mulf %610, %600 : vector<64x1xf32>
    %612 = vector.broadcast %611 : vector<64x1xf32> to vector<64x128xf32>
    %613 = arith.mulf %612, %31 : vector<64x128xf32>
    %614 = arith.addf %609, %613 : vector<64x128xf32>
    %615 = vector.extract_strided_slice %25 {offsets = [0, 75], sizes = [64, 1], strides = [1, 1]} : vector<64x128xf32> to vector<64x1xf32>
    %616 = arith.mulf %615, %600 : vector<64x1xf32>
    %617 = vector.broadcast %616 : vector<64x1xf32> to vector<64x128xf32>
    %618 = arith.mulf %617, %33 : vector<64x128xf32>
    %619 = arith.addf %614, %618 : vector<64x128xf32>
    %620 = vector.extract_strided_slice %25 {offsets = [0, 76], sizes = [64, 1], strides = [1, 1]} : vector<64x128xf32> to vector<64x1xf32>
    %621 = arith.mulf %620, %600 : vector<64x1xf32>
    %622 = vector.broadcast %621 : vector<64x1xf32> to vector<64x128xf32>
    %623 = arith.mulf %622, %35 : vector<64x128xf32>
    %624 = arith.addf %619, %623 : vector<64x128xf32>
    %625 = vector.extract_strided_slice %25 {offsets = [0, 77], sizes = [64, 1], strides = [1, 1]} : vector<64x128xf32> to vector<64x1xf32>
    %626 = arith.mulf %625, %600 : vector<64x1xf32>
    %627 = vector.broadcast %626 : vector<64x1xf32> to vector<64x128xf32>
    %628 = arith.mulf %627, %37 : vector<64x128xf32>
    %629 = arith.addf %624, %628 : vector<64x128xf32>
    %630 = vector.extract_strided_slice %25 {offsets = [0, 78], sizes = [64, 1], strides = [1, 1]} : vector<64x128xf32> to vector<64x1xf32>
    %631 = arith.mulf %630, %600 : vector<64x1xf32>
    %632 = vector.broadcast %631 : vector<64x1xf32> to vector<64x128xf32>
    %633 = arith.mulf %632, %39 : vector<64x128xf32>
    %634 = arith.addf %629, %633 : vector<64x128xf32>
    %635 = vector.extract_strided_slice %25 {offsets = [0, 79], sizes = [64, 1], strides = [1, 1]} : vector<64x128xf32> to vector<64x1xf32>
    %636 = arith.mulf %635, %600 : vector<64x1xf32>
    %637 = vector.broadcast %636 : vector<64x1xf32> to vector<64x128xf32>
    %638 = arith.mulf %637, %41 : vector<64x128xf32>
    %639 = arith.addf %634, %638 : vector<64x128xf32>
    %640 = vector.extract_strided_slice %25 {offsets = [0, 80], sizes = [64, 1], strides = [1, 1]} : vector<64x128xf32> to vector<64x1xf32>
    %641 = arith.mulf %640, %600 : vector<64x1xf32>
    %642 = vector.broadcast %641 : vector<64x1xf32> to vector<64x128xf32>
    %643 = arith.mulf %642, %43 : vector<64x128xf32>
    %644 = arith.addf %639, %643 : vector<64x128xf32>
    %c2_110 = arith.constant 2 : index
    %c2_111 = arith.constant 2 : index
    %c0_112 = arith.constant 0 : index
    %645 = vector.load %arg10[%c2_110, %c2_111, %c0_112] : memref<10x10x128xf32, #tpu.memory_space<vmem>>, vector<8x8x128xf32>
    %646 = vector.shape_cast %644 : vector<64x128xf32> to vector<8x8x128xf32>
    %647 = arith.addf %645, %646 : vector<8x8x128xf32>
    %c2_113 = arith.constant 2 : index
    %c2_114 = arith.constant 2 : index
    %c0_115 = arith.constant 0 : index
    %648 = vector.load %arg10[%c2_113, %c2_114, %c0_115] : memref<10x10x128xf32, #tpu.memory_space<vmem>>, vector<8x8x128xf32>
    tpu.vector_store %arg10[%c2_113, %c2_114, %c0_115], %647 {strides = array<i32>} : memref<10x10x128xf32, #tpu.memory_space<vmem>>, vector<8x8x128xf32>,
    %c1_116 = arith.constant 1 : index
    %c1_117 = arith.constant 1 : index
    %c0_118 = arith.constant 0 : index
    %649 = vector.load %arg10[%c1_116, %c1_117, %c0_118] : memref<10x10x128xf32, #tpu.memory_space<vmem>>, vector<8x8x128xf32>
    %cst_119 = arith.constant -1.000000e+30 : f32
    %650 = vector.broadcast %cst_119 : f32 to vector<10x10x128xf32>
    %c0_120 = arith.constant 0 : index
    %c0_121 = arith.constant 0 : index
    %c0_122 = arith.constant 0 : index
    %651 = vector.load %arg9[%c0_120, %c0_121, %c0_122] : memref<10x10x128xf32, #tpu.memory_space<vmem>>, vector<10x10x128xf32>
    tpu.vector_store %arg9[%c0_120, %c0_121, %c0_122], %650 {strides = array<i32>} : memref<10x10x128xf32, #tpu.memory_space<vmem>>, vector<10x10x128xf32>,
    %c1_123 = arith.constant 1 : index
    %c1_124 = arith.constant 1 : index
    %c0_125 = arith.constant 0 : index
    %652 = vector.load %arg9[%c1_123, %c1_124, %c0_125] : memref<10x10x128xf32, #tpu.memory_space<vmem>>, vector<8x8x128xf32>
    tpu.vector_store %arg9[%c1_123, %c1_124, %c0_125], %1 {strides = array<i32>} : memref<10x10x128xf32, #tpu.memory_space<vmem>>, vector<8x8x128xf32>,
    %c1_126 = arith.constant 1 : index
    %c0_127 = arith.constant 0 : index
    %c0_128 = arith.constant 0 : index
    %653 = vector.load %arg9[%c1_126, %c0_127, %c0_128] : memref<10x10x128xf32, #tpu.memory_space<vmem>>, vector<8x8x128xf32>
    %c1_129 = arith.constant 1 : index
    %c1_130 = arith.constant 1 : index
    %c0_131 = arith.constant 0 : index
    %654 = vector.load %arg9[%c1_129, %c1_130, %c0_131] : memref<10x10x128xf32, #tpu.memory_space<vmem>>, vector<8x8x128xf32>
    %655 = arith.maximumf %653, %654 : vector<8x8x128xf32>
    %c1_132 = arith.constant 1 : index
    %c2_133 = arith.constant 2 : index
    %c0_134 = arith.constant 0 : index
    %656 = vector.load %arg9[%c1_132, %c2_133, %c0_134] : memref<10x10x128xf32, #tpu.memory_space<vmem>>, vector<8x8x128xf32>
    %657 = arith.maximumf %655, %656 : vector<8x8x128xf32>
    %c1_135 = arith.constant 1 : index
    %c1_136 = arith.constant 1 : index
    %c0_137 = arith.constant 0 : index
    %658 = vector.load %arg9[%c1_135, %c1_136, %c0_137] : memref<10x10x128xf32, #tpu.memory_space<vmem>>, vector<8x8x128xf32>
    tpu.vector_store %arg9[%c1_135, %c1_136, %c0_137], %657 {strides = array<i32>} : memref<10x10x128xf32, #tpu.memory_space<vmem>>, vector<8x8x128xf32>,
    %c0_138 = arith.constant 0 : index
    %c1_139 = arith.constant 1 : index
    %c0_140 = arith.constant 0 : index
    %659 = vector.load %arg9[%c0_138, %c1_139, %c0_140] : memref<10x10x128xf32, #tpu.memory_space<vmem>>, vector<8x8x128xf32>
    %c1_141 = arith.constant 1 : index
    %c1_142 = arith.constant 1 : index
    %c0_143 = arith.constant 0 : index
    %660 = vector.load %arg9[%c1_141, %c1_142, %c0_143] : memref<10x10x128xf32, #tpu.memory_space<vmem>>, vector<8x8x128xf32>
    %661 = arith.maximumf %659, %660 : vector<8x8x128xf32>
    %c2_144 = arith.constant 2 : index
    %c1_145 = arith.constant 1 : index
    %c0_146 = arith.constant 0 : index
    %662 = vector.load %arg9[%c2_144, %c1_145, %c0_146] : memref<10x10x128xf32, #tpu.memory_space<vmem>>, vector<8x8x128xf32>
    %663 = arith.maximumf %661, %662 : vector<8x8x128xf32>
    %c1_147 = arith.constant 1 : index
    %c1_148 = arith.constant 1 : index
    %c0_149 = arith.constant 0 : index
    %664 = vector.load %arg9[%c1_147, %c1_148, %c0_149] : memref<10x10x128xf32, #tpu.memory_space<vmem>>, vector<8x8x128xf32>
    tpu.vector_store %arg9[%c1_147, %c1_148, %c0_149], %663 {strides = array<i32>} : memref<10x10x128xf32, #tpu.memory_space<vmem>>, vector<8x8x128xf32>,
    %c1_150 = arith.constant 1 : index
    %c0_151 = arith.constant 0 : index
    %c0_152 = arith.constant 0 : index
    %665 = vector.load %arg9[%c1_150, %c0_151, %c0_152] : memref<10x10x128xf32, #tpu.memory_space<vmem>>, vector<8x8x128xf32>
    %c1_153 = arith.constant 1 : index
    %c1_154 = arith.constant 1 : index
    %c0_155 = arith.constant 0 : index
    %666 = vector.load %arg9[%c1_153, %c1_154, %c0_155] : memref<10x10x128xf32, #tpu.memory_space<vmem>>, vector<8x8x128xf32>
    %667 = arith.maximumf %665, %666 : vector<8x8x128xf32>
    %c1_156 = arith.constant 1 : index
    %c2_157 = arith.constant 2 : index
    %c0_158 = arith.constant 0 : index
    %668 = vector.load %arg9[%c1_156, %c2_157, %c0_158] : memref<10x10x128xf32, #tpu.memory_space<vmem>>, vector<8x8x128xf32>
    %669 = arith.maximumf %667, %668 : vector<8x8x128xf32>
    %c1_159 = arith.constant 1 : index
    %c1_160 = arith.constant 1 : index
    %c0_161 = arith.constant 0 : index
    %670 = vector.load %arg9[%c1_159, %c1_160, %c0_161] : memref<10x10x128xf32, #tpu.memory_space<vmem>>, vector<8x8x128xf32>
    tpu.vector_store %arg9[%c1_159, %c1_160, %c0_161], %669 {strides = array<i32>} : memref<10x10x128xf32, #tpu.memory_space<vmem>>, vector<8x8x128xf32>,
    %c0_162 = arith.constant 0 : index
    %c1_163 = arith.constant 1 : index
    %c0_164 = arith.constant 0 : index
    %671 = vector.load %arg9[%c0_162, %c1_163, %c0_164] : memref<10x10x128xf32, #tpu.memory_space<vmem>>, vector<8x8x128xf32>
    %c1_165 = arith.constant 1 : index
    %c1_166 = arith.constant 1 : index
    %c0_167 = arith.constant 0 : index
    %672 = vector.load %arg9[%c1_165, %c1_166, %c0_167] : memref<10x10x128xf32, #tpu.memory_space<vmem>>, vector<8x8x128xf32>
    %673 = arith.maximumf %671, %672 : vector<8x8x128xf32>
    %c2_168 = arith.constant 2 : index
    %c1_169 = arith.constant 1 : index
    %c0_170 = arith.constant 0 : index
    %674 = vector.load %arg9[%c2_168, %c1_169, %c0_170] : memref<10x10x128xf32, #tpu.memory_space<vmem>>, vector<8x8x128xf32>
    %675 = arith.maximumf %673, %674 : vector<8x8x128xf32>
    %cst_171 = arith.constant 0.000000e+00 : f32
    %676 = vector.broadcast %cst_171 : f32 to vector<8x8x128xf32>
    %677 = arith.maximumf %649, %676 : vector<8x8x128xf32>
    %678 = arith.addf %677, %663 : vector<8x8x128xf32>
    %cst_172 = arith.constant 0.000000e+00 : f32
    %679 = vector.broadcast %cst_172 : f32 to vector<8x8x128xf32>
    %680 = arith.maximumf %678, %679 : vector<8x8x128xf32>
    %681 = arith.addf %680, %675 : vector<8x8x128xf32>
    %cst_173 = arith.constant 0.000000e+00 : f32
    %682 = vector.broadcast %cst_173 : f32 to vector<8x8x128xf32>
    %683 = arith.maximumf %681, %682 : vector<8x8x128xf32>
    %684 = arith.truncf %680 : vector<8x8x128xf32> to vector<8x8x128xbf16>
    %c0_174 = arith.constant 0 : index
    %c0_175 = arith.constant 0 : index
    %c0_176 = arith.constant 0 : index
    %c0_177 = arith.constant 0 : index
    %685 = vector.load %arg7[%c0_174, %c0_175, %c0_176, %c0_177] : memref<1x8x8x128xbf16, #tpu.memory_space<vmem>>, vector<1x8x8x128xbf16>
    %686 = vector.shape_cast %685 : vector<1x8x8x128xbf16> to vector<8x8x128xbf16>
    %687 = vector.shape_cast %684 : vector<8x8x128xbf16> to vector<1x8x8x128xbf16>
    tpu.vector_store %arg7[%c0_174, %c0_175, %c0_176, %c0_177], %687 {strides = array<i32>} : memref<1x8x8x128xbf16, #tpu.memory_space<vmem>>, vector<1x8x8x128xbf16>,
    %688 = arith.truncf %683 : vector<8x8x128xf32> to vector<8x8x128xbf16>
    %c0_178 = arith.constant 0 : index
    %c0_179 = arith.constant 0 : index
    %c0_180 = arith.constant 0 : index
    %c0_181 = arith.constant 0 : index
    %689 = vector.load %arg8[%c0_178, %c0_179, %c0_180, %c0_181] : memref<1x8x8x128xbf16, #tpu.memory_space<vmem>>, vector<1x8x8x128xbf16>
    %690 = vector.shape_cast %689 : vector<1x8x8x128xbf16> to vector<8x8x128xbf16>
    %691 = vector.shape_cast %688 : vector<8x8x128xbf16> to vector<1x8x8x128xbf16>
    tpu.vector_store %arg8[%c0_178, %c0_179, %c0_180, %c0_181], %691 {strides = array<i32>} : memref<1x8x8x128xbf16, #tpu.memory_space<vmem>>, vector<1x8x8x128xbf16>,
    return
  }
  func.func @transform_0(%arg0: i32) -> (i32, i32, i32, i32) {
    %c0_i32 = arith.constant 0 : i32
    %c0_i32_0 = arith.constant 0 : i32
    %c0_i32_1 = arith.constant 0 : i32
    %c0_i32_2 = arith.constant 0 : i32
    return %arg0, %c0_i32, %c0_i32_0, %c0_i32_1 : i32, i32, i32, i32
  }
  func.func @transform_1(%arg0: i32) -> (i32, i32, i32, i32) {
    %c0_i32 = arith.constant 0 : i32
    %c0_i32_0 = arith.constant 0 : i32
    %c0_i32_1 = arith.constant 0 : i32
    %c0_i32_2 = arith.constant 0 : i32
    return %arg0, %c0_i32, %c0_i32_0, %c0_i32_1 : i32, i32, i32, i32
  }
  func.func @transform_2(%arg0: i32) -> (i32, i32) {
    %c0_i32 = arith.constant 0 : i32
    %c0_i32_0 = arith.constant 0 : i32
    %c0_i32_1 = arith.constant 0 : i32
    return %c0_i32, %c0_i32_0 : i32, i32
  }
  func.func @transform_3(%arg0: i32) -> (i32, i32) {
    %c0_i32 = arith.constant 0 : i32
    %c0_i32_0 = arith.constant 0 : i32
    %c0_i32_1 = arith.constant 0 : i32
    return %c0_i32, %c0_i32_0 : i32, i32
  }
  func.func @transform_4(%arg0: i32) -> (i32, i32) {
    %c0_i32 = arith.constant 0 : i32
    %c0_i32_0 = arith.constant 0 : i32
    %c0_i32_1 = arith.constant 0 : i32
    return %c0_i32, %c0_i32_0 : i32, i32
  }
  func.func @transform_5(%arg0: i32) -> (i32, i32) {
    %c0_i32 = arith.constant 0 : i32
    %c0_i32_0 = arith.constant 0 : i32
    %c0_i32_1 = arith.constant 0 : i32
    return %c0_i32, %c0_i32_0 : i32, i32
  }
  func.func @transform_6(%arg0: i32) -> (i32, i32, i32, i32) {
    %c0_i32 = arith.constant 0 : i32
    %c0_i32_0 = arith.constant 0 : i32
    %c0_i32_1 = arith.constant 0 : i32
    %c0_i32_2 = arith.constant 0 : i32
    return %arg0, %c0_i32, %c0_i32_0, %c0_i32_1 : i32, i32, i32, i32
  }
  func.func @transform_7(%arg0: i32) -> (i32, i32, i32, i32) {
    %c0_i32 = arith.constant 0 : i32
    %c0_i32_0 = arith.constant 0 : i32
    %c0_i32_1 = arith.constant 0 : i32
    %c0_i32_2 = arith.constant 0 : i32
    return %arg0, %c0_i32, %c0_i32_0, %c0_i32_1 : i32, i32, i32, i32
  }
}

</mosaic_0001>

<bundles_post_ra>
// kernel: moa_forward.3
= control target key start
LH: loop header
LB: loop body
LE: loop exit
PB: predicated region body
PF: predicated region fallthrough
CT: control target
= control target key end

     0   :  { %s1190_s0 = inlined_call_operand.vmem [shape: bf16[128,128], index: 0, kind: input, shape index: {}]   ;;  %s1191_s1 = inlined_call_operand.vmem [shape: bf16[128,128], index: 1, kind: input, shape index: {}]   ;;  %s1192_s2 = inlined_call_operand.vmem [shape: bf16[128,128], index: 2, kind: input, shape index: {}]   ;;  %s1193_s3 = inlined_call_operand.vmem [shape: bf16[128,128], index: 3, kind: input, shape index: {}]   ;;  %s1194_s4 = inlined_call_operand.vmem [shape: f32[1,128], index: 4, kind: input, shape index: {}]   ;;  %s1195_s5 = inlined_call_operand.vmem [shape: f32[128,128], index: 5, kind: input, shape index: {}]   ;;  %s1196_s6 = inlined_call_operand.vmem [shape: f32[1,128], index: 6, kind: input, shape index: {}]   ;;  %s1197_s7 = inlined_call_operand.vmem [shape: f32[1,128], index: 7, kind: input, shape index: {}]   ;;  %s1198_s8 = inlined_call_operand.hbm [shape: f32[128,128], index: 8, kind: output, shape index: {}]  }
   0x1   :  { %v867_v0 = vld [vmem:[%s1193_s3] sm:$0xff]   ;;  %v869_v2 = vld [vmem:[%s1193_s3 + $0x8] sm:$0xff]   ;;  %v871_v4 = vld [vmem:[%s1193_s3 + $0x10] sm:$0xff]  }
   0x2   :  { %v868_v1 = vld [vmem:[%s1192_s2] sm:$0xff]   ;;  %784 = vmatprep.subr.bf16.mxu1 %v867_v0  ;;  %v870_v3 = vld [vmem:[%s1192_s2 + $0x8] sm:$0xff]   ;;  %v872_v5 = vld [vmem:[%s1192_s2 + $0x10] sm:$0xff]  }
   0x3   :  { %816 = vmatprep.subr.bf16.mxu0 %v868_v1  ;;  %785 = vmatpush3.bf16.msra.mxu1 %v867_v0  ;;  %v873_v6 = vld [vmem:[%s1193_s3 + $0x18] sm:$0xff]   ;;  %v875_v8 = vld [vmem:[%s1193_s3 + $0x20] sm:$0xff]   ;;  %v877_v10 = vld [vmem:[%s1193_s3 + $0x28] sm:$0xff]  }
   0x4   :  { %817 = vmatpush3.bf16.msra.mxu0 %v868_v1  ;;  %786 = vmatprep.subr.bf16.mxu1 %v869_v2  ;;  %v874_v7 = vld [vmem:[%s1192_s2 + $0x18] sm:$0xff]   ;;  %v876_v9 = vld [vmem:[%s1192_s2 + $0x20] sm:$0xff]   ;;  %v878_v11 = vld [vmem:[%s1192_s2 + $0x28] sm:$0xff]  }
   0x5   :  { %818 = vmatprep.subr.bf16.mxu0 %v870_v3  ;;  %v883_v12 = vld [vmem:[%s1191_s1] sm:$0xff]   ;;  %v879_v14 = vld [vmem:[%s1193_s3 + $0x30] sm:$0xff]   ;;  %v881_v16 = vld [vmem:[%s1193_s3 + $0x38] sm:$0xff]  }
   0x6   :  { %v884_v13 = vld [vmem:[%s1190_s0] sm:$0xff]   ;;  %800 = vmatprep.mubr.bf16.mxu1 %v883_v12  ;;  %v880_v15 = vld [vmem:[%s1192_s2 + $0x30] sm:$0xff]   ;;  %v882_v17 = vld [vmem:[%s1192_s2 + $0x38] sm:$0xff]  }
   0x7   :  { %787 = vmatpush3.bf16.msra.mxu1 %v869_v2  ;;  %832 = vmatprep.mubr.bf16.mxu0 %v884_v13  ;;  %v885_v18 = vld [vmem:[%s1191_s1 + $0x8] sm:$0xff]   ;;  %v887_v20 = vld [vmem:[%s1191_s1 + $0x10] sm:$0xff]  }
   0x8   :  { %819 = vmatpush3.bf16.msra.mxu0 %v870_v3  ;;  %788 = vmatprep.subr.bf16.mxu1 %v871_v4  ;;  %v886_v19 = vld [vmem:[%s1190_s0 + $0x8] sm:$0xff]   ;;  %v888_v21 = vld [vmem:[%s1190_s0 + $0x10] sm:$0xff]  }
   0x9   :  { %820 = vmatprep.subr.bf16.mxu0 %v872_v5 }
   0xb   :  { %789 = vmatpush3.bf16.msra.mxu1 %v871_v4 }
   0xc   :  { %821 = vmatpush3.bf16.msra.mxu0 %v872_v5  ;;  %790 = vmatprep.subr.bf16.mxu1 %v873_v6 }
   0xd   :  { %822 = vmatprep.subr.bf16.mxu0 %v874_v7 }
   0xf   :  { %791 = vmatpush3.bf16.msra.mxu1 %v873_v6 }
  0x10   :  { %823 = vmatpush3.bf16.msra.mxu0 %v874_v7  ;;  %792 = vmatprep.subr.bf16.mxu1 %v875_v8 }
  0x11   :  { %824 = vmatprep.subr.bf16.mxu0 %v876_v9 }
  0x13   :  { %793 = vmatpush3.bf16.msra.mxu1 %v875_v8 }
  0x14   :  { %825 = vmatpush3.bf16.msra.mxu0 %v876_v9  ;;  %794 = vmatprep.subr.bf16.mxu1 %v877_v10 }
  0x15   :  { %826 = vmatprep.subr.bf16.mxu0 %v878_v11 }
  0x17   :  { %795 = vmatpush3.bf16.msra.mxu1 %v877_v10 }
  0x18   :  { %827 = vmatpush3.bf16.msra.mxu0 %v878_v11  ;;  %796 = vmatprep.subr.bf16.mxu1 %v879_v14 }
  0x19   :  { %828 = vmatprep.subr.bf16.mxu0 %v880_v15 }
  0x1b   :  { %797 = vmatpush3.bf16.msra.mxu1 %v879_v14 }
  0x1c   :  { %829 = vmatpush3.bf16.msra.mxu0 %v880_v15  ;;  %798 = vmatprep.subr.bf16.mxu1 %v881_v16 }
  0x1d   :  { %830 = vmatprep.subr.bf16.mxu0 %v882_v17 }
  0x1f   :  { %799 = vmatpush3.bf16.msra.mxu1 %v881_v16 }
  0x20   :  { %831 = vmatpush3.bf16.msra.mxu0 %v882_v17 }
  0x21   :  { %13 = vsyncpa [#allocation4], 0  ;;  %v889_v22 = vld [vmem:[%s1191_s1 + $0x18] sm:$0xff]   ;;  %v891_v24 = vld [vmem:[%s1191_s1 + $0x20] sm:$0xff]   ;;  %s923_s27 = smov [#allocation3]  }
  0x22   :  { %801 = vmatmul.mubr.bf16.vlgmr.msra.gmra.mrb[0].mxu1 %v885_v18  ;;  %v890_v23 = vld [vmem:[%s1190_s0 + $0x18] sm:$0xff]   ;;  %v892_v25 = vld [vmem:[%s1190_s0 + $0x20] sm:$0xff]   ;;  %v893_v26 = vld [vmem:[%s1191_s1 + $0x28] sm:$0xff]   ;;  %s706_s28 = sshll.u32 %s923_s27, 4  ;;  %s707_s28 = int_to_ptr.vmem [resolvable:$true] %s706_s28 }
  0x23   :  { %833 = vmatmul.mubr.bf16.vlgmr.msra.gmra.mrb[0].mxu0 %v886_v19  ;;  %804 = vmatprep.mubr.bf16.mxu1 %v887_v20  ;;  %v894_v27 = vld [vmem:[%s1190_s0 + $0x28] sm:$0xff]   ;;  %v895_v28 = vld [vmem:[%s1191_s1 + $0x30] sm:$0xff]   ;;  %v897_v30 = vld [vmem:[%s1191_s1 + $0x38] sm:$0xff]   ;;  %p904_p1 = scmp.lt.s32.totalorder %s707_s28, %s707_s28 }
  0x24   :  { %836 = vmatprep.mubr.bf16.mxu0 %v888_v21  ;;  %v896_v29 = vld [vmem:[%s1190_s0 + $0x30] sm:$0xff]   ;;  %v898_v31 = vld [vmem:[%s1190_s0 + $0x38] sm:$0xff]   ;;  %v1070_v34 = vld [vmem:[%s1194_s4] ss:$0 sm:$0xff] }
  0x25   :  { %v609_v45 = vld [vmem:[%s1195_s5 + $0x10] sm:$0xff]  ;;  %v607_v49 = vld [vmem:[%s1195_s5] sm:$0xff]  ;;  %v610_v53 = vld [vmem:[%s1195_s5 + $0x18] sm:$0xff] }
  0x26   :  { %v1084_v51 = vld [vmem:[%s1196_s6] ss:$0 sm:$0xff]  ;;  %v608_v57 = vld [vmem:[%s1195_s5 + $0x8] sm:$0xff]  ;;  %v613_v17 = vld [vmem:[%s1195_s5 + $0x30] sm:$0xff] }
  0x27   :  { %v1096_v59 = vld [vmem:[%s1197_s7] ss:$0 sm:$0xff] }
  0x2a   :  { %805 = vmatmul.mubr.bf16.gmra.mrb[4].mxu1 %v889_v22  ;;  %v611_v22 = vld [vmem:[%s1195_s5 + $0x20] sm:$0xff] }
  0x2b   :  { %837 = vmatmul.mubr.bf16.gmra.mrb[4].mxu0 %v890_v23  ;;  %808 = vmatprep.mubr.bf16.mxu1 %v891_v24 }
  0x2c   :  { %840 = vmatprep.mubr.bf16.mxu0 %v892_v25 }
  0x32   :  { %809 = vmatmul.mubr.bf16.gmra.mrb[8].mxu1 %v893_v26  ;;  %v614_v26 = vld [vmem:[%s1195_s5 + $0x38] sm:$0xff] }
  0x33   :  { %841 = vmatmul.mubr.bf16.gmra.mrb[8].mxu0 %v894_v27  ;;  %812 = vmatprep.mubr.bf16.mxu1 %v895_v28 }
  0x34   :  { %844 = vmatprep.mubr.bf16.mxu0 %v896_v29 }
  0x3a   :  { %813 = vmatmul.mubr.bf16.gmra.mrb[12].mxu1 %v897_v30  ;;  %v612_v30 = vld [vmem:[%s1195_s5 + $0x28] sm:$0xff] }
  0x3b   :  { %845 = vmatmul.mubr.bf16.gmra.mrb[12].mxu0 %v898_v31 }
  0xf5   :  { %v802_v32 = vpop.f32.mrb[0].mxu1 }
  0xf6   :  { %v834_v33 = vpop.f32.mrb[0].mxu0  ;;  %v261_v35 = vpop.f32.mrb[1].mxu1 }
  0xf7   :  { %v463_v36 = vadd.f32 %v834_v33, %v802_v32  ;;  %v454_v37 = vpop.f32.mrb[1].mxu0  ;;  %v803_v38 = vpop.f32.mrb[2].mxu1 }
  0xf8   :  { %v455_v39 = vadd.f32 %v454_v37, %v261_v35  ;;  %v835_v40 = vpop.f32.mrb[2].mxu0  ;;  %v264_v41 = vpop.f32.mrb[3].mxu1 }
  0xf9   :  { %v577_v42 = vadd.f32 %v1070_v34, %v463_v36  ;;  %v466_v43 = vadd.f32 %v835_v40, %v803_v38  ;;  %v457_v44 = vpop.f32.mrb[3].mxu0 }
  0xfa   :  { %v575_v46 = vadd.f32 %v1070_v34, %v455_v39  ;;  %v458_v47 = vadd.f32 %v457_v44, %v264_v41 }
  0xfb   :  { %v593_v48 = vmax.f32 %v577_v42, 0.0  ;;  %v578_v50 = vadd.f32 %v1070_v34, %v466_v43 }
  0xfc   :  { %v591_v52 = vmax.f32 %v575_v46, 0.0  ;;  %v576_v54 = vadd.f32 %v1070_v34, %v458_v47 }
  0xfd   :  { %v625_v55 = vadd.f32 %v609_v45, %v593_v48  ;;  %v594_v56 = vmax.f32 %v578_v50, 0.0  ;;  %v806_v58 = vpop.f32.mrb[4].mxu1 }
  0xfe   :  { %v623_v60 = vadd.f32 %v607_v49, %v591_v52  ;;  %v592_v61 = vmax.f32 %v576_v54, 0.0  ;;  %v838_v62 = vpop.f32.mrb[4].mxu0  ;;  %v277_v63 = vpop.f32.mrb[5].mxu1 }
  0xff   :  { %v648_v0 = vmul.f32 %v1084_v51, %v625_v55  ;;  %v626_v1 = vadd.f32 %v610_v53, %v594_v56  ;;  %v479_v2 = vadd.f32 %v838_v62, %v806_v58  ;;  %v470_v3 = vpop.f32.mrb[5].mxu0  ;;  %v807_v4 = vpop.f32.mrb[6].mxu1  ;;  %v617_v55 = vld [vmem:[%s1195_s5 + $0x50] sm:$0xff] }
 0x100   :  { %v646_v5 = vmul.f32 %v1084_v51, %v623_v60  ;;  %v624_v6 = vadd.f32 %v608_v57, %v592_v61  ;;  %v471_v7 = vadd.f32 %v470_v3, %v277_v63  ;;  %v839_v8 = vpop.f32.mrb[6].mxu0  ;;  %v280_v9 = vpop.f32.mrb[7].mxu1  ;;  %v615_v61 = vld [vmem:[%s1195_s5 + $0x40] sm:$0xff] }
 0x101   :  { %v671_v10 = vadd.f32 %v1096_v59, %v648_v0  ;;  %v649_v11 = vmul.f32 %v1084_v51, %v626_v1  ;;  %v581_v12 = vadd.f32 %v1070_v34, %v479_v2  ;;  %v482_v13 = vadd.f32 %v839_v8, %v807_v4  ;;  %v473_v14 = vpop.f32.mrb[7].mxu0  ;;  %v618_v1 = vld [vmem:[%s1195_s5 + $0x58] sm:$0xff] }
 0x102   :  { %v669_v15 = vadd.f32 %v1096_v59, %v646_v5  ;;  %v647_v16 = vmul.f32 %v1084_v51, %v624_v6  ;;  %v579_v18 = vadd.f32 %v1070_v34, %v471_v7  ;;  %v474_v19 = vadd.f32 %v473_v14, %v280_v9  ;;  %v616_v5 = vld [vmem:[%s1195_s5 + $0x48] sm:$0xff] }
 0x103   :  { %687 = vst [vmem:[#allocation3 + $0x10] sm:$0xff] %v671_v10  ;;  %v672_v20 = vadd.f32 %v1096_v59, %v649_v11  ;;  %v597_v21 = vmax.f32 %v581_v12, 0.0  ;;  %v582_v23 = vadd.f32 %v1070_v34, %v482_v13 }
 0x104   :  { %685 = vst [vmem:[#allocation3] sm:$0xff] %v669_v15  ;;  %v670_v24 = vadd.f32 %v1096_v59, %v647_v16  ;;  %v595_v25 = vmax.f32 %v579_v18, 0.0  ;;  %v580_v27 = vadd.f32 %v1070_v34, %v474_v19 }
 0x105   :  { %688 = vst [vmem:[#allocation3 + $0x18] sm:$0xff] %v672_v20  ;;  %v629_v28 = vadd.f32 %v613_v17, %v597_v21  ;;  %v598_v29 = vmax.f32 %v582_v23, 0.0  ;;  %v810_v31 = vpop.f32.mrb[8].mxu1 }
 0x106   :  { %686 = vst [vmem:[#allocation3 + $0x8] sm:$0xff] %v670_v24  ;;  %v627_v32 = vadd.f32 %v611_v22, %v595_v25  ;;  %v596_v33 = vmax.f32 %v580_v27, 0.0  ;;  %v842_v35 = vpop.f32.mrb[8].mxu0  ;;  %v293_v36 = vpop.f32.mrb[9].mxu1 }
 0x107   :  { %v652_v37 = vmul.f32 %v1084_v51, %v629_v28  ;;  %v630_v38 = vadd.f32 %v614_v26, %v598_v29  ;;  %v495_v39 = vadd.f32 %v842_v35, %v810_v31  ;;  %v486_v40 = vpop.f32.mrb[9].mxu0  ;;  %v811_v41 = vpop.f32.mrb[10].mxu1  ;;  %v621_v28 = vld [vmem:[%s1195_s5 + $0x70] sm:$0xff] }
 0x108   :  { %v650_v42 = vmul.f32 %v1084_v51, %v627_v32  ;;  %v628_v43 = vadd.f32 %v612_v30, %v596_v33  ;;  %v487_v44 = vadd.f32 %v486_v40, %v293_v36  ;;  %v843_v45 = vpop.f32.mrb[10].mxu0  ;;  %v296_v46 = vpop.f32.mrb[11].mxu1  ;;  %v619_v33 = vld [vmem:[%s1195_s5 + $0x60] sm:$0xff] }
 0x109   :  { %v675_v47 = vadd.f32 %v1096_v59, %v652_v37  ;;  %v653_v48 = vmul.f32 %v1084_v51, %v630_v38  ;;  %v585_v49 = vadd.f32 %v1070_v34, %v495_v39  ;;  %v498_v50 = vadd.f32 %v843_v45, %v811_v41  ;;  %v489_v52 = vpop.f32.mrb[11].mxu0  ;;  %v622_v38 = vld [vmem:[%s1195_s5 + $0x78] sm:$0xff] }
 0x10a   :  { %v673_v53 = vadd.f32 %v1096_v59, %v650_v42  ;;  %v651_v54 = vmul.f32 %v1084_v51, %v628_v43  ;;  %v583_v56 = vadd.f32 %v1070_v34, %v487_v44  ;;  %v490_v57 = vadd.f32 %v489_v52, %v296_v46  ;;  %v620_v42 = vld [vmem:[%s1195_s5 + $0x68] sm:$0xff]  ;;  %s899_s5 = scalar_lea.vmem %s707_s28, 2048 }
 0x10b   :  { %691 = vst [vmem:[#allocation3 + $0x30] sm:$0xff] %v675_v47  ;;  %v676_v58 = vadd.f32 %v1096_v59, %v653_v48  ;;  %v601_v60 = vmax.f32 %v585_v49, 0.0  ;;  %v586_v62 = vadd.f32 %v1070_v34, %v498_v50  ;;  %p900_p0 = scmp.ne.s32.totalorder %s707_s28, %s899_s5  ;;  %p905_p2 = scmp.lt.s32.totalorder %s899_s5, %s899_s5 }
 0x10c   :  { %689 = vst [vmem:[#allocation3 + $0x20] sm:$0xff] %v673_v53  ;;  %v674_v63 = vadd.f32 %v1096_v59, %v651_v54  ;;  %v599_v0 = vmax.f32 %v583_v56, 0.0  ;;  %v584_v2 = vadd.f32 %v1070_v34, %v490_v57 }
 0x10d   :  { %692 = vst [vmem:[#allocation3 + $0x38] sm:$0xff] %v676_v58  ;;  %v633_v3 = vadd.f32 %v617_v55, %v601_v60  ;;  %v602_v4 = vmax.f32 %v586_v62, 0.0  ;;  %v814_v6 = vpop.f32.mrb[12].mxu1  ;;  %p906_p3 = por %p905_p2, %p904_p1 }
 0x10e   :  { %690 = vst [vmem:[#allocation3 + $0x28] sm:$0xff] %v674_v63  ;;  %v631_v7 = vadd.f32 %v615_v61, %v599_v0  ;;  %v600_v8 = vmax.f32 %v584_v2, 0.0  ;;  %v846_v9 = vpop.f32.mrb[12].mxu0  ;;  %v309_v10 = vpop.f32.mrb[13].mxu1 }
 0x10f   :  { %v656_v11 = vmul.f32 %v1084_v51, %v633_v3  ;;  %v634_v12 = vadd.f32 %v618_v1, %v602_v4  ;;  %v511_v13 = vadd.f32 %v846_v9, %v814_v6  ;;  %v502_v14 = vpop.f32.mrb[13].mxu0  ;;  %v815_v15 = vpop.f32.mrb[14].mxu1  ;;  %p907_p4 = pnand %p906_p3, %p900_p0 }
 0x110   :  { %v654_v16 = vmul.f32 %v1084_v51, %v631_v7  ;;  %v632_v17 = vadd.f32 %v616_v5, %v600_v8  ;;  %v503_v18 = vadd.f32 %v502_v14, %v309_v10  ;;  %v847_v19 = vpop.f32.mrb[14].mxu0  ;;  %v312_v20 = vpop.f32.mrb[15].mxu1 }
 0x111   :  { %v679_v21 = vadd.f32 %v1096_v59, %v656_v11  ;;  %v657_v22 = vmul.f32 %v1084_v51, %v634_v12  ;;  %v589_v23 = vadd.f32 %v1070_v34, %v511_v13  ;;  %v514_v24 = vadd.f32 %v847_v19, %v815_v15  ;;  %v505_v25 = vpop.f32.mrb[15].mxu0 }
 0x112   :  { %v677_v26 = vadd.f32 %v1096_v59, %v654_v16  ;;  %v655_v27 = vmul.f32 %v1084_v51, %v632_v17  ;;  %v587_v29 = vadd.f32 %v1070_v34, %v503_v18  ;;  %v506_v30 = vadd.f32 %v505_v25, %v312_v20 }
 0x113   :  { %695 = vst [vmem:[#allocation3 + $0x50] sm:$0xff] %v679_v21  ;;  %v680_v31 = vadd.f32 %v1096_v59, %v657_v22  ;;  %v605_v32 = vmax.f32 %v589_v23, 0.0  ;;  %v590_v35 = vadd.f32 %v1070_v34, %v514_v24 }
 0x114   :  { %693 = vst [vmem:[#allocation3 + $0x40] sm:$0xff] %v677_v26  ;;  %v678_v36 = vadd.f32 %v1096_v59, %v655_v27  ;;  %v603_v37 = vmax.f32 %v587_v29, 0.0  ;;  %v588_v39 = vadd.f32 %v1070_v34, %v506_v30 }
 0x115   :  { %696 = vst [vmem:[#allocation3 + $0x58] sm:$0xff] %v680_v31  ;;  %v637_v40 = vadd.f32 %v621_v28, %v605_v32  ;;  %v606_v41 = vmax.f32 %v590_v35, 0.0 }
 0x116   :  { %694 = vst [vmem:[#allocation3 + $0x48] sm:$0xff] %v678_v36  ;;  %v635_v43 = vadd.f32 %v619_v33, %v603_v37  ;;  %v604_v44 = vmax.f32 %v588_v39, 0.0 }
 0x117   :  { %v660_v45 = vmul.f32 %v1084_v51, %v637_v40  ;;  %v638_v46 = vadd.f32 %v622_v38, %v606_v41 }
 0x118   :  { %v658_v47 = vmul.f32 %v1084_v51, %v635_v43  ;;  %v636_v48 = vadd.f32 %v620_v42, %v604_v44 }
 0x119   :  { %v683_v34 = vadd.f32 %v1096_v59, %v660_v45  ;;  %v661_v49 = vmul.f32 %v1084_v51, %v638_v46 }
 0x11a   :  { %v681_v50 = vadd.f32 %v1096_v59, %v658_v47  ;;  %v659_v52 = vmul.f32 %v1084_v51, %v636_v48 }
 0x11b   :  { %699 = vst [vmem:[#allocation3 + $0x70] sm:$0xff] %v683_v34  ;;  %v684_v53 = vadd.f32 %v1096_v59, %v661_v49 }
 0x11c   :  { %697 = vst [vmem:[#allocation3 + $0x60] sm:$0xff] %v681_v50  ;;  %v682_v54 = vadd.f32 %v1096_v59, %v659_v52 }
 0x11d   :  { %700 = vst [vmem:[#allocation3 + $0x78] sm:$0xff] %v684_v53 }
 0x11e   :  { %698 = vst [vmem:[#allocation3 + $0x68] sm:$0xff] %v682_v54 }
 0x11f   :  { %910 = shalt.err (!%p907_p4)
}
 0x120   :  { %s911_s9 = scalar_lea.hbm %s1198_s8, 2048 }
 0x121   :  { %p912_p5 = scmp.ne.s32.totalorder %s1198_s8, %s911_s9  ;;  %p915_p6 = scmp.lt.u32.totalorder %s911_s9, %s1198_s8 }
 0x123   :  { %p917_p7 = pnand %p915_p6, %p912_p5 }
 0x125   :  { %920 = shalt.err (!%p917_p7)
}
 0x126   :  { %s924_s12 = smov 128   ;;  %s925_s13 = smov 8  }
 0x127   :  { %712 = dma.vmem_to_hbm [thread:$0]  %s707_s28, 2048, %s1198_s8, [#allocation4], %s924_s12, %s924_s12, %s925_s13  }
 0x128   :  { %921 = dma.done.wait [#allocation4], 2048  }
 0x129   :  { %922 = vsyncadd [#allocation4], 4294965248 }
 0x12a   :  { %716 = vsyncpa [#allocation4], 1 }

// kernel: moa_forward.2
= control target key start
LH: loop header
LB: loop body
LE: loop exit
PB: predicated region body
PF: predicated region fallthrough
CT: control target
= control target key end

     0   :  { %s6611_s24 = smov 0   ;;  %s10858_s0 = inlined_call_operand.vmem [shape: bf16[2,8,8,128], index: 0, kind: input, shape index: {}]   ;;  %s10859_s1 = inlined_call_operand.vmem [shape: f32[2,8,8,128], index: 1, kind: input, shape index: {}]   ;;  %s10860_s2 = inlined_call_operand.vmem [shape: bf16[128,128], index: 2, kind: input, shape index: {}]   ;;  %s10861_s3 = inlined_call_operand.vmem [shape: f32[1,128], index: 3, kind: input, shape index: {}]   ;;  %s10862_s4 = inlined_call_operand.vmem [shape: bf16[128,128], index: 4, kind: input, shape index: {}]   ;;  %s10863_s5 = inlined_call_operand.vmem [shape: f32[1,128], index: 5, kind: input, shape index: {}]   ;;  %s10864_s6 = inlined_call_operand.vmem [shape: bf16[2,8,8,128], index: 6, kind: output, shape index: {0}]   ;;  %s10865_s7 = inlined_call_operand.vmem [shape: bf16[2,8,8,128], index: 7, kind: output, shape index: {1}]  }
   0x1 LB: > { %s5841_s25 = sadd.s32 4294967295, %s6470_s24   ;;  %p5845_p0 = scmp.ge.s32.totalorder %s6470_s24, 1  ;;  %s6470_s24 = sphi %s6611_s24, %s18_s24  }
   0x2   : > { %p250_p1 = scmp.lt.s32.totalorder %s6470_s24, 3 }
   0x4   : > { %p251_p2 = pnand %p5845_p0, %p250_p1 }
   0x6   : > { %254 = sbr.rel (%p251_p2) target bundleno = 2465 (0x9a1), region = 44 }
   0xd   : > { %v6400_v0 = vld [vmem:[%s10862_s4] sm:$0xff]   ;;  %p292_p3 = scmp.lt.s32.totalorder %s5841_s25, 1  ;;  %v6401_v1 = vld [vmem:[%s10862_s4 + $0x8] sm:$0xff]   ;;  %v6402_v2 = vld [vmem:[%s10862_s4 + $0x10] sm:$0xff]   ;;  %s6473_s27 = smov 126  }
   0xe   : > { %5976 = vmatprep.subr.bf16.mxu1 %v6400_v0  ;;  %v6403_v3 = vld [vmem:[%s10862_s4 + $0x18] sm:$0xff]   ;;  %v6404_v5 = vld [vmem:[%s10862_s4 + $0x20] sm:$0xff]   ;;  %v6405_v6 = vld [vmem:[%s10862_s4 + $0x28] sm:$0xff]   ;;  %s6474_s28 = smov 125   ;;  %s6475_s29 = smov 124  }
   0xf   : > { %s12655_s25 = smov (!%p292_p3, %s5841_s25), 1  ;;  %5977 = vmatpush3.bf16.msra.mxu1 %v6400_v0  ;;  %v6406_v7 = vld [vmem:[%s10862_s4 + $0x30] sm:$0xff]   ;;  %v6407_v8 = vld [vmem:[%s10862_s4 + $0x38] sm:$0xff]   ;;  %v5863_v12 = vld [vmem:[%s10863_s5] ss:$0 sm:$0xff]  ;;  %s6476_s30 = smov 123  }
  0x10   : > { %5978 = vmatprep.subr.bf16.mxu1 %v6401_v1  ;;  %s6631_s9 = sshll.u32 %s12655_s25, 5  ;;  %v6412_v29 = vld [vmem:[%s10860_s2] sm:$0xff]   ;;  %v6413_v30 = vld [vmem:[%s10860_s2 + $0x8] sm:$0xff]   ;;  %v6414_v31 = vld [vmem:[%s10860_s2 + $0x10] sm:$0xff]   ;;  %s5879_s21 = sshll.u32 %s12655_s25, 6 }
  0x11   : > { %s296_s12 = scalar_lea.vmem %s10858_s0, %s6631_s9  ;;  %5952 = vmatprep.subr.bf16.mxu0 %v6412_v29  ;;  %v6415_v32 = vld [vmem:[%s10860_s2 + $0x18] sm:$0xff]   ;;  %v6416_v33 = vld [vmem:[%s10860_s2 + $0x20] sm:$0xff]   ;;  %v6417_v34 = vld [vmem:[%s10860_s2 + $0x28] sm:$0xff]   ;;  %s6701_s26 = scalar_lea.vmem %s10859_s1, %s5879_s21 }
  0x12   : > { %v6408_v4 = vld [vmem:[%s296_s12] sm:$0xff]   ;;  %v6409_v9 = vld [vmem:[%s296_s12 + $0x8] sm:$0xff]   ;;  %v6410_v10 = vld [vmem:[%s296_s12 + $0x10] sm:$0xff]   ;;  %5953 = vmatpush3.bf16.msra.mxu0 %v6412_v29  ;;  %s6472_s25 = smov 127   ;;  %s6477_s8 = smov 122  }
  0x13   : > { %5979 = vmatpush3.bf16.msra.mxu1 %v6401_v1  ;;  %5992 = vmatprep.mubr.bf16.mxu1 %v6408_v4  ;;  %v6411_v11 = vld [vmem:[%s296_s12 + $0x18] sm:$0xff]   ;;  %v6418_v35 = vld [vmem:[%s10860_s2 + $0x30] sm:$0xff]   ;;  %v6704_v37 = vld [vmem:[%s6701_s26] sm:$0xff]  ;;  %s6478_s10 = smov 121   ;;  %s6479_s11 = smov 120  }
  0x14   : > { %5980 = vmatprep.subr.bf16.mxu1 %v6402_v2  ;;  %5954 = vmatprep.subr.bf16.mxu0 %v6413_v30  ;;  %v6419_v36 = vld [vmem:[%s10860_s2 + $0x38] sm:$0xff]   ;;  %v6707_v38 = vld [vmem:[%s6701_s26 + $0x8] sm:$0xff]  ;;  %v6712_v40 = vld [vmem:[%s6701_s26 + $0x10] sm:$0xff]  ;;  %s6481_s12 = smov 2   ;;  %s6482_s13 = smov 1  }
  0x15   : > { %v321_v39 = vpack.c.bf16 %v6707_v38, %v6704_v37  ;;  %v6715_v41 = vld [vmem:[%s6701_s26 + $0x18] sm:$0xff]  ;;  %s6483_s14 = smov 4   ;;  %s6484_s15 = smov 3  }
  0x16   : > { %5955 = vmatpush3.bf16.msra.mxu0 %v6413_v30  ;;  %v322_v42 = vpack.c.bf16 %v6715_v41, %v6712_v40  ;;  %s6485_s16 = smov 6   ;;  %s6486_s17 = smov 5  }
  0x17   : > { %5981 = vmatpush3.bf16.msra.mxu1 %v6402_v2  ;;  %5956 = vmatprep.subr.bf16.mxu0 %v6414_v31  ;;  %v6802_v2 = vld [vmem:[%s6701_s26 + $0x20] sm:$0xff]  ;;  %s6487_s18 = smov 8   ;;  %s6488_s19 = smov 7  }
  0x18   : > { %5982 = vmatprep.subr.bf16.mxu1 %v6403_v3  ;;  %5968 = vmatprep.mubr.bf16.mxu0 %v321_v39  ;;  %11353 = vst [vmem:[#allocation4_spill] sm:$0xff] %v6802_v2 }
  0x1a   : > { %5957 = vmatpush3.bf16.msra.mxu0 %v6414_v31 }
  0x1b   : > { %5983 = vmatpush3.bf16.msra.mxu1 %v6403_v3  ;;  %5958 = vmatprep.subr.bf16.mxu0 %v6415_v32  ;;  %v6805_v3 = vld [vmem:[%s6701_s26 + $0x28] sm:$0xff] }
  0x1c   : > { %5984 = vmatprep.subr.bf16.mxu1 %v6404_v5  ;;  %11354 = vst [vmem:[#allocation5_spill] sm:$0xff] %v6805_v3 }
  0x1e   : > { %5959 = vmatpush3.bf16.msra.mxu0 %v6415_v32 }
  0x1f   : > { %5985 = vmatpush3.bf16.msra.mxu1 %v6404_v5  ;;  %5960 = vmatprep.subr.bf16.mxu0 %v6416_v33  ;;  %v323_v5 = vpack.c.bf16 %v6805_v3, %v6802_v2 }
  0x20   : > { %5986 = vmatprep.subr.bf16.mxu1 %v6405_v6 }
  0x22   : > { %5961 = vmatpush3.bf16.msra.mxu0 %v6416_v33 }
  0x23   : > { %5987 = vmatpush3.bf16.msra.mxu1 %v6405_v6  ;;  %5962 = vmatprep.subr.bf16.mxu0 %v6417_v34  ;;  %v6812_v6 = vld [vmem:[%s6701_s26 + $0x30] sm:$0xff] }
  0x24   : > { %5988 = vmatprep.subr.bf16.mxu1 %v6406_v7  ;;  %11356 = vst [vmem:[#allocation7_spill] sm:$0xff] %v6812_v6 }
  0x26   : > { %5963 = vmatpush3.bf16.msra.mxu0 %v6417_v34 }
  0x27   : > { %5989 = vmatpush3.bf16.msra.mxu1 %v6406_v7  ;;  %5964 = vmatprep.subr.bf16.mxu0 %v6418_v35  ;;  %v6815_v7 = vld [vmem:[%s6701_s26 + $0x38] sm:$0xff]  ;;  %s10800_s26 = scalar_lea.vmem %s10864_s6, %s6631_s9 }
  0x28   : > { %5990 = vmatprep.subr.bf16.mxu1 %v6407_v8 }
  0x2a   : > { %5965 = vmatpush3.bf16.msra.mxu0 %v6418_v35 }
  0x2b   : > { %5991 = vmatpush3.bf16.msra.mxu1 %v6407_v8  ;;  %5966 = vmatprep.subr.bf16.mxu0 %v6419_v36  ;;  %v324_v8 = vpack.c.bf16 %v6815_v7, %v6812_v6  ;;  %v10915_v6 = vmov 8  }
  0x2e   : > { %5993 = vmatmul.mubr.bf16.vlgmr.msra.gmra.mrb[0].mxu1 %v6409_v9  ;;  %5967 = vmatpush3.bf16.msra.mxu0 %v6419_v36 }
  0x2f   : > { %5996 = vmatprep.mubr.bf16.mxu1 %v6410_v10  ;;  %v10867_v10 = vmov 0  }
  0x30   : > { %6107 = vset.pattern.permute.xlu1 %v10867_v10  ;;  %6110 = vset.pattern.permute.xlu0 %v10867_v10 }
  0x31   : > { %5969 = vmatmul.mubr.bf16.vlgmr.msra.gmra.mrb[0].mxu0 %v322_v42 }
  0x32   : > { %5972 = vmatprep.mubr.bf16.mxu0 %v323_v5 }
  0x36   : > { %5997 = vmatmul.mubr.bf16.gmra.mrb[4].mxu1 %v6411_v11 }
  0x39   : > { %5973 = vmatmul.mubr.bf16.gmra.mrb[4].mxu0 %v324_v8 }
 0x101   : > { %v5994_v13 = vpop.f32.mrb[0].mxu1 }
 0x102   : > { %v636_v14 = vadd.f32 %v5994_v13, %v5863_v12  ;;  %v627_v15 = vpop.f32.mrb[1].mxu1 }
 0x103   : > { %v6655_v16 = vadd.f32 %v5863_v12, %v627_v15  ;;  %v5995_v17 = vpop.f32.mrb[2].mxu1 }
 0x104   : > { %662 = vmax.xlane.f32.xlu1 %v636_v14  ;;  %v630_v18 = vpop.f32.mrb[3].mxu1  ;;  %v639_v19 = vadd.f32 %v5995_v17, %v5863_v12 }
 0x105   : > { %658 = vmax.xlane.f32.xlu0 %v6655_v16  ;;  %v6658_v20 = vadd.f32 %v5863_v12, %v630_v18 }
 0x108   : > { %664 = vmax.xlane.f32.xlu1 %v639_v19 }
 0x109   : > { %v5998_v21 = vpop.f32.mrb[4].mxu1  ;;  %660 = vmax.xlane.f32.xlu0 %v6658_v20 }
 0x10a   : > { %v6661_v22 = vadd.f32 %v5998_v21, %v5863_v12  ;;  %v643_v23 = vpop.f32.mrb[5].mxu1 }
 0x10b   : > { %v5999_v24 = vpop.f32.mrb[6].mxu1  ;;  %v6665_v27 = vadd.f32 %v5863_v12, %v643_v23 }
 0x10c   : > { %v6663_v25 = vadd.f32 %v5999_v24, %v5863_v12  ;;  %v646_v26 = vpop.f32.mrb[7].mxu1 }
 0x10d   : > { %670 = vmax.xlane.f32.xlu0 %v6661_v22  ;;  %v6669_v28 = vadd.f32 %v5863_v12, %v646_v26 }
 0x10e   : > { %672 = vmax.xlane.f32.xlu1 %v6663_v25 }
 0x111   : > { %666 = vmax.xlane.f32.xlu0 %v6665_v27 }
 0x112   : > { %668 = vmax.xlane.f32.xlu1 %v6669_v28 }
 0x191   : > { %v663_v43 = vpop.xlane.xlu1 %662 }
 0x192   : > { %v676_v44 = vsub.f32 %v636_v14, %v663_v43  ;;  %v659_v51 = vpop.xlane.xlu0 %658 }
 0x193   : > { %v674_v52 = vsub.f32 %v6655_v16, %v659_v51 }
 0x194   : > { %v686_v45 = vmul.f32 1.442695, %v676_v44 }
 0x195   : > { %v665_v46 = vpop.xlane.xlu1 %664  ;;  %v682_v53 = vmul.f32 1.442695, %v674_v52 }
 0x196   : > { %6420 = vpow2.f32 %v686_v45  ;;  %v677_v47 = vsub.f32 %v639_v19, %v665_v46  ;;  %v661_v54 = vpop.xlane.xlu0 %660 }
 0x197   : > { %v675_v55 = vsub.f32 %v6658_v20, %v661_v54 }
 0x198   : > { %v688_v48 = vmul.f32 1.442695, %v677_v47 }
 0x199   : > { %v684_v56 = vmul.f32 1.442695, %v675_v55 }
 0x19a   : > { %6422 = vpow2.f32 %v688_v48  ;;  %v671_v59 = vpop.xlane.xlu0 %670 }
 0x19b   : > { %6424 = vpow2.f32 %v682_v53  ;;  %v680_v60 = vsub.f32 %v6661_v22, %v671_v59  ;;  %v673_v62 = vpop.xlane.xlu1 %672 }
 0x19c   : > { %6426 = vpow2.f32 %v684_v56  ;;  %v681_v63 = vsub.f32 %v6663_v25, %v673_v62 }
 0x19d   : > { %v694_v61 = vmul.f32 1.442695, %v680_v60 }
 0x19e   : > { %v696_v0 = vmul.f32 1.442695, %v681_v63  ;;  %v667_v9 = vpop.xlane.xlu0 %666 }
 0x19f   : > { %6428 = vpow2.f32 %v694_v61  ;;  %v678_v11 = vsub.f32 %v6665_v27, %v667_v9  ;;  %v669_v13 = vpop.xlane.xlu1 %668 }
 0x1a0   : > { %v6719_v49 = vpop.eup %6420  ;;  %6430 = vpow2.f32 %v696_v0  ;;  %v679_v14 = vsub.f32 %v6669_v28, %v669_v13 }
 0x1a1   : > { %803 = vrot.lane.b32.xlu1 %v6719_v49, %s6472_s25  ;;  %835 = vrot.lane.b32.xlu0 %v6719_v49, %s6473_s27  ;;  %v690_v12 = vmul.f32 1.442695, %v678_v11 }
 0x1a2   : > { %v692_v15 = vmul.f32 1.442695, %v679_v14 }
 0x1a3   : > { %6432 = vpow2.f32 %v690_v12 }
 0x1a4   : > { %v6725_v50 = vpop.eup %6422  ;;  %6434 = vpow2.f32 %v692_v15 }
 0x1a5   : > { %805 = vrot.lane.b32.xlu1 %v6725_v50, %s6472_s25  ;;  %867 = vrot.lane.b32.xlu0 %v6719_v49, %s6474_s28  ;;  %v6753_v57 = vpop.eup %6424 }
 0x1a6   : > { %v6763_v58 = vpop.eup %6426 }
 0x1a9   : > { %837 = vrot.lane.b32.xlu1 %v6725_v50, %s6473_s27  ;;  %899 = vrot.lane.b32.xlu0 %v6719_v49, %s6475_s29  ;;  %v6791_v1 = vpop.eup %6428 }
 0x1aa   : > { %v6807_v4 = vpop.eup %6430 }
 0x1ab   : > { %11355 = vst [vmem:[#allocation6_spill] sm:$0xff] %v6807_v4 }
 0x1ad   : > { %869 = vrot.lane.b32.xlu1 %v6725_v50, %s6474_s28  ;;  %931 = vrot.lane.b32.xlu0 %v6719_v49, %s6476_s30  ;;  %v6847_v16 = vpop.eup %6432 }
 0x1ae   : > { %11357 = vst [vmem:[#allocation8_spill] sm:$0xff] %v6847_v16  ;;  %v6857_v17 = vpop.eup %6434 }
 0x1af   : > { %11358 = vst [vmem:[#allocation9_spill] sm:$0xff] %v6857_v17 }
 0x1b1   : > { %901 = vrot.lane.b32.xlu1 %v6725_v50, %s6475_s29  ;;  %963 = vrot.lane.b32.xlu0 %v6719_v49, %s6477_s8 }
 0x1b5   : > { %933 = vrot.lane.b32.xlu1 %v6725_v50, %s6476_s30  ;;  %995 = vrot.lane.b32.xlu0 %v6719_v49, %s6478_s10 }
 0x1b9   : > { %965 = vrot.lane.b32.xlu1 %v6725_v50, %s6477_s8  ;;  %1027 = vrot.lane.b32.xlu0 %v6719_v49, %s6479_s11 }
 0x1bd   : > { %997 = vrot.lane.b32.xlu1 %v6725_v50, %s6478_s10  ;;  %799 = vrot.lane.b32.xlu0 %v6753_v57, %s6472_s25 }
 0x1c1   : > { %1029 = vrot.lane.b32.xlu1 %v6725_v50, %s6479_s11  ;;  %831 = vrot.lane.b32.xlu0 %v6753_v57, %s6473_s27 }
 0x1c5   : > { %863 = vrot.lane.b32.xlu0 %v6753_v57, %s6474_s28  ;;  %801 = vrot.lane.b32.xlu1 %v6763_v58, %s6472_s25 }
 0x1c9   : > { %895 = vrot.lane.b32.xlu0 %v6753_v57, %s6475_s29  ;;  %833 = vrot.lane.b32.xlu1 %v6763_v58, %s6473_s27 }
 0x1cd   : > { %927 = vrot.lane.b32.xlu0 %v6753_v57, %s6476_s30  ;;  %865 = vrot.lane.b32.xlu1 %v6763_v58, %s6474_s28 }
 0x1d1   : > { %959 = vrot.lane.b32.xlu0 %v6753_v57, %s6477_s8  ;;  %897 = vrot.lane.b32.xlu1 %v6763_v58, %s6475_s29 }
 0x1d5   : > { %991 = vrot.lane.b32.xlu0 %v6753_v57, %s6478_s10  ;;  %929 = vrot.lane.b32.xlu1 %v6763_v58, %s6476_s30 }
 0x1d9   : > { %1023 = vrot.lane.b32.xlu0 %v6753_v57, %s6479_s11  ;;  %961 = vrot.lane.b32.xlu1 %v6763_v58, %s6477_s8 }
 0x1dd   : > { %993 = vrot.lane.b32.xlu1 %v6763_v58, %s6478_s10  ;;  %811 = vrot.lane.b32.xlu0 %v6791_v1, %s6472_s25 }
 0x1e1   : > { %1025 = vrot.lane.b32.xlu1 %v6763_v58, %s6479_s11  ;;  %843 = vrot.lane.b32.xlu0 %v6791_v1, %s6473_s27 }
 0x1e5   : > { %813 = vrot.lane.b32.xlu1 %v6807_v4, %s6472_s25  ;;  %875 = vrot.lane.b32.xlu0 %v6791_v1, %s6474_s28 }
 0x1e9   : > { %845 = vrot.lane.b32.xlu1 %v6807_v4, %s6473_s27  ;;  %907 = vrot.lane.b32.xlu0 %v6791_v1, %s6475_s29 }
 0x1ed   : > { %877 = vrot.lane.b32.xlu1 %v6807_v4, %s6474_s28  ;;  %939 = vrot.lane.b32.xlu0 %v6791_v1, %s6476_s30 }
 0x1f1   : > { %909 = vrot.lane.b32.xlu1 %v6807_v4, %s6475_s29  ;;  %971 = vrot.lane.b32.xlu0 %v6791_v1, %s6477_s8 }
 0x1f5   : > { %941 = vrot.lane.b32.xlu1 %v6807_v4, %s6476_s30  ;;  %1003 = vrot.lane.b32.xlu0 %v6791_v1, %s6478_s10 }
 0x1f9   : > { %973 = vrot.lane.b32.xlu1 %v6807_v4, %s6477_s8  ;;  %1035 = vrot.lane.b32.xlu0 %v6791_v1, %s6479_s11 }
 0x1fd   : > { %1005 = vrot.lane.b32.xlu1 %v6807_v4, %s6478_s10  ;;  %807 = vrot.lane.b32.xlu0 %v6847_v16, %s6472_s25 }
 0x201   : > { %1037 = vrot.lane.b32.xlu1 %v6807_v4, %s6479_s11  ;;  %839 = vrot.lane.b32.xlu0 %v6847_v16, %s6473_s27 }
 0x205   : > { %809 = vrot.lane.b32.xlu1 %v6857_v17, %s6472_s25  ;;  %871 = vrot.lane.b32.xlu0 %v6847_v16, %s6474_s28 }
 0x209   : > { %841 = vrot.lane.b32.xlu1 %v6857_v17, %s6473_s27  ;;  %903 = vrot.lane.b32.xlu0 %v6847_v16, %s6475_s29 }
 0x20d   : > { %873 = vrot.lane.b32.xlu1 %v6857_v17, %s6474_s28  ;;  %935 = vrot.lane.b32.xlu0 %v6847_v16, %s6476_s30  ;;  %s10808_s28 = scalar_lea.vmem %s10865_s7, %s6631_s9 }
 0x211   : > { %905 = vrot.lane.b32.xlu1 %v6857_v17, %s6475_s29  ;;  %967 = vrot.lane.b32.xlu0 %v6847_v16, %s6477_s8 }
 0x213   : > { %v804_v18 = vpop.permute.xlu1 %803  ;;  %v836_v19 = vpop.permute.xlu0 %835 }
 0x214   : > { %v825_v22 = vadd.f32 %v6719_v49, %v804_v18 }
 0x215   : > { %937 = vrot.lane.b32.xlu1 %v6857_v17, %s6476_s30  ;;  %999 = vrot.lane.b32.xlu0 %v6847_v16, %s6478_s10 }
 0x216   : > { %v857_v25 = vadd.f32 %v836_v19, %v825_v22 }
 0x217   : > { %v6879_v20 = vpop.permute.xlu1 %805  ;;  %v868_v21 = vpop.permute.xlu0 %867 }
 0x218   : > { %v889_v28 = vadd.f32 %v868_v21, %v857_v25  ;;  %v826_v14 = vadd.f32 %v6725_v50, %v6879_v20 }
 0x219   : > { %969 = vrot.lane.b32.xlu1 %v6857_v17, %s6477_s8  ;;  %1031 = vrot.lane.b32.xlu0 %v6847_v16, %s6479_s11 }
 0x21b   : > { %v838_v23 = vpop.permute.xlu1 %837  ;;  %v900_v24 = vpop.permute.xlu0 %899 }
 0x21c   : > { %v921_v31 = vadd.f32 %v900_v24, %v889_v28  ;;  %v858_v19 = vadd.f32 %v838_v23, %v826_v14  ;;  %v6489_v23 = vmov 0.0  }
 0x21d   : > { %1001 = vrot.lane.b32.xlu1 %v6857_v17, %s6478_s10  ;;  %467 = vst [vmem:[#allocation2 + $0x30] sm:$0xff] %v6489_v23  ;;  %468 = vst [vmem:[#allocation2 + $0x38] sm:$0x3] %v6489_v23 }
 0x21e   : > { %461 = vst [vmem:[#allocation2] sm:$0xff] %v6489_v23  ;;  %462 = vst [vmem:[#allocation2 + $0x8] sm:$0x3] %v6489_v23 }
 0x21f   : > { %v870_v26 = vpop.permute.xlu1 %869  ;;  %v932_v27 = vpop.permute.xlu0 %931  ;;  %463 = vst [vmem:[#allocation2 + $0x10] sm:$0xff] %v6489_v23  ;;  %464 = vst [vmem:[#allocation2 + $0x18] sm:$0x3] %v6489_v23 }
 0x220   : > { %v953_v32 = vadd.f32 %v932_v27, %v921_v31  ;;  %v890_v22 = vadd.f32 %v870_v26, %v858_v19  ;;  %465 = vst [vmem:[#allocation2 + $0x20] sm:$0xff] %v6489_v23  ;;  %466 = vst [vmem:[#allocation2 + $0x28] sm:$0x3] %v6489_v23 }
 0x221   : > { %1033 = vrot.lane.b32.xlu1 %v6857_v17, %s6479_s11  ;;  %469 = vst [vmem:[#allocation2 + $0x40] sm:$0xff] %v6489_v23  ;;  %470 = vst [vmem:[#allocation2 + $0x48] sm:$0x3] %v6489_v23 }
 0x222   : > { %471 = vst [vmem:[#allocation2 + $0x50] sm:$0xff] %v6489_v23  ;;  %472 = vst [vmem:[#allocation2 + $0x58] sm:$0x3] %v6489_v23 }
 0x223   : > { %v902_v29 = vpop.permute.xlu1 %901  ;;  %v964_v30 = vpop.permute.xlu0 %963  ;;  %473 = vst [vmem:[#allocation2 + $0x60] sm:$0xff] %v6489_v23  ;;  %474 = vst [vmem:[#allocation2 + $0x68] sm:$0x3] %v6489_v23 }
 0x224   : > { %v985_v35 = vadd.f32 %v964_v30, %v953_v32  ;;  %v922_v24 = vadd.f32 %v902_v29, %v890_v22  ;;  %475 = vst [vmem:[#allocation2 + $0x70] sm:$0xff] %v6489_v23  ;;  %476 = vst [vmem:[#allocation2 + $0x78] sm:$0x3] %v6489_v23  ;;  %v10866_v22 = vmov 9  }
 0x225   : > { %477 = vst [vmem:[#allocation2 + $0x80] sm:$0xff] %v6489_v23  ;;  %478 = vst [vmem:[#allocation2 + $0x88] sm:$0x3] %v6489_v23 }
 0x226   : > { %479 = vst [vmem:[#allocation2 + $0x90] sm:$0xff] %v6489_v23  ;;  %480 = vst [vmem:[#allocation2 + $0x98] sm:$0x3] %v6489_v23 }
 0x227   : > { %v934_v33 = vpop.permute.xlu1 %933  ;;  %v996_v34 = vpop.permute.xlu0 %995  ;;  %772 = vst [vmem:[#allocation3 + $0x8] sm:$0x3] %v6489_v23  ;;  %774 = vst [vmem:[#allocation3 + $0x18] sm:$0x3] %v6489_v23 }
 0x228   : > { %v1017_v36 = vadd.f32 %v996_v34, %v985_v35  ;;  %v954_v28 = vadd.f32 %v934_v33, %v922_v24  ;;  %776 = vst [vmem:[#allocation3 + $0x28] sm:$0x3] %v6489_v23  ;;  %778 = vst [vmem:[#allocation3 + $0x38] sm:$0x3] %v6489_v23  ;;  %v5970_v33 = vpop.f32.mrb[0].mxu0 }
 0x229   : > { %780 = vst [vmem:[#allocation3 + $0x48] sm:$0x3] %v6489_v23  ;;  %782 = vst [vmem:[#allocation3 + $0x58] sm:$0x3] %v6489_v23  ;;  %v6947_v35 = vld [vmem:[%s10861_s3] ss:$0 sm:$0xff] }
 0x22a   : > { %784 = vst [vmem:[#allocation3 + $0x68] sm:$0x3] %v6489_v23  ;;  %786 = vst [vmem:[#allocation3 + $0x78] sm:$0x3] %v6489_v23 }
 0x22b   : > { %v966_v39 = vpop.permute.xlu1 %965  ;;  %v1028_v42 = vpop.permute.xlu0 %1027  ;;  %788 = vst [vmem:[#allocation3 + $0x88] sm:$0x3] %v6489_v23  ;;  %790 = vst [vmem:[#allocation3 + $0x98] sm:$0x3] %v6489_v23 }
 0x22c   : > { %v1049_v43 = vadd.f32 %v1028_v42, %v1017_v36  ;;  %v986_v30 = vadd.f32 %v966_v39, %v954_v28  ;;  %v6954_v36 = vadd.f32 %v5970_v33, %v6947_v35  ;;  %v430_v39 = vpop.f32.mrb[1].mxu0 }
 0x22e   : > { %6436 = vrcp.f32 %v1049_v43  ;;  %11359 = vst [vmem:[#allocation10_spill] sm:$0xff] %v6954_v36  ;;  %v6959_v43 = vadd.f32 %v6947_v35, %v430_v39  ;;  %484 = vst [vmem:[#allocation2 + $0x31] sm:$0xff] %v6954_v36  ;;  %v10881_v39 = vmov 18  }
 0x22f   : > { %v998_v44 = vpop.permute.xlu1 %997  ;;  %v800_v45 = vpop.permute.xlu0 %799 }
 0x230   : > { %v823_v55 = vadd.f32 %v6753_v57, %v800_v45  ;;  %v1018_v20 = vadd.f32 %v998_v44, %v986_v30  ;;  %11360 = vst [vmem:[#allocation11_spill] sm:$0xff] %v6959_v43  ;;  %v5971_v44 = vpop.f32.mrb[2].mxu0  ;;  %482 = vst [vmem:[#allocation2 + $0x11] sm:$0xff] %v6959_v43  ;;  %v11407_v43 = vmov 4  }
 0x233   : > { %v6890_v46 = vpop.permute.xlu1 %1029  ;;  %v832_v47 = vpop.permute.xlu0 %831 }
 0x234   : > { %v855_v60 = vadd.f32 %v832_v47, %v823_v55  ;;  %v1050_v26 = vadd.f32 %v6890_v46, %v1018_v20  ;;  %v6965_v46 = vadd.f32 %v5971_v44, %v6947_v35 }
 0x236   : > { %11361 = vst [vmem:[#allocation12_spill] sm:$0xff] %v6965_v46  ;;  %485 = vst [vmem:[#allocation2 + $0x41] sm:$0xff] %v6965_v46 }
 0x237   : > { %v6892_v48 = vpop.permute.xlu1 %801  ;;  %v864_v51 = vpop.permute.xlu0 %863 }
 0x238   : > { %v6894_v52 = vpop.eup %6436  ;;  %v887_v61 = vadd.f32 %v864_v51, %v855_v60  ;;  %v824_v47 = vadd.f32 %v6763_v58, %v6892_v48  ;;  %v433_v51 = vpop.f32.mrb[3].mxu0 }
 0x239   : > { %1227 = vrot.lane.b32.xlu0 %v6894_v52, %s6481_s12  ;;  %1139 = vrot.lane.b32.xlu1 %v6894_v52, %s6482_s13 }
 0x23b   : > { %v6900_v53 = vpop.permute.xlu1 %833  ;;  %v896_v54 = vpop.permute.xlu0 %895 }
 0x23c   : > { %v919_v0 = vadd.f32 %v896_v54, %v887_v61  ;;  %v6976_v54 = vadd.f32 %v6947_v35, %v433_v51  ;;  %v856_v55 = vadd.f32 %v6900_v53, %v824_v47  ;;  %v6994_v53 = vmul.f32 %v6894_v52, %v6719_v49 }
 0x23d   : > { %1403 = vrot.lane.b32.xlu0 %v6894_v52, %s6483_s14  ;;  %1315 = vrot.lane.b32.xlu1 %v6894_v52, %s6484_s15 }
 0x23e   : > { %11362 = vst [vmem:[#allocation13_spill] sm:$0xff] %v6976_v54  ;;  %483 = vst [vmem:[#allocation2 + $0x21] sm:$0xff] %v6976_v54 }
 0x23f   : > { %v6907_v56 = vpop.permute.xlu1 %865  ;;  %v928_v59 = vpop.permute.xlu0 %927  ;;  %11364 = vst [vmem:[#allocation15_spill] sm:$0xff] %v6994_v53 }
 0x240   : > { %v951_v5 = vadd.f32 %v928_v59, %v919_v0  ;;  %v888_v48 = vadd.f32 %v6907_v56, %v856_v55  ;;  %v10869_v0 = vmov -1e+30   ;;  %v6997_v56 = vld [vmem:[#allocation2 + $0x10] sm:$0xff] }
 0x241   : > { %1579 = vrot.lane.b32.xlu0 %v6894_v52, %s6485_s16  ;;  %1491 = vrot.lane.b32.xlu1 %v6894_v52, %s6486_s17  ;;  %11365 = vst [vmem:[#allocation16_spill] sm:$0xff] %v6997_v56 }
 0x243   : > { %v6913_v62 = vpop.permute.xlu1 %897  ;;  %v960_v63 = vpop.permute.xlu0 %959 }
 0x244   : > { %v983_v11 = vadd.f32 %v960_v63, %v951_v5  ;;  %v920_v61 = vadd.f32 %v6913_v62, %v888_v48  ;;  %v6990_v63 = vld [vmem:[#allocation2 + $0x32] sm:$0xff]  ;;  %v7008_v62 = vld [vmem:[#allocation2 + $0x42] sm:$0xff] }
 0x245   : > { %1755 = vrot.lane.b32.xlu0 %v6894_v52, %s6487_s18  ;;  %1667 = vrot.lane.b32.xlu1 %v6894_v52, %s6488_s19  ;;  %11363 = vst [vmem:[#allocation14_spill] sm:$0xff] %v6990_v63  ;;  %5464 = vst [vmem:[#allocation2 + $0x38] sm:$0x3] %v10869_v0  ;;  %v6999_v5 = vld [vmem:[#allocation2 + $0x12] sm:$0xff] }
 0x246   : > { %11366 = vst [vmem:[#allocation17_spill] sm:$0xff] %v6999_v5  ;;  %5459 = vst [vmem:[#allocation2 + $0x10] sm:$0xff] %v10869_v0  ;;  %v7372_v5 = vld [vmem:[#allocation2 + $0x1] sm:$0xff] }
 0x247   : > { %v6919_v8 = vpop.permute.xlu1 %929  ;;  %v992_v9 = vpop.permute.xlu0 %991  ;;  %5460 = vst [vmem:[#allocation2 + $0x18] sm:$0x3] %v10869_v0  ;;  %5466 = vst [vmem:[#allocation2 + $0x48] sm:$0x3] %v10869_v0 }
 0x248   : > { %v1015_v12 = vadd.f32 %v992_v9, %v983_v11  ;;  %v952_v11 = vadd.f32 %v6919_v8, %v920_v61  ;;  %5477 = vst [vmem:[#allocation2 + $0x11] sm:$0xff] %v6704_v37  ;;  %11405 = vst [vmem:[#allocation51_spill] sm:$0xff] %v7372_v5  ;;  %v10934_v5 = vmov 16  }
 0x24b   : > { %v1024_v13 = vpop.permute.xlu0 %1023  ;;  %v6923_v15 = vpop.permute.xlu1 %961 }
 0x24c   : > { %v1047_v18 = vadd.f32 %v1024_v13, %v1015_v12  ;;  %v984_v52 = vadd.f32 %v6923_v15, %v952_v11  ;;  %v7018_v13 = vld [vmem:[#allocation2 + $0x22] sm:$0xff] }
 0x24d   : > { %11367 = vst [vmem:[#allocation18_spill] sm:$0xff] %v7018_v13  ;;  %5462 = vst [vmem:[#allocation2 + $0x28] sm:$0x3] %v10869_v0 }
 0x24e   : > { %6438 = vrcp.f32 %v1047_v18 }
 0x24f   : > { %v6925_v21 = vpop.permute.xlu0 %811  ;;  %v6927_v25 = vpop.permute.xlu1 %993  ;;  %6440 = vrcp.f32 %v1050_v26  ;;  %v5485_v24 = vld [vmem:[#allocation2 + $0x10] sm:$0xff] }
 0x250   : > { %v1016_v14 = vadd.f32 %v6927_v25, %v984_v52  ;;  %v5509_v28 = vld [vmem:[#allocation2 + $0x12] sm:$0xff]  ;;  %v5501_v25 = vmax.f32 %v5485_v24, %v6704_v37  ;;  %v829_v47 = vadd.f32 %v6791_v1, %v6925_v21 }
 0x251   : > { %v7082_v24 = vld [vmem:[#allocation2 + $0x30] sm:$0xff] }
 0x252   : > { %v5517_v30 = vmax.f32 %v5501_v25, %v5509_v28  ;;  %11370 = vst [vmem:[#allocation21_spill] sm:$0xff] %v7082_v24  ;;  %5463 = vst [vmem:[#allocation2 + $0x30] sm:$0xff] %v10869_v0 }
 0x253   : > { %v6929_v27 = vpop.permute.xlu0 %843  ;;  %v6935_v34 = vpop.permute.xlu1 %1025  ;;  %5479 = vst [vmem:[#allocation2 + $0x31] sm:$0xff] %v6712_v40 }
 0x254   : > { %v1048_v18 = vadd.f32 %v6935_v34, %v1016_v14  ;;  %5525 = vst [vmem:[#allocation2 + $0x11] sm:$0xff] %v5517_v30  ;;  %v861_v51 = vadd.f32 %v6929_v27, %v829_v47 }
 0x256   : > { %6442 = vrcp.f32 %v1048_v18 }
 0x257   : > { %v6931_v31 = vpop.permute.xlu0 %875  ;;  %v6956_v42 = vpop.permute.xlu1 %813 }
 0x258   : > { %v6933_v32 = vpop.eup %6438  ;;  %v893_v48 = vadd.f32 %v6931_v31, %v861_v51 }
 0x259   : > { %1223 = vrot.lane.b32.xlu0 %v6933_v32, %s6481_s12  ;;  %1135 = vrot.lane.b32.xlu1 %v6933_v32, %s6482_s13  ;;  %v7001_v9 = vpop.eup %6440  ;;  %v7043_v23 = vmul.f32 %v6933_v32, %v6753_v57 }
 0x25b   : > { %v6942_v29 = vpop.permute.xlu0 %907  ;;  %v6983_v60 = vpop.permute.xlu1 %845  ;;  %11368 = vst [vmem:[#allocation19_spill] sm:$0xff] %v7043_v23 }
 0x25c   : > { %v925_v11 = vadd.f32 %v6942_v29, %v893_v48  ;;  %v7079_v29 = vmul.f32 %v7001_v9, %v6725_v50 }
 0x25d   : > { %1399 = vrot.lane.b32.xlu0 %v6933_v32, %s6483_s14  ;;  %1311 = vrot.lane.b32.xlu1 %v6933_v32, %s6484_s15 }
 0x25e   : > { %11369 = vst [vmem:[#allocation20_spill] sm:$0xff] %v7079_v29 }
 0x25f   : > { %v6961_v45 = vpop.permute.xlu0 %939  ;;  %v7016_v8 = vpop.permute.xlu1 %877 }
 0x260   : > { %v6443_v26 = vpop.eup %6442  ;;  %v957_v21 = vadd.f32 %v6961_v45, %v925_v11  ;;  %v830_v11 = vadd.f32 %v6807_v4, %v6956_v42 }
 0x261   : > { %1575 = vrot.lane.b32.xlu0 %v6933_v32, %s6485_s16  ;;  %1487 = vrot.lane.b32.xlu1 %v6933_v32, %s6486_s17  ;;  %v7094_v47 = vmul.f32 %v6443_v26, %v6763_v58 }
 0x263   : > { %v6979_v59 = vpop.permute.xlu0 %971  ;;  %v7028_v15 = vpop.permute.xlu1 %909  ;;  %11371 = vst [vmem:[#allocation22_spill] sm:$0xff] %v7094_v47 }
 0x264   : > { %v989_v52 = vadd.f32 %v6979_v59, %v957_v21  ;;  %v862_v21 = vadd.f32 %v6983_v60, %v830_v11 }
 0x265   : > { %1751 = vrot.lane.b32.xlu0 %v6933_v32, %s6487_s18  ;;  %1663 = vrot.lane.b32.xlu1 %v6933_v32, %s6488_s19 }
 0x267   : > { %v7004_v12 = vpop.permute.xlu0 %1003  ;;  %v7039_v34 = vpop.permute.xlu1 %941 }
 0x268   : > { %v1021_v31 = vadd.f32 %v7004_v12, %v989_v52  ;;  %v894_v52 = vadd.f32 %v7016_v8, %v862_v21 }
 0x269   : > { %1141 = vrot.lane.b32.xlu0 %v7001_v9, %s6482_s13  ;;  %1091 = vperm.xlu1 %6107, %v6994_v53  }
 0x26a   : > { %v926_v42 = vadd.f32 %v7028_v15, %v894_v52 }
 0x26b   : > { %v1036_v19 = vpop.permute.xlu0 %1035  ;;  %v7048_v33 = vpop.permute.xlu1 %973 }
 0x26c   : > { %v1053_v18 = vadd.f32 %v1036_v19, %v1021_v31  ;;  %v958_v31 = vadd.f32 %v7039_v34, %v926_v42 }
 0x26d   : > { %1317 = vrot.lane.b32.xlu0 %v7001_v9, %s6484_s15  ;;  %1229 = vrot.lane.b32.xlu1 %v7001_v9, %s6481_s12 }
 0x26e   : > { %6108 = vset.pattern.permute.xlu1 %v10866_v22  ;;  %6444 = vrcp.f32 %v1053_v18  ;;  %v990_v60 = vadd.f32 %v7048_v33, %v958_v31 }
 0x26f   : > { %v808_v20 = vpop.permute.xlu0 %807  ;;  %v7055_v32 = vpop.permute.xlu1 %1005 }
 0x270   : > { %v827_v59 = vadd.f32 %v6847_v16, %v808_v20 }
 0x271   : > { %1493 = vrot.lane.b32.xlu0 %v7001_v9, %s6486_s17  ;;  %1405 = vrot.lane.b32.xlu1 %v7001_v9, %s6483_s14 }
 0x273   : > { %v840_v37 = vpop.permute.xlu0 %839  ;;  %v7065_v61 = vpop.permute.xlu1 %1037 }
 0x275   : > { %1669 = vrot.lane.b32.xlu0 %v7001_v9, %s6488_s19  ;;  %1581 = vrot.lane.b32.xlu1 %v7001_v9, %s6485_s16 }
 0x277   : > { %v872_v44 = vpop.permute.xlu0 %871  ;;  %v7073_v14 = vpop.permute.xlu1 %809 }
 0x279   : > { %1757 = vrot.lane.b32.xlu1 %v7001_v9, %s6487_s18  ;;  %1081 = vperm.xlu0 %6110, %v7043_v23   ;;  %v859_v9 = vadd.f32 %v840_v37, %v827_v59 }
 0x27b   : > { %v904_v55 = vpop.permute.xlu0 %903  ;;  %v842_v12 = vpop.permute.xlu1 %841  ;;  %v891_v19 = vadd.f32 %v872_v44, %v859_v9 }
 0x27c   : > { %v7099_v44 = vpop.eup %6444  ;;  %v5974_v9 = vpop.f32.mrb[4].mxu0 }
 0x27d   : > { %1872 = vperm.xlu1 %6108, %v6994_v53   ;;  %1137 = vrot.lane.b32.xlu0 %v6443_v26, %s6482_s13  ;;  %v923_v25 = vadd.f32 %v904_v55, %v891_v19 }
 0x27e   : > { %6112 = vset.pattern.permute.xlu0 %v10881_v39 }
 0x27f   : > { %v936_v27 = vpop.permute.xlu0 %935  ;;  %v874_v30 = vpop.permute.xlu1 %873 }
 0x280   : > { %v955_v20 = vadd.f32 %v936_v27, %v923_v25  ;;  %v7147_v25 = vadd.f32 %v5974_v9, %v6947_v35 }
 0x281   : > { %6109 = vset.pattern.permute.xlu1 %v10881_v39  ;;  %1313 = vrot.lane.b32.xlu0 %v6443_v26, %s6484_s15 }
 0x282   : > { %2320 = vperm.xlu1 %6109, %v6994_v53   ;;  %11372 = vst [vmem:[#allocation23_spill] sm:$0xff] %v7147_v25  ;;  %488 = vst [vmem:[#allocation2 + $0x71] sm:$0xff] %v7147_v25 }
 0x283   : > { %v968_v45 = vpop.permute.xlu0 %967  ;;  %v906_v55 = vpop.permute.xlu1 %905 }
 0x284   : > { %v987_v37 = vadd.f32 %v968_v45, %v955_v20  ;;  %v1022_v45 = vadd.f32 %v7055_v32, %v990_v60  ;;  %v828_v32 = vadd.f32 %v6857_v17, %v7073_v14  ;;  %v446_v20 = vpop.f32.mrb[5].mxu0 }
 0x285   : > { %1489 = vrot.lane.b32.xlu0 %v6443_v26, %s6486_s17  ;;  %v7156_v14 = vadd.f32 %v6947_v35, %v446_v20 }
 0x286   : > { %1225 = vrot.lane.b32.xlu1 %v6443_v26, %s6481_s12  ;;  %v1054_v15 = vadd.f32 %v7065_v61, %v1022_v45  ;;  %v860_v61 = vadd.f32 %v842_v12, %v828_v32  ;;  %v5975_v12 = vpop.f32.mrb[6].mxu0 }
 0x287   : > { %6111 = vset.pattern.permute.xlu1 %v10866_v22  ;;  %v1000_v28 = vpop.permute.xlu0 %999  ;;  %v938_v27 = vpop.permute.xlu1 %937  ;;  %11373 = vst [vmem:[#allocation24_spill] sm:$0xff] %v7156_v14  ;;  %486 = vst [vmem:[#allocation2 + $0x51] sm:$0xff] %v7156_v14 }
 0x288   : > { %v1019_v48 = vadd.f32 %v1000_v28, %v987_v37  ;;  %v892_v19 = vadd.f32 %v874_v30, %v860_v61  ;;  %v7160_v30 = vadd.f32 %v5975_v12, %v6947_v35 }
 0x289   : > { %1665 = vrot.lane.b32.xlu0 %v6443_v26, %s6488_s19 }
 0x28a   : > { %1401 = vrot.lane.b32.xlu1 %v6443_v26, %s6483_s14  ;;  %11374 = vst [vmem:[#allocation25_spill] sm:$0xff] %v7160_v30  ;;  %489 = vst [vmem:[#allocation2 + $0x81] sm:$0xff] %v7160_v30  ;;  %v11389_v30 = vmov 18  }
 0x28b   : > { %v1032_v51 = vpop.permute.xlu0 %1031  ;;  %v970_v18 = vpop.permute.xlu1 %969 }
 0x28d   : > { %2312 = vperm.xlu0 %6112, %v7043_v23  }
 0x28e   : > { %1577 = vrot.lane.b32.xlu1 %v6443_v26, %s6485_s16  ;;  %v7185_v60 = vld [vmem:[#allocation2 + $0x52] sm:$0xff] }
 0x28f   : > { %v1002_v34 = vpop.permute.xlu1 %1001  ;;  %11377 = vst [vmem:[#allocation28_spill] sm:$0xff] %v7185_v60  ;;  %5468 = vst [vmem:[#allocation2 + $0x58] sm:$0x3] %v10869_v0 }
 0x291   : > { %6113 = vset.pattern.permute.xlu0 %v10867_v10  ;;  %v7192_v45 = vld [vmem:[#allocation2 + $0x80] sm:$0xff] }
 0x292   : > { %1753 = vrot.lane.b32.xlu1 %v6443_v26, %s6487_s18  ;;  %1096 = vperm.xlu0 %6113, %v7079_v29   ;;  %v1051_v26 = vadd.f32 %v1032_v51, %v1019_v48  ;;  %v924_v51 = vadd.f32 %v906_v55, %v892_v19  ;;  %v449_v48 = vpop.f32.mrb[7].mxu0  ;;  %11379 = vst [vmem:[#allocation30_spill] sm:$0xff] %v7192_v45 }
 0x293   : > { %v1034_v59 = vpop.permute.xlu1 %1033 }
 0x294   : > { %6446 = vrcp.f32 %v1051_v26  ;;  %v7164_v26 = vadd.f32 %v6947_v35, %v449_v48  ;;  %v956_v21 = vadd.f32 %v938_v27, %v924_v51  ;;  %v7182_v27 = vld [vmem:[#allocation2 + $0x72] sm:$0xff] }
 0x295   : > { %6448 = vrcp.f32 %v1054_v15  ;;  %11376 = vst [vmem:[#allocation27_spill] sm:$0xff] %v7182_v27  ;;  %5472 = vst [vmem:[#allocation2 + $0x78] sm:$0x3] %v10869_v0  ;;  %v7194_v15 = vld [vmem:[#allocation2 + $0x82] sm:$0xff] }
 0x296   : > { %1864 = vperm.xlu1 %6111, %v7043_v23   ;;  %6114 = vset.pattern.permute.xlu0 %v10881_v39  ;;  %11375 = vst [vmem:[#allocation26_spill] sm:$0xff] %v7164_v26  ;;  %487 = vst [vmem:[#allocation2 + $0x61] sm:$0xff] %v7164_v26  ;;  %v988_v55 = vadd.f32 %v970_v18, %v956_v21  ;;  %v7189_v18 = vmul.f32 %v7099_v44, %v6791_v1  ;;  %v10900_v26 = vmov 4  }
 0x297   : > { %2324 = vperm.xlu0 %6114, %v7079_v29   ;;  %11380 = vst [vmem:[#allocation31_spill] sm:$0xff] %v7194_v15  ;;  %5473 = vst [vmem:[#allocation2 + $0x80] sm:$0xff] %v10869_v0 }
 0x298   : > { %v1020_v35 = vadd.f32 %v1002_v34, %v988_v55  ;;  %11378 = vst [vmem:[#allocation29_spill] sm:$0xff] %v7189_v18  ;;  %5474 = vst [vmem:[#allocation2 + $0x88] sm:$0x3] %v10869_v0 }
 0x299   : > { %5484 = vst [vmem:[#allocation2 + $0x81] sm:$0xff] %v6815_v7 }
 0x29a   : > { %1876 = vperm.xlu1 %6111, %v7079_v29   ;;  %v1052_v31 = vadd.f32 %v1034_v59, %v1020_v35 }
 0x29b   : > { %6116 = vset.pattern.permute.xlu0 %v10866_v22 }
 0x29c   : > { %1868 = vperm.xlu0 %6116, %v7094_v47   ;;  %6450 = vrcp.f32 %v1052_v31 }
 0x29d   : > { %v7200_v32 = vld [vmem:[#allocation2 + $0x62] sm:$0xff] }
 0x29e   : > { %6115 = vset.pattern.permute.xlu1 %v10867_v10  ;;  %v7124_v8 = vpop.eup %6446  ;;  %11381 = vst [vmem:[#allocation32_spill] sm:$0xff] %v7200_v32  ;;  %5470 = vst [vmem:[#allocation2 + $0x68] sm:$0x3] %v10869_v0  ;;  %v10896_v32 = vmov 2  }
 0x29f   : > { %1086 = vperm.xlu1 %6115, %v7094_v47   ;;  %v7166_v11 = vpop.eup %6448 }
 0x2a0   : > { %1235 = vrot.lane.b32.xlu0 %v7099_v44, %s6481_s12  ;;  %v5492_v9 = vld [vmem:[#allocation2 + $0x80] sm:$0xff] }
 0x2a1   : > { %v5516_v19 = vld [vmem:[#allocation2 + $0x82] sm:$0xff]  ;;  %v5508_v12 = vmax.f32 %v5492_v9, %v6815_v7  ;;  %v7244_v9 = vmul.f32 %v7124_v8, %v6847_v16 }
 0x2a3   : > { %6117 = vset.pattern.permute.xlu1 %v10881_v39  ;;  %v5524_v48 = vmax.f32 %v5508_v12, %v5516_v19  ;;  %11382 = vst [vmem:[#allocation33_spill] sm:$0xff] %v7244_v9  ;;  %v7248_v19 = vld [vmem:[#allocation2 + $0x40] sm:$0xff] }
 0x2a4   : > { %2316 = vperm.xlu1 %6117, %v7094_v47   ;;  %1411 = vrot.lane.b32.xlu0 %v7099_v44, %s6483_s14  ;;  %11383 = vst [vmem:[#allocation34_spill] sm:$0xff] %v7248_v19  ;;  %5465 = vst [vmem:[#allocation2 + $0x40] sm:$0xff] %v10869_v0  ;;  %v11385_v0 = vmov 0   ;;  %v11388_v47 = vmov -1e+30  }
 0x2a5   : > { %5532 = vst [vmem:[#allocation2 + $0x81] sm:$0xff] %v5524_v48  ;;  %5480 = vst [vmem:[#allocation2 + $0x41] sm:$0xff] %v6715_v41 }
 0x2a6   : > { %v6451_v21 = vpop.eup %6450 }
 0x2a7   : > { %v7282_v23 = vmul.f32 %v6451_v21, %v6857_v17 }
 0x2a8   : > { %1587 = vrot.lane.b32.xlu0 %v7099_v44, %s6485_s16  ;;  %1147 = vrot.lane.b32.xlu1 %v7099_v44, %s6482_s13 }
 0x2a9   : > { %6118 = vset.pattern.permute.xlu1 %v10867_v10  ;;  %11386 = vst [vmem:[#allocation36_spill] sm:$0xff] %v7282_v23 }
 0x2ab   : > { %v7136_v33 = vpop.permute.xlu0 %1227  ;;  %v7149_v37 = vpop.permute.xlu1 %1139 }
 0x2ac   : > { %1763 = vrot.lane.b32.xlu0 %v7099_v44, %s6487_s18  ;;  %1323 = vrot.lane.b32.xlu1 %v7099_v44, %s6484_s15 }
 0x2af   : > { %v7144_v28 = vpop.permute.xlu0 %1403  ;;  %v7176_v42 = vpop.permute.xlu1 %1315 }
 0x2b0   : > { %1499 = vrot.lane.b32.xlu1 %v7099_v44, %s6486_s17  ;;  %1231 = vrot.lane.b32.xlu0 %v7124_v8, %s6481_s12 }
 0x2b3   : > { %v7174_v52 = vpop.permute.xlu0 %1579  ;;  %v7202_v59 = vpop.permute.xlu1 %1491 }
 0x2b4   : > { %1675 = vrot.lane.b32.xlu1 %v7099_v44, %s6488_s19  ;;  %1407 = vrot.lane.b32.xlu0 %v7124_v8, %s6483_s14 }
 0x2b7   : > { %v7196_v34 = vpop.permute.xlu0 %1755  ;;  %v7216_v61 = vpop.permute.xlu1 %1667 }
 0x2b8   : > { %1583 = vrot.lane.b32.xlu0 %v7124_v8, %s6485_s16  ;;  %1143 = vrot.lane.b32.xlu1 %v7124_v8, %s6482_s13 }
 0x2bc   : > { %1759 = vrot.lane.b32.xlu0 %v7124_v8, %s6487_s18  ;;  %1319 = vrot.lane.b32.xlu1 %v7124_v8, %s6484_s15 }
 0x2c0   : > { %1149 = vrot.lane.b32.xlu0 %v7166_v11, %s6482_s13  ;;  %1495 = vrot.lane.b32.xlu1 %v7124_v8, %s6486_s17 }
 0x2c4   : > { %1325 = vrot.lane.b32.xlu0 %v7166_v11, %s6484_s15  ;;  %1671 = vrot.lane.b32.xlu1 %v7124_v8, %s6488_s19  ;;  %v7262_v8 = vmul.f32 %v7166_v11, %v6807_v4  ;;  %v10927_v4 = vmov 12  }
 0x2c6   : > { %11384 = vst [vmem:[#allocation35_spill] sm:$0xff] %v7262_v8 }
 0x2c8   : > { %1501 = vrot.lane.b32.xlu0 %v7166_v11, %s6486_s17  ;;  %1111 = vperm.xlu1 %6118, %v7189_v18  }
 0x2cb   : > { %v7209_v44 = vpop.permute.xlu0 %1223  ;;  %v7224_v51 = vpop.permute.xlu1 %1135 }
 0x2cc   : > { %1677 = vrot.lane.b32.xlu0 %v7166_v11, %s6488_s19  ;;  %1237 = vrot.lane.b32.xlu1 %v7166_v11, %s6481_s12  ;;  %v7305_v27 = vmul.f32 %v6753_v57, %v7209_v44  ;;  %v7322_v44 = vmul.f32 %v6719_v49, %v7149_v37 }
 0x2cd   : > { %6119 = vset.pattern.permute.xlu1 %v10881_v39 }
 0x2ce   : > { %11392 = vst [vmem:[#allocation39_spill] sm:$0xff] %v7305_v27  ;;  %11395 = vst [vmem:[#allocation42_spill] sm:$0xff] %v7322_v44 }
 0x2cf   : > { %v7218_v20 = vpop.permute.xlu0 %1399  ;;  %v7231_v35 = vpop.permute.xlu1 %1311 }
 0x2d0   : > { %1888 = vperm.xlu0 %6116, %v7189_v18   ;;  %1413 = vrot.lane.b32.xlu1 %v7166_v11, %s6483_s14 }
 0x2d3   : > { %v7229_v55 = vpop.permute.xlu0 %1575  ;;  %v7240_v31 = vpop.permute.xlu1 %1487 }
 0x2d4   : > { %1145 = vrot.lane.b32.xlu0 %v6451_v21, %s6482_s13  ;;  %1589 = vrot.lane.b32.xlu1 %v7166_v11, %s6485_s16 }
 0x2d7   : > { %v7236_v7 = vpop.permute.xlu0 %1751  ;;  %v7255_v48 = vpop.permute.xlu1 %1663 }
 0x2d8   : > { %1321 = vrot.lane.b32.xlu0 %v6451_v21, %s6484_s15  ;;  %1765 = vrot.lane.b32.xlu1 %v7166_v11, %s6487_s18 }
 0x2db   : > { %v7252_v12 = vpop.permute.xlu0 %1141 }
 0x2dc   : > { %1497 = vrot.lane.b32.xlu0 %v6451_v21, %s6486_s17  ;;  %2336 = vperm.xlu1 %6119, %v7189_v18   ;;  %v7284_v18 = vld [vmem:[#allocation2 + $0x50] sm:$0xff] }
 0x2dd   : > { %11387 = vst [vmem:[#allocation37_spill] sm:$0xff] %v7284_v18  ;;  %5467 = vst [vmem:[#allocation2 + $0x50] sm:$0xff] %v11388_v47 }
 0x2de   : > { %5481 = vst [vmem:[#allocation2 + $0x51] sm:$0xff] %v6802_v2 }
 0x2df   : > { %v7264_v22 = vpop.permute.xlu0 %1317 }
 0x2e0   : > { %1673 = vrot.lane.b32.xlu0 %v6451_v21, %s6488_s19  ;;  %6120 = vset.pattern.permute.xlu1 %v10867_v10 }
 0x2e1   : > { %1101 = vperm.xlu1 %6120, %v7244_v9  }
 0x2e3   : > { %v7275_v53 = vpop.permute.xlu0 %1493 }
 0x2e4   : > { %1880 = vperm.xlu0 %6116, %v7244_v9  }
 0x2e5   : > { %1233 = vrot.lane.b32.xlu1 %v6451_v21, %s6481_s12 }
 0x2e6   : > { %6121 = vset.pattern.permute.xlu1 %v10881_v39 }
 0x2e8   : > { %v7266_v10 = vpop.permute.xlu1 %1091  ;;  %6122 = vset.pattern.permute.xlu0 %v11385_v0 }
 0x2e9   : > { %1116 = vperm.xlu0 %6122, %v7262_v8   ;;  %1409 = vrot.lane.b32.xlu1 %v6451_v21, %s6483_s14 }
 0x2ec   : > { %v7271_v29 = vpop.permute.xlu1 %1229 }
 0x2ed   : > { %6124 = vset.pattern.permute.xlu0 %v10881_v39  ;;  %1585 = vrot.lane.b32.xlu1 %v6451_v21, %s6485_s16  ;;  %v7290_v39 = vpop.permute.xlu0 %1669 }
 0x2ee   : > { %2340 = vperm.xlu0 %6124, %v7262_v8  }
 0x2f0   : > { %v7278_v11 = vpop.permute.xlu1 %1405 }
 0x2f1   : > { %1761 = vrot.lane.b32.xlu1 %v6451_v21, %s6487_s18  ;;  %v7466_v3 = vmul.f32 %v6725_v50, %v7278_v11 }
 0x2f2   : > { %6125 = vset.pattern.permute.xlu0 %v11385_v0  ;;  %v11391_v0 = vmov 9  }
 0x2f3   : > { %1106 = vperm.xlu0 %6125, %v7282_v23   ;;  %11426 = vst [vmem:[#allocation68_spill] sm:$0xff] %v7466_v3 }
 0x2f4   : > { %v7292_v15 = vpop.permute.xlu1 %1581 }
 0x2f5   : > { %2328 = vperm.xlu1 %6121, %v7244_v9   ;;  %v7478_v2 = vmul.f32 %v6725_v50, %v7292_v15 }
 0x2f7   : > { %6126 = vset.pattern.permute.xlu0 %v11389_v30  ;;  %11428 = vst [vmem:[#allocation70_spill] sm:$0xff] %v7478_v2 }
 0x2f8   : > { %v7296_v21 = vpop.permute.xlu1 %1757  ;;  %2332 = vperm.xlu0 %6126, %v7282_v23   ;;  %v7299_v45 = vpop.permute.xlu0 %1081 }
 0x2f9   : > { %11390 = vst [vmem:[#allocation38_spill] sm:$0xff] %v7299_v45  ;;  %6123 = vset.pattern.permute.xlu1 %v11391_v0  ;;  %v7316_v0 = vmul.f32 %v6753_v57, %v7218_v20  ;;  %v10936_v45 = vmov 7  }
 0x2fa   : > { %1892 = vperm.xlu1 %6123, %v7262_v8  }
 0x2fb   : > { %11394 = vst [vmem:[#allocation41_spill] sm:$0xff] %v7316_v0 }
 0x2fc   : > { %v7307_v25 = vpop.permute.xlu1 %1872  ;;  %6147 = vset.pattern.permute.xlu0 %v10896_v32  ;;  %v7310_v30 = vpop.permute.xlu0 %1137  ;;  %v10902_v32 = vmov 1  }
 0x2fd   : > { %11393 = vst [vmem:[#allocation40_spill] sm:$0xff] %v7307_v25  ;;  %1257 = vperm.xlu0 %6147, %v7305_v27   ;;  %v10947_v25 = vmov 11  }
 0x2fe   : > { %1884 = vperm.xlu1 %6123, %v7282_v23   ;;  %v7334_v23 = vmul.f32 %v6753_v57, %v7229_v55  ;;  %v7352_v55 = vmul.f32 %v6753_v57, %v7236_v7  ;;  %v7368_v7 = vmul.f32 %v6753_v57, %v7224_v51 }
 0x300   : > { %v7318_v8 = vpop.permute.xlu0 %1313  ;;  %11397 = vst [vmem:[#allocation44_spill] sm:$0xff] %v7334_v23  ;;  %11400 = vst [vmem:[#allocation46_spill] sm:$0xff] %v7352_v55 }
 0x301   : > { %v7324_v9 = vpop.permute.xlu1 %2320  ;;  %6149 = vset.pattern.permute.xlu0 %v10900_v26  ;;  %v10909_v26 = vmov 6   ;;  %11403 = vst [vmem:[#allocation49_spill] sm:$0xff] %v7368_v7 }
 0x302   : > { %11396 = vst [vmem:[#allocation43_spill] sm:$0xff] %v7324_v9  ;;  %6127 = vset.pattern.permute.xlu1 %v10902_v32  ;;  %1433 = vperm.xlu0 %6149, %v7316_v0   ;;  %v7340_v9 = vmul.f32 %v6719_v49, %v7136_v33  ;;  %v11399_v32 = vmov 2   ;;  %v7356_v33 = vmul.f32 %v6719_v49, %v7176_v42  ;;  %v7370_v42 = vld [vmem:[#allocation2 + $0x2] sm:$0xff] }
 0x303   : > { %1179 = vperm.xlu1 %6127, %v7322_v44   ;;  %11404 = vst [vmem:[#allocation50_spill] sm:$0xff] %v7370_v42  ;;  %5457 = vst [vmem:[#allocation2] sm:$0xff] %v11388_v47  ;;  %v10929_v42 = vmov 5  }
 0x304   : > { %v7330_v20 = vpop.permute.xlu0 %1489  ;;  %11398 = vst [vmem:[#allocation45_spill] sm:$0xff] %v7340_v9  ;;  %11401 = vst [vmem:[#allocation47_spill] sm:$0xff] %v7356_v33 }
 0x305   : > { %v7336_v37 = vpop.permute.xlu1 %1225  ;;  %5458 = vst [vmem:[#allocation2 + $0x8] sm:$0x3] %v11388_v47 }
 0x306   : > { %6151 = vset.pattern.permute.xlu0 %v10909_v26  ;;  %v10917_v26 = vmov 3  }
 0x307   : > { %6128 = vset.pattern.permute.xlu1 %v11399_v32  ;;  %1609 = vperm.xlu0 %6151, %v7334_v23  }
 0x308   : > { %1267 = vperm.xlu1 %6128, %v7340_v9   ;;  %v7346_v60 = vpop.permute.xlu0 %1665 }
 0x309   : > { %v7348_v14 = vpop.permute.xlu1 %1401 }
 0x30b   : > { %6153 = vset.pattern.permute.xlu0 %v10915_v6  ;;  %v7376_v6 = vmul.f32 %v6719_v49, %v7144_v28  ;;  %v7390_v28 = vmul.f32 %v6753_v57, %v7231_v35  ;;  %v7406_v35 = vmul.f32 %v6753_v57, %v7240_v31  ;;  %v7422_v31 = vmul.f32 %v6753_v57, %v7255_v48 }
 0x30c   : > { %6129 = vset.pattern.permute.xlu1 %v10917_v26  ;;  %1785 = vperm.xlu0 %6153, %v7352_v55   ;;  %v7361_v18 = vpop.permute.xlu0 %2312  ;;  %v10921_v26 = vmov 10  }
 0x30d   : > { %11402 = vst [vmem:[#allocation48_spill] sm:$0xff] %v7361_v18  ;;  %v7363_v17 = vpop.permute.xlu1 %1577  ;;  %1355 = vperm.xlu1 %6129, %v7356_v33   ;;  %11406 = vst [vmem:[#allocation52_spill] sm:$0xff] %v7376_v6 }
 0x30e   : > { %11409 = vst [vmem:[#allocation54_spill] sm:$0xff] %v7390_v28  ;;  %11413 = vst [vmem:[#allocation58_spill] sm:$0xff] %v7406_v35 }
 0x30f   : > { %11418 = vst [vmem:[#allocation62_spill] sm:$0xff] %v7422_v31 }
 0x310   : > { %6154 = vset.pattern.permute.xlu0 %v10921_v26  ;;  %v7394_v26 = vmul.f32 %v6719_v49, %v7202_v59 }
 0x311   : > { %v7381_v18 = vpop.permute.xlu1 %1753  ;;  %6130 = vset.pattern.permute.xlu1 %v11407_v43  ;;  %1904 = vperm.xlu0 %6154, %v7368_v7   ;;  %v7385_v51 = vpop.permute.xlu0 %1096 }
 0x312   : > { %11408 = vst [vmem:[#allocation53_spill] sm:$0xff] %v7385_v51  ;;  %1443 = vperm.xlu1 %6130, %v7376_v6   ;;  %11410 = vst [vmem:[#allocation55_spill] sm:$0xff] %v7394_v26 }
 0x315   : > { %v7396_v56 = vpop.permute.xlu1 %1864  ;;  %6156 = vset.pattern.permute.xlu0 %v10927_v4  ;;  %v10932_v4 = vmov 14  }
 0x316   : > { %11411 = vst [vmem:[#allocation56_spill] sm:$0xff] %v7396_v56  ;;  %6131 = vset.pattern.permute.xlu1 %v10929_v42  ;;  %2000 = vperm.xlu0 %6156, %v7390_v28   ;;  %v7401_v51 = vpop.permute.xlu0 %2324  ;;  %v7412_v56 = vmul.f32 %v6719_v49, %v7174_v52  ;;  %v11416_v42 = vmov 6   ;;  %v7428_v52 = vmul.f32 %v6719_v49, %v7216_v61 }
 0x317   : > { %11412 = vst [vmem:[#allocation57_spill] sm:$0xff] %v7401_v51  ;;  %1531 = vperm.xlu1 %6131, %v7394_v26   ;;  %v7442_v61 = vmul.f32 %v6719_v49, %v7196_v34  ;;  %v11425_v49 = vmov 10  }
 0x318   : > { %11415 = vst [vmem:[#allocation60_spill] sm:$0xff] %v7412_v56  ;;  %11420 = vst [vmem:[#allocation64_spill] sm:$0xff] %v7428_v52 }
 0x319   : > { %v7408_v59 = vpop.permute.xlu1 %1876  ;;  %11422 = vst [vmem:[#allocation66_spill] sm:$0xff] %v7442_v61 }
 0x31a   : > { %11414 = vst [vmem:[#allocation59_spill] sm:$0xff] %v7408_v59  ;;  %6158 = vset.pattern.permute.xlu0 %v10932_v4 }
 0x31b   : > { %6132 = vset.pattern.permute.xlu1 %v11416_v42  ;;  %2096 = vperm.xlu0 %6158, %v7406_v35   ;;  %v7417_v51 = vpop.permute.xlu0 %1868 }
 0x31c   : > { %11417 = vst [vmem:[#allocation61_spill] sm:$0xff] %v7417_v51  ;;  %1619 = vperm.xlu1 %6132, %v7412_v56   ;;  %v10938_v51 = vmov 20  }
 0x31e   : > { %v7424_v59 = vpop.permute.xlu1 %1086 }
 0x31f   : > { %11419 = vst [vmem:[#allocation63_spill] sm:$0xff] %v7424_v59  ;;  %6160 = vset.pattern.permute.xlu0 %v10934_v5  ;;  %v7431_v4 = vpop.permute.xlu0 %1235  ;;  %v11423_v5 = vmov 8  }
 0x320   : > { %6133 = vset.pattern.permute.xlu1 %v10936_v45  ;;  %2192 = vperm.xlu0 %6160, %v7422_v31  }
 0x321   : > { %1707 = vperm.xlu1 %6133, %v7428_v52  }
 0x323   : > { %v7436_v57 = vpop.permute.xlu1 %2316  ;;  %v7438_v48 = vpop.permute.xlu0 %1411 }
 0x324   : > { %11421 = vst [vmem:[#allocation65_spill] sm:$0xff] %v7436_v57  ;;  %6163 = vset.pattern.permute.xlu0 %v10938_v51  ;;  %v7454_v57 = vmul.f32 %v6725_v50, %v7271_v29 }
 0x325   : > { %6134 = vset.pattern.permute.xlu1 %v11423_v5  ;;  %2400 = vperm.xlu0 %6163, %v7305_v27  }
 0x326   : > { %1795 = vperm.xlu1 %6134, %v7442_v61   ;;  %11424 = vst [vmem:[#allocation67_spill] sm:$0xff] %v7454_v57 }
 0x327   : > { %v7448_v45 = vpop.permute.xlu1 %1147  ;;  %v7450_v59 = vpop.permute.xlu0 %1587 }
 0x329   : > { %6166 = vset.pattern.permute.xlu0 %v11399_v32 }
 0x32a   : > { %6135 = vset.pattern.permute.xlu1 %v11425_v49  ;;  %1272 = vperm.xlu0 %6166, %v7454_v57  }
 0x32b   : > { %v7459_v34 = vpop.permute.xlu1 %1323  ;;  %1912 = vperm.xlu1 %6135, %v7322_v44   ;;  %v7462_v51 = vpop.permute.xlu0 %1763 }
 0x32e   : > { %6168 = vset.pattern.permute.xlu0 %v11407_v43  ;;  %v11430_v43 = vmov 12  }
 0x32f   : > { %v7469_v29 = vpop.permute.xlu1 %1499  ;;  %6136 = vset.pattern.permute.xlu1 %v10947_v25  ;;  %1448 = vperm.xlu0 %6168, %v7466_v3   ;;  %v7473_v32 = vpop.permute.xlu0 %1231  ;;  %v7490_v25 = vmul.f32 %v6725_v50, %v7296_v21  ;;  %v10953_v3 = vmov 13   ;;  %v7506_v21 = vmul.f32 %v6725_v50, %v7252_v12 }
 0x330   : > { %11427 = vst [vmem:[#allocation69_spill] sm:$0xff] %v7473_v32  ;;  %1960 = vperm.xlu1 %6136, %v7340_v9  }
 0x331   : > { %11431 = vst [vmem:[#allocation72_spill] sm:$0xff] %v7490_v25  ;;  %11435 = vst [vmem:[#allocation76_spill] sm:$0xff] %v7506_v21 }
 0x333   : > { %v7480_v16 = vpop.permute.xlu1 %1675  ;;  %6170 = vset.pattern.permute.xlu0 %v11416_v42  ;;  %v7483_v11 = vpop.permute.xlu0 %1407 }
 0x334   : > { %11429 = vst [vmem:[#allocation71_spill] sm:$0xff] %v7483_v11  ;;  %6137 = vset.pattern.permute.xlu1 %v11430_v43  ;;  %1624 = vperm.xlu0 %6170, %v7478_v2  }
 0x335   : > { %2008 = vperm.xlu1 %6137, %v7356_v33  }
 0x337   : > { %v7492_v32 = vpop.permute.xlu1 %1143  ;;  %v7494_v15 = vpop.permute.xlu0 %1583 }
 0x338   : > { %11432 = vst [vmem:[#allocation73_spill] sm:$0xff] %v7494_v15  ;;  %6172 = vset.pattern.permute.xlu0 %v11423_v5  ;;  %v11436_v15 = vmov 14  }
 0x339   : > { %6138 = vset.pattern.permute.xlu1 %v10953_v3  ;;  %1800 = vperm.xlu0 %6172, %v7490_v25   ;;  %v10963_v25 = vmov 15  }
 0x33a   : > { %2056 = vperm.xlu1 %6138, %v7376_v6   ;;  %v7518_v6 = vmul.f32 %v6725_v50, %v7264_v22  ;;  %v7531_v22 = vmul.f32 %v6725_v50, %v7275_v53 }
 0x33b   : > { %v7500_v42 = vpop.permute.xlu1 %1319  ;;  %v7502_v11 = vpop.permute.xlu0 %1759 }
 0x33c   : > { %11433 = vst [vmem:[#allocation74_spill] sm:$0xff] %v7500_v42  ;;  %11434 = vst [vmem:[#allocation75_spill] sm:$0xff] %v7502_v11  ;;  %v5488_v11 = vld [vmem:[#allocation2 + $0x40] sm:$0xff] }
 0x33d   : > { %6173 = vset.pattern.permute.xlu0 %v11425_v49  ;;  %11438 = vst [vmem:[#allocation78_spill] sm:$0xff] %v7518_v6  ;;  %v5512_v42 = vld [vmem:[#allocation2 + $0x42] sm:$0xff]  ;;  %v5504_v12 = vmax.f32 %v5488_v11, %v6715_v41  ;;  %11440 = vst [vmem:[#allocation80_spill] sm:$0xff] %v7531_v22  ;;  %v11443_v11 = vmov 16  }
 0x33e   : > { %6139 = vset.pattern.permute.xlu1 %v11436_v15  ;;  %1916 = vperm.xlu0 %6173, %v7506_v21  }
 0x33f   : > { %v7511_v5 = vpop.permute.xlu1 %1495  ;;  %2104 = vperm.xlu1 %6139, %v7394_v26   ;;  %v7514_v3 = vpop.permute.xlu0 %1149 }
 0x340   : > { %11437 = vst [vmem:[#allocation77_spill] sm:$0xff] %v7514_v3  ;;  %v5520_v3 = vmax.f32 %v5504_v12, %v5512_v42  ;;  %v7543_v42 = vmul.f32 %v6725_v50, %v7290_v39  ;;  %v10973_v50 = vmov 19  }
 0x342   : > { %6175 = vset.pattern.permute.xlu0 %v11430_v43  ;;  %5528 = vst [vmem:[#allocation2 + $0x41] sm:$0xff] %v5520_v3  ;;  %11444 = vst [vmem:[#allocation83_spill] sm:$0xff] %v7543_v42  ;;  %v10969_v3 = vmov 17  }
 0x343   : > { %v7522_v49 = vpop.permute.xlu1 %1671  ;;  %6140 = vset.pattern.permute.xlu1 %v10963_v25  ;;  %2012 = vperm.xlu0 %6175, %v7518_v6   ;;  %v7526_v26 = vpop.permute.xlu0 %1325 }
 0x344   : > { %11439 = vst [vmem:[#allocation79_spill] sm:$0xff] %v7526_v26  ;;  %2152 = vperm.xlu1 %6140, %v7412_v56   ;;  %v11447_v56 = vmov 20  }
 0x347   : > { %v7533_v43 = vpop.permute.xlu1 %1111  ;;  %6177 = vset.pattern.permute.xlu0 %v11436_v15  ;;  %v7536_v41 = vpop.permute.xlu0 %1501 }
 0x348   : > { %11441 = vst [vmem:[#allocation81_spill] sm:$0xff] %v7533_v43  ;;  %11442 = vst [vmem:[#allocation82_spill] sm:$0xff] %v7536_v41  ;;  %6141 = vset.pattern.permute.xlu1 %v11443_v11  ;;  %2108 = vperm.xlu0 %6177, %v7531_v22   ;;  %v11451_v43 = vmov 1   ;;  %v11458_v41 = vmov 3  }
 0x349   : > { %2200 = vperm.xlu1 %6141, %v7428_v52  }
 0x34b   : > { %v7545_v12 = vpop.permute.xlu1 %1237  ;;  %v7547_v53 = vpop.permute.xlu0 %1677 }
 0x34c   : > { %11445 = vst [vmem:[#allocation84_spill] sm:$0xff] %v7547_v53  ;;  %6179 = vset.pattern.permute.xlu0 %v11443_v11  ;;  %v7577_v53 = vld [vmem:[#allocation2 + $0x20] sm:$0xff] }
 0x34d   : > { %6142 = vset.pattern.permute.xlu1 %v10969_v3  ;;  %2204 = vperm.xlu0 %6179, %v7543_v42   ;;  %11454 = vst [vmem:[#allocation91_spill] sm:$0xff] %v7577_v53 }
 0x34e   : > { %2248 = vperm.xlu1 %6142, %v7442_v61   ;;  %v7567_v61 = vmul.f32 %v6763_v58, %v7310_v30  ;;  %v7583_v30 = vld [vmem:[#allocation2 + $0x20] sm:$0xff] }
 0x34f   : > { %v7553_v25 = vpop.permute.xlu1 %1413  ;;  %v7555_v52 = vpop.permute.xlu0 %1888  ;;  %11456 = vst [vmem:[#allocation93_spill] sm:$0xff] %v7583_v30  ;;  %5461 = vst [vmem:[#allocation2 + $0x20] sm:$0xff] %v11388_v47  ;;  %v11463_v30 = vmov 5  }
 0x350   : > { %11446 = vst [vmem:[#allocation85_spill] sm:$0xff] %v7555_v52  ;;  %11450 = vst [vmem:[#allocation88_spill] sm:$0xff] %v7567_v61 }
 0x351   : > { %6182 = vset.pattern.permute.xlu0 %v11447_v56  ;;  %5478 = vst [vmem:[#allocation2 + $0x21] sm:$0xff] %v6707_v38 }
 0x352   : > { %6143 = vset.pattern.permute.xlu1 %v10973_v50  ;;  %2412 = vperm.xlu0 %6182, %v7454_v57  }
 0x353   : > { %v7560_v39 = vpop.permute.xlu1 %1589  ;;  %2360 = vperm.xlu1 %6143, %v7322_v44   ;;  %v7563_v3 = vpop.permute.xlu0 %1145  ;;  %v7581_v44 = vmul.f32 %v6763_v58, %v7318_v8  ;;  %v7597_v8 = vmul.f32 %v6763_v58, %v7330_v20  ;;  %v7611_v20 = vmul.f32 %v6763_v58, %v7346_v60  ;;  %v7626_v60 = vmul.f32 %v6763_v58, %v7336_v37 }
 0x354   : > { %11448 = vst [vmem:[#allocation86_spill] sm:$0xff] %v7560_v39  ;;  %11449 = vst [vmem:[#allocation87_spill] sm:$0xff] %v7563_v3 }
 0x355   : > { %11455 = vst [vmem:[#allocation92_spill] sm:$0xff] %v7581_v44  ;;  %11460 = vst [vmem:[#allocation96_spill] sm:$0xff] %v7597_v8 }
 0x356   : > { %6184 = vset.pattern.permute.xlu0 %v11451_v43  ;;  %11465 = vst [vmem:[#allocation100_spill] sm:$0xff] %v7611_v20  ;;  %11470 = vst [vmem:[#allocation104_spill] sm:$0xff] %v7626_v60 }
 0x357   : > { %v7570_v52 = vpop.permute.xlu1 %1765  ;;  %6144 = vset.pattern.permute.xlu1 %v11447_v56  ;;  %1174 = vperm.xlu0 %6184, %v7567_v61   ;;  %v7574_v50 = vpop.permute.xlu0 %1321 }
 0x358   : > { %11452 = vst [vmem:[#allocation89_spill] sm:$0xff] %v7570_v52  ;;  %11453 = vst [vmem:[#allocation90_spill] sm:$0xff] %v7574_v50  ;;  %2408 = vperm.xlu1 %6144, %v7340_v9   ;;  %v10980_v52 = vmov 21  }
 0x35b   : > { %v7585_v3 = vpop.permute.xlu1 %2336  ;;  %6186 = vset.pattern.permute.xlu0 %v11458_v41  ;;  %v7588_v26 = vpop.permute.xlu0 %1497 }
 0x35c   : > { %11457 = vst [vmem:[#allocation94_spill] sm:$0xff] %v7585_v3  ;;  %11459 = vst [vmem:[#allocation95_spill] sm:$0xff] %v7588_v26  ;;  %6145 = vset.pattern.permute.xlu1 %v10980_v52  ;;  %1350 = vperm.xlu0 %6186, %v7581_v44   ;;  %v5486_v26 = vld [vmem:[#allocation2 + $0x20] sm:$0xff] }
 0x35d   : > { %2456 = vperm.xlu1 %6145, %v7356_v33   ;;  %v5510_v33 = vld [vmem:[#allocation2 + $0x22] sm:$0xff] }
 0x35f   : > { %v7599_v3 = vpop.permute.xlu0 %1673 }
 0x360   : > { %11461 = vst [vmem:[#allocation97_spill] sm:$0xff] %v7599_v3  ;;  %v7601_v9 = vpop.permute.xlu1 %1101  ;;  %6188 = vset.pattern.permute.xlu0 %v11463_v30  ;;  %v11467_v3 = vmov 7  }
 0x361   : > { %11462 = vst [vmem:[#allocation98_spill] sm:$0xff] %v7601_v9  ;;  %6146 = vset.pattern.permute.xlu1 %v11451_v43  ;;  %1526 = vperm.xlu0 %6188, %v7597_v8   ;;  %v5502_v9 = vmax.f32 %v5486_v26, %v6707_v38 }
 0x362   : > { %1169 = vperm.xlu1 %6146, %v7368_v7  }
 0x363   : > { %v7607_v52 = vpop.permute.xlu0 %1880  ;;  %v5518_v39 = vmax.f32 %v5502_v9, %v5510_v33  ;;  %v7638_v9 = vmul.f32 %v6763_v58, %v7348_v14  ;;  %v11475_v33 = vmov 13   ;;  %v11480_v14 = vmov 15  }
 0x364   : > { %11464 = vst [vmem:[#allocation99_spill] sm:$0xff] %v7607_v52  ;;  %v7613_v50 = vpop.permute.xlu1 %1233 }
 0x365   : > { %11466 = vst [vmem:[#allocation101_spill] sm:$0xff] %v7613_v50  ;;  %6190 = vset.pattern.permute.xlu0 %v11467_v3  ;;  %5526 = vst [vmem:[#allocation2 + $0x21] sm:$0xff] %v5518_v39  ;;  %v11471_v50 = vmov 11  }
 0x366   : > { %6148 = vset.pattern.permute.xlu1 %v11458_v41  ;;  %1702 = vperm.xlu0 %6190, %v7611_v20   ;;  %11474 = vst [vmem:[#allocation107_spill] sm:$0xff] %v7638_v9 }
 0x367   : > { %1345 = vperm.xlu1 %6148, %v7390_v28  }
 0x368   : > { %v7620_v52 = vpop.permute.xlu1 %1409  ;;  %v7622_v56 = vpop.permute.xlu0 %1116 }
 0x369   : > { %11468 = vst [vmem:[#allocation102_spill] sm:$0xff] %v7620_v52  ;;  %11469 = vst [vmem:[#allocation103_spill] sm:$0xff] %v7622_v56  ;;  %v7650_v56 = vmul.f32 %v6763_v58, %v7363_v17  ;;  %v11484_v17 = vmov 17  }
 0x36a   : > { %6193 = vset.pattern.permute.xlu0 %v11471_v50 }
 0x36b   : > { %6150 = vset.pattern.permute.xlu1 %v11463_v30  ;;  %1956 = vperm.xlu0 %6193, %v7626_v60   ;;  %11478 = vst [vmem:[#allocation110_spill] sm:$0xff] %v7650_v56 }
 0x36c   : > { %v7631_v38 = vpop.permute.xlu1 %1585  ;;  %1521 = vperm.xlu1 %6150, %v7406_v35  }
 0x36d   : > { %11472 = vst [vmem:[#allocation105_spill] sm:$0xff] %v7631_v38  ;;  %v7634_v26 = vpop.permute.xlu0 %2340 }
 0x36e   : > { %11473 = vst [vmem:[#allocation106_spill] sm:$0xff] %v7634_v26 }
 0x36f   : > { %6195 = vset.pattern.permute.xlu0 %v11475_v33 }
 0x370   : > { %v7641_v37 = vpop.permute.xlu1 %1761  ;;  %6152 = vset.pattern.permute.xlu1 %v11467_v3  ;;  %2052 = vperm.xlu0 %6195, %v7638_v9  }
 0x371   : > { %11476 = vst [vmem:[#allocation108_spill] sm:$0xff] %v7641_v37  ;;  %1697 = vperm.xlu1 %6152, %v7422_v31   ;;  %v7662_v31 = vmul.f32 %v6763_v58, %v7381_v18  ;;  %v5487_v37 = vld [vmem:[#allocation2 + $0x30] sm:$0xff]  ;;  %v11486_v58 = vmov 19  }
 0x372   : > { %v7646_v39 = vpop.permute.xlu0 %1106  ;;  %v5503_v38 = vmax.f32 %v5487_v37, %v6712_v40  ;;  %v11487_v40 = vmov 21  }
 0x373   : > { %11477 = vst [vmem:[#allocation109_spill] sm:$0xff] %v7646_v39  ;;  %11482 = vst [vmem:[#allocation113_spill] sm:$0xff] %v7662_v31 }
 0x374   : > { %v7652_v26 = vpop.permute.xlu1 %2328  ;;  %6197 = vset.pattern.permute.xlu0 %v11480_v14 }
 0x375   : > { %11479 = vst [vmem:[#allocation111_spill] sm:$0xff] %v7652_v26  ;;  %6155 = vset.pattern.permute.xlu1 %v11471_v50  ;;  %2148 = vperm.xlu0 %6197, %v7650_v56   ;;  %v5511_v26 = vld [vmem:[#allocation2 + $0x32] sm:$0xff] }
 0x376   : > { %1952 = vperm.xlu1 %6155, %v7305_v27  }
 0x377   : > { %v7658_v35 = vpop.permute.xlu0 %2332 }
 0x378   : > { %11481 = vst [vmem:[#allocation112_spill] sm:$0xff] %v7658_v35  ;;  %v5519_v35 = vmax.f32 %v5503_v38, %v5511_v26 }
 0x379   : > { %v7664_v39 = vpop.permute.xlu1 %1892  ;;  %6199 = vset.pattern.permute.xlu0 %v11484_v17 }
 0x37a   : > { %11483 = vst [vmem:[#allocation114_spill] sm:$0xff] %v7664_v39  ;;  %6157 = vset.pattern.permute.xlu1 %v11475_v33  ;;  %2244 = vperm.xlu0 %6199, %v7662_v31   ;;  %5527 = vst [vmem:[#allocation2 + $0x31] sm:$0xff] %v5519_v35  ;;  %v7689_v35 = vmul.f32 %v6791_v1, %v7448_v45 }
 0x37b   : > { %2048 = vperm.xlu1 %6157, %v7316_v0  }
 0x37c   : > { %v7671_v27 = vpop.permute.xlu0 %1257  ;;  %11489 = vst [vmem:[#allocation117_spill] sm:$0xff] %v7689_v35 }
 0x37d   : > { %v7673_v52 = vpop.permute.xlu1 %1884 }
 0x37e   : > { %11485 = vst [vmem:[#allocation115_spill] sm:$0xff] %v7673_v52  ;;  %6200 = vset.pattern.permute.xlu0 %v11486_v58  ;;  %v7699_v52 = vmul.f32 %v6791_v1, %v7459_v34 }
 0x37f   : > { %6159 = vset.pattern.permute.xlu1 %v11480_v14  ;;  %2356 = vperm.xlu0 %6200, %v7567_v61  }
 0x380   : > { %2144 = vperm.xlu1 %6159, %v7334_v23   ;;  %11491 = vst [vmem:[#allocation119_spill] sm:$0xff] %v7699_v52 }
 0x381   : > { %v7679_v18 = vpop.permute.xlu0 %1433 }
 0x382   : > { %v1180_v39 = vpop.permute.xlu1 %1179 }
 0x383   : > { %6202 = vset.pattern.permute.xlu0 %v11487_v40  ;;  %v1209_v0 = vmul.f32 %v1180_v39, %v6976_v54  ;;  %v7734_v39 = vmul.f32 %v6791_v1, %v7431_v4  ;;  %v7746_v4 = vmul.f32 %v6791_v1, %v7438_v48  ;;  %v7758_v48 = vmul.f32 %v6791_v1, %v7450_v59  ;;  %v7771_v59 = vld [vmem:[#allocation2 + $0x90] sm:$0xff] }
 0x384   : > { %6161 = vset.pattern.permute.xlu1 %v11484_v17  ;;  %2452 = vperm.xlu0 %6202, %v7581_v44   ;;  %11501 = vst [vmem:[#allocation129_spill] sm:$0xff] %v7771_v59 }
 0x385   : > { %2240 = vperm.xlu1 %6161, %v7352_v55   ;;  %11496 = vst [vmem:[#allocation124_spill] sm:$0xff] %v7734_v39  ;;  %11497 = vst [vmem:[#allocation125_spill] sm:$0xff] %v7746_v4 }
 0x386   : > { %v7685_v38 = vpop.permute.xlu0 %1609  ;;  %11499 = vst [vmem:[#allocation127_spill] sm:$0xff] %v7758_v48 }
 0x387   : > { %11488 = vst [vmem:[#allocation116_spill] sm:$0xff] %v7685_v38  ;;  %v1268_v26 = vpop.permute.xlu1 %1267 }
 0x388   : > { %6203 = vset.pattern.permute.xlu0 %v11451_v43 }
 0x389   : > { %6162 = vset.pattern.permute.xlu1 %v11486_v58  ;;  %1199 = vperm.xlu0 %6203, %v7689_v35  }
 0x38a   : > { %2352 = vperm.xlu1 %6162, %v7368_v7   ;;  %v7709_v7 = vmul.f32 %v6791_v1, %v7469_v29  ;;  %v1121_v29 = vmul.f32 %v7266_v10, %v7577_v53 }
 0x38b   : > { %v7695_v37 = vpop.permute.xlu0 %1785 }
 0x38c   : > { %11490 = vst [vmem:[#allocation118_spill] sm:$0xff] %v7695_v37  ;;  %v1356_v55 = vpop.permute.xlu1 %1355  ;;  %11493 = vst [vmem:[#allocation121_spill] sm:$0xff] %v7709_v7  ;;  %v1297_v37 = vmul.f32 %v1268_v26, %v7018_v13 }
 0x38d   : > { %6205 = vset.pattern.permute.xlu0 %v11458_v41 }
 0x38e   : > { %6164 = vset.pattern.permute.xlu1 %v11487_v40  ;;  %1375 = vperm.xlu0 %6205, %v7699_v52  }
 0x38f   : > { %2448 = vperm.xlu1 %6164, %v7390_v28   ;;  %v7719_v28 = vmul.f32 %v6791_v1, %v7480_v16  ;;  %v1385_v16 = vmul.f32 %v1356_v55, %v7082_v24 }
 0x390   : > { %v7705_v45 = vpop.permute.xlu0 %1904 }
 0x391   : > { %11492 = vst [vmem:[#allocation120_spill] sm:$0xff] %v7705_v45  ;;  %v1444_v23 = vpop.permute.xlu1 %1443  ;;  %11495 = vst [vmem:[#allocation123_spill] sm:$0xff] %v7719_v28 }
 0x392   : > { %6207 = vset.pattern.permute.xlu0 %v11463_v30  ;;  %v1473_v10 = vmul.f32 %v1444_v23, %v6954_v36 }
 0x393   : > { %6165 = vset.pattern.permute.xlu1 %v11451_v43  ;;  %1551 = vperm.xlu0 %6207, %v7709_v7   ;;  %v1217_v7 = vadd.f32 %v1209_v0, %v1121_v29 }
 0x394   : > { %1184 = vperm.xlu1 %6165, %v7506_v21  }
 0x395   : > { %v7715_v34 = vpop.permute.xlu0 %2000  ;;  %v1305_v38 = vadd.f32 %v1297_v37, %v1217_v7 }
 0x396   : > { %11494 = vst [vmem:[#allocation122_spill] sm:$0xff] %v7715_v34  ;;  %v1532_v52 = vpop.permute.xlu1 %1531 }
 0x397   : > { %6209 = vset.pattern.permute.xlu0 %v11467_v3  ;;  %v1393_v26 = vadd.f32 %v1385_v16, %v1305_v38  ;;  %v1561_v0 = vmul.f32 %v1532_v52, %v6990_v63 }
 0x398   : > { %6167 = vset.pattern.permute.xlu1 %v11458_v41  ;;  %1727 = vperm.xlu0 %6209, %v7719_v28  }
 0x399   : > { %1360 = vperm.xlu1 %6167, %v7518_v6   ;;  %v1481_v7 = vadd.f32 %v1473_v10, %v1393_v26 }
 0x39a   : > { %v7730_v34 = vpop.permute.xlu0 %2096 }
 0x39b   : > { %v1620_v45 = vpop.permute.xlu1 %1619  ;;  %v1569_v29 = vadd.f32 %v1561_v0, %v1481_v7  ;;  %v7769_v7 = vmul.f32 %v6791_v1, %v7462_v51  ;;  %v11504_v51 = vld [vmem:[#allocation8_spill] sm:$0xff] }
 0x39c   : > { %6212 = vset.pattern.permute.xlu0 %v11471_v50  ;;  %v1649_v23 = vmul.f32 %v1620_v45, %v7248_v19 }
 0x39d   : > { %6169 = vset.pattern.permute.xlu1 %v11463_v30  ;;  %1976 = vperm.xlu0 %6212, %v7734_v39   ;;  %11500 = vst [vmem:[#allocation128_spill] sm:$0xff] %v7769_v7 }
 0x39e   : > { %1536 = vperm.xlu1 %6169, %v7531_v22   ;;  %v1657_v52 = vadd.f32 %v1649_v23, %v1569_v29  ;;  %v5513_v22 = vld [vmem:[#allocation2 + $0x52] sm:$0xff] }
 0x39f   : > { %v7742_v55 = vpop.permute.xlu0 %2192 }
 0x3a0   : > { %v1708_v37 = vpop.permute.xlu1 %1707 }
 0x3a1   : > { %6214 = vset.pattern.permute.xlu0 %v11475_v33  ;;  %v1737_v28 = vmul.f32 %v1708_v37, %v6965_v46  ;;  %v11502_v37 = vld [vmem:[#allocation68_spill] sm:$0xff] }
 0x3a2   : > { %6171 = vset.pattern.permute.xlu1 %v11467_v3  ;;  %2072 = vperm.xlu0 %6214, %v7746_v4  }
 0x3a3   : > { %1712 = vperm.xlu1 %6171, %v7543_v42   ;;  %v1745_v16 = vadd.f32 %v1737_v28, %v1657_v52  ;;  %v5489_v42 = vld [vmem:[#allocation2 + $0x50] sm:$0xff] }
 0x3a4   : > { %v7754_v38 = vpop.permute.xlu0 %2400 }
 0x3a5   : > { %11498 = vst [vmem:[#allocation126_spill] sm:$0xff] %v7754_v38  ;;  %v1796_v45 = vpop.permute.xlu1 %1795 }
 0x3a6   : > { %v1825_v10 = vmul.f32 %v1796_v45, %v7008_v62  ;;  %6216 = vset.pattern.permute.xlu0 %v11480_v14  ;;  %v7788_v45 = vmul.f32 %v11504_v51, %v7492_v32 }
 0x3a7   : > { %6174 = vset.pattern.permute.xlu1 %v11471_v50  ;;  %2168 = vperm.xlu0 %6216, %v7758_v48  }
 0x3a8   : > { %v1833_v26 = vadd.f32 %v1825_v10, %v1745_v16  ;;  %1964 = vperm.xlu1 %6174, %v7454_v57   ;;  %11505 = vst [vmem:[#allocation8_spill] sm:$0xff] %v7788_v45  ;;  %v11506_v10 = vld [vmem:[#allocation72_spill] sm:$0xff] }
 0x3a9   : > { %v7765_v0 = vpop.permute.xlu0 %1272 }
 0x3aa   : > { %v1849_v28 = vadd.f32 %v7771_v59, %v1833_v26  ;;  %v1913_v23 = vpop.permute.xlu1 %1912 }
 0x3ab   : > { %6218 = vset.pattern.permute.xlu0 %v11484_v17 }
 0x3ac   : > { %1857 = vst [vmem:[#allocation3 + $0x20] sm:$0xff] %v1849_v28  ;;  %6176 = vset.pattern.permute.xlu1 %v11475_v33  ;;  %2264 = vperm.xlu0 %6218, %v7769_v7   ;;  %v11508_v28 = vld [vmem:[#allocation74_spill] sm:$0xff] }
 0x3ad   : > { %2060 = vperm.xlu1 %6176, %v11502_v37   ;;  %v7798_v38 = vmul.f32 %v11504_v51, %v11508_v28  ;;  %v1937_v28 = vmul.f32 %v1913_v23, %v6976_v54 }
 0x3ae   : > { %v7778_v29 = vpop.permute.xlu0 %1448 }
 0x3af   : > { %v1961_v52 = vpop.permute.xlu1 %1960  ;;  %11509 = vst [vmem:[#allocation74_spill] sm:$0xff] %v7798_v38 }
 0x3b0   : > { %6219 = vset.pattern.permute.xlu0 %v11486_v58 }
 0x3b1   : > { %6178 = vset.pattern.permute.xlu1 %v11480_v14  ;;  %2376 = vperm.xlu0 %6219, %v7689_v35  }
 0x3b2   : > { %2156 = vperm.xlu1 %6178, %v7478_v2  }
 0x3b3   : > { %v7784_v1 = vpop.permute.xlu0 %1624 }
 0x3b4   : > { %11503 = vst [vmem:[#allocation130_spill] sm:$0xff] %v7784_v1  ;;  %v2009_v16 = vpop.permute.xlu1 %2008 }
 0x3b5   : > { %6221 = vset.pattern.permute.xlu0 %v11451_v43  ;;  %v11512_v43 = vld [vmem:[#allocation4_spill] sm:$0xff]  ;;  %v2033_v23 = vmul.f32 %v2009_v16, %v7082_v24 }
 0x3b6   : > { %6180 = vset.pattern.permute.xlu1 %v11484_v17  ;;  %1189 = vperm.xlu0 %6221, %v7788_v45   ;;  %v5505_v37 = vmax.f32 %v5489_v42, %v11512_v43  ;;  %v7824_v43 = vmul.f32 %v11504_v51, %v7522_v49 }
 0x3b7   : > { %2252 = vperm.xlu1 %6180, %v11506_v10   ;;  %v7808_v10 = vmul.f32 %v11504_v51, %v7511_v5 }
 0x3b8   : > { %v7794_v26 = vpop.permute.xlu0 %1800  ;;  %11514 = vst [vmem:[#allocation4_spill] sm:$0xff] %v7824_v43 }
 0x3b9   : > { %11507 = vst [vmem:[#allocation131_spill] sm:$0xff] %v7794_v26  ;;  %v2057_v57 = vpop.permute.xlu1 %2056  ;;  %11511 = vst [vmem:[#allocation133_spill] sm:$0xff] %v7808_v10 }
 0x3ba   : > { %6223 = vset.pattern.permute.xlu0 %v11458_v41  ;;  %v11513_v41 = vld [vmem:[#allocation40_spill] sm:$0xff] }
 0x3bb   : > { %6181 = vset.pattern.permute.xlu1 %v11486_v58  ;;  %1365 = vperm.xlu0 %6223, %v7798_v38   ;;  %v1897_v26 = vmul.f32 %v11513_v41, %v7577_v53 }
 0x3bc   : > { %2364 = vperm.xlu1 %6181, %v7506_v21   ;;  %v1985_v21 = vmul.f32 %v1961_v52, %v7018_v13  ;;  %v2081_v52 = vmul.f32 %v2057_v57, %v6954_v36 }
 0x3bd   : > { %v7804_v32 = vpop.permute.xlu0 %1916  ;;  %v1945_v5 = vadd.f32 %v1937_v28, %v1897_v26  ;;  %v11516_v26 = vld [vmem:[#allocation69_spill] sm:$0xff] }
 0x3be   : > { %11510 = vst [vmem:[#allocation132_spill] sm:$0xff] %v7804_v32  ;;  %v2105_v2 = vpop.permute.xlu1 %2104  ;;  %v5521_v32 = vmax.f32 %v5505_v37, %v5513_v22  ;;  %v7836_v49 = vmul.f32 %v11504_v51, %v11516_v26  ;;  %v11519_v26 = vld [vmem:[#allocation71_spill] sm:$0xff] }
 0x3bf   : > { %6225 = vset.pattern.permute.xlu0 %v11463_v30  ;;  %v1993_v42 = vadd.f32 %v1985_v21, %v1945_v5  ;;  %v11515_v30 = vmov 2   ;;  %v2129_v37 = vmul.f32 %v2105_v2, %v6990_v63 }
 0x3c0   : > { %6183 = vset.pattern.permute.xlu1 %v11487_v40  ;;  %1541 = vperm.xlu0 %6225, %v7808_v10   ;;  %5529 = vst [vmem:[#allocation2 + $0x51] sm:$0xff] %v5521_v32  ;;  %11517 = vst [vmem:[#allocation40_spill] sm:$0xff] %v7836_v49 }
 0x3c1   : > { %2460 = vperm.xlu1 %6183, %v7518_v6   ;;  %v2041_v22 = vadd.f32 %v2033_v23, %v1993_v42  ;;  %v11518_v23 = vmov 4  }
 0x3c2   : > { %v7820_v1 = vpop.permute.xlu0 %2012 }
 0x3c3   : > { %v2153_v41 = vpop.permute.xlu1 %2152  ;;  %v2089_v21 = vadd.f32 %v2081_v52, %v2041_v22  ;;  %v7848_v52 = vmul.f32 %v11504_v51, %v11519_v26 }
 0x3c4   : > { %6227 = vset.pattern.permute.xlu0 %v11467_v3  ;;  %v2177_v57 = vmul.f32 %v2153_v41, %v7248_v19 }
 0x3c5   : > { %6185 = vset.pattern.permute.xlu1 %v11515_v30  ;;  %1717 = vperm.xlu0 %6227, %v7824_v43   ;;  %v2137_v28 = vadd.f32 %v2129_v37, %v2089_v21  ;;  %11520 = vst [vmem:[#allocation69_spill] sm:$0xff] %v7848_v52  ;;  %v11521_v37 = vmov 6  }
 0x3c6   : > { %1262 = vperm.xlu1 %6185, %v7626_v60  }
 0x3c7   : > { %v7832_v16 = vpop.permute.xlu0 %2108  ;;  %v2185_v2 = vadd.f32 %v2177_v57, %v2137_v28  ;;  %v2289_v57 = vld [vmem:[#allocation3 + $0x21] sm:$0xff] }
 0x3c8   : > { %v2201_v32 = vpop.permute.xlu1 %2200  ;;  %v11523_v28 = vld [vmem:[#allocation73_spill] sm:$0xff] }
 0x3c9   : > { %6230 = vset.pattern.permute.xlu0 %v11471_v50  ;;  %v2225_v5 = vmul.f32 %v2201_v32, %v6965_v46  ;;  %v7859_v26 = vmul.f32 %v11504_v51, %v11523_v28  ;;  %v11544_v50 = vld [vmem:[#allocation16_spill] sm:$0xff] }
 0x3ca   : > { %6187 = vset.pattern.permute.xlu1 %v11518_v23  ;;  %1968 = vperm.xlu0 %6230, %v7836_v49  }
 0x3cb   : > { %1438 = vperm.xlu1 %6187, %v7638_v9   ;;  %v2233_v22 = vadd.f32 %v2225_v5, %v2185_v2  ;;  %11524 = vst [vmem:[#allocation73_spill] sm:$0xff] %v7859_v26  ;;  %v7863_v2 = vld [vmem:[#allocation2 + $0x60] sm:$0xff] }
 0x3cc   : > { %v7844_v42 = vpop.permute.xlu0 %2204  ;;  %11526 = vst [vmem:[#allocation135_spill] sm:$0xff] %v7863_v2  ;;  %v11539_v2 = vld [vmem:[#allocation51_spill] sm:$0xff] }
 0x3cd   : > { %v2249_v41 = vpop.permute.xlu1 %2248 }
 0x3ce   : > { %v2273_v6 = vmul.f32 %v2249_v41, %v7008_v62  ;;  %6232 = vset.pattern.permute.xlu0 %v11475_v33  ;;  %v7866_v41 = vld [vmem:[#allocation2 + $0x60] sm:$0xff] }
 0x3cf   : > { %6189 = vset.pattern.permute.xlu1 %v11521_v37  ;;  %2064 = vperm.xlu0 %6232, %v7848_v52   ;;  %11527 = vst [vmem:[#allocation136_spill] sm:$0xff] %v7866_v41  ;;  %5469 = vst [vmem:[#allocation2 + $0x60] sm:$0xff] %v11388_v47 }
 0x3d0   : > { %v2281_v21 = vadd.f32 %v2273_v6, %v2233_v22  ;;  %1614 = vperm.xlu1 %6189, %v7650_v56   ;;  %v11528_v6 = vmov 8   ;;  %v11529_v22 = vld [vmem:[#allocation5_spill] sm:$0xff]  ;;  %v11536_v56 = vmov 12  }
 0x3d1   : > { %v7855_v32 = vpop.permute.xlu0 %2412  ;;  %5482 = vst [vmem:[#allocation2 + $0x61] sm:$0xff] %v11529_v22 }
 0x3d2   : > { %11522 = vst [vmem:[#allocation71_spill] sm:$0xff] %v7855_v32  ;;  %v2297_v9 = vadd.f32 %v2289_v57, %v2281_v21  ;;  %v7861_v5 = vpop.permute.xlu1 %2360  ;;  %v11530_v57 = vld [vmem:[#allocation75_spill] sm:$0xff] }
 0x3d3   : > { %11525 = vst [vmem:[#allocation134_spill] sm:$0xff] %v7861_v5  ;;  %6234 = vset.pattern.permute.xlu0 %v11480_v14  ;;  %v7877_v28 = vmul.f32 %v11504_v51, %v11530_v57  ;;  %v11542_v14 = vld [vmem:[#allocation6_spill] sm:$0xff] }
 0x3d4   : > { %2305 = vst [vmem:[#allocation3 + $0x21] sm:$0xff] %v2297_v9  ;;  %6191 = vset.pattern.permute.xlu1 %v11528_v6  ;;  %2160 = vperm.xlu0 %6234, %v7859_v26   ;;  %v11533_v9 = vmov 10   ;;  %v7908_v33 = vmul.f32 %v11542_v14, %v7545_v12  ;;  %v7921_v12 = vmul.f32 %v11542_v14, %v7553_v25  ;;  %v11552_v25 = vld [vmem:[#allocation86_spill] sm:$0xff] }
 0x3d5   : > { %1790 = vperm.xlu1 %6191, %v7662_v31   ;;  %11531 = vst [vmem:[#allocation5_spill] sm:$0xff] %v7877_v28 }
 0x3d6   : > { %v7873_v21 = vpop.permute.xlu0 %1174  ;;  %11543 = vst [vmem:[#allocation6_spill] sm:$0xff] %v7908_v33  ;;  %11547 = vst [vmem:[#allocation141_spill] sm:$0xff] %v7921_v12 }
 0x3d7   : > { %v7879_v5 = vpop.permute.xlu1 %2408 }
 0x3d8   : > { %11532 = vst [vmem:[#allocation75_spill] sm:$0xff] %v7879_v5  ;;  %6236 = vset.pattern.permute.xlu0 %v11484_v17  ;;  %v11538_v5 = vld [vmem:[#allocation38_spill] sm:$0xff] }
 0x3d9   : > { %6192 = vset.pattern.permute.xlu1 %v11533_v9  ;;  %2256 = vperm.xlu0 %6236, %v7877_v28   ;;  %v1119_v41 = vmul.f32 %v7771_v59, %v11538_v5 }
 0x3da   : > { %1908 = vperm.xlu1 %6192, %v7567_v61  }
 0x3db   : > { %v7885_v32 = vpop.permute.xlu0 %1350 }
 0x3dc   : > { %11534 = vst [vmem:[#allocation137_spill] sm:$0xff] %v7885_v32  ;;  %v7887_v31 = vpop.permute.xlu1 %2456 }
 0x3dd   : > { %11535 = vst [vmem:[#allocation138_spill] sm:$0xff] %v7887_v31  ;;  %6237 = vset.pattern.permute.xlu0 %v11486_v58  ;;  %v11540_v31 = vld [vmem:[#allocation50_spill] sm:$0xff] }
 0x3de   : > { %6194 = vset.pattern.permute.xlu1 %v11536_v56  ;;  %2368 = vperm.xlu0 %6237, %v7788_v45   ;;  %v1295_v58 = vmul.f32 %v7671_v27, %v11540_v31  ;;  %v11545_v27 = vld [vmem:[#allocation11_spill] sm:$0xff] }
 0x3df   : > { %2004 = vperm.xlu1 %6194, %v7581_v44  }
 0x3e0   : > { %v7893_v51 = vpop.permute.xlu0 %1526 }
 0x3e1   : > { %11537 = vst [vmem:[#allocation139_spill] sm:$0xff] %v7893_v51  ;;  %v1170_v57 = vpop.permute.xlu1 %1169  ;;  %v11549_v51 = vmov 20  }
 0x3e2   : > { %v1207_v61 = vmul.f32 %v1170_v57, %v11539_v2  ;;  %6239 = vset.pattern.permute.xlu0 %v11487_v40 }
 0x3e3   : > { %6196 = vset.pattern.permute.xlu1 %v11436_v15  ;;  %2464 = vperm.xlu0 %6239, %v7798_v38  }
 0x3e4   : > { %v1215_v17 = vadd.f32 %v1207_v61, %v1119_v41  ;;  %2100 = vperm.xlu1 %6196, %v7597_v8   ;;  %v1471_v61 = vmul.f32 %v7679_v18, %v11545_v27 }
 0x3e5   : > { %v7904_v44 = vpop.permute.xlu0 %1702 }
 0x3e6   : > { %11541 = vst [vmem:[#allocation38_spill] sm:$0xff] %v7904_v44  ;;  %v1346_v5 = vpop.permute.xlu1 %1345  ;;  %v1303_v57 = vadd.f32 %v1295_v58, %v1215_v17 }
 0x3e7   : > { %v1383_v3 = vmul.f32 %v1346_v5, %v11544_v50  ;;  %6241 = vset.pattern.permute.xlu0 %v11515_v30  ;;  %v11548_v5 = vld [vmem:[#allocation17_spill] sm:$0xff] }
 0x3e8   : > { %6198 = vset.pattern.permute.xlu1 %v11443_v11  ;;  %1292 = vperm.xlu0 %6241, %v7908_v33  }
 0x3e9   : > { %v1391_v41 = vadd.f32 %v1383_v3, %v1303_v57  ;;  %2196 = vperm.xlu1 %6198, %v7611_v20   ;;  %v11550_v3 = vld [vmem:[#allocation116_spill] sm:$0xff] }
 0x3ea   : > { %v7917_v8 = vpop.permute.xlu0 %1956  ;;  %v1647_v18 = vmul.f32 %v11550_v3, %v7577_v53 }
 0x3eb   : > { %11546 = vst [vmem:[#allocation140_spill] sm:$0xff] %v7917_v8  ;;  %v1522_v17 = vpop.permute.xlu1 %1521  ;;  %v1479_v58 = vadd.f32 %v1471_v61, %v1391_v41  ;;  %v7934_v8 = vmul.f32 %v11542_v14, %v11552_v25  ;;  %v11556_v25 = vld [vmem:[#allocation56_spill] sm:$0xff] }
 0x3ec   : > { %v1559_v44 = vmul.f32 %v1522_v17, %v11548_v5  ;;  %6243 = vset.pattern.permute.xlu0 %v11518_v23 }
 0x3ed   : > { %6201 = vset.pattern.permute.xlu1 %v11549_v51  ;;  %1468 = vperm.xlu0 %6243, %v7921_v12   ;;  %11553 = vst [vmem:[#allocation86_spill] sm:$0xff] %v7934_v8  ;;  %v11554_v12 = vld [vmem:[#allocation120_spill] sm:$0xff] }
 0x3ee   : > { %v1567_v57 = vadd.f32 %v1559_v44, %v1479_v58  ;;  %2404 = vperm.xlu1 %6201, %v7626_v60   ;;  %v1935_v32 = vmul.f32 %v11554_v12, %v11539_v2  ;;  %v11555_v44 = vld [vmem:[#allocation118_spill] sm:$0xff] }
 0x3ef   : > { %v7930_v20 = vpop.permute.xlu0 %2052  ;;  %v1823_v58 = vmul.f32 %v11555_v44, %v7018_v13 }
 0x3f0   : > { %11551 = vst [vmem:[#allocation116_spill] sm:$0xff] %v7930_v20  ;;  %v1698_v61 = vpop.permute.xlu1 %1697  ;;  %v1655_v41 = vadd.f32 %v1647_v18, %v1567_v57  ;;  %v1895_v18 = vmul.f32 %v7771_v59, %v11556_v25 }
 0x3f1   : > { %v1735_v17 = vmul.f32 %v1698_v61, %v6976_v54  ;;  %6245 = vset.pattern.permute.xlu0 %v11521_v37  ;;  %v11558_v61 = vld [vmem:[#allocation89_spill] sm:$0xff] }
 0x3f2   : > { %6204 = vset.pattern.permute.xlu1 %v11515_v30  ;;  %1644 = vperm.xlu0 %6245, %v7934_v8   ;;  %v7951_v60 = vmul.f32 %v11542_v14, %v11558_v61  ;;  %v1943_v20 = vadd.f32 %v1935_v32, %v1895_v18  ;;  %v11562_v32 = vld [vmem:[#allocation77_spill] sm:$0xff] }
 0x3f3   : > { %v1743_v3 = vadd.f32 %v1735_v17, %v1655_v41  ;;  %1287 = vperm.xlu1 %6204, %v7734_v39   ;;  %v11560_v17 = vld [vmem:[#allocation122_spill] sm:$0xff] }
 0x3f4   : > { %v7947_v57 = vpop.permute.xlu0 %2148  ;;  %11559 = vst [vmem:[#allocation118_spill] sm:$0xff] %v7951_v60  ;;  %v2031_v44 = vmul.f32 %v11560_v17, %v11544_v50 }
 0x3f5   : > { %11557 = vst [vmem:[#allocation120_spill] sm:$0xff] %v7947_v57  ;;  %v1831_v12 = vadd.f32 %v1823_v58, %v1743_v3  ;;  %v1953_v2 = vpop.permute.xlu1 %1952 }
 0x3f6   : > { %v1983_v8 = vmul.f32 %v1953_v2, %v11540_v31  ;;  %6247 = vset.pattern.permute.xlu0 %v11528_v6  ;;  %v7965_v2 = vmul.f32 %v11542_v14, %v11562_v32  ;;  %v11584_v31 = vld [vmem:[#allocation53_spill] sm:$0xff] }
 0x3f7   : > { %v1847_v41 = vadd.f32 %v7771_v59, %v1831_v12  ;;  %6206 = vset.pattern.permute.xlu1 %v11518_v23  ;;  %1820 = vperm.xlu0 %6247, %v7951_v60  }
 0x3f8   : > { %v1991_v25 = vadd.f32 %v1983_v8, %v1943_v20  ;;  %1463 = vperm.xlu1 %6206, %v7746_v4   ;;  %11563 = vst [vmem:[#allocation89_spill] sm:$0xff] %v7965_v2  ;;  %v2127_v8 = vmul.f32 %v7730_v34, %v11548_v5  ;;  %v2223_v34 = vmul.f32 %v7742_v55, %v6976_v54 }
 0x3f9   : > { %1855 = vst [vmem:[#allocation3] sm:$0xff] %v1847_v41  ;;  %v7961_v58 = vpop.permute.xlu0 %2244  ;;  %v11565_v41 = vld [vmem:[#allocation79_spill] sm:$0xff] }
 0x3fa   : > { %11561 = vst [vmem:[#allocation56_spill] sm:$0xff] %v7961_v58  ;;  %v2049_v3 = vpop.permute.xlu1 %2048  ;;  %v2039_v18 = vadd.f32 %v2031_v44, %v1991_v25  ;;  %v7978_v17 = vmul.f32 %v11542_v14, %v11565_v41 }
 0x3fb   : > { %v2079_v61 = vmul.f32 %v2049_v3, %v11545_v27  ;;  %6248 = vset.pattern.permute.xlu0 %v11533_v9 }
 0x3fc   : > { %6208 = vset.pattern.permute.xlu1 %v11521_v37  ;;  %1932 = vperm.xlu0 %6248, %v7965_v2   ;;  %11566 = vst [vmem:[#allocation77_spill] sm:$0xff] %v7978_v17 }
 0x3fd   : > { %v2087_v20 = vadd.f32 %v2079_v61, %v2039_v18  ;;  %1639 = vperm.xlu1 %6208, %v7758_v48   ;;  %v11568_v61 = vld [vmem:[#allocation82_spill] sm:$0xff]  ;;  %v11585_v48 = vld [vmem:[#allocation123_spill] sm:$0xff] }
 0x3fe   : > { %v7974_v12 = vpop.permute.xlu0 %2356  ;;  %v7991_v41 = vmul.f32 %v11542_v14, %v11568_v61 }
 0x3ff   : > { %11564 = vst [vmem:[#allocation122_spill] sm:$0xff] %v7974_v12  ;;  %v2145_v44 = vpop.permute.xlu1 %2144  ;;  %v2135_v25 = vadd.f32 %v2127_v8, %v2087_v20 }
 0x400   : > { %v2175_v32 = vmul.f32 %v2145_v44, %v7577_v53  ;;  %6250 = vset.pattern.permute.xlu0 %v11536_v56  ;;  %11569 = vst [vmem:[#allocation82_spill] sm:$0xff] %v7991_v41 }
 0x401   : > { %6210 = vset.pattern.permute.xlu1 %v11528_v6  ;;  %2028 = vperm.xlu0 %6250, %v7978_v17  }
 0x402   : > { %v2183_v3 = vadd.f32 %v2175_v32, %v2135_v25  ;;  %1815 = vperm.xlu1 %6210, %v7769_v7   ;;  %v2287_v25 = vld [vmem:[#allocation3 + $0x1] sm:$0xff] }
 0x403   : > { %v7987_v18 = vpop.permute.xlu0 %2452 }
 0x404   : > { %11567 = vst [vmem:[#allocation79_spill] sm:$0xff] %v7987_v18  ;;  %v2241_v8 = vpop.permute.xlu1 %2240  ;;  %v2231_v20 = vadd.f32 %v2223_v34, %v2183_v3  ;;  %v11571_v18 = vld [vmem:[#allocation84_spill] sm:$0xff]  ;;  %v8006_v3 = vld [vmem:[#allocation2 + $0x92] sm:$0xff] }
 0x405   : > { %v2271_v44 = vmul.f32 %v2241_v8, %v7018_v13  ;;  %6252 = vset.pattern.permute.xlu0 %v11436_v15  ;;  %v8002_v61 = vmul.f32 %v11542_v14, %v11571_v18  ;;  %11574 = vst [vmem:[#allocation144_spill] sm:$0xff] %v8006_v3  ;;  %v8008_v8 = vld [vmem:[#allocation2 + $0x91] sm:$0xff] }
 0x406   : > { %6211 = vset.pattern.permute.xlu1 %v11533_v9  ;;  %2124 = vperm.xlu0 %6252, %v7991_v41   ;;  %11575 = vst [vmem:[#allocation145_spill] sm:$0xff] %v8008_v8  ;;  %5475 = vst [vmem:[#allocation2 + $0x90] sm:$0xff] %v11388_v47  ;;  %v11576_v14 = vld [vmem:[#allocation119_spill] sm:$0xff]  ;;  %v11587_v3 = vld [vmem:[#allocation102_spill] sm:$0xff] }
 0x407   : > { %v2279_v55 = vadd.f32 %v2271_v44, %v2231_v20  ;;  %1928 = vperm.xlu1 %6211, %v7689_v35   ;;  %11572 = vst [vmem:[#allocation84_spill] sm:$0xff] %v8002_v61  ;;  %5476 = vst [vmem:[#allocation2 + $0x98] sm:$0x3] %v11388_v47  ;;  %v11579_v44 = vld [vmem:[#allocation121_spill] sm:$0xff]  ;;  %v1298_v35 = vmul.f32 %v7765_v0, %v6990_v63  ;;  %v1474_v0 = vmul.f32 %v7778_v29, %v6965_v46 }
 0x408   : > { %v7998_v32 = vpop.permute.xlu0 %1199  ;;  %v11594_v29 = vld [vmem:[#allocation37_spill] sm:$0xff] }
 0x409   : > { %11570 = vst [vmem:[#allocation142_spill] sm:$0xff] %v7998_v32  ;;  %v2295_v12 = vadd.f32 %v2287_v25, %v2279_v55  ;;  %v8004_v34 = vpop.permute.xlu1 %2352  ;;  %v11582_v55 = vld [vmem:[#allocation9_spill] sm:$0xff] }
 0x40a   : > { %11573 = vst [vmem:[#allocation143_spill] sm:$0xff] %v8004_v34  ;;  %6254 = vset.pattern.permute.xlu0 %v11443_v11  ;;  %v1122_v34 = vmul.f32 %v11584_v31, %v7082_v24  ;;  %v8043_v8 = vmul.f32 %v11582_v55, %v11587_v3  ;;  %v11590_v3 = vld [vmem:[#allocation105_spill] sm:$0xff] }
 0x40b   : > { %2303 = vst [vmem:[#allocation3 + $0x1] sm:$0xff] %v2295_v12  ;;  %6213 = vset.pattern.permute.xlu1 %v11536_v56  ;;  %2220 = vperm.xlu0 %6254, %v8002_v61   ;;  %v11581_v12 = vld [vmem:[#allocation101_spill] sm:$0xff] }
 0x40c   : > { %2024 = vperm.xlu1 %6213, %v11576_v14   ;;  %v8028_v25 = vmul.f32 %v11582_v55, %v11581_v12  ;;  %11588 = vst [vmem:[#allocation53_spill] sm:$0xff] %v8043_v8 }
 0x40d   : > { %v8016_v18 = vpop.permute.xlu0 %1375 }
 0x40e   : > { %11577 = vst [vmem:[#allocation146_spill] sm:$0xff] %v8016_v18  ;;  %v8018_v20 = vpop.permute.xlu1 %2448  ;;  %11583 = vst [vmem:[#allocation101_spill] sm:$0xff] %v8028_v25  ;;  %v11600_v18 = vld [vmem:[#allocation24_spill] sm:$0xff] }
 0x40f   : > { %11578 = vst [vmem:[#allocation147_spill] sm:$0xff] %v8018_v20  ;;  %6257 = vset.pattern.permute.xlu0 %v11549_v51 }
 0x410   : > { %6215 = vset.pattern.permute.xlu1 %v11436_v15  ;;  %2428 = vperm.xlu0 %6257, %v7908_v33  }
 0x411   : > { %2120 = vperm.xlu1 %6215, %v11579_v44  }
 0x412   : > { %v8024_v47 = vpop.permute.xlu0 %1551 }
 0x413   : > { %11580 = vst [vmem:[#allocation148_spill] sm:$0xff] %v8024_v47  ;;  %v1185_v53 = vpop.permute.xlu1 %1184  ;;  %v8062_v47 = vld [vmem:[#allocation2 + $0x70] sm:$0xff] }
 0x414   : > { %v1210_v20 = vmul.f32 %v1185_v53, %v6954_v36  ;;  %6259 = vset.pattern.permute.xlu0 %v11515_v30  ;;  %11593 = vst [vmem:[#allocation150_spill] sm:$0xff] %v8062_v47 }
 0x415   : > { %6217 = vset.pattern.permute.xlu1 %v11443_v11  ;;  %1282 = vperm.xlu0 %6259, %v8028_v25  }
 0x416   : > { %v1218_v7 = vadd.f32 %v1210_v20, %v1122_v34  ;;  %2216 = vperm.xlu1 %6217, %v11585_v48  }
 0x417   : > { %v8039_v12 = vpop.permute.xlu0 %1727 }
 0x418   : > { %11586 = vst [vmem:[#allocation9_spill] sm:$0xff] %v8039_v12  ;;  %v1361_v31 = vpop.permute.xlu1 %1360  ;;  %v1306_v53 = vadd.f32 %v1298_v35, %v1218_v7  ;;  %v8056_v12 = vmul.f32 %v11582_v55, %v11590_v3 }
 0x419   : > { %v1386_v4 = vmul.f32 %v1361_v31, %v7248_v19  ;;  %6261 = vset.pattern.permute.xlu0 %v11518_v23  ;;  %v8058_v31 = vld [vmem:[#allocation2 + $0x70] sm:$0xff] }
 0x41a   : > { %6220 = vset.pattern.permute.xlu1 %v11549_v51  ;;  %1458 = vperm.xlu0 %6261, %v8043_v8   ;;  %11591 = vst [vmem:[#allocation105_spill] sm:$0xff] %v8056_v12  ;;  %11592 = vst [vmem:[#allocation149_spill] sm:$0xff] %v8058_v31 }
 0x41b   : > { %v1394_v34 = vadd.f32 %v1386_v4, %v1306_v53  ;;  %2424 = vperm.xlu1 %6220, %v7734_v39   ;;  %v6453_v4 = vld [vmem:[#allocation2] sm:$0xff]  ;;  %v11595_v53 = vld [vmem:[#allocation130_spill] sm:$0xff] }
 0x41c   : > { %v8052_v20 = vpop.permute.xlu0 %1976  ;;  %5471 = vst [vmem:[#allocation2 + $0x70] sm:$0xff] %v6453_v4  ;;  %v1650_v3 = vmul.f32 %v11595_v53, %v11594_v29  ;;  %v11601_v4 = vld [vmem:[#allocation132_spill] sm:$0xff] }
 0x41d   : > { %11589 = vst [vmem:[#allocation102_spill] sm:$0xff] %v8052_v20  ;;  %v1537_v35 = vpop.permute.xlu1 %1536  ;;  %v1482_v7 = vadd.f32 %v1474_v0, %v1394_v34  ;;  %v11596_v0 = vld [vmem:[#allocation7_spill] sm:$0xff]  ;;  %v1938_v53 = vmul.f32 %v11601_v4, %v6954_v36 }
 0x41e   : > { %v1562_v48 = vmul.f32 %v1537_v35, %v7008_v62  ;;  %6263 = vset.pattern.permute.xlu0 %v11521_v37  ;;  %5483 = vst [vmem:[#allocation2 + $0x71] sm:$0xff] %v11596_v0  ;;  %v11598_v35 = vld [vmem:[#allocation108_spill] sm:$0xff] }
 0x41f   : > { %6222 = vset.pattern.permute.xlu1 %v11515_v30  ;;  %1634 = vperm.xlu0 %6263, %v8056_v12   ;;  %v8074_v20 = vmul.f32 %v11582_v55, %v11598_v35  ;;  %v11604_v35 = vld [vmem:[#allocation59_spill] sm:$0xff] }
 0x420   : > { %v1570_v39 = vadd.f32 %v1562_v48, %v1482_v7  ;;  %1277 = vperm.xlu1 %6222, %v7836_v49   ;;  %v11602_v48 = vld [vmem:[#allocation28_spill] sm:$0xff]  ;;  %v11603_v7 = vld [vmem:[#allocation131_spill] sm:$0xff] }
 0x421   : > { %v8070_v34 = vpop.permute.xlu0 %2072  ;;  %11599 = vst [vmem:[#allocation130_spill] sm:$0xff] %v8074_v20 }
 0x422   : > { %11597 = vst [vmem:[#allocation37_spill] sm:$0xff] %v8070_v34  ;;  %v1713_v47 = vpop.permute.xlu1 %1712  ;;  %v1658_v30 = vadd.f32 %v1650_v3, %v1570_v39  ;;  %v1826_v34 = vmul.f32 %v11603_v7, %v11602_v48  ;;  %v1898_v39 = vmul.f32 %v11604_v35, %v7082_v24  ;;  %v2034_v7 = vmul.f32 %v7820_v1, %v7248_v19  ;;  %v5514_v1 = vld [vmem:[#allocation2 + $0x62] sm:$0xff] }
 0x423   : > { %v1738_v31 = vmul.f32 %v1713_v47, %v11600_v18  ;;  %6265 = vset.pattern.permute.xlu0 %v11528_v6  ;;  %v11605_v47 = vld [vmem:[#allocation87_spill] sm:$0xff] }
 0x424   : > { %6224 = vset.pattern.permute.xlu1 %v11518_v23  ;;  %1810 = vperm.xlu0 %6265, %v8074_v20   ;;  %v8091_v32 = vmul.f32 %v11582_v55, %v11605_v47  ;;  %v1946_v20 = vadd.f32 %v1938_v53, %v1898_v39  ;;  %v5490_v47 = vld [vmem:[#allocation2 + $0x60] sm:$0xff] }
 0x425   : > { %v1746_v60 = vadd.f32 %v1738_v31, %v1658_v30  ;;  %1453 = vperm.xlu1 %6224, %v7848_v52   ;;  %v5491_v23 = vld [vmem:[#allocation2 + $0x70] sm:$0xff] }
 0x426   : > { %v8087_v3 = vpop.permute.xlu0 %2168  ;;  %11606 = vst [vmem:[#allocation7_spill] sm:$0xff] %v8091_v32  ;;  %v5515_v58 = vld [vmem:[#allocation2 + $0x72] sm:$0xff]  ;;  %v5507_v31 = vmax.f32 %v5491_v23, %v11596_v0 }
 0x427   : > { %v1834_v4 = vadd.f32 %v1826_v34, %v1746_v60  ;;  %v1965_v12 = vpop.permute.xlu1 %1964 }
 0x428   : > { %v1986_v57 = vmul.f32 %v1965_v12, %v6990_v63  ;;  %6266 = vset.pattern.permute.xlu0 %v11533_v9  ;;  %v5523_v34 = vmax.f32 %v5507_v31, %v5515_v58  ;;  %v11607_v12 = vld [vmem:[#allocation90_spill] sm:$0xff]  ;;  %v2130_v58 = vmul.f32 %v7832_v16, %v7008_v62  ;;  %v11610_v31 = vld [vmem:[#allocation95_spill] sm:$0xff]  ;;  %v2226_v16 = vmul.f32 %v7844_v42, %v11600_v18 }
 0x429   : > { %v1850_v30 = vadd.f32 %v7771_v59, %v1834_v4  ;;  %6226 = vset.pattern.permute.xlu1 %v11521_v37  ;;  %1924 = vperm.xlu0 %6266, %v8091_v32   ;;  %v8106_v35 = vmul.f32 %v11582_v55, %v11607_v12  ;;  %v11612_v12 = vld [vmem:[#allocation97_spill] sm:$0xff] }
 0x42a   : > { %v1994_v60 = vadd.f32 %v1986_v57, %v1946_v20  ;;  %1629 = vperm.xlu1 %6226, %v7859_v26   ;;  %5531 = vst [vmem:[#allocation2 + $0x71] sm:$0xff] %v5523_v34  ;;  %v5506_v57 = vmax.f32 %v5490_v47, %v11529_v22 }
 0x42b   : > { %1858 = vst [vmem:[#allocation3 + $0x30] sm:$0xff] %v1850_v30  ;;  %v8102_v53 = vpop.permute.xlu0 %2264  ;;  %11608 = vst [vmem:[#allocation108_spill] sm:$0xff] %v8106_v35  ;;  %v8120_v30 = vmul.f32 %v11582_v55, %v11610_v31 }
 0x42c   : > { %v2061_v0 = vpop.permute.xlu1 %2060  ;;  %v2042_v39 = vadd.f32 %v2034_v7, %v1994_v60  ;;  %v5522_v23 = vmax.f32 %v5506_v57, %v5514_v1 }
 0x42d   : > { %v2082_v37 = vmul.f32 %v2061_v0, %v6965_v46  ;;  %6268 = vset.pattern.permute.xlu0 %v11536_v56  ;;  %11611 = vst [vmem:[#allocation132_spill] sm:$0xff] %v8120_v30  ;;  %v8133_v0 = vmul.f32 %v11582_v55, %v11612_v12 }
 0x42e   : > { %6228 = vset.pattern.permute.xlu1 %v11528_v6  ;;  %2020 = vperm.xlu0 %6268, %v8106_v35   ;;  %5530 = vst [vmem:[#allocation2 + $0x61] sm:$0xff] %v5522_v23 }
 0x42f   : > { %v2090_v20 = vadd.f32 %v2082_v37, %v2042_v39  ;;  %1805 = vperm.xlu1 %6228, %v7877_v28   ;;  %11613 = vst [vmem:[#allocation28_spill] sm:$0xff] %v8133_v0  ;;  %v11659_v28 = vld [vmem:[#allocation148_spill] sm:$0xff] }
 0x430   : > { %v8116_v4 = vpop.permute.xlu0 %2376 }
 0x431   : > { %11609 = vst [vmem:[#allocation24_spill] sm:$0xff] %v8116_v4  ;;  %v2157_v7 = vpop.permute.xlu1 %2156  ;;  %v2138_v60 = vadd.f32 %v2130_v58, %v2090_v20  ;;  %v1208_v20 = vmul.f32 %v7873_v21, %v11545_v27  ;;  %v11617_v21 = vld [vmem:[#allocation41_spill] sm:$0xff] }
 0x432   : > { %v2178_v6 = vmul.f32 %v2157_v7, %v11594_v29  ;;  %6270 = vset.pattern.permute.xlu0 %v11436_v15 }
 0x433   : > { %6229 = vset.pattern.permute.xlu1 %v11533_v9  ;;  %2116 = vperm.xlu0 %6270, %v8120_v30   ;;  %v2290_v9 = vld [vmem:[#allocation3 + $0x31] sm:$0xff] }
 0x434   : > { %v2186_v22 = vadd.f32 %v2178_v6, %v2138_v60  ;;  %1920 = vperm.xlu1 %6229, %v7788_v45  }
 0x435   : > { %v8129_v34 = vpop.permute.xlu0 %1189 }
 0x436   : > { %v2253_v39 = vpop.permute.xlu1 %2252  ;;  %v2234_v37 = vadd.f32 %v2226_v16, %v2186_v22  ;;  %v11074_v16 = vmov 22   ;;  %v11619_v22 = vld [vmem:[#allocation137_spill] sm:$0xff] }
 0x437   : > { %v2274_v47 = vmul.f32 %v2253_v39, %v11602_v48  ;;  %6272 = vset.pattern.permute.xlu0 %v11443_v11 }
 0x438   : > { %6231 = vset.pattern.permute.xlu1 %v11536_v56  ;;  %2212 = vperm.xlu0 %6272, %v8133_v0  }
 0x439   : > { %v2282_v42 = vadd.f32 %v2274_v47, %v2234_v37  ;;  %2016 = vperm.xlu1 %6231, %v7798_v38  }
 0x43a   : > { %v8140_v1 = vpop.permute.xlu0 %1365 }
 0x43b   : > { %v2298_v57 = vadd.f32 %v2290_v9, %v2282_v42  ;;  %v8142_v58 = vpop.permute.xlu1 %2364 }
 0x43c   : > { %11614 = vst [vmem:[#allocation131_spill] sm:$0xff] %v8142_v58  ;;  %6275 = vset.pattern.permute.xlu0 %v11549_v51 }
 0x43d   : > { %2306 = vst [vmem:[#allocation3 + $0x31] sm:$0xff] %v2298_v57  ;;  %6233 = vset.pattern.permute.xlu1 %v11436_v15  ;;  %2420 = vperm.xlu0 %6275, %v8028_v25   ;;  %v11616_v15 = vld [vmem:[#allocation63_spill] sm:$0xff]  ;;  %v11620_v57 = vld [vmem:[#allocation68_spill] sm:$0xff] }
 0x43e   : > { %2112 = vperm.xlu1 %6233, %v7808_v10   ;;  %v1120_v23 = vmul.f32 %v11616_v15, %v11544_v50 }
 0x43f   : > { %v8148_v56 = vpop.permute.xlu0 %1541 }
 0x440   : > { %v8150_v55 = vpop.permute.xlu1 %2460  ;;  %v1216_v60 = vadd.f32 %v1208_v20, %v1120_v23  ;;  %v11621_v20 = vmov 1  }
 0x441   : > { %11615 = vst [vmem:[#allocation59_spill] sm:$0xff] %v8150_v55  ;;  %6277 = vset.pattern.permute.xlu0 %v11487_v40 }
 0x442   : > { %6235 = vset.pattern.permute.xlu1 %v11443_v11  ;;  %2472 = vperm.xlu0 %6277, %v11576_v14   ;;  %v11618_v11 = vld [vmem:[#allocation93_spill] sm:$0xff] }
 0x443   : > { %2208 = vperm.xlu1 %6235, %v7824_v43   ;;  %v1384_v12 = vmul.f32 %v11619_v22, %v11618_v11 }
 0x444   : > { %v8160_v31 = vpop.permute.xlu0 %1717 }
 0x445   : > { %v1263_v7 = vpop.permute.xlu1 %1262 }
 0x446   : > { %v1296_v6 = vmul.f32 %v1263_v7, %v11548_v5  ;;  %6278 = vset.pattern.permute.xlu0 %v11074_v16 }
 0x447   : > { %6238 = vset.pattern.permute.xlu1 %v11549_v51  ;;  %2496 = vperm.xlu0 %6278, %v11617_v21   ;;  %v11622_v51 = vld [vmem:[#allocation139_spill] sm:$0xff] }
 0x448   : > { %v1304_v39 = vadd.f32 %v1296_v6, %v1216_v60  ;;  %2416 = vperm.xlu1 %6238, %v7836_v49   ;;  %v1560_v15 = vmul.f32 %v11622_v51, %v7018_v13  ;;  %v11625_v51 = vld [vmem:[#allocation141_spill] sm:$0xff] }
 0x449   : > { %v8169_v37 = vpop.permute.xlu0 %1968 }
 0x44a   : > { %v1439_v47 = vpop.permute.xlu1 %1438  ;;  %v1392_v42 = vadd.f32 %v1384_v12, %v1304_v39  ;;  %v11623_v12 = vmov 3   ;;  %v11624_v39 = vld [vmem:[#allocation38_spill] sm:$0xff] }
 0x44b   : > { %v1472_v9 = vmul.f32 %v1439_v47, %v6976_v54  ;;  %2508 = vperm.xlu0 %6278, %v11620_v57   ;;  %v1736_v47 = vmul.f32 %v11624_v39, %v6954_v36  ;;  %v11627_v39 = vld [vmem:[#allocation96_spill] sm:$0xff]  ;;  %v11628_v57 = vld [vmem:[#allocation61_spill] sm:$0xff] }
 0x44c   : > { %6240 = vset.pattern.permute.xlu1 %v11621_v20 }
 0x44d   : > { %v1480_v23 = vadd.f32 %v1472_v9, %v1392_v42  ;;  %1204 = vperm.xlu1 %6240, %v7965_v2  }
 0x44e   : > { %v8177_v7 = vpop.permute.xlu0 %2064 }
 0x44f   : > { %v1615_v60 = vpop.permute.xlu1 %1614  ;;  %v1568_v6 = vadd.f32 %v1560_v15, %v1480_v23  ;;  %2516 = vperm.xlu0 %6278, %v8043_v8   ;;  %v11626_v23 = vmov 5  }
 0x450   : > { %v1648_v22 = vmul.f32 %v1615_v60, %v7082_v24  ;;  %v11075_v60 = vmov 23  }
 0x451   : > { %6242 = vset.pattern.permute.xlu1 %v11623_v12 }
 0x452   : > { %v1656_v16 = vadd.f32 %v1648_v22, %v1568_v6  ;;  %1380 = vperm.xlu1 %6242, %v7978_v17  }
 0x453   : > { %2524 = vperm.xlu0 %6278, %v11625_v51   ;;  %v8186_v42 = vpop.permute.xlu0 %2160 }
 0x454   : > { %v1791_v9 = vpop.permute.xlu1 %1790  ;;  %v1744_v4 = vadd.f32 %v1736_v47, %v1656_v16  ;;  %v1896_v16 = vmul.f32 %v11628_v57, %v11544_v50  ;;  %v11632_v57 = vmov 11  }
 0x455   : > { %v1824_v15 = vmul.f32 %v1791_v9, %v6990_v63  ;;  %v11629_v9 = vmov 7  }
 0x456   : > { %6244 = vset.pattern.permute.xlu1 %v11626_v23 }
 0x457   : > { %v1832_v55 = vadd.f32 %v1824_v15, %v1744_v4  ;;  %1556 = vperm.xlu1 %6244, %v7991_v41   ;;  %6281 = vset.pattern.permute.xlu0 %v11075_v60  ;;  %v11630_v4 = vld [vmem:[#allocation140_spill] sm:$0xff] }
 0x458   : > { %2548 = vperm.xlu0 %6281, %v11627_v39   ;;  %v8193_v6 = vpop.permute.xlu0 %2256  ;;  %v1984_v15 = vmul.f32 %v11630_v4, %v11548_v5  ;;  %v11646_v5 = vmov 17  }
 0x459   : > { %v1848_v22 = vadd.f32 %v7771_v59, %v1832_v55  ;;  %v1909_v58 = vpop.permute.xlu1 %1908 }
 0x45a   : > { %v1936_v47 = vmul.f32 %v1909_v58, %v11545_v27  ;;  %v11633_v58 = vld [vmem:[#allocation116_spill] sm:$0xff] }
 0x45b   : > { %1856 = vst [vmem:[#allocation3 + $0x10] sm:$0xff] %v1848_v22  ;;  %6246 = vset.pattern.permute.xlu1 %v11629_v9  ;;  %v2080_v22 = vmul.f32 %v11633_v58, %v6976_v54  ;;  %v11643_v54 = vld [vmem:[#allocation105_spill] sm:$0xff] }
 0x45c   : > { %v1944_v21 = vadd.f32 %v1936_v47, %v1896_v16  ;;  %1732 = vperm.xlu1 %6246, %v8002_v61   ;;  %2560 = vperm.xlu0 %6281, %v7808_v10   ;;  %v11081_v10 = vmov 24  }
 0x45d   : > { %v8204_v60 = vpop.permute.xlu0 %2368 }
 0x45e   : > { %11631 = vst [vmem:[#allocation87_spill] sm:$0xff] %v8204_v60  ;;  %v2005_v55 = vpop.permute.xlu1 %2004  ;;  %v1992_v39 = vadd.f32 %v1984_v15, %v1944_v21  ;;  %v11635_v21 = vmov 13   ;;  %v11636_v15 = vld [vmem:[#allocation44_spill] sm:$0xff] }
 0x45f   : > { %v2032_v14 = vmul.f32 %v2005_v55, %v11618_v11  ;;  %v11637_v55 = vld [vmem:[#allocation120_spill] sm:$0xff] }
 0x460   : > { %6249 = vset.pattern.permute.xlu1 %v11632_v57  ;;  %2568 = vperm.xlu0 %6281, %v11579_v44   ;;  %v2176_v44 = vmul.f32 %v11637_v55, %v7082_v24  ;;  %v11647_v24 = vld [vmem:[#allocation118_spill] sm:$0xff] }
 0x461   : > { %v2040_v27 = vadd.f32 %v2032_v14, %v1992_v39  ;;  %1980 = vperm.xlu1 %6249, %v7908_v33   ;;  %v11107_v33 = vmov 25  }
 0x462   : > { %v8212_v16 = vpop.permute.xlu0 %2464 }
 0x463   : > { %11634 = vst [vmem:[#allocation90_spill] sm:$0xff] %v8212_v16  ;;  %v2101_v47 = vpop.permute.xlu1 %2100  ;;  %v2088_v4 = vadd.f32 %v2080_v22, %v2040_v27  ;;  %v11638_v22 = vld [vmem:[#allocation70_spill] sm:$0xff] }
 0x464   : > { %v2128_v60 = vmul.f32 %v2101_v47, %v7018_v13  ;;  %6282 = vset.pattern.permute.xlu0 %v11081_v10  ;;  %v11639_v47 = vmov 15   ;;  %v11640_v10 = vld [vmem:[#allocation56_spill] sm:$0xff]  ;;  %v11641_v13 = vld [vmem:[#allocation86_spill] sm:$0xff] }
 0x465   : > { %6251 = vset.pattern.permute.xlu1 %v11635_v21  ;;  %2592 = vperm.xlu0 %6282, %v11636_v15   ;;  %v2272_v11 = vmul.f32 %v11640_v10, %v6990_v63  ;;  %v11648_v10 = vld [vmem:[#allocation135_spill] sm:$0xff]  ;;  %v11651_v63 = vld [vmem:[#allocation32_spill] sm:$0xff] }
 0x466   : > { %v2136_v58 = vadd.f32 %v2128_v60, %v2088_v4  ;;  %2076 = vperm.xlu1 %6251, %v11625_v51  }
 0x467   : > { %v8221_v14 = vpop.permute.xlu0 %1292 }
 0x468   : > { %v2197_v39 = vpop.permute.xlu1 %2196  ;;  %v2184_v16 = vadd.f32 %v2176_v44, %v2136_v58  ;;  %v2288_v44 = vld [vmem:[#allocation3 + $0x11] sm:$0xff] }
 0x469   : > { %v2224_v27 = vmul.f32 %v2197_v39, %v6954_v36  ;;  %2604 = vperm.xlu0 %6282, %v11638_v22   ;;  %v11644_v58 = vld [vmem:[#allocation26_spill] sm:$0xff]  ;;  %v11652_v36 = vmov 19  }
 0x46a   : > { %6253 = vset.pattern.permute.xlu1 %v11639_v47  ;;  %v11645_v39 = vld [vmem:[#allocation142_spill] sm:$0xff] }
 0x46b   : > { %v2232_v15 = vadd.f32 %v2224_v27, %v2184_v16  ;;  %2172 = vperm.xlu1 %6253, %v11641_v13   ;;  %v1213_v51 = vmul.f32 %v11645_v39, %v11644_v58  ;;  %v11649_v16 = vld [vmem:[#allocation81_spill] sm:$0xff] }
 0x46c   : > { %v8229_v55 = vpop.permute.xlu0 %1468  ;;  %v1125_v27 = vmul.f32 %v11649_v16, %v11648_v10  ;;  %v11653_v39 = vld [vmem:[#allocation149_spill] sm:$0xff] }
 0x46d   : > { %v2280_v60 = vadd.f32 %v2272_v11, %v2232_v15  ;;  %v8231_v4 = vpop.permute.xlu1 %2404  ;;  %2612 = vperm.xlu0 %6282, %v11643_v54  }
 0x46e   : > { %11642 = vst [vmem:[#allocation95_spill] sm:$0xff] %v8231_v4  ;;  %v1221_v4 = vadd.f32 %v1213_v51, %v1125_v27  ;;  %v11657_v51 = vld [vmem:[#allocation23_spill] sm:$0xff] }
 0x46f   : > { %v2296_v22 = vadd.f32 %v2288_v44, %v2280_v60  ;;  %6255 = vset.pattern.permute.xlu1 %v11646_v5  ;;  %v11654_v60 = vld [vmem:[#allocation146_spill] sm:$0xff] }
 0x470   : > { %2268 = vperm.xlu1 %6255, %v11647_v24   ;;  %v1389_v44 = vmul.f32 %v11654_v60, %v11653_v39 }
 0x471   : > { %2304 = vst [vmem:[#allocation3 + $0x11] sm:$0xff] %v2296_v22  ;;  %2620 = vperm.xlu0 %6282, %v11641_v13   ;;  %v8241_v11 = vpop.permute.xlu0 %1644  ;;  %v11655_v22 = vld [vmem:[#allocation100_spill] sm:$0xff] }
 0x472   : > { %11650 = vst [vmem:[#allocation97_spill] sm:$0xff] %v8241_v11  ;;  %v1288_v15 = vpop.permute.xlu1 %1287  ;;  %v11112_v11 = vmov 26  }
 0x473   : > { %v1301_v50 = vmul.f32 %v1288_v15, %v11651_v63  ;;  %v11658_v15 = vld [vmem:[#allocation27_spill] sm:$0xff] }
 0x474   : > { %6256 = vset.pattern.permute.xlu1 %v11652_v36  ;;  %v1565_v61 = vmul.f32 %v11659_v28, %v11658_v15 }
 0x475   : > { %v1309_v38 = vadd.f32 %v1301_v50, %v1221_v4  ;;  %2380 = vperm.xlu1 %6256, %v7965_v2   ;;  %6285 = vset.pattern.permute.xlu0 %v11107_v33 }
 0x476   : > { %2644 = vperm.xlu0 %6285, %v11655_v22   ;;  %v8250_v16 = vpop.permute.xlu0 %1820  ;;  %v11661_v22 = vld [vmem:[#allocation30_spill] sm:$0xff] }
 0x477   : > { %11656 = vst [vmem:[#allocation63_spill] sm:$0xff] %v8250_v16  ;;  %v1464_v13 = vpop.permute.xlu1 %1463  ;;  %v1397_v45 = vadd.f32 %v1389_v44, %v1309_v38  ;;  %v11662_v38 = vld [vmem:[#allocation123_spill] sm:$0xff] }
 0x478   : > { %v1477_v27 = vmul.f32 %v1464_v13, %v11657_v51  ;;  %v11663_v13 = vld [vmem:[#allocation25_spill] sm:$0xff] }
 0x479   : > { %6258 = vset.pattern.permute.xlu1 %v11621_v20  ;;  %v11664_v20 = vld [vmem:[#allocation9_spill] sm:$0xff] }
 0x47a   : > { %v1485_v60 = vadd.f32 %v1477_v27, %v1397_v45  ;;  %1194 = vperm.xlu1 %6258, %v8091_v32   ;;  %2656 = vperm.xlu0 %6285, %v7824_v43   ;;  %v1741_v44 = vmul.f32 %v11664_v20, %v11663_v13  ;;  %v11665_v43 = vld [vmem:[#allocation31_spill] sm:$0xff] }
 0x47b   : > { %v8258_v50 = vpop.permute.xlu0 %1932 }
 0x47c   : > { %11660 = vst [vmem:[#allocation137_spill] sm:$0xff] %v8258_v50  ;;  %v1640_v4 = vpop.permute.xlu1 %1639  ;;  %v1573_v33 = vadd.f32 %v1565_v61, %v1485_v60  ;;  %v11666_v61 = vld [vmem:[#allocation46_spill] sm:$0xff] }
 0x47d   : > { %v1653_v26 = vmul.f32 %v1640_v4, %v11661_v22  ;;  %v11667_v4 = vld [vmem:[#allocation85_spill] sm:$0xff] }
 0x47e   : > { %6260 = vset.pattern.permute.xlu1 %v11623_v12  ;;  %2664 = vperm.xlu0 %6285, %v11662_v38  }
 0x47f   : > { %v1661_v16 = vadd.f32 %v1653_v26, %v1573_v33  ;;  %1370 = vperm.xlu1 %6260, %v8106_v35  }
 0x480   : > { %v8266_v45 = vpop.permute.xlu0 %2028 }
 0x481   : > { %v1816_v28 = vpop.permute.xlu1 %1815  ;;  %v1749_v27 = vadd.f32 %v1741_v44, %v1661_v16  ;;  %v1901_v16 = vmul.f32 %v11667_v4, %v11648_v10  ;;  %v11668_v44 = vld [vmem:[#allocation72_spill] sm:$0xff] }
 0x482   : > { %v1829_v50 = vmul.f32 %v1816_v28, %v11665_v43  ;;  %6286 = vset.pattern.permute.xlu0 %v11112_v11 }
 0x483   : > { %6262 = vset.pattern.permute.xlu1 %v11626_v23  ;;  %2688 = vperm.xlu0 %6286, %v11666_v61   ;;  %v11669_v23 = vld [vmem:[#allocation102_spill] sm:$0xff] }
 0x484   : > { %v1837_v12 = vadd.f32 %v1829_v50, %v1749_v27  ;;  %1546 = vperm.xlu1 %6262, %v8120_v30   ;;  %v1989_v50 = vmul.f32 %v11669_v23, %v11651_v63  ;;  %v11670_v61 = vld [vmem:[#allocation130_spill] sm:$0xff] }
 0x485   : > { %v8273_v60 = vpop.permute.xlu0 %2124 }
 0x486   : > { %v1853_v33 = vadd.f32 %v7771_v59, %v1837_v12  ;;  %v1929_v26 = vpop.permute.xlu1 %1928 }
 0x487   : > { %v1941_v20 = vmul.f32 %v1929_v26, %v11644_v58  ;;  %2700 = vperm.xlu0 %6286, %v11668_v44  }
 0x488   : > { %1861 = vst [vmem:[#allocation3 + $0x60] sm:$0xff] %v1853_v33  ;;  %6264 = vset.pattern.permute.xlu1 %v11629_v9  ;;  %v11671_v33 = vld [vmem:[#allocation37_spill] sm:$0xff] }
 0x489   : > { %v1949_v28 = vadd.f32 %v1941_v20, %v1901_v16  ;;  %1722 = vperm.xlu1 %6264, %v8133_v0   ;;  %v2085_v26 = vmul.f32 %v11671_v33, %v11657_v51 }
 0x48a   : > { %v8284_v27 = vpop.permute.xlu0 %2220 }
 0x48b   : > { %v2025_v12 = vpop.permute.xlu1 %2024  ;;  %v1997_v11 = vadd.f32 %v1989_v50, %v1949_v28  ;;  %2708 = vperm.xlu0 %6286, %v11670_v61   ;;  %v2181_v28 = vmul.f32 %v8087_v3, %v11661_v22 }
 0x48c   : > { %v2037_v4 = vmul.f32 %v2025_v12, %v11653_v39  ;;  %v11114_v12 = vmov 27  }
 0x48d   : > { %6267 = vset.pattern.permute.xlu1 %v11632_v57 }
 0x48e   : > { %v2045_v9 = vadd.f32 %v2037_v4, %v1997_v11  ;;  %1972 = vperm.xlu1 %6267, %v8028_v25   ;;  %v11672_v11 = vld [vmem:[#allocation22_spill] sm:$0xff] }
 0x48f   : > { %2716 = vperm.xlu0 %6286, %v11647_v24   ;;  %v8293_v16 = vpop.permute.xlu0 %2428 }
 0x490   : > { %v2121_v20 = vpop.permute.xlu1 %2120  ;;  %v2093_v23 = vadd.f32 %v2085_v26, %v2045_v9  ;;  %v11673_v9 = vld [vmem:[#allocation33_spill] sm:$0xff] }
 0x491   : > { %v2133_v50 = vmul.f32 %v2121_v20, %v11658_v15 }
 0x492   : > { %6269 = vset.pattern.permute.xlu1 %v11635_v21  ;;  %v2277_v21 = vmul.f32 %v8102_v53, %v11665_v43 }
 0x493   : > { %v2141_v57 = vadd.f32 %v2133_v50, %v2093_v23  ;;  %2068 = vperm.xlu1 %6269, %v8043_v8   ;;  %6289 = vset.pattern.permute.xlu0 %v11114_v12  ;;  %v2293_v12 = vld [vmem:[#allocation3 + $0x61] sm:$0xff] }
 0x494   : > { %2764 = vperm.xlu0 %6289, %v11672_v11   ;;  %v8302_v4 = vpop.permute.xlu0 %1282 }
 0x495   : > { %v2217_v33 = vpop.permute.xlu1 %2216  ;;  %v2189_v24 = vadd.f32 %v2181_v28, %v2141_v57  ;;  %v1211_v28 = vmul.f32 %v8129_v34, %v6965_v46  ;;  %v1387_v34 = vmul.f32 %v8140_v1, %v11594_v29 }
 0x496   : > { %v2229_v26 = vmul.f32 %v2217_v33, %v11663_v13 }
 0x497   : > { %6271 = vset.pattern.permute.xlu1 %v11639_v47  ;;  %v11674_v47 = vld [vmem:[#allocation29_spill] sm:$0xff] }
 0x498   : > { %v2237_v3 = vadd.f32 %v2229_v26, %v2189_v24  ;;  %2164 = vperm.xlu1 %6271, %v11643_v54   ;;  %2776 = vperm.xlu0 %6289, %v11673_v9   ;;  %v11675_v24 = vld [vmem:[#allocation98_spill] sm:$0xff]  ;;  %v11115_v9 = vmov 28   ;;  %v11702_v54 = vld [vmem:[#allocation63_spill] sm:$0xff] }
 0x499   : > { %v8310_v20 = vpop.permute.xlu0 %1458  ;;  %v1123_v53 = vmul.f32 %v11675_v24, %v7248_v19 }
 0x49a   : > { %v2285_v23 = vadd.f32 %v2277_v21, %v2237_v3  ;;  %v8312_v50 = vpop.permute.xlu1 %2424 }
 0x49b   : > { %v1219_v21 = vadd.f32 %v1211_v28, %v1123_v53  ;;  %v11677_v53 = vld [vmem:[#allocation76_spill] sm:$0xff] }
 0x49c   : > { %v2301_v57 = vadd.f32 %v2293_v12, %v2285_v23  ;;  %6273 = vset.pattern.permute.xlu1 %v11646_v5  ;;  %2784 = vperm.xlu0 %6289, %v11674_v47   ;;  %v11676_v5 = vld [vmem:[#allocation49_spill] sm:$0xff]  ;;  %v11123_v47 = vmov 30  }
 0x49d   : > { %2260 = vperm.xlu1 %6273, %v11670_v61  }
 0x49e   : > { %2309 = vst [vmem:[#allocation3 + $0x61] sm:$0xff] %v2301_v57  ;;  %v8321_v33 = vpop.permute.xlu0 %1634 }
 0x49f   : > { %v1278_v26 = vpop.permute.xlu1 %1277 }
 0x4a0   : > { %v1299_v3 = vmul.f32 %v1278_v26, %v7008_v62  ;;  %6290 = vset.pattern.permute.xlu0 %v11115_v9  ;;  %v11678_v9 = vld [vmem:[#allocation136_spill] sm:$0xff] }
 0x4a1   : > { %6274 = vset.pattern.permute.xlu1 %v11652_v36  ;;  %2800 = vperm.xlu0 %6290, %v11676_v5   ;;  %v1563_v36 = vmul.f32 %v8148_v56, %v11602_v48  ;;  %v11685_v5 = vld [vmem:[#allocation125_spill] sm:$0xff] }
 0x4a2   : > { %v1307_v12 = vadd.f32 %v1299_v3, %v1219_v21  ;;  %2372 = vperm.xlu1 %6274, %v8091_v32  }
 0x4a3   : > { %v8330_v23 = vpop.permute.xlu0 %1810 }
 0x4a4   : > { %v1454_v57 = vpop.permute.xlu1 %1453  ;;  %v1395_v24 = vadd.f32 %v1387_v34, %v1307_v12  ;;  %v1739_v12 = vmul.f32 %v8160_v31, %v11644_v58 }
 0x4a5   : > { %v1475_v28 = vmul.f32 %v1454_v57, %v11600_v18  ;;  %2812 = vperm.xlu0 %6290, %v11677_v53   ;;  %v11679_v53 = vmov 22  }
 0x4a6   : > { %6276 = vset.pattern.permute.xlu1 %v11487_v40 }
 0x4a7   : > { %v1483_v26 = vadd.f32 %v1475_v28, %v1395_v24  ;;  %2468 = vperm.xlu1 %6276, %v8106_v35  }
 0x4a8   : > { %v8338_v1 = vpop.permute.xlu0 %1924 }
 0x4a9   : > { %v1630_v21 = vpop.permute.xlu1 %1629  ;;  %v1571_v3 = vadd.f32 %v1563_v36, %v1483_v26  ;;  %2820 = vperm.xlu0 %6290, %v8091_v32   ;;  %v11680_v36 = vld [vmem:[#allocation107_spill] sm:$0xff]  ;;  %v11681_v32 = vld [vmem:[#allocation104_spill] sm:$0xff] }
 0x4aa   : > { %v1651_v34 = vmul.f32 %v1630_v21, %v11678_v9  ;;  %v11120_v21 = vmov 29  }
 0x4ab   : > { %2476 = vperm.xlu1 %6276, %v7978_v17  }
 0x4ac   : > { %v1659_v40 = vadd.f32 %v1651_v34, %v1571_v3 }
 0x4ad   : > { %2828 = vperm.xlu0 %6290, %v7965_v2   ;;  %v8346_v56 = vpop.permute.xlu0 %2020  ;;  %v11682_v2 = vld [vmem:[#allocation99_spill] sm:$0xff] }
 0x4ae   : > { %v1806_v57 = vpop.permute.xlu1 %1805  ;;  %v1747_v24 = vadd.f32 %v1739_v12, %v1659_v40  ;;  %v1899_v12 = vmul.f32 %v11682_v2, %v7248_v19  ;;  %v11684_v2 = vld [vmem:[#allocation124_spill] sm:$0xff] }
 0x4af   : > { %v1827_v28 = vmul.f32 %v1806_v57, %v11651_v63  ;;  %6279 = vset.pattern.permute.xlu1 %v11679_v53  ;;  %v11683_v57 = vld [vmem:[#allocation52_spill] sm:$0xff]  ;;  %v1987_v53 = vmul.f32 %v8169_v37, %v7008_v62 }
 0x4b0   : > { %2500 = vperm.xlu1 %6279, %v11680_v36  }
 0x4b1   : > { %v1835_v26 = vadd.f32 %v1827_v28, %v1747_v24  ;;  %6293 = vset.pattern.permute.xlu0 %v11120_v21 }
 0x4b2   : > { %2852 = vperm.xlu0 %6293, %v11681_v32   ;;  %v8353_v31 = vpop.permute.xlu0 %2116 }
 0x4b3   : > { %v1851_v3 = vadd.f32 %v7771_v59, %v1835_v26  ;;  %v1921_v34 = vpop.permute.xlu1 %1920 }
 0x4b4   : > { %v1939_v40 = vmul.f32 %v1921_v34, %v6965_v46  ;;  %2504 = vperm.xlu1 %6279, %v11683_v57   ;;  %v2083_v34 = vmul.f32 %v8177_v7, %v11600_v18 }
 0x4b5   : > { %1859 = vst [vmem:[#allocation3 + $0x40] sm:$0xff] %v1851_v3 }
 0x4b6   : > { %v1947_v24 = vadd.f32 %v1939_v40, %v1899_v12  ;;  %2864 = vperm.xlu0 %6293, %v7836_v49  }
 0x4b7   : > { %v8363_v28 = vpop.permute.xlu0 %2212 }
 0x4b8   : > { %v2017_v21 = vpop.permute.xlu1 %2016  ;;  %v1995_v32 = vadd.f32 %v1987_v53, %v1947_v24  ;;  %2512 = vperm.xlu1 %6279, %v7848_v52   ;;  %v11686_v53 = vld [vmem:[#allocation54_spill] sm:$0xff] }
 0x4b9   : > { %v2035_v26 = vmul.f32 %v2017_v21, %v11594_v29  ;;  %v2179_v21 = vmul.f32 %v8186_v42, %v11678_v9 }
 0x4ba   : > { %2872 = vperm.xlu0 %6293, %v11684_v2   ;;  %v11687_v2 = vmov 23  }
 0x4bb   : > { %v2043_v3 = vadd.f32 %v2035_v26, %v1995_v32  ;;  %v11688_v32 = vld [vmem:[#allocation58_spill] sm:$0xff] }
 0x4bc   : > { %2520 = vperm.xlu1 %6279, %v11685_v5   ;;  %v8371_v37 = vpop.permute.xlu0 %2420 }
 0x4bd   : > { %v2113_v12 = vpop.permute.xlu1 %2112  ;;  %v2091_v40 = vadd.f32 %v2083_v34, %v2043_v3  ;;  %v11690_v3 = vld [vmem:[#allocation78_spill] sm:$0xff] }
 0x4be   : > { %v2131_v49 = vmul.f32 %v2113_v12, %v11602_v48  ;;  %6294 = vset.pattern.permute.xlu0 %v11123_v47  ;;  %v2275_v12 = vmul.f32 %v8193_v6, %v11651_v63 }
 0x4bf   : > { %2896 = vperm.xlu0 %6294, %v11686_v53   ;;  %v11691_v53 = vld [vmem:[#allocation55_spill] sm:$0xff] }
 0x4c0   : > { %v2139_v24 = vadd.f32 %v2131_v49, %v2091_v40  ;;  %6280 = vset.pattern.permute.xlu1 %v11687_v2  ;;  %v2291_v40 = vld [vmem:[#allocation3 + $0x41] sm:$0xff] }
 0x4c1   : > { %2544 = vperm.xlu1 %6280, %v11688_v32   ;;  %v8380_v7 = vpop.permute.xlu0 %2472 }
 0x4c2   : > { %11689 = vst [vmem:[#allocation139_spill] sm:$0xff] %v8380_v7  ;;  %v2209_v26 = vpop.permute.xlu1 %2208  ;;  %v2187_v11 = vadd.f32 %v2179_v21, %v2139_v24  ;;  %v11692_v21 = vld [vmem:[#allocation80_spill] sm:$0xff] }
 0x4c3   : > { %v2227_v34 = vmul.f32 %v2209_v26, %v11644_v58  ;;  %2908 = vperm.xlu0 %6294, %v11690_v3  }
 0x4c5   : > { %v2235_v47 = vadd.f32 %v2227_v34, %v2187_v11  ;;  %2552 = vperm.xlu1 %6280, %v11691_v53   ;;  %v11693_v11 = vld [vmem:[#allocation103_spill] sm:$0xff] }
 0x4c6   : > { %v8387_v42 = vpop.permute.xlu0 %2496  ;;  %v1126_v26 = vmul.f32 %v11693_v11, %v11653_v39 }
 0x4c7   : > { %v2283_v49 = vadd.f32 %v2275_v12, %v2235_v47  ;;  %v8389_v2 = vpop.permute.xlu1 %2416  ;;  %2916 = vperm.xlu0 %6294, %v8106_v35   ;;  %v1302_v12 = vmul.f32 %v8221_v14, %v11658_v15  ;;  %v1478_v35 = vmul.f32 %v8229_v55, %v11663_v13  ;;  %v11694_v14 = vmov 24   ;;  %v11697_v55 = vld [vmem:[#allocation60_spill] sm:$0xff] }
 0x4c9   : > { %v2299_v61 = vadd.f32 %v2291_v40, %v2283_v49  ;;  %2556 = vperm.xlu1 %6280, %v11692_v21   ;;  %v11129_v40 = vmov 31  }
 0x4ca   : > { %v8393_v24 = vpop.permute.xlu0 %2508 }
 0x4cb   : > { %2307 = vst [vmem:[#allocation3 + $0x41] sm:$0xff] %v2299_v61  ;;  %2924 = vperm.xlu0 %6294, %v7978_v17  }
 0x4cc   : > { %v1205_v6 = vpop.permute.xlu1 %1204 }
 0x4cd   : > { %v1214_v34 = vmul.f32 %v1205_v6, %v11657_v51  ;;  %2564 = vperm.xlu1 %6280, %v8120_v30  }
 0x4ce   : > { %v8400_v47 = vpop.permute.xlu0 %2516 }
 0x4cf   : > { %v1222_v49 = vadd.f32 %v1214_v34, %v1126_v26  ;;  %6297 = vset.pattern.permute.xlu0 %v11129_v40  ;;  %v11695_v40 = vld [vmem:[#allocation110_spill] sm:$0xff] }
 0x4d0   : > { %2948 = vperm.xlu0 %6297, %v11680_v36  }
 0x4d1   : > { %v1381_v61 = vpop.permute.xlu1 %1380  ;;  %v1310_v17 = vadd.f32 %v1302_v12, %v1222_v49  ;;  %2572 = vperm.xlu1 %6280, %v7991_v41  }
 0x4d2   : > { %v1390_v11 = vmul.f32 %v1381_v61, %v11661_v22  ;;  %v8408_v6 = vpop.permute.xlu0 %2524  ;;  %v11696_v61 = vld [vmem:[#allocation97_spill] sm:$0xff] }
 0x4d3   : > { %v1654_v36 = vmul.f32 %v7771_v59, %v11696_v61 }
 0x4d4   : > { %v1398_v3 = vadd.f32 %v1390_v11, %v1310_v17  ;;  %2960 = vperm.xlu0 %6297, %v7848_v52  }
 0x4d5   : > { %6283 = vset.pattern.permute.xlu1 %v11694_v14  ;;  %v11699_v14 = vld [vmem:[#allocation145_spill] sm:$0xff] }
 0x4d6   : > { %v1557_v26 = vpop.permute.xlu1 %1556  ;;  %v1486_v34 = vadd.f32 %v1478_v35, %v1398_v3  ;;  %2596 = vperm.xlu1 %6283, %v11695_v40   ;;  %v11135_v3 = vmov 32  }
 0x4d7   : > { %v1566_v12 = vmul.f32 %v1557_v26, %v11665_v43  ;;  %v8416_v49 = vpop.permute.xlu0 %2548  ;;  %v11700_v26 = vld [vmem:[#allocation137_spill] sm:$0xff] }
 0x4d8   : > { %2968 = vperm.xlu0 %6297, %v11685_v5   ;;  %v1942_v38 = vmul.f32 %v11700_v26, %v11657_v51  ;;  %v11701_v5 = vld [vmem:[#allocation144_spill] sm:$0xff] }
 0x4d9   : > { %v1574_v44 = vadd.f32 %v1566_v12, %v1486_v34  ;;  %v1830_v61 = vmul.f32 %v11702_v54, %v11701_v5  ;;  %v11703_v12 = vld [vmem:[#allocation73_spill] sm:$0xff]  ;;  %v2038_v54 = vmul.f32 %v8266_v45, %v11661_v22 }
 0x4da   : > { %2600 = vperm.xlu1 %6283, %v11697_v55  }
 0x4db   : > { %v1733_v17 = vpop.permute.xlu1 %1732  ;;  %v1662_v11 = vadd.f32 %v1654_v36, %v1574_v44  ;;  %v8422_v52 = vpop.permute.xlu0 %2560  ;;  %v11704_v44 = vld [vmem:[#allocation114_spill] sm:$0xff] }
 0x4dc   : > { %11698 = vst [vmem:[#allocation38_spill] sm:$0xff] %v8422_v52  ;;  %v1742_v35 = vmul.f32 %v1733_v17, %v11699_v14  ;;  %6298 = vset.pattern.permute.xlu0 %v11135_v3  ;;  %v1902_v36 = vmul.f32 %v11704_v44, %v11653_v39 }
 0x4dd   : > { %2992 = vperm.xlu0 %6298, %v11688_v32   ;;  %v11706_v32 = vld [vmem:[#allocation127_spill] sm:$0xff] }
 0x4de   : > { %v1750_v34 = vadd.f32 %v1742_v35, %v1662_v11  ;;  %2608 = vperm.xlu1 %6283, %v11703_v12   ;;  %v1950_v7 = vadd.f32 %v1942_v38, %v1902_v36 }
 0x4df   : > { %v8434_v55 = vpop.permute.xlu0 %2568 }
 0x4e0   : > { %11705 = vst [vmem:[#allocation61_spill] sm:$0xff] %v8434_v55  ;;  %v1838_v17 = vadd.f32 %v1830_v61, %v1750_v34  ;;  %v1981_v52 = vpop.permute.xlu1 %1980  ;;  %v11708_v61 = vld [vmem:[#allocation62_spill] sm:$0xff]  ;;  %v2134_v34 = vmul.f32 %v8273_v60, %v11665_v43 }
 0x4e1   : > { %v1990_v3 = vmul.f32 %v1981_v52, %v11658_v15  ;;  %3004 = vperm.xlu0 %6298, %v11692_v21   ;;  %v11707_v52 = vmov 25  }
 0x4e2   : > { %v1854_v26 = vadd.f32 %v7771_v59, %v1838_v17  ;;  %2616 = vperm.xlu1 %6283, %v11706_v32  }
 0x4e3   : > { %v1998_v11 = vadd.f32 %v1990_v3, %v1950_v7 }
 0x4e4   : > { %1862 = vst [vmem:[#allocation3 + $0x70] sm:$0xff] %v1854_v26  ;;  %v8442_v35 = vpop.permute.xlu0 %2592  ;;  %v11709_v26 = vld [vmem:[#allocation64_spill] sm:$0xff] }
 0x4e5   : > { %v2077_v44 = vpop.permute.xlu1 %2076  ;;  %v2046_v55 = vadd.f32 %v2038_v54, %v1998_v11  ;;  %3012 = vperm.xlu0 %6298, %v8120_v30   ;;  %v2230_v11 = vmul.f32 %v8284_v27, %v11699_v14 }
 0x4e6   : > { %v2086_v38 = vmul.f32 %v2077_v44, %v11663_v13  ;;  %6284 = vset.pattern.permute.xlu1 %v11707_v52  ;;  %v11139_v52 = vmov 33  }
 0x4e7   : > { %2640 = vperm.xlu1 %6284, %v11708_v61  }
 0x4e8   : > { %v2094_v36 = vadd.f32 %v2086_v38, %v2046_v55  ;;  %v8450_v17 = vpop.permute.xlu0 %2604  ;;  %v11710_v38 = vld [vmem:[#allocation83_spill] sm:$0xff] }
 0x4e9   : > { %3020 = vperm.xlu0 %6298, %v7991_v41  }
 0x4ea   : > { %v2173_v45 = vpop.permute.xlu1 %2172  ;;  %v2142_v7 = vadd.f32 %v2134_v34, %v2094_v36 }
 0x4eb   : > { %v2182_v3 = vmul.f32 %v7771_v59, %v2173_v45  ;;  %2648 = vperm.xlu1 %6284, %v11709_v26   ;;  %v2294_v41 = vld [vmem:[#allocation3 + $0x71] sm:$0xff]  ;;  %v11720_v26 = vld [vmem:[#allocation5_spill] sm:$0xff] }
 0x4ec   : > { %v8455_v54 = vpop.permute.xlu0 %2612 }
 0x4ed   : > { %v2190_v44 = vadd.f32 %v2182_v3, %v2142_v7  ;;  %6301 = vset.pattern.permute.xlu0 %v11139_v52 }
 0x4ee   : > { %3044 = vperm.xlu0 %6301, %v11695_v40  }
 0x4ef   : > { %v2269_v60 = vpop.permute.xlu1 %2268  ;;  %v2238_v55 = vadd.f32 %v2230_v11, %v2190_v44  ;;  %2652 = vperm.xlu1 %6284, %v11710_v38   ;;  %v11713_v11 = vld [vmem:[#allocation84_spill] sm:$0xff] }
 0x4f0   : > { %v2278_v34 = vmul.f32 %v2269_v60, %v11701_v5  ;;  %v8463_v36 = vpop.permute.xlu0 %2620  ;;  %v11778_v5 = vld [vmem:[#allocation10_spill] sm:$0xff] }
 0x4f1   : > { %11711 = vst [vmem:[#allocation140_spill] sm:$0xff] %v8463_v36 }
 0x4f2   : > { %v2286_v45 = vadd.f32 %v2278_v34, %v2238_v55  ;;  %3056 = vperm.xlu0 %6301, %v11703_v12   ;;  %v11715_v55 = vld [vmem:[#allocation109_spill] sm:$0xff]  ;;  %v11146_v12 = vmov 34  }
 0x4f3   : > { %2660 = vperm.xlu1 %6284, %v8133_v0   ;;  %v1124_v34 = vmul.f32 %v11715_v55, %v11594_v29 }
 0x4f4   : > { %v2302_v27 = vadd.f32 %v2294_v41, %v2286_v45  ;;  %v8467_v7 = vpop.permute.xlu1 %2380  ;;  %v11716_v41 = vmov 26   ;;  %v1300_v45 = vmul.f32 %v8302_v4, %v11602_v48 }
 0x4f5   : > { %v8469_v3 = vpop.permute.xlu0 %2644 }
 0x4f6   : > { %11712 = vst [vmem:[#allocation116_spill] sm:$0xff] %v8469_v3  ;;  %2310 = vst [vmem:[#allocation3 + $0x71] sm:$0xff] %v2302_v27  ;;  %3064 = vperm.xlu0 %6301, %v11706_v32   ;;  %v11717_v32 = vld [vmem:[#allocation113_spill] sm:$0xff] }
 0x4f7   : > { %2668 = vperm.xlu1 %6284, %v11713_v11  }
 0x4f9   : > { %v1195_v44 = vpop.permute.xlu1 %1194  ;;  %v8473_v60 = vpop.permute.xlu0 %2656 }
 0x4fa   : > { %11714 = vst [vmem:[#allocation120_spill] sm:$0xff] %v8473_v60  ;;  %v1212_v52 = vmul.f32 %v1195_v44, %v11600_v18  ;;  %6302 = vset.pattern.permute.xlu0 %v11146_v12  ;;  %v11719_v44 = vld [vmem:[#allocation66_spill] sm:$0xff] }
 0x4fb   : > { %6287 = vset.pattern.permute.xlu1 %v11716_v41  ;;  %3088 = vperm.xlu0 %6302, %v11708_v61   ;;  %v1476_v41 = vmul.f32 %v8310_v20, %v11644_v58  ;;  %v11722_v20 = vld [vmem:[#allocation128_spill] sm:$0xff] }
 0x4fc   : > { %v1220_v27 = vadd.f32 %v1212_v52, %v1124_v34  ;;  %2692 = vperm.xlu1 %6287, %v11717_v32  }
 0x4fd   : > { %v8484_v40 = vpop.permute.xlu0 %2664 }
 0x4fe   : > { %11718 = vst [vmem:[#allocation56_spill] sm:$0xff] %v8484_v40  ;;  %v1371_v30 = vpop.permute.xlu1 %1370  ;;  %v1308_v21 = vadd.f32 %v1300_v45, %v1220_v27  ;;  %v11721_v45 = vld [vmem:[#allocation150_spill] sm:$0xff] }
 0x4ff   : > { %v1388_v55 = vmul.f32 %v1371_v30, %v11678_v9  ;;  %3100 = vperm.xlu0 %6302, %v11710_v38   ;;  %v1652_v30 = vmul.f32 %v8321_v33, %v11721_v45 }
 0x500   : > { %2696 = vperm.xlu1 %6287, %v11719_v44   ;;  %v11725_v44 = vmov 27  }
 0x501   : > { %v1396_v12 = vadd.f32 %v1388_v55, %v1308_v21 }
 0x502   : > { %v8491_v61 = vpop.permute.xlu0 %2688 }
 0x503   : > { %v1547_v4 = vpop.permute.xlu1 %1546  ;;  %v1484_v52 = vadd.f32 %v1476_v41, %v1396_v12  ;;  %3108 = vperm.xlu0 %6302, %v8133_v0   ;;  %v1940_v41 = vmul.f32 %v8338_v1, %v11600_v18  ;;  %v1828_v0 = vmul.f32 %v8330_v23, %v11658_v15 }
 0x504   : > { %v1564_v34 = vmul.f32 %v1547_v4, %v11651_v63  ;;  %2704 = vperm.xlu1 %6287, %v11720_v26  }
 0x506   : > { %v1572_v27 = vadd.f32 %v1564_v34, %v1484_v52  ;;  %v8498_v38 = vpop.permute.xlu0 %2700  ;;  %v11152_v52 = vmov 35   ;;  %v11724_v34 = vld [vmem:[#allocation115_spill] sm:$0xff] }
 0x507   : > { %3116 = vperm.xlu0 %6302, %v11713_v11   ;;  %v1900_v11 = vmul.f32 %v11724_v34, %v11594_v29 }
 0x508   : > { %2712 = vperm.xlu1 %6287, %v11722_v20   ;;  %v1723_v21 = vpop.permute.xlu1 %1722  ;;  %v1660_v55 = vadd.f32 %v1652_v30, %v1572_v27  ;;  %v11726_v27 = vld [vmem:[#allocation19_spill] sm:$0xff] }
 0x509   : > { %v1740_v12 = vmul.f32 %v1723_v21, %v11657_v51  ;;  %v1948_v21 = vadd.f32 %v1940_v41, %v1900_v11  ;;  %v2132_v41 = vmul.f32 %v8353_v31, %v11651_v63 }
 0x50a   : > { %v8505_v4 = vpop.permute.xlu0 %2708 }
 0x50b   : > { %11723 = vst [vmem:[#allocation26_spill] sm:$0xff] %v8505_v4  ;;  %v1748_v33 = vadd.f32 %v1740_v12, %v1660_v55  ;;  %6305 = vset.pattern.permute.xlu0 %v11152_v52  ;;  %v2036_v55 = vmul.f32 %v8346_v56, %v11678_v9  ;;  %v11153_v52 = vmov 36  }
 0x50c   : > { %6288 = vset.pattern.permute.xlu1 %v11725_v44  ;;  %3140 = vperm.xlu0 %6305, %v11717_v32   ;;  %v11728_v44 = vld [vmem:[#allocation15_spill] sm:$0xff] }
 0x50d   : > { %v1836_v30 = vadd.f32 %v1828_v0, %v1748_v33  ;;  %2760 = vperm.xlu1 %6288, %v11726_v27   ;;  %v1973_v1 = vpop.permute.xlu1 %1972 }
 0x50e   : > { %v1988_v40 = vmul.f32 %v1973_v1, %v11602_v48  ;;  %v8516_v60 = vpop.permute.xlu0 %2716  ;;  %v11730_v1 = vld [vmem:[#allocation20_spill] sm:$0xff] }
 0x50f   : > { %11727 = vst [vmem:[#allocation142_spill] sm:$0xff] %v8516_v60  ;;  %v1852_v23 = vadd.f32 %v7771_v59, %v1836_v30  ;;  %v11773_v60 = vmov 31  }
 0x510   : > { %v1996_v12 = vadd.f32 %v1988_v40, %v1948_v21  ;;  %3152 = vperm.xlu0 %6305, %v11720_v26  }
 0x511   : > { %1860 = vst [vmem:[#allocation3 + $0x50] sm:$0xff] %v1852_v23  ;;  %2768 = vperm.xlu1 %6288, %v11728_v44  }
 0x512   : > { %v2069_v0 = vpop.permute.xlu1 %2068  ;;  %v2044_v33 = vadd.f32 %v2036_v55, %v1996_v12  ;;  %v11732_v55 = vld [vmem:[#allocation36_spill] sm:$0xff]  ;;  %v2228_v12 = vmul.f32 %v8363_v28, %v11657_v51 }
 0x513   : > { %v2084_v34 = vmul.f32 %v2069_v0, %v11644_v58  ;;  %v8524_v11 = vpop.permute.xlu0 %2764  ;;  %v11737_v28 = vld [vmem:[#allocation88_spill] sm:$0xff] }
 0x514   : > { %11729 = vst [vmem:[#allocation81_spill] sm:$0xff] %v8524_v11  ;;  %3160 = vperm.xlu0 %6305, %v11722_v20   ;;  %v11766_v11 = vld [vmem:[#allocation51_spill] sm:$0xff] }
 0x515   : > { %v2092_v30 = vadd.f32 %v2084_v34, %v2044_v33  ;;  %2772 = vperm.xlu1 %6288, %v11730_v1  }
 0x517   : > { %v2165_v56 = vpop.permute.xlu1 %2164  ;;  %v2140_v40 = vadd.f32 %v2132_v41, %v2092_v30  ;;  %v8530_v21 = vpop.permute.xlu0 %2776  ;;  %v11734_v30 = vld [vmem:[#allocation35_spill] sm:$0xff] }
 0x518   : > { %11731 = vst [vmem:[#allocation32_spill] sm:$0xff] %v8530_v21  ;;  %v2180_v23 = vmul.f32 %v2165_v56, %v11721_v45  ;;  %6306 = vset.pattern.permute.xlu0 %v11153_v52  ;;  %v2292_v52 = vld [vmem:[#allocation3 + $0x51] sm:$0xff] }
 0x519   : > { %2780 = vperm.xlu1 %6288, %v11732_v55   ;;  %3209 = vperm.xlu0 %6306, %v11726_v27   ;;  %v11736_v27 = vmov 28  }
 0x51a   : > { %v2188_v31 = vadd.f32 %v2180_v23, %v2140_v40  ;;  %v11739_v23 = vld [vmem:[#allocation42_spill] sm:$0xff] }
 0x51b   : > { %v8538_v0 = vpop.permute.xlu0 %2784 }
 0x51c   : > { %11733 = vst [vmem:[#allocation149_spill] sm:$0xff] %v8538_v0  ;;  %v2261_v33 = vpop.permute.xlu1 %2260  ;;  %v2236_v34 = vadd.f32 %v2228_v12, %v2188_v31  ;;  %v11759_v0 = vmov 30  }
 0x51d   : > { %v2276_v41 = vmul.f32 %v2261_v33, %v11658_v15  ;;  %2788 = vperm.xlu1 %6288, %v11734_v30   ;;  %3221 = vperm.xlu0 %6306, %v11730_v1  }
 0x51f   : > { %v2284_v56 = vadd.f32 %v2276_v41, %v2236_v34  ;;  %v11743_v34 = vld [vmem:[#allocation117_spill] sm:$0xff] }
 0x520   : > { %v8543_v20 = vpop.permute.xlu0 %2800 }
 0x521   : > { %11735 = vst [vmem:[#allocation146_spill] sm:$0xff] %v8543_v20  ;;  %v2300_v26 = vadd.f32 %v2292_v52, %v2284_v56  ;;  %6291 = vset.pattern.permute.xlu1 %v11736_v27  ;;  %v8546_v32 = vpop.permute.xlu1 %2372  ;;  %3229 = vperm.xlu0 %6306, %v11732_v55   ;;  %v11159_v52 = vmov 37   ;;  %v11741_v27 = vld [vmem:[#allocation8_spill] sm:$0xff] }
 0x522   : > { %2804 = vperm.xlu1 %6291, %v11737_v28  }
 0x523   : > { %2308 = vst [vmem:[#allocation3 + $0x51] sm:$0xff] %v2300_v26 }
 0x524   : > { %v8550_v40 = vpop.permute.xlu0 %2812 }
 0x525   : > { %11738 = vst [vmem:[#allocation23_spill] sm:$0xff] %v8550_v40  ;;  %3237 = vperm.xlu0 %6306, %v11734_v30   ;;  %v11745_v30 = vmov 29  }
 0x526   : > { %2808 = vperm.xlu1 %6291, %v11739_v23   ;;  %v8554_v12 = vpop.permute.xlu1 %2468 }
 0x528   : > { %v8556_v31 = vpop.permute.xlu0 %2820 }
 0x529   : > { %11740 = vst [vmem:[#allocation27_spill] sm:$0xff] %v8556_v31  ;;  %6309 = vset.pattern.permute.xlu0 %v11159_v52  ;;  %v11746_v52 = vld [vmem:[#allocation39_spill] sm:$0xff] }
 0x52a   : > { %2816 = vperm.xlu1 %6291, %v11741_v27   ;;  %v8560_v33 = vpop.permute.xlu1 %2476  ;;  %3253 = vperm.xlu0 %6309, %v11737_v28   ;;  %v11165_v28 = vmov 38  }
 0x52c   : > { %v8563_v26 = vpop.permute.xlu0 %2828 }
 0x52d   : > { %11742 = vst [vmem:[#allocation148_spill] sm:$0xff] %v8563_v26  ;;  %v11749_v26 = vld [vmem:[#allocation45_spill] sm:$0xff] }
 0x52e   : > { %2824 = vperm.xlu1 %6291, %v11743_v34   ;;  %3265 = vperm.xlu0 %6309, %v11741_v27  }
 0x52f   : > { %v8567_v41 = vpop.permute.xlu1 %2500 }
 0x531   : > { %v8569_v56 = vpop.permute.xlu0 %2852 }
 0x532   : > { %11744 = vst [vmem:[#allocation30_spill] sm:$0xff] %v8569_v56  ;;  %6292 = vset.pattern.permute.xlu1 %v11745_v30  ;;  %3273 = vperm.xlu0 %6309, %v11743_v34   ;;  %v11752_v30 = vld [vmem:[#allocation67_spill] sm:$0xff]  ;;  %v11763_v56 = vld [vmem:[#allocation74_spill] sm:$0xff] }
 0x533   : > { %2848 = vperm.xlu1 %6292, %v11746_v52   ;;  %v8574_v55 = vpop.permute.xlu1 %2504 }
 0x534   : > { %11747 = vst [vmem:[#allocation9_spill] sm:$0xff] %v8574_v55  ;;  %v11780_v55 = vld [vmem:[#allocation16_spill] sm:$0xff] }
 0x535   : > { %v8576_v1 = vpop.permute.xlu0 %2864 }
 0x536   : > { %11748 = vst [vmem:[#allocation85_spill] sm:$0xff] %v8576_v1  ;;  %6310 = vset.pattern.permute.xlu0 %v11165_v28  ;;  %v11756_v1 = vld [vmem:[#allocation6_spill] sm:$0xff] }
 0x537   : > { %2856 = vperm.xlu1 %6292, %v11749_v26   ;;  %v8580_v27 = vpop.permute.xlu1 %2512  ;;  %3297 = vperm.xlu0 %6310, %v11746_v52   ;;  %v11767_v26 = vld [vmem:[#allocation143_spill] sm:$0xff] }
 0x538   : > { %11750 = vst [vmem:[#allocation102_spill] sm:$0xff] %v8580_v27  ;;  %v2383_v23 = vmul.f32 %v11767_v26, %v11766_v11  ;;  %v11774_v26 = vld [vmem:[#allocation50_spill] sm:$0xff]  ;;  %v11781_v27 = vld [vmem:[#allocation147_spill] sm:$0xff] }
 0x539   : > { %v8583_v31 = vpop.permute.xlu0 %2872  ;;  %v11775_v11 = vld [vmem:[#allocation126_spill] sm:$0xff] }
 0x53a   : > { %11751 = vst [vmem:[#allocation37_spill] sm:$0xff] %v8583_v31 }
 0x53b   : > { %2860 = vperm.xlu1 %6292, %v11752_v30   ;;  %v8586_v34 = vpop.permute.xlu1 %2520  ;;  %3309 = vperm.xlu0 %6310, %v11752_v30   ;;  %v11171_v30 = vmov 39  }
 0x53c   : > { %11753 = vst [vmem:[#allocation98_spill] sm:$0xff] %v8586_v34 }
 0x53e   : > { %v8589_v40 = vpop.permute.xlu0 %2896 }
 0x53f   : > { %11754 = vst [vmem:[#allocation99_spill] sm:$0xff] %v8589_v40  ;;  %2868 = vperm.xlu1 %6292, %v8028_v25   ;;  %3317 = vperm.xlu0 %6310, %v8028_v25   ;;  %v11760_v40 = vld [vmem:[#allocation92_spill] sm:$0xff] }
 0x540   : > { %v2545_v28 = vpop.permute.xlu1 %2544 }
 0x542   : > { %v8593_v20 = vpop.permute.xlu0 %2908 }
 0x543   : > { %11755 = vst [vmem:[#allocation103_spill] sm:$0xff] %v8593_v20  ;;  %2876 = vperm.xlu1 %6292, %v11756_v1   ;;  %3325 = vperm.xlu0 %6310, %v11756_v1   ;;  %v11762_v20 = vld [vmem:[#allocation47_spill] sm:$0xff] }
 0x544   : > { %v8597_v52 = vpop.permute.xlu1 %2552 }
 0x545   : > { %11757 = vst [vmem:[#allocation97_spill] sm:$0xff] %v8597_v52 }
 0x546   : > { %v8599_v31 = vpop.permute.xlu0 %2916 }
 0x547   : > { %11758 = vst [vmem:[#allocation137_spill] sm:$0xff] %v8599_v31  ;;  %6295 = vset.pattern.permute.xlu1 %v11759_v0  ;;  %6313 = vset.pattern.permute.xlu0 %v11171_v30  ;;  %v11765_v30 = vld [vmem:[#allocation119_spill] sm:$0xff] }
 0x548   : > { %2900 = vperm.xlu1 %6295, %v11760_v40   ;;  %v8604_v21 = vpop.permute.xlu1 %2556  ;;  %3349 = vperm.xlu0 %6313, %v11760_v40  }
 0x54a   : > { %v8607_v25 = vpop.permute.xlu0 %2924 }
 0x54b   : > { %11761 = vst [vmem:[#allocation63_spill] sm:$0xff] %v8607_v25  ;;  %v11175_v25 = vmov 40  }
 0x54c   : > { %2904 = vperm.xlu1 %6295, %v11762_v20   ;;  %v8610_v1 = vpop.permute.xlu1 %2564  ;;  %3361 = vperm.xlu0 %6313, %v11763_v56   ;;  %v11769_v20 = vld [vmem:[#allocation48_spill] sm:$0xff] }
 0x54d   : > { %v2343_v44 = vmul.f32 %v7771_v59, %v11769_v20  ;;  %v11779_v20 = vld [vmem:[#allocation131_spill] sm:$0xff] }
 0x54e   : > { %v2386_v52 = vmul.f32 %v11779_v20, %v11778_v5  ;;  %v11790_v5 = vld [vmem:[#allocation71_spill] sm:$0xff] }
 0x54f   : > { %v8613_v31 = vpop.permute.xlu0 %2948  ;;  %v2391_v34 = vadd.f32 %v2383_v23, %v2343_v44  ;;  %v2479_v44 = vmul.f32 %v11781_v27, %v11780_v55  ;;  %v11782_v23 = vld [vmem:[#allocation21_spill] sm:$0xff]  ;;  %v11787_v27 = vld [vmem:[#allocation112_spill] sm:$0xff] }
 0x550   : > { %11764 = vst [vmem:[#allocation114_spill] sm:$0xff] %v8613_v31  ;;  %2912 = vperm.xlu1 %6295, %v11763_v56   ;;  %v8616_v0 = vpop.permute.xlu1 %2572  ;;  %3369 = vperm.xlu0 %6313, %v11765_v30   ;;  %v11771_v56 = vld [vmem:[#allocation41_spill] sm:$0xff] }
 0x553   : > { %v8621_v40 = vpop.permute.xlu0 %2960 }
 0x554   : > { %11768 = vst [vmem:[#allocation109_spill] sm:$0xff] %v8621_v40  ;;  %2920 = vperm.xlu1 %6295, %v11765_v30   ;;  %6314 = vset.pattern.permute.xlu0 %v11175_v25  ;;  %v2431_v40 = vmul.f32 %v11775_v11, %v11774_v26  ;;  %v11777_v25 = vld [vmem:[#allocation68_spill] sm:$0xff] }
 0x555   : > { %v8627_v31 = vpop.permute.xlu1 %2596  ;;  %3393 = vperm.xlu0 %6314, %v11771_v56  }
 0x556   : > { %11770 = vst [vmem:[#allocation115_spill] sm:$0xff] %v8627_v31  ;;  %v2439_v14 = vadd.f32 %v2431_v40, %v2391_v34  ;;  %v11785_v31 = vld [vmem:[#allocation11_spill] sm:$0xff]  ;;  %v2348_v34 = vmul.f32 %v11787_v27, %v11594_v29 }
 0x557   : > { %v8630_v3 = vpop.permute.xlu0 %2968  ;;  %v2527_v11 = vmul.f32 %v8387_v42, %v11785_v31 }
 0x558   : > { %11772 = vst [vmem:[#allocation143_spill] sm:$0xff] %v8630_v3  ;;  %6296 = vset.pattern.permute.xlu1 %v11773_v60  ;;  %v11783_v3 = vld [vmem:[#allocation57_spill] sm:$0xff]  ;;  %v2487_v20 = vadd.f32 %v2479_v44, %v2439_v14  ;;  %v2436_v14 = vmul.f32 %v8371_v37, %v11602_v48  ;;  %v11795_v44 = vld [vmem:[#allocation91_spill] sm:$0xff] }
 0x559   : > { %2944 = vperm.xlu1 %6296, %v11771_v56   ;;  %v8636_v30 = vpop.permute.xlu1 %2600  ;;  %3405 = vperm.xlu0 %6314, %v11777_v25   ;;  %v2346_v4 = vmul.f32 %v11783_v3, %v11782_v23  ;;  %v2388_v56 = vmul.f32 %v8546_v32, %v11600_v18  ;;  %v11788_v3 = vld [vmem:[#allocation17_spill] sm:$0xff]  ;;  %v2623_v37 = vmul.f32 %v8442_v35, %v11795_v44 }
 0x55a   : > { %11776 = vst [vmem:[#allocation48_spill] sm:$0xff] %v8636_v30  ;;  %v2575_v30 = vmul.f32 %v2545_v28, %v11788_v3  ;;  %v2535_v36 = vadd.f32 %v2527_v11, %v2487_v20  ;;  %v11796_v11 = vld [vmem:[#allocation43_spill] sm:$0xff] }
 0x55b   : > { %v2394_v40 = vadd.f32 %v2386_v52, %v2346_v4  ;;  %v2396_v32 = vadd.f32 %v2388_v56, %v2348_v34  ;;  %v11794_v52 = vld [vmem:[#allocation59_spill] sm:$0xff]  ;;  %v2345_v56 = vmul.f32 %v11796_v11, %v11795_v44  ;;  %v11797_v34 = vld [vmem:[#allocation65_spill] sm:$0xff] }
 0x55c   : > { %v8645_v60 = vpop.permute.xlu0 %2992  ;;  %v2482_v27 = vmul.f32 %v11794_v52, %v7248_v19  ;;  %v2583_v28 = vadd.f32 %v2575_v30, %v2535_v36  ;;  %v2344_v20 = vmul.f32 %v11797_v34, %v11780_v55  ;;  %v2484_v36 = vmul.f32 %v8554_v12, %v11678_v9  ;;  %v11800_v30 = vld [vmem:[#allocation94_spill] sm:$0xff]  ;;  %v11801_v11 = vld [vmem:[#allocation13_spill] sm:$0xff]  ;;  %v11807_v9 = vld [vmem:[#allocation95_spill] sm:$0xff] }
 0x55d   : > { %11784 = vst [vmem:[#allocation126_spill] sm:$0xff] %v8645_v60  ;;  %2952 = vperm.xlu1 %6296, %v11683_v57   ;;  %v8652_v26 = vpop.permute.xlu1 %2608  ;;  %3413 = vperm.xlu0 %6314, %v8043_v8   ;;  %v11789_v60 = vld [vmem:[#allocation14_spill] sm:$0xff]  ;;  %v2444_v52 = vadd.f32 %v2436_v14, %v2396_v32  ;;  %v11804_v14 = vld [vmem:[#allocation96_spill] sm:$0xff] }
 0x55e   : > { %11786 = vst [vmem:[#allocation131_spill] sm:$0xff] %v8652_v26  ;;  %v2434_v59 = vmul.f32 %v11790_v5, %v11789_v60  ;;  %v11793_v26 = vld [vmem:[#allocation141_spill] sm:$0xff]  ;;  %v2390_v5 = vmul.f32 %v8467_v7, %v11657_v51  ;;  %v11187_v7 = vmov 41   ;;  %v2631_v44 = vadd.f32 %v2623_v37, %v2583_v28  ;;  %v11809_v37 = vld [vmem:[#allocation111_spill] sm:$0xff] }
 0x560   : > { %v8660_v42 = vpop.permute.xlu0 %3004  ;;  %v2442_v4 = vadd.f32 %v2434_v59, %v2394_v40  ;;  %v2530_v59 = vmul.f32 %v8393_v24, %v6965_v46  ;;  %v11802_v24 = vld [vmem:[#allocation134_spill] sm:$0xff] }
 0x561   : > { %11791 = vst [vmem:[#allocation147_spill] sm:$0xff] %v8660_v42  ;;  %2956 = vperm.xlu1 %6296, %v11777_v25   ;;  %v8663_v57 = vpop.permute.xlu1 %2616  ;;  %3421 = vperm.xlu0 %6314, %v11793_v26   ;;  %v11798_v25 = vld [vmem:[#allocation106_spill] sm:$0xff]  ;;  %v2385_v34 = vmul.f32 %v11802_v24, %v11801_v11  ;;  %v2432_v24 = vmul.f32 %v11807_v9, %v11788_v3 }
 0x562   : > { %11792 = vst [vmem:[#allocation21_spill] sm:$0xff] %v8663_v57  ;;  %v2350_v42 = vmul.f32 %v11798_v25, %v11653_v39  ;;  %v8690_v25 = vmul.f32 %v11800_v30, %v11648_v10  ;;  %v2490_v35 = vadd.f32 %v2482_v27, %v2442_v4  ;;  %v11805_v57 = vld [vmem:[#allocation18_spill] sm:$0xff]  ;;  %v11806_v30 = vld [vmem:[#allocation75_spill] sm:$0xff] }
 0x563   : > { %v2433_v10 = vmul.f32 %v11806_v30, %v11805_v57  ;;  %v2393_v9 = vadd.f32 %v2385_v34, %v2345_v56  ;;  %v2626_v34 = vmul.f32 %v8450_v17, %v11594_v29  ;;  %v11815_v17 = vld [vmem:[#allocation121_spill] sm:$0xff] }
 0x564   : > { %v8680_v40 = vpop.permute.xlu0 %3012  ;;  %v2398_v12 = vadd.f32 %v2390_v5, %v2350_v42  ;;  %v2538_v4 = vadd.f32 %v2530_v59, %v2490_v35  ;;  %v2719_v42 = vmul.f32 %v8491_v61, %v11805_v57  ;;  %v2492_v5 = vadd.f32 %v2484_v36, %v2444_v52  ;;  %v11810_v35 = vld [vmem:[#allocation133_spill] sm:$0xff] }
 0x565   : > { %11799 = vst [vmem:[#allocation57_spill] sm:$0xff] %v8680_v40  ;;  %2964 = vperm.xlu1 %6296, %v8043_v8   ;;  %6317 = vset.pattern.permute.xlu0 %v11187_v7  ;;  %v11803_v40 = vld [vmem:[#allocation122_spill] sm:$0xff]  ;;  %v2578_v8 = vmul.f32 %v8604_v21, %v7008_v62  ;;  %v2486_v21 = vmul.f32 %v8560_v33, %v11661_v22 }
 0x566   : > { %v2384_v55 = vmul.f32 %v11803_v40, %v11785_v31  ;;  %v2641_v32 = vpop.permute.xlu1 %2640  ;;  %3445 = vperm.xlu0 %6317, %v11804_v14   ;;  %v2438_v40 = vmul.f32 %v8293_v16, %v11658_v15  ;;  %v2532_v16 = vmul.f32 %v8400_v47, %v11644_v58  ;;  %v2580_v33 = vmul.f32 %v8610_v1, %v11651_v63  ;;  %v2735_v47 = vld [vmem:[#allocation3 + $0x2] sm:$0xff] }
 0x567   : > { %v2671_v7 = vmul.f32 %v2641_v32, %v11801_v11  ;;  %v2347_v32 = vmul.f32 %v11809_v37, %v7248_v19  ;;  %v2586_v52 = vadd.f32 %v2578_v8, %v2538_v4  ;;  %v8722_v36 = vadd.f32 %v2433_v10, %v2393_v9 }
 0x568   : > { %v8706_v27 = vpop.permute.xlu0 %3020  ;;  %v2392_v30 = vadd.f32 %v2384_v55, %v2344_v20  ;;  %v2446_v61 = vadd.f32 %v2438_v40, %v2398_v12  ;;  %v11813_v55 = vld [vmem:[#allocation87_spill] sm:$0xff]  ;;  %v2540_v12 = vadd.f32 %v2532_v16, %v2492_v5  ;;  %v11814_v40 = vmov 32  }
 0x569   : > { %11808 = vst [vmem:[#allocation112_spill] sm:$0xff] %v8706_v27  ;;  %v2679_v28 = vadd.f32 %v2671_v7, %v2631_v44  ;;  %2972 = vperm.xlu1 %6296, %v11793_v26   ;;  %v11811_v7 = vld [vmem:[#allocation93_spill] sm:$0xff]  ;;  %v11812_v26 = vld [vmem:[#allocation79_spill] sm:$0xff]  ;;  %v2387_v56 = vmul.f32 %v11813_v55, %v6965_v46  ;;  %v2435_v10 = vmul.f32 %v8389_v2, %v7008_v62  ;;  %v11816_v2 = vld [vmem:[#allocation138_spill] sm:$0xff] }
 0x56a   : > { %v8717_v59 = vpop.permute.xlu1 %2648  ;;  %3457 = vperm.xlu0 %6317, %v11810_v35   ;;  %v2480_v37 = vmul.f32 %v11812_v26, %v11811_v7  ;;  %v2440_v20 = vadd.f32 %v2432_v24, %v2392_v30  ;;  %v2494_v27 = vadd.f32 %v2486_v21, %v2446_v61  ;;  %v2534_v26 = vmul.f32 %v8408_v6, %v11663_v13  ;;  %v11817_v6 = vld [vmem:[#allocation24_spill] sm:$0xff] }
 0x56b   : > { %v2727_v44 = vadd.f32 %v2719_v42, %v2679_v28  ;;  %v2528_v24 = vmul.f32 %v8567_v41, %v11801_v11  ;;  %v2588_v42 = vadd.f32 %v2580_v33, %v2540_v12  ;;  %v2582_v5 = vmul.f32 %v8616_v0, %v11665_v43 }
 0x56c   : > { %v2634_v21 = vadd.f32 %v2626_v34, %v2586_v52  ;;  %v2481_v9 = vmul.f32 %v11816_v2, %v11782_v23  ;;  %v2389_v30 = vmul.f32 %v11817_v6, %v11644_v58  ;;  %v2395_v41 = vadd.f32 %v2387_v56, %v2347_v32  ;;  %v11818_v52 = vld [vmem:[#allocation90_spill] sm:$0xff] }
 0x56d   : > { %v2743_v8 = vadd.f32 %v2735_v47, %v2727_v44  ;;  %6299 = vset.pattern.permute.xlu1 %v11814_v40  ;;  %v8731_v1 = vpop.permute.xlu0 %3044  ;;  %v2488_v16 = vadd.f32 %v2480_v37, %v2440_v20  ;;  %v2628_v61 = vmul.f32 %v8455_v54, %v11721_v45  ;;  %v2722_v33 = vmul.f32 %v8498_v38, %v11602_v48  ;;  %v11824_v2 = vld [vmem:[#allocation102_spill] sm:$0xff] }
 0x56e   : > { %2996 = vperm.xlu1 %6299, %v11804_v14   ;;  %v2653_v4 = vpop.permute.xlu1 %2652  ;;  %3465 = vperm.xlu0 %6317, %v11815_v17   ;;  %v2542_v44 = vadd.f32 %v2534_v26, %v2494_v27  ;;  %v2483_v47 = vmul.f32 %v11818_v52, %v11594_v29  ;;  %v2443_v34 = vadd.f32 %v2435_v10, %v2395_v41  ;;  %v11191_v32 = vmov 42   ;;  %v11819_v27 = vld [vmem:[#allocation44_spill] sm:$0xff]  ;;  %v11821_v26 = vld [vmem:[#allocation129_spill] sm:$0xff] }
 0x56f   : > { %2751 = vst [vmem:[#allocation3 + $0x2] sm:$0xff] %v2743_v8  ;;  %v2674_v28 = vmul.f32 %v2653_v4, %v11600_v18  ;;  %v2536_v12 = vadd.f32 %v2528_v24, %v2488_v16  ;;  %v2636_v56 = vadd.f32 %v2628_v61, %v2588_v42  ;;  %v2437_v20 = vmul.f32 %v8312_v50, %v11651_v63  ;;  %v11820_v10 = vld [vmem:[#allocation140_spill] sm:$0xff]  ;;  %v11822_v4 = vld [vmem:[#allocation115_spill] sm:$0xff] }
 0x570   : > { %v2590_v37 = vadd.f32 %v2582_v5, %v2542_v44  ;;  %v2576_v40 = vmul.f32 %v8416_v49, %v11805_v57  ;;  %v2630_v24 = vmul.f32 %v11821_v26, %v11820_v10  ;;  %v11823_v5 = vld [vmem:[#allocation26_spill] sm:$0xff]  ;;  %v2531_v6 = vmul.f32 %v11824_v2, %v11600_v18  ;;  %v11825_v49 = vld [vmem:[#allocation139_spill] sm:$0xff] }
 0x571   : > { %v2682_v0 = vadd.f32 %v2674_v28, %v2634_v21  ;;  %v8752_v55 = vpop.permute.xlu0 %3056  ;;  %v2624_v21 = vmul.f32 %v11822_v4, %v11782_v23  ;;  %v2738_v28 = vld [vmem:[#allocation3 + $0x32] sm:$0xff]  ;;  %v2724_v42 = vmul.f32 %v11823_v5, %v11658_v15  ;;  %v2397_v50 = vadd.f32 %v2389_v30, %v8690_v25 }
 0x572   : > { %3000 = vperm.xlu1 %6299, %v11691_v53   ;;  %v2661_v8 = vpop.permute.xlu1 %2660  ;;  %6318 = vset.pattern.permute.xlu0 %v11191_v32  ;;  %v11826_v44 = vld [vmem:[#allocation10_spill] sm:$0xff]  ;;  %v2491_v4 = vadd.f32 %v2483_v47, %v2443_v34  ;;  %v2638_v2 = vadd.f32 %v2630_v24, %v2590_v37  ;;  %v2489_v25 = vadd.f32 %v2481_v9, %v8722_v36  ;;  %v11833_v37 = vld [vmem:[#allocation116_spill] sm:$0xff] }
 0x573   : > { %v2730_v54 = vadd.f32 %v2722_v33, %v2682_v0  ;;  %v2676_v38 = vmul.f32 %v2661_v8, %v11657_v51  ;;  %3489 = vperm.xlu0 %6318, %v11819_v27   ;;  %v2485_v33 = vmul.f32 %v11825_v49, %v11653_v39  ;;  %v11827_v0 = vld [vmem:[#allocation9_spill] sm:$0xff]  ;;  %v2584_v8 = vadd.f32 %v2576_v40, %v2536_v12  ;;  %v11831_v12 = vld [vmem:[#allocation144_spill] sm:$0xff]  ;;  %v11832_v40 = vld [vmem:[#allocation142_spill] sm:$0xff] }
 0x574   : > { %v2529_v52 = vmul.f32 %v11827_v0, %v11826_v44  ;;  %v2445_v30 = vadd.f32 %v2437_v20, %v2397_v50  ;;  %v2740_v0 = vld [vmem:[#allocation3 + $0x52] sm:$0xff]  ;;  %v2539_v14 = vadd.f32 %v2531_v6, %v2491_v4  ;;  %v2672_v24 = vmul.f32 %v11833_v37, %v11826_v44  ;;  %v11835_v36 = vld [vmem:[#allocation48_spill] sm:$0xff] }
 0x575   : > { %v2746_v41 = vadd.f32 %v2738_v28, %v2730_v54  ;;  %v2684_v16 = vadd.f32 %v2676_v38, %v2636_v56  ;;  %v8772_v61 = vpop.permute.xlu0 %3064  ;;  %v11828_v54 = vld [vmem:[#allocation145_spill] sm:$0xff]  ;;  %v11829_v38 = vld [vmem:[#allocation70_spill] sm:$0xff]  ;;  %v2632_v32 = vadd.f32 %v2624_v21, %v2584_v8  ;;  %v2625_v9 = vmul.f32 %v11835_v36, %v7248_v19  ;;  %v11838_v8 = vld [vmem:[#allocation136_spill] sm:$0xff] }
 0x576   : > { %3008 = vperm.xlu1 %6299, %v11810_v35   ;;  %v2669_v10 = vpop.permute.xlu1 %2668  ;;  %v11830_v28 = vld [vmem:[#allocation97_spill] sm:$0xff]  ;;  %v2726_v35 = vmul.f32 %v11832_v40, %v11831_v12  ;;  %v2493_v21 = vadd.f32 %v2485_v33, %v2445_v30  ;;  %v11837_v50 = vld [vmem:[#allocation38_spill] sm:$0xff]  ;;  %v11211_v12 = vmov 47  }
 0x577   : > { %2754 = vst [vmem:[#allocation3 + $0x32] sm:$0xff] %v2746_v41  ;;  %v2732_v5 = vadd.f32 %v2724_v42, %v2684_v16  ;;  %v2678_v56 = vmul.f32 %v2669_v10, %v11828_v54  ;;  %3501 = vperm.xlu0 %6318, %v11829_v38   ;;  %v2577_v49 = vmul.f32 %v11830_v28, %v11789_v60  ;;  %v11834_v41 = vld [vmem:[#allocation98_spill] sm:$0xff]  ;;  %v11839_v10 = vld [vmem:[#allocation131_spill] sm:$0xff]  ;;  %v11889_v54 = vmov 37  }
 0x578   : > { %v2537_v42 = vadd.f32 %v2529_v52, %v2489_v25  ;;  %v2533_v16 = vmul.f32 %v11834_v41, %v11657_v51  ;;  %v2579_v6 = vmul.f32 %v11837_v50, %v11602_v48  ;;  %v2627_v4 = vmul.f32 %v11839_v10, %v11838_v8  ;;  %v2742_v28 = vld [vmem:[#allocation3 + $0x72] sm:$0xff] }
 0x579   : > { %v2748_v47 = vadd.f32 %v2740_v0, %v2732_v5  ;;  %v2686_v34 = vadd.f32 %v2678_v56, %v2638_v2  ;;  %v11840_v2 = vld [vmem:[#allocation105_spill] sm:$0xff]  ;;  %v2673_v25 = vmul.f32 %v8717_v59, %v6965_v46  ;;  %v2680_v0 = vadd.f32 %v2672_v24, %v2632_v32  ;;  %v11844_v32 = vld [vmem:[#allocation86_spill] sm:$0xff] }
 0x57a   : > { %3016 = vperm.xlu1 %6299, %v11815_v17   ;;  %v8794_v20 = vpop.permute.xlu0 %3088  ;;  %v2585_v56 = vadd.f32 %v2577_v49, %v2537_v42  ;;  %v2587_v33 = vadd.f32 %v2579_v6, %v2539_v14  ;;  %v2541_v37 = vadd.f32 %v2533_v16, %v2493_v21  ;;  %v11841_v50 = vmov 33   ;;  %v2736_v42 = vld [vmem:[#allocation3 + $0x12] sm:$0xff]  ;;  %v11845_v14 = vld [vmem:[#allocation21_spill] sm:$0xff]  ;;  %v11846_v6 = vld [vmem:[#allocation120_spill] sm:$0xff] }
 0x57b   : > { %11836 = vst [vmem:[#allocation71_spill] sm:$0xff] %v8794_v20  ;;  %2756 = vst [vmem:[#allocation3 + $0x52] sm:$0xff] %v2748_v47  ;;  %v2734_v5 = vadd.f32 %v2726_v35, %v2686_v34  ;;  %v2693_v52 = vpop.permute.xlu1 %2692  ;;  %3509 = vperm.xlu0 %6318, %v11840_v2   ;;  %v11843_v35 = vld [vmem:[#allocation61_spill] sm:$0xff]  ;;  %v2629_v24 = vmul.f32 %v11845_v14, %v11661_v22  ;;  %v2675_v10 = vmul.f32 %v11846_v6, %v11644_v58  ;;  %v11878_v17 = vmov 36  }
 0x57c   : > { %v2720_v40 = vmul.f32 %v2693_v52, %v11789_v60  ;;  %v2633_v41 = vadd.f32 %v2625_v9, %v2585_v56  ;;  %v2581_v34 = vmul.f32 %v11843_v35, %v11658_v15  ;;  %v2635_v49 = vadd.f32 %v2627_v4, %v2587_v33  ;;  %v2737_v56 = vld [vmem:[#allocation3 + $0x22] sm:$0xff] }
 0x57d   : > { %v2750_v30 = vadd.f32 %v2742_v28, %v2734_v5  ;;  %v11848_v28 = vld [vmem:[#allocation60_spill] sm:$0xff] }
 0x57e   : > { %v2728_v36 = vadd.f32 %v2720_v40, %v2680_v0  ;;  %6300 = vset.pattern.permute.xlu1 %v11841_v50  ;;  %v8805_v47 = vpop.permute.xlu0 %3100  ;;  %v2681_v16 = vadd.f32 %v2673_v25, %v2633_v41  ;;  %v2589_v5 = vadd.f32 %v2581_v34, %v2541_v37  ;;  %v11195_v40 = vmov 43   ;;  %v11850_v37 = vld [vmem:[#allocation56_spill] sm:$0xff] }
 0x57f   : > { %11842 = vst [vmem:[#allocation59_spill] sm:$0xff] %v8805_v47  ;;  %2758 = vst [vmem:[#allocation3 + $0x72] sm:$0xff] %v2750_v30  ;;  %3040 = vperm.xlu1 %6300, %v11819_v27   ;;  %v2697_v59 = vpop.permute.xlu1 %2696  ;;  %3517 = vperm.xlu0 %6318, %v11844_v32   ;;  %v2683_v30 = vadd.f32 %v2675_v10, %v2635_v49  ;;  %v2677_v50 = vmul.f32 %v11850_v37, %v11663_v13  ;;  %v11852_v49 = vld [vmem:[#allocation4_spill] sm:$0xff]  ;;  %v11895_v47 = vld [vmem:[#allocation78_spill] sm:$0xff]  ;;  %v11903_v13 = vmov 38  }
 0x580   : > { %v2744_v9 = vadd.f32 %v2736_v42, %v2728_v36  ;;  %v2721_v21 = vmul.f32 %v2697_v59, %v7008_v62  ;;  %v2637_v33 = vadd.f32 %v2629_v24, %v2589_v5  ;;  %v11849_v36 = vld [vmem:[#allocation100_spill] sm:$0xff] }
 0x581   : > { %v2739_v42 = vld [vmem:[#allocation3 + $0x42] sm:$0xff] }
 0x582   : > { %2752 = vst [vmem:[#allocation3 + $0x12] sm:$0xff] %v2744_v9  ;;  %v2729_v4 = vadd.f32 %v2721_v21, %v2681_v16  ;;  %v8816_v52 = vpop.permute.xlu0 %3108  ;;  %v2685_v16 = vadd.f32 %v2677_v50, %v2637_v33  ;;  %v2741_v21 = vld [vmem:[#allocation3 + $0x62] sm:$0xff]  ;;  %v11194_v33 = vmov 44  }
 0x583   : > { %11847 = vst [vmem:[#allocation43_spill] sm:$0xff] %v8816_v52  ;;  %3048 = vperm.xlu1 %6300, %v11848_v28   ;;  %v2705_v0 = vpop.permute.xlu1 %2704  ;;  %6321 = vset.pattern.permute.xlu0 %v11195_v40  ;;  %v11857_v50 = vld [vmem:[#allocation72_spill] sm:$0xff]  ;;  %v11866_v40 = vmov 35   ;;  %v11215_v28 = vmov 48  }
 0x584   : > { %v2745_v25 = vadd.f32 %v2737_v56, %v2729_v4  ;;  %v2723_v41 = vmul.f32 %v2705_v0, %v11651_v63  ;;  %3541 = vperm.xlu0 %6321, %v11849_v36   ;;  %v11853_v4 = vld [vmem:[#allocation123_spill] sm:$0xff] }
 0x586   : > { %2753 = vst [vmem:[#allocation3 + $0x22] sm:$0xff] %v2745_v25  ;;  %v2731_v35 = vadd.f32 %v2723_v41, %v2683_v30  ;;  %v8824_v34 = vpop.permute.xlu0 %3116  ;;  %v11854_v25 = vld [vmem:[#allocation46_spill] sm:$0xff]  ;;  %v11855_v30 = vmov 34  }
 0x587   : > { %11851 = vst [vmem:[#allocation65_spill] sm:$0xff] %v8824_v34  ;;  %3052 = vperm.xlu1 %6300, %v11829_v38   ;;  %v2713_v59 = vpop.permute.xlu1 %2712 }
 0x588   : > { %v2747_v14 = vadd.f32 %v2739_v42, %v2731_v35  ;;  %v2725_v24 = vmul.f32 %v2713_v59, %v11665_v43  ;;  %3553 = vperm.xlu0 %6321, %v11852_v49   ;;  %v11858_v35 = vld [vmem:[#allocation64_spill] sm:$0xff] }
 0x58a   : > { %2755 = vst [vmem:[#allocation3 + $0x42] sm:$0xff] %v2747_v14  ;;  %v2733_v9 = vadd.f32 %v2725_v24, %v2685_v16  ;;  %v11860_v14 = vld [vmem:[#allocation130_spill] sm:$0xff] }
 0x58b   : > { %3060 = vperm.xlu1 %6300, %v11840_v2   ;;  %v8830_v6 = vpop.permute.xlu0 %3140 }
 0x58c   : > { %v2749_v10 = vadd.f32 %v2741_v21, %v2733_v9  ;;  %v8832_v5 = vpop.permute.xlu1 %2760  ;;  %3561 = vperm.xlu0 %6321, %v11853_v4   ;;  %v11863_v9 = vld [vmem:[#allocation118_spill] sm:$0xff] }
 0x58e   : > { %2757 = vst [vmem:[#allocation3 + $0x62] sm:$0xff] %v2749_v10 }
 0x58f   : > { %3068 = vperm.xlu1 %6300, %v11844_v32   ;;  %v8836_v56 = vpop.permute.xlu0 %3152  ;;  %v11871_v32 = vld [vmem:[#allocation29_spill] sm:$0xff] }
 0x590   : > { %v8838_v0 = vpop.permute.xlu1 %2768  ;;  %6322 = vset.pattern.permute.xlu0 %v11194_v33  ;;  %v11865_v33 = vld [vmem:[#allocation22_spill] sm:$0xff] }
 0x591   : > { %3585 = vperm.xlu0 %6322, %v11854_v25  }
 0x593   : > { %6303 = vset.pattern.permute.xlu1 %v11855_v30  ;;  %v8843_v41 = vpop.permute.xlu0 %3160  ;;  %v11200_v30 = vmov 45  }
 0x594   : > { %11856 = vst [vmem:[#allocation106_spill] sm:$0xff] %v8843_v41  ;;  %3092 = vperm.xlu1 %6303, %v11849_v36   ;;  %v8846_v37 = vpop.permute.xlu1 %2772  ;;  %v11910_v41 = vld [vmem:[#allocation125_spill] sm:$0xff] }
 0x595   : > { %3597 = vperm.xlu0 %6322, %v11857_v50  }
 0x598   : > { %3096 = vperm.xlu1 %6303, %v11858_v35   ;;  %v8850_v42 = vpop.permute.xlu1 %2780  ;;  %v8852_v59 = vpop.permute.xlu0 %3209 }
 0x599   : > { %11859 = vst [vmem:[#allocation94_spill] sm:$0xff] %v8852_v59  ;;  %3605 = vperm.xlu0 %6322, %v11860_v14  }
 0x59c   : > { %3104 = vperm.xlu1 %6303, %v11852_v49   ;;  %v8856_v16 = vpop.permute.xlu1 %2788  ;;  %v8858_v24 = vpop.permute.xlu0 %3221  ;;  %v11868_v49 = vld [vmem:[#allocation33_spill] sm:$0xff] }
 0x59d   : > { %11861 = vst [vmem:[#allocation13_spill] sm:$0xff] %v8856_v16  ;;  %11862 = vst [vmem:[#allocation134_spill] sm:$0xff] %v8858_v24  ;;  %3613 = vperm.xlu0 %6322, %v11863_v9  }
 0x5a0   : > { %3112 = vperm.xlu1 %6303, %v11853_v4   ;;  %v8862_v21 = vpop.permute.xlu0 %3229  ;;  %v11869_v4 = vld [vmem:[#allocation66_spill] sm:$0xff] }
 0x5a1   : > { %11864 = vst [vmem:[#allocation122_spill] sm:$0xff] %v8862_v21  ;;  %v8864_v10 = vpop.permute.xlu1 %2804  ;;  %6325 = vset.pattern.permute.xlu0 %v11200_v30 }
 0x5a2   : > { %3661 = vperm.xlu0 %6325, %v11865_v33  }
 0x5a4   : > { %6304 = vset.pattern.permute.xlu1 %v11866_v40  ;;  %v8869_v59 = vpop.permute.xlu0 %3237 }
 0x5a5   : > { %11867 = vst [vmem:[#allocation18_spill] sm:$0xff] %v8869_v59  ;;  %3136 = vperm.xlu1 %6304, %v11854_v25   ;;  %v8872_v24 = vpop.permute.xlu1 %2808  ;;  %v11207_v59 = vmov 46   ;;  %v11873_v25 = vld [vmem:[#allocation49_spill] sm:$0xff] }
 0x5a6   : > { %3673 = vperm.xlu0 %6325, %v11868_v49  }
 0x5a9   : > { %3144 = vperm.xlu1 %6304, %v11869_v4   ;;  %v8876_v21 = vpop.permute.xlu1 %2816  ;;  %v8878_v36 = vpop.permute.xlu0 %3253  ;;  %v11881_v4 = vld [vmem:[#allocation15_spill] sm:$0xff] }
 0x5aa   : > { %11870 = vst [vmem:[#allocation75_spill] sm:$0xff] %v8878_v36  ;;  %3681 = vperm.xlu0 %6325, %v11871_v32   ;;  %v11875_v36 = vld [vmem:[#allocation76_spill] sm:$0xff] }
 0x5ad   : > { %3148 = vperm.xlu1 %6304, %v11857_v50   ;;  %v8882_v30 = vpop.permute.xlu1 %2824  ;;  %v8884_v40 = vpop.permute.xlu0 %3265 }
 0x5ae   : > { %11872 = vst [vmem:[#allocation95_spill] sm:$0xff] %v8884_v40  ;;  %6326 = vset.pattern.permute.xlu0 %v11207_v59  ;;  %v11877_v40 = vld [vmem:[#allocation7_spill] sm:$0xff] }
 0x5af   : > { %3697 = vperm.xlu0 %6326, %v11873_v25  }
 0x5b1   : > { %3156 = vperm.xlu1 %6304, %v11860_v14   ;;  %v8889_v2 = vpop.permute.xlu0 %3273 }
 0x5b2   : > { %11874 = vst [vmem:[#allocation111_spill] sm:$0xff] %v8889_v2  ;;  %v8891_v38 = vpop.permute.xlu1 %2848  ;;  %v11880_v2 = vld [vmem:[#allocation89_spill] sm:$0xff] }
 0x5b3   : > { %3709 = vperm.xlu0 %6326, %v11875_v36  }
 0x5b5   : > { %3164 = vperm.xlu1 %6304, %v11863_v9  }
 0x5b6   : > { %v8895_v50 = vpop.permute.xlu1 %2856  ;;  %v8897_v27 = vpop.permute.xlu0 %3297 }
 0x5b7   : > { %11876 = vst [vmem:[#allocation79_spill] sm:$0xff] %v8897_v27  ;;  %3717 = vperm.xlu0 %6326, %v11877_v40   ;;  %v11883_v27 = vld [vmem:[#allocation104_spill] sm:$0xff] }
 0x5b9   : > { %6307 = vset.pattern.permute.xlu1 %v11878_v17 }
 0x5ba   : > { %3213 = vperm.xlu1 %6307, %v11865_v33   ;;  %v8902_v59 = vpop.permute.xlu1 %2860  ;;  %v8904_v14 = vpop.permute.xlu0 %3309 }
 0x5bb   : > { %11879 = vst [vmem:[#allocation87_spill] sm:$0xff] %v8904_v14  ;;  %3725 = vperm.xlu0 %6326, %v11880_v2   ;;  %v11886_v14 = vld [vmem:[#allocation40_spill] sm:$0xff] }
 0x5be   : > { %3217 = vperm.xlu1 %6307, %v11881_v4   ;;  %v8908_v35 = vpop.permute.xlu1 %2868  ;;  %v8910_v9 = vpop.permute.xlu0 %3317 }
 0x5bf   : > { %11882 = vst [vmem:[#allocation138_spill] sm:$0xff] %v8910_v9  ;;  %6329 = vset.pattern.permute.xlu0 %v11211_v12  ;;  %v11888_v9 = vld [vmem:[#allocation124_spill] sm:$0xff] }
 0x5c0   : > { %3749 = vperm.xlu0 %6329, %v11883_v27  }
 0x5c2   : > { %3225 = vperm.xlu1 %6307, %v11868_v49   ;;  %v8915_v17 = vpop.permute.xlu1 %2876  ;;  %v8917_v33 = vpop.permute.xlu0 %3325 }
 0x5c3   : > { %11884 = vst [vmem:[#allocation24_spill] sm:$0xff] %v8915_v17  ;;  %11885 = vst [vmem:[#allocation90_spill] sm:$0xff] %v8917_v33  ;;  %v11892_v33 = vld [vmem:[#allocation54_spill] sm:$0xff]  ;;  %v11906_v17 = vld [vmem:[#allocation69_spill] sm:$0xff] }
 0x5c4   : > { %3761 = vperm.xlu0 %6329, %v11886_v14  }
 0x5c6   : > { %3233 = vperm.xlu1 %6307, %v11871_v32   ;;  %v11893_v32 = vld [vmem:[#allocation42_spill] sm:$0xff] }
 0x5c7   : > { %v8921_v4 = vpop.permute.xlu1 %2900  ;;  %v8923_v34 = vpop.permute.xlu0 %3349 }
 0x5c8   : > { %11887 = vst [vmem:[#allocation140_spill] sm:$0xff] %v8923_v34  ;;  %3769 = vperm.xlu0 %6329, %v11888_v9  }
 0x5ca   : > { %6308 = vset.pattern.permute.xlu1 %v11889_v54 }
 0x5cb   : > { %3249 = vperm.xlu1 %6308, %v11873_v25   ;;  %v8928_v12 = vpop.permute.xlu1 %2904  ;;  %v8930_v49 = vpop.permute.xlu0 %3361 }
 0x5cc   : > { %11890 = vst [vmem:[#allocation115_spill] sm:$0xff] %v8928_v12  ;;  %11891 = vst [vmem:[#allocation26_spill] sm:$0xff] %v8930_v49  ;;  %6330 = vset.pattern.permute.xlu0 %v11215_v28  ;;  %v11897_v49 = vld [vmem:[#allocation108_spill] sm:$0xff]  ;;  %v11922_v12 = vld [vmem:[#allocation82_spill] sm:$0xff] }
 0x5cd   : > { %3793 = vperm.xlu0 %6330, %v11892_v33  }
 0x5cf   : > { %3257 = vperm.xlu1 %6308, %v11893_v32   ;;  %v8935_v52 = vpop.permute.xlu1 %2912  ;;  %v8937_v34 = vpop.permute.xlu0 %3369  ;;  %v11899_v32 = vld [vmem:[#allocation77_spill] sm:$0xff] }
 0x5d0   : > { %11894 = vst [vmem:[#allocation102_spill] sm:$0xff] %v8937_v34 }
 0x5d1   : > { %3805 = vperm.xlu0 %6330, %v11895_v47  }
 0x5d3   : > { %3261 = vperm.xlu1 %6308, %v11875_v36   ;;  %v8941_v54 = vpop.permute.xlu1 %2920  ;;  %v11221_v36 = vmov 49  }
 0x5d4   : > { %v8943_v25 = vpop.permute.xlu0 %3393 }
 0x5d5   : > { %11896 = vst [vmem:[#allocation139_spill] sm:$0xff] %v8943_v25  ;;  %3813 = vperm.xlu0 %6330, %v11897_v49   ;;  %v11902_v25 = vld [vmem:[#allocation107_spill] sm:$0xff] }
 0x5d7   : > { %3269 = vperm.xlu1 %6308, %v11877_v40  }
 0x5d8   : > { %v8947_v28 = vpop.permute.xlu1 %2944  ;;  %v8949_v45 = vpop.permute.xlu0 %3405 }
 0x5d9   : > { %11898 = vst [vmem:[#allocation9_spill] sm:$0xff] %v8949_v45  ;;  %3821 = vperm.xlu0 %6330, %v11899_v32  }
 0x5db   : > { %3277 = vperm.xlu1 %6308, %v11880_v2   ;;  %v11907_v2 = vld [vmem:[#allocation45_spill] sm:$0xff] }
 0x5dc   : > { %v8953_v34 = vpop.permute.xlu1 %2952  ;;  %v8955_v20 = vpop.permute.xlu0 %3413 }
 0x5dd   : > { %11900 = vst [vmem:[#allocation97_spill] sm:$0xff] %v8953_v34  ;;  %11901 = vst [vmem:[#allocation142_spill] sm:$0xff] %v8955_v20  ;;  %6333 = vset.pattern.permute.xlu0 %v11221_v36 }
 0x5de   : > { %3845 = vperm.xlu0 %6333, %v11902_v25  }
 0x5df   : > { %6311 = vset.pattern.permute.xlu1 %v11903_v13 }
 0x5e0   : > { %3301 = vperm.xlu1 %6311, %v11883_v27   ;;  %v8961_v40 = vpop.permute.xlu1 %2956  ;;  %v8963_v45 = vpop.permute.xlu0 %3421  ;;  %v11224_v27 = vmov 50  }
 0x5e1   : > { %11904 = vst [vmem:[#allocation116_spill] sm:$0xff] %v8961_v40  ;;  %11905 = vst [vmem:[#allocation98_spill] sm:$0xff] %v8963_v45  ;;  %v11913_v45 = vld [vmem:[#allocation58_spill] sm:$0xff] }
 0x5e2   : > { %3857 = vperm.xlu0 %6333, %v11906_v17  }
 0x5e4   : > { %3305 = vperm.xlu1 %6311, %v11907_v2   ;;  %v8967_v34 = vpop.permute.xlu1 %2964 }
 0x5e5   : > { %11908 = vst [vmem:[#allocation48_spill] sm:$0xff] %v8967_v34  ;;  %v8969_v20 = vpop.permute.xlu0 %3445  ;;  %v11915_v34 = vld [vmem:[#allocation80_spill] sm:$0xff] }
 0x5e6   : > { %11909 = vst [vmem:[#allocation38_spill] sm:$0xff] %v8969_v20  ;;  %3865 = vperm.xlu0 %6333, %v11910_v41   ;;  %v11916_v20 = vmov 39  }
 0x5e8   : > { %3313 = vperm.xlu1 %6311, %v11886_v14   ;;  %v8973_v36 = vpop.permute.xlu1 %2972 }
 0x5e9   : > { %11911 = vst [vmem:[#allocation131_spill] sm:$0xff] %v8973_v36  ;;  %v8975_v13 = vpop.permute.xlu0 %3457 }
 0x5ea   : > { %11912 = vst [vmem:[#allocation61_spill] sm:$0xff] %v8975_v13  ;;  %6334 = vset.pattern.permute.xlu0 %v11224_v27  ;;  %v11919_v13 = vld [vmem:[#allocation132_spill] sm:$0xff]  ;;  %v11920_v27 = vld [vmem:[#allocation47_spill] sm:$0xff] }
 0x5eb   : > { %3889 = vperm.xlu0 %6334, %v11913_v45  }
 0x5ec   : > { %3321 = vperm.xlu1 %6311, %v11888_v9  }
 0x5ed   : > { %v2997_v2 = vpop.permute.xlu1 %2996  ;;  %v8980_v40 = vpop.permute.xlu0 %3465 }
 0x5ee   : > { %11914 = vst [vmem:[#allocation21_spill] sm:$0xff] %v8980_v40 }
 0x5ef   : > { %3901 = vperm.xlu0 %6334, %v11915_v34  }
 0x5f0   : > { %6312 = vset.pattern.permute.xlu1 %v11916_v20 }
 0x5f1   : > { %3345 = vperm.xlu1 %6312, %v11892_v33   ;;  %v8985_v14 = vpop.permute.xlu1 %3000  ;;  %v11229_v33 = vmov 51  }
 0x5f2   : > { %11917 = vst [vmem:[#allocation120_spill] sm:$0xff] %v8985_v14  ;;  %v8987_v36 = vpop.permute.xlu0 %3489 }
 0x5f3   : > { %11918 = vst [vmem:[#allocation56_spill] sm:$0xff] %v8987_v36  ;;  %3909 = vperm.xlu0 %6334, %v11919_v13   ;;  %v11924_v36 = vld [vmem:[#allocation110_spill] sm:$0xff] }
 0x5f5   : > { %3353 = vperm.xlu1 %6312, %v11920_v27   ;;  %v8991_v43 = vpop.permute.xlu1 %3008 }
 0x5f6   : > { %v8993_v9 = vpop.permute.xlu0 %3501 }
 0x5f7   : > { %11921 = vst [vmem:[#allocation151_spill] sm:$0xff] %v8993_v9  ;;  %3917 = vperm.xlu0 %6334, %v11922_v12   ;;  %v2832_v9 = vmul.f32 %v8864_v10, %v11785_v31  ;;  %v11927_v12 = vld [vmem:[#allocation73_spill] sm:$0xff]  ;;  %v2928_v10 = vmul.f32 %v8921_v4, %v11811_v7  ;;  %v11939_v4 = vld [vmem:[#allocation52_spill] sm:$0xff] }
 0x5f9   : > { %3357 = vperm.xlu1 %6312, %v11895_v47   ;;  %v8997_v40 = vpop.permute.xlu1 %3016  ;;  %v11928_v47 = vld [vmem:[#allocation16_spill] sm:$0xff] }
 0x5fa   : > { %v8999_v20 = vpop.permute.xlu0 %3509 }
 0x5fb   : > { %11923 = vst [vmem:[#allocation152_spill] sm:$0xff] %v8999_v20  ;;  %6337 = vset.pattern.permute.xlu0 %v11229_v33  ;;  %v11929_v20 = vld [vmem:[#allocation81_spill] sm:$0xff] }
 0x5fc   : > { %3941 = vperm.xlu0 %6337, %v11924_v36   ;;  %v2792_v14 = vmul.f32 %v11929_v20, %v11928_v47 }
 0x5fd   : > { %3365 = vperm.xlu1 %6312, %v11897_v49   ;;  %v11932_v49 = vld [vmem:[#allocation127_spill] sm:$0xff] }
 0x5fe   : > { %v9004_v27 = vpop.permute.xlu1 %3040  ;;  %v9006_v13 = vpop.permute.xlu0 %3517  ;;  %v2840_v36 = vadd.f32 %v2832_v9, %v2792_v14  ;;  %v11234_v9 = vmov 52  }
 0x5ff   : > { %11925 = vst [vmem:[#allocation153_spill] sm:$0xff] %v9004_v27  ;;  %11926 = vst [vmem:[#allocation154_spill] sm:$0xff] %v9006_v13  ;;  %v11933_v27 = vmov 40   ;;  %v11934_v13 = vld [vmem:[#allocation30_spill] sm:$0xff] }
 0x600   : > { %3953 = vperm.xlu0 %6337, %v11927_v12   ;;  %v2880_v16 = vmul.f32 %v11934_v13, %v11788_v3  ;;  %v11938_v13 = vld [vmem:[#allocation32_spill] sm:$0xff] }
 0x601   : > { %3373 = vperm.xlu1 %6312, %v11899_v32  }
 0x602   : > { %v9014_v34 = vpop.permute.xlu1 %3048  ;;  %v2888_v14 = vadd.f32 %v2880_v16, %v2840_v36  ;;  %v2837_v36 = vmul.f32 %v8882_v30, %v11644_v58  ;;  %v3024_v16 = vmul.f32 %v2997_v2, %v11805_v57  ;;  %v11949_v30 = vld [vmem:[#allocation146_spill] sm:$0xff]  ;;  %v11950_v2 = vld [vmem:[#allocation23_spill] sm:$0xff] }
 0x603   : > { %11930 = vst [vmem:[#allocation81_spill] sm:$0xff] %v9014_v34  ;;  %v9016_v33 = vpop.permute.xlu0 %3541 }
 0x604   : > { %11931 = vst [vmem:[#allocation155_spill] sm:$0xff] %v9016_v33  ;;  %3961 = vperm.xlu0 %6337, %v11932_v49   ;;  %v2835_v33 = vmul.f32 %v8876_v21, %v6965_v46  ;;  %v2795_v49 = vmul.f32 %v11938_v13, %v7248_v19  ;;  %v2936_v12 = vadd.f32 %v2928_v10, %v2888_v14  ;;  %v11945_v13 = vld [vmem:[#allocation149_spill] sm:$0xff] }
 0x605   : > { %6315 = vset.pattern.permute.xlu1 %v11933_v27  ;;  %v11937_v27 = vld [vmem:[#allocation62_spill] sm:$0xff]  ;;  %v11946_v14 = vld [vmem:[#allocation85_spill] sm:$0xff] }
 0x606   : > { %3397 = vperm.xlu1 %6315, %v11902_v25   ;;  %v9025_v32 = vpop.permute.xlu1 %3052  ;;  %v2843_v21 = vadd.f32 %v2835_v33, %v2795_v49  ;;  %v11948_v33 = vld [vmem:[#allocation51_spill] sm:$0xff] }
 0x607   : > { %11935 = vst [vmem:[#allocation30_spill] sm:$0xff] %v9025_v32  ;;  %v9027_v20 = vpop.permute.xlu0 %3553 }
 0x608   : > { %11936 = vst [vmem:[#allocation156_spill] sm:$0xff] %v9027_v20  ;;  %6338 = vset.pattern.permute.xlu0 %v11234_v9  ;;  %v11942_v20 = vld [vmem:[#allocation114_spill] sm:$0xff]  ;;  %v11943_v9 = vld [vmem:[#allocation83_spill] sm:$0xff] }
 0x609   : > { %3985 = vperm.xlu0 %6338, %v11937_v27   ;;  %v2976_v32 = vmul.f32 %v11942_v20, %v11801_v11  ;;  %v11944_v27 = vld [vmem:[#allocation135_spill] sm:$0xff]  ;;  %v2831_v20 = vmul.f32 %v11949_v30, %v11948_v33  ;;  %v11954_v30 = vld [vmem:[#allocation37_spill] sm:$0xff] }
 0x60a   : > { %3401 = vperm.xlu1 %6315, %v11939_v4   ;;  %v9036_v25 = vpop.permute.xlu1 %3060  ;;  %v2797_v10 = vmul.f32 %v11945_v13, %v11944_v27  ;;  %v2883_v4 = vmul.f32 %v11946_v14, %v7008_v62  ;;  %v2791_v13 = vmul.f32 %v11821_v26, %v8832_v5  ;;  %v11951_v27 = vld [vmem:[#allocation27_spill] sm:$0xff]  ;;  %v2885_v33 = vmul.f32 %v11954_v30, %v11651_v63  ;;  %v11956_v5 = vld [vmem:[#allocation50_spill] sm:$0xff] }
 0x60b   : > { %11940 = vst [vmem:[#allocation32_spill] sm:$0xff] %v9036_v25  ;;  %v9038_v7 = vpop.permute.xlu0 %3561  ;;  %v2984_v25 = vadd.f32 %v2976_v32, %v2936_v12  ;;  %v9063_v14 = vmul.f32 %v11951_v27, %v11600_v18  ;;  %v2879_v26 = vmul.f32 %v8891_v38, %v11956_v5  ;;  %v11957_v27 = vld [vmem:[#allocation28_spill] sm:$0xff]  ;;  %v11960_v38 = vld [vmem:[#allocation109_spill] sm:$0xff] }
 0x60c   : > { %11941 = vst [vmem:[#allocation157_spill] sm:$0xff] %v9038_v7  ;;  %v2931_v7 = vmul.f32 %v8935_v52, %v11594_v29  ;;  %v2845_v34 = vadd.f32 %v2837_v36, %v2797_v10  ;;  %v2891_v52 = vadd.f32 %v2883_v4, %v2843_v21  ;;  %v11958_v4 = vld [vmem:[#allocation103_spill] sm:$0xff]  ;;  %v3072_v21 = vmul.f32 %v8731_v1, %v11782_v23 }
 0x60d   : > { %3997 = vperm.xlu0 %6338, %v11943_v9   ;;  %v2834_v9 = vmul.f32 %v11950_v2, %v11826_v44  ;;  %v3032_v12 = vadd.f32 %v3024_v16, %v2984_v25  ;;  %v11955_v2 = vld [vmem:[#allocation99_spill] sm:$0xff]  ;;  %v9080_v25 = vmul.f32 %v11958_v4, %v7248_v19  ;;  %v2933_v36 = vmul.f32 %v8941_v54, %v11653_v39  ;;  %v11959_v16 = vld [vmem:[#allocation137_spill] sm:$0xff] }
 0x60e   : > { %3409 = vperm.xlu1 %6315, %v11906_v17   ;;  %v9053_v49 = vpop.permute.xlu1 %3068  ;;  %v11953_v17 = vld [vmem:[#allocation148_spill] sm:$0xff]  ;;  %v2927_v46 = vmul.f32 %v11955_v2, %v11928_v47  ;;  %v9089_v10 = vmul.f32 %v11959_v16, %v11838_v8  ;;  %v2979_v30 = vmul.f32 %v11960_v38, %v11600_v18  ;;  %v11961_v2 = vld [vmem:[#allocation143_spill] sm:$0xff]  ;;  %v2893_v5 = vadd.f32 %v2885_v33, %v2845_v34  ;;  %v11962_v16 = vld [vmem:[#allocation126_spill] sm:$0xff] }
 0x60f   : > { %11947 = vst [vmem:[#allocation114_spill] sm:$0xff] %v9053_v49  ;;  %v9069_v49 = vmul.f32 %v11953_v17, %v11657_v51  ;;  %v2939_v17 = vadd.f32 %v2931_v7, %v2891_v52  ;;  %v2981_v4 = vmul.f32 %v11961_v2, %v11657_v51  ;;  %v3027_v7 = vmul.f32 %v8991_v43, %v11602_v48 }
 0x610   : > { %v9065_v32 = vpop.permute.xlu0 %3585  ;;  %v3080_v1 = vadd.f32 %v3072_v21, %v3032_v12  ;;  %v3168_v38 = vmul.f32 %v8830_v6, %v11789_v60  ;;  %v2794_v2 = vmul.f32 %v8846_v37, %v11782_v23  ;;  %v2941_v34 = vadd.f32 %v2933_v36, %v2893_v5 }
 0x611   : > { %11952 = vst [vmem:[#allocation149_spill] sm:$0xff] %v9065_v32  ;;  %4005 = vperm.xlu0 %6338, %v11957_v27   ;;  %v2839_v32 = vadd.f32 %v2831_v20, %v2791_v13  ;;  %v11963_v13 = vld [vmem:[#allocation84_spill] sm:$0xff]  ;;  %v2987_v33 = vadd.f32 %v2979_v30, %v2939_v17  ;;  %v11964_v12 = vmov 41   ;;  %v2882_v6 = vmul.f32 %v8902_v59, %v11789_v60 }
 0x612   : > { %3417 = vperm.xlu1 %6315, %v11910_v41   ;;  %v3023_v41 = vmul.f32 %v11962_v16, %v11788_v3  ;;  %v3075_v16 = vmul.f32 %v8752_v55, %v11838_v8  ;;  %v3029_v17 = vmul.f32 %v8997_v40, %v11658_v15  ;;  %v3077_v55 = vmul.f32 %v8772_v61, %v11661_v22 }
 0x613   : > { %v3093_v47 = vpop.permute.xlu1 %3092  ;;  %v2887_v20 = vadd.f32 %v2879_v26, %v2839_v32  ;;  %v2975_v26 = vmul.f32 %v8947_v28, %v11785_v31  ;;  %v2833_v32 = vmul.f32 %v8872_v24, %v11801_v11  ;;  %v3035_v5 = vadd.f32 %v3027_v7, %v2987_v33  ;;  %v11966_v24 = vld [vmem:[#allocation91_spill] sm:$0xff] }
 0x614   : > { %v3120_v54 = vmul.f32 %v3093_v47, %v11826_v44  ;;  %v9098_v52 = vpop.permute.xlu0 %3597  ;;  %v11965_v47 = vld [vmem:[#allocation147_spill] sm:$0xff]  ;;  %v2842_v59 = vadd.f32 %v2834_v9, %v2794_v2  ;;  %v2796_v28 = vmul.f32 %v8850_v42, %v11594_v29  ;;  %v2793_v7 = vmul.f32 %v8838_v0, %v11966_v24 }
 0x615   : > { %4013 = vperm.xlu0 %6338, %v11963_v13   ;;  %v9110_v21 = vmul.f32 %v11965_v47, %v7008_v62  ;;  %v2881_v40 = vmul.f32 %v8895_v50, %v11805_v57  ;;  %v3171_v61 = vmul.f32 %v8836_v56, %v11651_v63  ;;  %v3083_v47 = vadd.f32 %v3075_v16, %v3035_v5  ;;  %v11969_v56 = vld [vmem:[#allocation13_spill] sm:$0xff]  ;;  %v11974_v16 = vld [vmem:[#allocation12_spill] sm:$0xff] }
 0x616   : > { %v3128_v43 = vadd.f32 %v3120_v54, %v3080_v1  ;;  %6316 = vset.pattern.permute.xlu1 %v11964_v12  ;;  %v2935_v1 = vadd.f32 %v2927_v46, %v2887_v20  ;;  %v3185_v54 = vld [vmem:[#allocation3 + $0x20] sm:$0xff]  ;;  %v11241_v12 = vmov 53   ;;  %v2890_v9 = vadd.f32 %v2882_v6, %v2842_v59 }
 0x617   : > { %3441 = vperm.xlu1 %6316, %v11913_v45   ;;  %v9119_v37 = vpop.permute.xlu1 %3096  ;;  %v2884_v46 = vmul.f32 %v8908_v35, %v11602_v48  ;;  %v2841_v20 = vadd.f32 %v2833_v32, %v2793_v7  ;;  %v2798_v6 = vmul.f32 %v11969_v56, %v11653_v39  ;;  %v11973_v32 = vld [vmem:[#allocation106_spill] sm:$0xff]  ;;  %v11975_v5 = vld [vmem:[#allocation116_spill] sm:$0xff] }
 0x618   : > { %v3176_v36 = vadd.f32 %v3168_v38, %v3128_v43  ;;  %v9125_v30 = vpop.permute.xlu0 %3605  ;;  %v2989_v38 = vadd.f32 %v2981_v4, %v2941_v34  ;;  %v11967_v43 = vld [vmem:[#allocation113_spill] sm:$0xff]  ;;  %v2983_v42 = vadd.f32 %v2975_v26, %v2935_v1  ;;  %v2844_v34 = vadd.f32 %v9063_v14, %v2796_v28  ;;  %v11972_v1 = vld [vmem:[#allocation31_spill] sm:$0xff]  ;;  %v11979_v45 = vld [vmem:[#allocation24_spill] sm:$0xff] }
 0x619   : > { %6341 = vset.pattern.permute.xlu0 %v11241_v12  ;;  %v11971_v26 = vld [vmem:[#allocation153_spill] sm:$0xff]  ;;  %v2978_v7 = vmul.f32 %v11975_v5, %v11974_v16  ;;  %v2938_v56 = vadd.f32 %v9080_v25, %v2890_v9  ;;  %v11978_v12 = vld [vmem:[#allocation80_spill] sm:$0xff] }
 0x61a   : > { %v3193_v33 = vadd.f32 %v3185_v54, %v3176_v36  ;;  %4037 = vperm.xlu0 %6341, %v11967_v43   ;;  %v3037_v0 = vadd.f32 %v3029_v17, %v2989_v38  ;;  %v11970_v36 = vld [vmem:[#allocation115_spill] sm:$0xff]  ;;  %v3071_v59 = vmul.f32 %v11971_v26, %v11966_v24  ;;  %v3173_v17 = vmul.f32 %v11973_v32, %v11972_v1  ;;  %v11977_v28 = vld [vmem:[#allocation97_spill] sm:$0xff]  ;;  %v11983_v9 = vld [vmem:[#allocation48_spill] sm:$0xff] }
 0x61b   : > { %3449 = vperm.xlu1 %6316, %v11691_v53   ;;  %v3105_v2 = vpop.permute.xlu1 %3104  ;;  %v2929_v35 = vmul.f32 %v11970_v36, %v11782_v23  ;;  %v2889_v54 = vadd.f32 %v2881_v40, %v2841_v20  ;;  %v2892_v14 = vadd.f32 %v2884_v46, %v2844_v34  ;;  %v3031_v36 = vadd.f32 %v3023_v41, %v2983_v42  ;;  %v11981_v46 = vld [vmem:[#allocation120_spill] sm:$0xff]  ;;  %v3188_v53 = vld [vmem:[#allocation3 + $0x50] sm:$0xff] }
 0x61c   : > { %3201 = vst [vmem:[#allocation3 + $0x20] sm:$0xff] %v3193_v33  ;;  %v3123_v50 = vmul.f32 %v3105_v2, %v11644_v58  ;;  %v9143_v4 = vpop.permute.xlu0 %3613  ;;  %v11976_v33 = vld [vmem:[#allocation5_spill] sm:$0xff]  ;;  %v2977_v2 = vmul.f32 %v11977_v28, %v11826_v44  ;;  %v2886_v32 = vmul.f32 %v11979_v45, %v11658_v15  ;;  %v3085_v20 = vadd.f32 %v3077_v55, %v3037_v0  ;;  %v11985_v55 = vld [vmem:[#allocation71_spill] sm:$0xff] }
 0x61d   : > { %11968 = vst [vmem:[#allocation85_spill] sm:$0xff] %v9143_v4  ;;  %v11980_v4 = vld [vmem:[#allocation25_spill] sm:$0xff]  ;;  %v3025_v34 = vmul.f32 %v11981_v46, %v11789_v60  ;;  %v3079_v28 = vadd.f32 %v3071_v59, %v3031_v36  ;;  %v2986_v41 = vadd.f32 %v2978_v7, %v2938_v56  ;;  %v2980_v42 = vmul.f32 %v11983_v9, %v11644_v58  ;;  %v11988_v7 = vld [vmem:[#allocation30_spill] sm:$0xff] }
 0x61e   : > { %v3131_v38 = vadd.f32 %v3123_v50, %v3083_v47  ;;  %4049 = vperm.xlu0 %6341, %v11976_v33   ;;  %v2846_v47 = vadd.f32 %v9069_v49, %v2798_v6  ;;  %v2937_v50 = vadd.f32 %v2929_v35, %v2889_v54  ;;  %v3119_v0 = vmul.f32 %v11985_v55, %v11801_v11  ;;  %v11986_v6 = vld [vmem:[#allocation81_spill] sm:$0xff]  ;;  %v11987_v54 = vld [vmem:[#allocation132_spill] sm:$0xff] }
 0x61f   : > { %3453 = vperm.xlu1 %6316, %v11978_v12   ;;  %v3113_v26 = vpop.permute.xlu1 %3112  ;;  %v3073_v35 = vmul.f32 %v11986_v6, %v7248_v19  ;;  %v3074_v56 = vmul.f32 %v11988_v7, %v11594_v29  ;;  %v11994_v55 = vld [vmem:[#allocation57_spill] sm:$0xff]  ;;  %v11995_v6 = vld [vmem:[#allocation150_spill] sm:$0xff] }
 0x620   : > { %v3179_v40 = vadd.f32 %v3171_v61, %v3131_v38  ;;  %v3125_v5 = vmul.f32 %v3113_v26, %v11980_v4  ;;  %v11984_v61 = vld [vmem:[#allocation128_spill] sm:$0xff]  ;;  %v2985_v49 = vadd.f32 %v2977_v2, %v2937_v50  ;;  %v2894_v59 = vadd.f32 %v2886_v32, %v2846_v47  ;;  %v11990_v32 = vld [vmem:[#allocation63_spill] sm:$0xff] }
 0x621   : > { %v9167_v25 = vpop.permute.xlu0 %3661  ;;  %v2940_v38 = vadd.f32 %v9089_v10, %v2892_v14  ;;  %v3127_v2 = vadd.f32 %v3119_v0, %v3079_v28  ;;  %v2934_v47 = vmul.f32 %v11990_v32, %v11661_v22  ;;  %v3034_v14 = vadd.f32 %v9110_v21, %v2986_v41  ;;  %v11992_v28 = vld [vmem:[#allocation82_spill] sm:$0xff] }
 0x622   : > { %11982 = vst [vmem:[#allocation146_spill] sm:$0xff] %v9167_v25  ;;  %v3196_v12 = vadd.f32 %v3188_v53, %v3179_v40  ;;  %v3133_v45 = vadd.f32 %v3125_v5, %v3085_v20  ;;  %4057 = vperm.xlu0 %6341, %v11984_v61   ;;  %v3033_v26 = vadd.f32 %v3025_v34, %v2985_v49  ;;  %v3190_v20 = vld [vmem:[#allocation3 + $0x70] sm:$0xff] }
 0x623   : > { %3461 = vperm.xlu1 %6316, %v11987_v54   ;;  %v3121_v40 = vmul.f32 %v9119_v37, %v11974_v16  ;;  %v2988_v10 = vadd.f32 %v2980_v42, %v2940_v38  ;;  %v3028_v0 = vmul.f32 %v11994_v55, %v11651_v63  ;;  %v2942_v49 = vadd.f32 %v2934_v47, %v2894_v59  ;;  %v3184_v21 = vld [vmem:[#allocation3 + $0x10] sm:$0xff]  ;;  %v11996_v38 = vld [vmem:[#allocation32_spill] sm:$0xff] }
 0x624   : > { %3204 = vst [vmem:[#allocation3 + $0x50] sm:$0xff] %v3196_v12  ;;  %v3181_v53 = vadd.f32 %v3173_v17, %v3133_v45  ;;  %v3137_v36 = vpop.permute.xlu1 %3136  ;;  %v11244_v12 = vmov 54   ;;  %v11991_v17 = vld [vmem:[#allocation131_spill] sm:$0xff]  ;;  %v3081_v37 = vadd.f32 %v3073_v35, %v3033_v26  ;;  %v3082_v42 = vadd.f32 %v3074_v56, %v3034_v14  ;;  %v12000_v47 = vld [vmem:[#allocation20_spill] sm:$0xff]  ;;  %v12036_v25 = vld [vmem:[#allocation6_spill] sm:$0xff] }
 0x625   : > { %v3167_v5 = vmul.f32 %v3137_v36, %v11805_v57  ;;  %v9183_v50 = vpop.permute.xlu0 %3673  ;;  %v2982_v34 = vmul.f32 %v11991_v17, %v11980_v4  ;;  %v11993_v45 = vld [vmem:[#allocation19_spill] sm:$0xff]  ;;  %v3076_v7 = vmul.f32 %v11996_v38, %v11995_v6  ;;  %v3036_v32 = vadd.f32 %v3028_v0, %v2988_v10  ;;  %v12001_v14 = vld [vmem:[#allocation112_spill] sm:$0xff]  ;;  %v12002_v17 = vld [vmem:[#allocation110_spill] sm:$0xff] }
 0x626   : > { %11989 = vst [vmem:[#allocation23_spill] sm:$0xff] %v9183_v50  ;;  %v3198_v46 = vadd.f32 %v3190_v20, %v3181_v53  ;;  %6342 = vset.pattern.permute.xlu0 %v11244_v12  ;;  %v3129_v53 = vadd.f32 %v3121_v40, %v3081_v37  ;;  %v11998_v20 = vld [vmem:[#allocation59_spill] sm:$0xff]  ;;  %v11999_v56 = vmov 42   ;;  %v3186_v40 = vld [vmem:[#allocation3 + $0x30] sm:$0xff] }
 0x627   : > { %v3175_v9 = vadd.f32 %v3167_v5, %v3127_v2  ;;  %3469 = vperm.xlu1 %6316, %v11992_v28   ;;  %4105 = vperm.xlu0 %6342, %v11993_v45   ;;  %v3122_v2 = vmul.f32 %v11998_v20, %v11600_v18  ;;  %v2990_v5 = vadd.f32 %v2982_v34, %v2942_v49  ;;  %v12006_v49 = vld [vmem:[#allocation43_spill] sm:$0xff]  ;;  %v12007_v20 = vld [vmem:[#allocation36_spill] sm:$0xff]  ;;  %v11253_v28 = vmov 58  }
 0x628   : > { %3206 = vst [vmem:[#allocation3 + $0x70] sm:$0xff] %v3198_v46  ;;  %v3145_v41 = vpop.permute.xlu1 %3144  ;;  %v3030_v46 = vmul.f32 %v12001_v14, %v11972_v1  ;;  %v3084_v55 = vadd.f32 %v3076_v7, %v3036_v32  ;;  %v12008_v14 = vld [vmem:[#allocation60_spill] sm:$0xff] }
 0x629   : > { %v3192_v36 = vadd.f32 %v3184_v21, %v3175_v9  ;;  %v3169_v35 = vmul.f32 %v3145_v41, %v7008_v62  ;;  %v9198_v26 = vpop.permute.xlu0 %3681  ;;  %v3130_v9 = vadd.f32 %v3122_v2, %v3082_v42  ;;  %v12003_v21 = vld [vmem:[#allocation114_spill] sm:$0xff]  ;;  %v12004_v41 = vld [vmem:[#allocation129_spill] sm:$0xff] }
 0x62a   : > { %11997 = vst [vmem:[#allocation27_spill] sm:$0xff] %v9198_v26  ;;  %v3078_v38 = vmul.f32 %v12004_v41, %v12003_v21  ;;  %v12011_v21 = vld [vmem:[#allocation65_spill] sm:$0xff] }
 0x62b   : > { %3200 = vst [vmem:[#allocation3 + $0x10] sm:$0xff] %v3192_v36  ;;  %v3177_v59 = vadd.f32 %v3169_v35, %v3129_v53  ;;  %6319 = vset.pattern.permute.xlu1 %v11999_v56  ;;  %4117 = vperm.xlu0 %6342, %v12000_v47   ;;  %v3124_v53 = vmul.f32 %v12006_v49, %v11657_v51  ;;  %v3187_v56 = vld [vmem:[#allocation3 + $0x40] sm:$0xff] }
 0x62c   : > { %3493 = vperm.xlu1 %6319, %v12002_v17   ;;  %v3149_v37 = vpop.permute.xlu1 %3148  ;;  %v3038_v36 = vadd.f32 %v3030_v46, %v2990_v5  ;;  %v12012_v46 = vld [vmem:[#allocation35_spill] sm:$0xff]  ;;  %v12045_v17 = vmov 45  }
 0x62d   : > { %v3194_v34 = vadd.f32 %v3186_v40, %v3177_v59  ;;  %v3170_v10 = vmul.f32 %v3149_v37, %v11602_v48  ;;  %v3132_v32 = vadd.f32 %v3124_v53, %v3084_v55  ;;  %v12010_v37 = vld [vmem:[#allocation145_spill] sm:$0xff] }
 0x62e   : > { %v9210_v0 = vpop.permute.xlu0 %3697  ;;  %v3086_v7 = vadd.f32 %v3078_v38, %v3038_v36  ;;  %v3126_v12 = vmul.f32 %v12011_v21, %v12010_v37  ;;  %v12014_v38 = vld [vmem:[#allocation144_spill] sm:$0xff]  ;;  %v12021_v21 = vld [vmem:[#allocation62_spill] sm:$0xff]  ;;  %v12061_v37 = vld [vmem:[#allocation133_spill] sm:$0xff] }
 0x62f   : > { %12005 = vst [vmem:[#allocation148_spill] sm:$0xff] %v9210_v0  ;;  %3202 = vst [vmem:[#allocation3 + $0x30] sm:$0xff] %v3194_v34  ;;  %v3178_v35 = vadd.f32 %v3170_v10, %v3130_v9  ;;  %4125 = vperm.xlu0 %6342, %v12007_v20   ;;  %v3189_v9 = vld [vmem:[#allocation3 + $0x60] sm:$0xff]  ;;  %v12013_v34 = vld [vmem:[#allocation73_spill] sm:$0xff] }
 0x630   : > { %3497 = vperm.xlu1 %6319, %v12008_v14   ;;  %v3157_v42 = vpop.permute.xlu1 %3156  ;;  %v3134_v0 = vadd.f32 %v3126_v12, %v3086_v7  ;;  %v12019_v12 = vmov 43   ;;  %v12020_v7 = vld [vmem:[#allocation8_spill] sm:$0xff]  ;;  %v11258_v14 = vmov 59  }
 0x631   : > { %v3195_v2 = vadd.f32 %v3187_v56, %v3178_v35  ;;  %v3172_v59 = vmul.f32 %v3157_v42, %v11658_v15  ;;  %v11245_v35 = vmov 55   ;;  %v12016_v56 = vld [vmem:[#allocation127_spill] sm:$0xff]  ;;  %v12017_v42 = vld [vmem:[#allocation88_spill] sm:$0xff] }
 0x632   : > { %v9217_v40 = vpop.permute.xlu0 %3709 }
 0x633   : > { %12009 = vst [vmem:[#allocation37_spill] sm:$0xff] %v9217_v40  ;;  %3203 = vst [vmem:[#allocation3 + $0x40] sm:$0xff] %v3195_v2  ;;  %v3180_v5 = vadd.f32 %v3172_v59, %v3132_v32  ;;  %4133 = vperm.xlu0 %6342, %v12012_v46  }
 0x634   : > { %3505 = vperm.xlu1 %6319, %v12013_v34   ;;  %v3165_v10 = vpop.permute.xlu1 %3164 }
 0x635   : > { %v3197_v49 = vadd.f32 %v3189_v9, %v3180_v5  ;;  %v3174_v36 = vmul.f32 %v3165_v10, %v12014_v38  ;;  %v12024_v9 = vld [vmem:[#allocation117_spill] sm:$0xff]  ;;  %v12025_v10 = vld [vmem:[#allocation64_spill] sm:$0xff] }
 0x636   : > { %v9224_v55 = vpop.permute.xlu0 %3717 }
 0x637   : > { %12015 = vst [vmem:[#allocation99_spill] sm:$0xff] %v9224_v55  ;;  %3205 = vst [vmem:[#allocation3 + $0x60] sm:$0xff] %v3197_v49  ;;  %v3182_v53 = vadd.f32 %v3174_v36, %v3134_v0  ;;  %6345 = vset.pattern.permute.xlu0 %v11245_v35  ;;  %v12029_v35 = vld [vmem:[#allocation39_spill] sm:$0xff] }
 0x638   : > { %3513 = vperm.xlu1 %6319, %v12016_v56   ;;  %4149 = vperm.xlu0 %6345, %v12017_v42   ;;  %v12031_v55 = vld [vmem:[#allocation67_spill] sm:$0xff] }
 0x639   : > { %v3199_v2 = vadd.f32 %v12004_v41, %v3182_v53  ;;  %v9230_v32 = vpop.permute.xlu1 %3213  ;;  %v11246_v53 = vmov 56  }
 0x63a   : > { %v9232_v59 = vpop.permute.xlu0 %3725 }
 0x63b   : > { %12018 = vst [vmem:[#allocation103_spill] sm:$0xff] %v9232_v59  ;;  %3207 = vst [vmem:[#allocation3 + $0x80] sm:$0xff] %v3199_v2  ;;  %v12027_v2 = vld [vmem:[#allocation83_spill] sm:$0xff] }
 0x63c   : > { %6320 = vset.pattern.permute.xlu1 %v12019_v12  ;;  %4161 = vperm.xlu0 %6345, %v12020_v7  }
 0x63d   : > { %3537 = vperm.xlu1 %6320, %v12021_v21   ;;  %v9237_v0 = vpop.permute.xlu1 %3217  ;;  %v12039_v21 = vld [vmem:[#allocation92_spill] sm:$0xff] }
 0x63e   : > { %12022 = vst [vmem:[#allocation137_spill] sm:$0xff] %v9237_v0  ;;  %v12099_v0 = vld [vmem:[#allocation16_spill] sm:$0xff] }
 0x63f   : > { %v9239_v5 = vpop.permute.xlu0 %3749 }
 0x640   : > { %12023 = vst [vmem:[#allocation109_spill] sm:$0xff] %v9239_v5  ;;  %4169 = vperm.xlu0 %6345, %v12024_v9   ;;  %v12035_v5 = vmov 44  }
 0x641   : > { %3545 = vperm.xlu1 %6320, %v12025_v10   ;;  %v9243_v49 = vpop.permute.xlu1 %3225  ;;  %v12055_v10 = vld [vmem:[#allocation141_spill] sm:$0xff] }
 0x643   : > { %v9245_v36 = vpop.permute.xlu0 %3761 }
 0x644   : > { %12026 = vst [vmem:[#allocation143_spill] sm:$0xff] %v9245_v36  ;;  %6346 = vset.pattern.permute.xlu0 %v11246_v53  ;;  %v12033_v36 = vld [vmem:[#allocation101_spill] sm:$0xff] }
 0x645   : > { %3549 = vperm.xlu1 %6320, %v12027_v2   ;;  %v9249_v12 = vpop.permute.xlu1 %3233  ;;  %4193 = vperm.xlu0 %6346, %v12029_v35   ;;  %v11250_v2 = vmov 57  }
 0x646   : > { %12028 = vst [vmem:[#allocation126_spill] sm:$0xff] %v9249_v12 }
 0x647   : > { %v9252_v59 = vpop.permute.xlu0 %3769 }
 0x648   : > { %12030 = vst [vmem:[#allocation147_spill] sm:$0xff] %v9252_v59 }
 0x649   : > { %3557 = vperm.xlu1 %6320, %v11957_v27   ;;  %4205 = vperm.xlu0 %6346, %v12031_v55  }
 0x64a   : > { %v9256_v40 = vpop.permute.xlu1 %3249 }
 0x64c   : > { %v9258_v26 = vpop.permute.xlu0 %3793 }
 0x64d   : > { %12032 = vst [vmem:[#allocation13_spill] sm:$0xff] %v9258_v26  ;;  %3565 = vperm.xlu1 %6320, %v11963_v13   ;;  %4213 = vperm.xlu0 %6346, %v12033_v36   ;;  %v12038_v26 = vld [vmem:[#allocation66_spill] sm:$0xff] }
 0x64e   : > { %v9262_v53 = vpop.permute.xlu1 %3257 }
 0x650   : > { %v9264_v50 = vpop.permute.xlu0 %3805 }
 0x651   : > { %12034 = vst [vmem:[#allocation115_spill] sm:$0xff] %v9264_v50  ;;  %6323 = vset.pattern.permute.xlu1 %v12035_v5  ;;  %4221 = vperm.xlu0 %6346, %v12036_v25  }
 0x652   : > { %3589 = vperm.xlu1 %6323, %v11967_v43   ;;  %v9269_v59 = vpop.permute.xlu1 %3261  ;;  %v12041_v43 = vld [vmem:[#allocation74_spill] sm:$0xff] }
 0x654   : > { %v9271_v27 = vpop.permute.xlu0 %3813 }
 0x655   : > { %12037 = vst [vmem:[#allocation153_spill] sm:$0xff] %v9271_v27  ;;  %6349 = vset.pattern.permute.xlu0 %v11250_v2  ;;  %v12043_v27 = vld [vmem:[#allocation119_spill] sm:$0xff] }
 0x656   : > { %3593 = vperm.xlu1 %6323, %v12038_v26   ;;  %v9275_v13 = vpop.permute.xlu1 %3269  ;;  %4245 = vperm.xlu0 %6349, %v12039_v21   ;;  %v12050_v26 = vld [vmem:[#allocation68_spill] sm:$0xff] }
 0x658   : > { %v9278_v50 = vpop.permute.xlu0 %3821 }
 0x659   : > { %12040 = vst [vmem:[#allocation106_spill] sm:$0xff] %v9278_v50 }
 0x65a   : > { %3601 = vperm.xlu1 %6323, %v11976_v33   ;;  %v9281_v5 = vpop.permute.xlu1 %3277  ;;  %4257 = vperm.xlu0 %6349, %v12041_v43   ;;  %v12047_v33 = vld [vmem:[#allocation41_spill] sm:$0xff] }
 0x65d   : > { %v9284_v56 = vpop.permute.xlu0 %3845 }
 0x65e   : > { %12042 = vst [vmem:[#allocation116_spill] sm:$0xff] %v9284_v56  ;;  %3609 = vperm.xlu1 %6323, %v11984_v61   ;;  %4265 = vperm.xlu0 %6349, %v12043_v27   ;;  %v12049_v61 = vld [vmem:[#allocation15_spill] sm:$0xff] }
 0x65f   : > { %v9288_v2 = vpop.permute.xlu1 %3301 }
 0x661   : > { %v9290_v34 = vpop.permute.xlu0 %3857 }
 0x662   : > { %12044 = vst [vmem:[#allocation97_spill] sm:$0xff] %v9290_v34  ;;  %6324 = vset.pattern.permute.xlu1 %v12045_v17  ;;  %6350 = vset.pattern.permute.xlu0 %v11253_v28  ;;  %v12053_v28 = vld [vmem:[#allocation53_spill] sm:$0xff] }
 0x663   : > { %3657 = vperm.xlu1 %6324, %v11993_v45   ;;  %v9295_v50 = vpop.permute.xlu1 %3305  ;;  %4289 = vperm.xlu0 %6350, %v12047_v33  }
 0x664   : > { %12046 = vst [vmem:[#allocation24_spill] sm:$0xff] %v9295_v50  ;;  %v12072_v50 = vld [vmem:[#allocation105_spill] sm:$0xff] }
 0x665   : > { %v9298_v56 = vpop.permute.xlu0 %3865 }
 0x666   : > { %12048 = vst [vmem:[#allocation120_spill] sm:$0xff] %v9298_v56 }
 0x667   : > { %3665 = vperm.xlu1 %6324, %v12049_v61   ;;  %v9301_v54 = vpop.permute.xlu1 %3313  ;;  %4301 = vperm.xlu0 %6350, %v12050_v26  }
 0x66a   : > { %v9304_v34 = vpop.permute.xlu0 %3889 }
 0x66b   : > { %12051 = vst [vmem:[#allocation48_spill] sm:$0xff] %v9304_v34  ;;  %3669 = vperm.xlu1 %6324, %v12000_v47   ;;  %v9307_v17 = vpop.permute.xlu1 %3321  ;;  %4309 = vperm.xlu0 %6350, %v12053_v28   ;;  %v12058_v47 = vld [vmem:[#allocation96_spill] sm:$0xff] }
 0x66c   : > { %12052 = vst [vmem:[#allocation71_spill] sm:$0xff] %v9307_v17 }
 0x66e   : > { %v9310_v45 = vpop.permute.xlu0 %3901 }
 0x66f   : > { %12054 = vst [vmem:[#allocation81_spill] sm:$0xff] %v9310_v45  ;;  %3677 = vperm.xlu1 %6324, %v12007_v20   ;;  %4317 = vperm.xlu0 %6350, %v12055_v10   ;;  %v12060_v45 = vmov 46  }
 0x670   : > { %v9314_v56 = vpop.permute.xlu1 %3345 }
 0x672   : > { %v9316_v61 = vpop.permute.xlu0 %3909 }
 0x673   : > { %12056 = vst [vmem:[#allocation30_spill] sm:$0xff] %v9316_v61  ;;  %3685 = vperm.xlu1 %6324, %v12012_v46   ;;  %6353 = vset.pattern.permute.xlu0 %v11258_v14  ;;  %v12063_v46 = vld [vmem:[#allocation42_spill] sm:$0xff]  ;;  %v12064_v14 = vld [vmem:[#allocation121_spill] sm:$0xff] }
 0x674   : > { %v9320_v34 = vpop.permute.xlu1 %3353  ;;  %4341 = vperm.xlu0 %6353, %v12058_v47  }
 0x675   : > { %12057 = vst [vmem:[#allocation63_spill] sm:$0xff] %v9320_v34 }
 0x676   : > { %v9323_v38 = vpop.permute.xlu0 %3917 }
 0x677   : > { %12059 = vst [vmem:[#allocation131_spill] sm:$0xff] %v9323_v38  ;;  %6327 = vset.pattern.permute.xlu1 %v12060_v45  ;;  %v11261_v45 = vmov 60  }
 0x678   : > { %3701 = vperm.xlu1 %6327, %v12017_v42   ;;  %v9327_v20 = vpop.permute.xlu1 %3357  ;;  %4353 = vperm.xlu0 %6353, %v12061_v37   ;;  %v12066_v42 = vld [vmem:[#allocation44_spill] sm:$0xff] }
 0x67b   : > { %v9330_v61 = vpop.permute.xlu0 %3941 }
 0x67c   : > { %12062 = vst [vmem:[#allocation57_spill] sm:$0xff] %v9330_v61  ;;  %3705 = vperm.xlu1 %6327, %v12063_v46   ;;  %v9333_v17 = vpop.permute.xlu1 %3365  ;;  %4361 = vperm.xlu0 %6353, %v12064_v14   ;;  %v12068_v46 = vld [vmem:[#allocation70_spill] sm:$0xff]  ;;  %v12069_v14 = vmov 47  }
 0x67f   : > { %v9336_v34 = vpop.permute.xlu0 %3953 }
 0x680   : > { %12065 = vst [vmem:[#allocation32_spill] sm:$0xff] %v9336_v34  ;;  %3713 = vperm.xlu1 %6327, %v12020_v7   ;;  %v9339_v38 = vpop.permute.xlu1 %3373  ;;  %6354 = vset.pattern.permute.xlu0 %v11261_v45 }
 0x681   : > { %4385 = vperm.xlu0 %6354, %v12066_v42   ;;  %v12074_v42 = vld [vmem:[#allocation45_spill] sm:$0xff] }
 0x683   : > { %v9343_v37 = vpop.permute.xlu0 %3961 }
 0x684   : > { %12067 = vst [vmem:[#allocation59_spill] sm:$0xff] %v9343_v37  ;;  %3721 = vperm.xlu1 %6327, %v12024_v9   ;;  %v12076_v9 = vld [vmem:[#allocation86_spill] sm:$0xff] }
 0x685   : > { %v9346_v61 = vpop.permute.xlu1 %3397  ;;  %4397 = vperm.xlu0 %6354, %v12068_v46   ;;  %v12085_v46 = vmov 48  }
 0x688   : > { %6328 = vset.pattern.permute.xlu1 %v12069_v14  ;;  %v9350_v34 = vpop.permute.xlu0 %3985 }
 0x689   : > { %12070 = vst [vmem:[#allocation112_spill] sm:$0xff] %v9350_v34  ;;  %3745 = vperm.xlu1 %6328, %v12029_v35   ;;  %v9353_v7 = vpop.permute.xlu1 %3401  ;;  %4405 = vperm.xlu0 %6354, %v12072_v50   ;;  %v11265_v34 = vmov 61   ;;  %v12079_v35 = vld [vmem:[#allocation100_spill] sm:$0xff] }
 0x68a   : > { %12071 = vst [vmem:[#allocation114_spill] sm:$0xff] %v9353_v7  ;;  %v12081_v50 = vld [vmem:[#allocation4_spill] sm:$0xff]  ;;  %v12096_v7 = vmov 49  }
 0x68c   : > { %v9356_v45 = vpop.permute.xlu0 %3997 }
 0x68d   : > { %12073 = vst [vmem:[#allocation43_spill] sm:$0xff] %v9356_v45  ;;  %3753 = vperm.xlu1 %6328, %v12074_v42   ;;  %v9359_v37 = vpop.permute.xlu1 %3409  ;;  %4413 = vperm.xlu0 %6354, %v12076_v9  }
 0x68e   : > { %12075 = vst [vmem:[#allocation65_spill] sm:$0xff] %v9359_v37  ;;  %v12098_v37 = vld [vmem:[#allocation79_spill] sm:$0xff] }
 0x690   : > { %v9362_v12 = vpop.permute.xlu0 %4005 }
 0x691   : > { %12077 = vst [vmem:[#allocation158_spill] sm:$0xff] %v9362_v12  ;;  %3757 = vperm.xlu1 %6328, %v12031_v55   ;;  %v9365_v14 = vpop.permute.xlu1 %3417  ;;  %6357 = vset.pattern.permute.xlu0 %v11265_v34  ;;  %v12083_v12 = vld [vmem:[#allocation123_spill] sm:$0xff] }
 0x692   : > { %12078 = vst [vmem:[#allocation159_spill] sm:$0xff] %v9365_v14  ;;  %4437 = vperm.xlu0 %6357, %v12079_v35   ;;  %v12092_v14 = vld [vmem:[#allocation51_spill] sm:$0xff] }
 0x694   : > { %v9370_v45 = vpop.permute.xlu0 %4013 }
 0x695   : > { %3765 = vperm.xlu1 %6328, %v12033_v36   ;;  %12080 = vst [vmem:[#allocation160_spill] sm:$0xff] %v9370_v45  ;;  %v11269_v36 = vmov 62   ;;  %v12086_v45 = vld [vmem:[#allocation46_spill] sm:$0xff] }
 0x696   : > { %v3442_v42 = vpop.permute.xlu1 %3441  ;;  %4449 = vperm.xlu0 %6357, %v12081_v50  }
 0x699   : > { %3773 = vperm.xlu1 %6328, %v12036_v25   ;;  %v9377_v55 = vpop.permute.xlu0 %4037  ;;  %v12088_v25 = vld [vmem:[#allocation47_spill] sm:$0xff] }
 0x69a   : > { %v9374_v9 = vpop.permute.xlu1 %3449  ;;  %4457 = vperm.xlu0 %6357, %v12083_v12   ;;  %12084 = vst [vmem:[#allocation162_spill] sm:$0xff] %v9377_v55  ;;  %v12089_v12 = vld [vmem:[#allocation72_spill] sm:$0xff]  ;;  %v12090_v55 = vld [vmem:[#allocation130_spill] sm:$0xff] }
 0x69b   : > { %12082 = vst [vmem:[#allocation161_spill] sm:$0xff] %v9374_v9  ;;  %v12094_v9 = vld [vmem:[#allocation118_spill] sm:$0xff] }
 0x69d   : > { %6331 = vset.pattern.permute.xlu1 %v12085_v46  ;;  %v9385_v50 = vpop.permute.xlu0 %4049 }
 0x69e   : > { %3797 = vperm.xlu1 %6331, %v12039_v21   ;;  %v9381_v34 = vpop.permute.xlu1 %3453  ;;  %6358 = vset.pattern.permute.xlu0 %v11269_v36  ;;  %12087 = vst [vmem:[#allocation163_spill] sm:$0xff] %v9385_v50  ;;  %v3280_v36 = vmul.f32 %v9256_v40, %v12092_v14  ;;  %v12093_v50 = vld [vmem:[#allocation94_spill] sm:$0xff]  ;;  %v3376_v40 = vmul.f32 %v9314_v56, %v12099_v0 }
 0x69f   : > { %4481 = vperm.xlu0 %6358, %v12086_v45   ;;  %v12101_v14 = vld [vmem:[#allocation22_spill] sm:$0xff] }
 0x6a1   : > { %v9395_v21 = vpop.permute.xlu0 %4057 }
 0x6a2   : > { %3801 = vperm.xlu1 %6331, %v12088_v25   ;;  %v9388_v35 = vpop.permute.xlu1 %3461  ;;  %12091 = vst [vmem:[#allocation164_spill] sm:$0xff] %v9395_v21  ;;  %v3240_v25 = vmul.f32 %v12004_v41, %v12093_v50  ;;  %v11273_v50 = vmov 63  }
 0x6a3   : > { %4493 = vperm.xlu0 %6358, %v12089_v12  }
 0x6a4   : > { %v3288_v12 = vadd.f32 %v3280_v36, %v3240_v25  ;;  %v3283_v25 = vmul.f32 %v9269_v59, %v11826_v44 }
 0x6a6   : > { %3809 = vperm.xlu1 %6331, %v12041_v43   ;;  %v9392_v46 = vpop.permute.xlu1 %3469  ;;  %v9405_v43 = vpop.permute.xlu0 %4105 }
 0x6a7   : > { %4501 = vperm.xlu0 %6358, %v12090_v55   ;;  %12095 = vst [vmem:[#allocation94_spill] sm:$0xff] %v9405_v43  ;;  %v12097_v55 = vld [vmem:[#allocation50_spill] sm:$0xff] }
 0x6a8   : > { %v3328_v21 = vmul.f32 %v12098_v37, %v12097_v55  ;;  %v12103_v55 = vld [vmem:[#allocation52_spill] sm:$0xff] }
 0x6aa   : > { %3817 = vperm.xlu1 %6331, %v12043_v27   ;;  %v3336_v36 = vadd.f32 %v3328_v21, %v3288_v12  ;;  %v3472_v21 = vmul.f32 %v3442_v42, %v11788_v3  ;;  %v12108_v12 = vld [vmem:[#allocation122_spill] sm:$0xff] }
 0x6ab   : > { %v9402_v45 = vpop.permute.xlu1 %3493  ;;  %4509 = vperm.xlu0 %6358, %v12094_v9   ;;  %v9426_v9 = vpop.permute.xlu0 %4117 }
 0x6ac   : > { %v3384_v37 = vadd.f32 %v3376_v40, %v3336_v36  ;;  %12105 = vst [vmem:[#allocation165_spill] sm:$0xff] %v9426_v9  ;;  %v3245_v40 = vmul.f32 %v12108_v12, %v11594_v29  ;;  %v12109_v36 = vld [vmem:[#allocation87_spill] sm:$0xff] }
 0x6ae   : > { %6332 = vset.pattern.permute.xlu1 %v12096_v7  ;;  %v12102_v7 = vld [vmem:[#allocation134_spill] sm:$0xff] }
 0x6af   : > { %3841 = vperm.xlu1 %6332, %v12047_v33   ;;  %v9413_v27 = vpop.permute.xlu1 %3497  ;;  %6361 = vset.pattern.permute.xlu0 %v11273_v50  ;;  %v3243_v43 = vmul.f32 %v12102_v7, %v11782_v23  ;;  %v3285_v33 = vmul.f32 %v9275_v13, %v11600_v18  ;;  %v12106_v50 = vld [vmem:[#allocation33_spill] sm:$0xff]  ;;  %v3331_v7 = vmul.f32 %v12109_v36, %v11789_v60  ;;  %v12113_v36 = vld [vmem:[#allocation75_spill] sm:$0xff] }
 0x6b0   : > { %12100 = vst [vmem:[#allocation79_spill] sm:$0xff] %v9413_v27  ;;  %4558 = vperm.xlu0 %6361, %v12101_v14   ;;  %v12107_v14 = vld [vmem:[#allocation139_spill] sm:$0xff]  ;;  %v3281_v60 = vmul.f32 %v12113_v36, %v11785_v31  ;;  %v3241_v36 = vmul.f32 %v9230_v32, %v12099_v0 }
 0x6b1   : > { %v3424_v27 = vmul.f32 %v12107_v14, %v11785_v31  ;;  %v3291_v59 = vadd.f32 %v3283_v25, %v3243_v43  ;;  %v3287_v43 = vmul.f32 %v9281_v5, %v11657_v51  ;;  %v12112_v25 = vld [vmem:[#allocation18_spill] sm:$0xff]  ;;  %v12122_v31 = vld [vmem:[#allocation93_spill] sm:$0xff] }
 0x6b2   : > { %v3247_v12 = vmul.f32 %v12112_v25, %v11653_v39  ;;  %v3289_v0 = vadd.f32 %v3281_v60, %v3241_v36  ;;  %v3244_v60 = vmul.f32 %v9243_v49, %v7248_v19 }
 0x6b3   : > { %3849 = vperm.xlu1 %6332, %v12103_v55   ;;  %v9422_v56 = vpop.permute.xlu1 %3505  ;;  %v3379_v55 = vmul.f32 %v9327_v20, %v7248_v19  ;;  %v3432_v13 = vadd.f32 %v3424_v27, %v3384_v37  ;;  %v3339_v42 = vadd.f32 %v3331_v7, %v3291_v59  ;;  %v12114_v27 = vld [vmem:[#allocation138_spill] sm:$0xff]  ;;  %v9450_v37 = vpop.permute.xlu0 %4125  ;;  %v3381_v59 = vmul.f32 %v9333_v17, %v11838_v8 }
 0x6b4   : > { %12104 = vst [vmem:[#allocation134_spill] sm:$0xff] %v9422_v56  ;;  %4570 = vperm.xlu0 %6361, %v12106_v50   ;;  %v3293_v50 = vadd.f32 %v3285_v33, %v3245_v40  ;;  %v12111_v56 = vld [vmem:[#allocation29_spill] sm:$0xff]  ;;  %v3333_v20 = vmul.f32 %v12114_v27, %v11602_v48  ;;  %12115 = vst [vmem:[#allocation122_spill] sm:$0xff] %v9450_v37  ;;  %v12116_v33 = vld [vmem:[#allocation95_spill] sm:$0xff]  ;;  %v11278_v37 = vmov 64  }
 0x6b5   : > { %v3480_v14 = vadd.f32 %v3472_v21, %v3432_v13  ;;  %v3284_v40 = vmul.f32 %v12116_v33, %v11974_v16  ;;  %v3387_v5 = vadd.f32 %v3379_v55, %v3339_v42  ;;  %v12118_v21 = vld [vmem:[#allocation111_spill] sm:$0xff]  ;;  %v12119_v13 = vld [vmem:[#allocation9_spill] sm:$0xff]  ;;  %v3475_v55 = vmul.f32 %v9381_v34, %v7008_v62 }
 0x6b6   : > { %v9461_v7 = vmul.f32 %v12118_v21, %v11644_v58  ;;  %v3427_v25 = vmul.f32 %v12119_v13, %v11974_v16  ;;  %v3341_v27 = vadd.f32 %v3333_v20, %v3293_v50  ;;  %v12120_v21 = vld [vmem:[#allocation49_spill] sm:$0xff]  ;;  %v3383_v34 = vmul.f32 %v9339_v38, %v11661_v22 }
 0x6b7   : > { %3853 = vperm.xlu1 %6332, %v12050_v26   ;;  %v9439_v9 = vpop.permute.xlu1 %3513  ;;  %v12117_v26 = vld [vmem:[#allocation56_spill] sm:$0xff]  ;;  %v12124_v50 = vld [vmem:[#allocation149_spill] sm:$0xff] }
 0x6b8   : > { %12110 = vst [vmem:[#allocation139_spill] sm:$0xff] %v9439_v9  ;;  %4578 = vperm.xlu0 %6361, %v12111_v56   ;;  %v3520_v56 = vmul.f32 %v12117_v26, %v11966_v24  ;;  %v3295_v26 = vadd.f32 %v3287_v43, %v3247_v12  ;;  %v12123_v9 = vld [vmem:[#allocation140_spill] sm:$0xff]  ;;  %v3616_v20 = vmul.f32 %v12124_v50, %v11805_v57  ;;  %v12127_v50 = vld [vmem:[#allocation98_spill] sm:$0xff] }
 0x6b9   : > { %v3377_v32 = vmul.f32 %v12123_v9, %v12122_v31  ;;  %v3329_v43 = vmul.f32 %v9288_v2, %v11788_v3  ;;  %v3389_v12 = vadd.f32 %v3381_v59, %v3341_v27  ;;  %v12126_v9 = vld [vmem:[#allocation142_spill] sm:$0xff]  ;;  %v3431_v31 = vmul.f32 %v12127_v50, %v11980_v4  ;;  %v9491_v2 = vpop.permute.xlu0 %4133 }
 0x6ba   : > { %v3528_v17 = vadd.f32 %v3520_v56, %v3480_v14  ;;  %v3435_v56 = vadd.f32 %v3427_v25, %v3387_v5  ;;  %12128 = vst [vmem:[#allocation87_spill] sm:$0xff] %v9491_v2  ;;  %v3477_v25 = vmul.f32 %v9388_v35, %v11651_v63  ;;  %v3632_v50 = vld [vmem:[#allocation3 + $0x11] sm:$0xff] }
 0x6bb   : > { %3861 = vperm.xlu1 %6332, %v12053_v28   ;;  %v12121_v28 = vld [vmem:[#allocation90_spill] sm:$0xff]  ;;  %v3337_v36 = vadd.f32 %v3329_v43, %v3289_v0  ;;  %v3425_v0 = vmul.f32 %v9346_v61, %v11801_v11  ;;  %v3282_v61 = vmul.f32 %v9262_v53, %v11801_v11  ;;  %v12142_v53 = vld [vmem:[#allocation55_spill] sm:$0xff] }
 0x6bc   : > { %v3538_v33 = vpop.permute.xlu1 %3537  ;;  %6362 = vset.pattern.permute.xlu0 %v11278_v37  ;;  %v3335_v13 = vmul.f32 %v12121_v28, %v11658_v15  ;;  %v3429_v37 = vmul.f32 %v12126_v9, %v11644_v58  ;;  %v3483_v5 = vadd.f32 %v3475_v55, %v3435_v56  ;;  %v12131_v9 = vld [vmem:[#allocation151_spill] sm:$0xff] }
 0x6bd   : > { %v3568_v42 = vmul.f32 %v3538_v33, %v11801_v11  ;;  %4594 = vperm.xlu0 %6362, %v12120_v21   ;;  %v12125_v33 = vld [vmem:[#allocation26_spill] sm:$0xff] }
 0x6be   : > { %v9485_v28 = vmul.f32 %v12125_v33, %v11594_v29  ;;  %v3343_v38 = vadd.f32 %v3335_v13, %v3295_v26  ;;  %v12132_v26 = vld [vmem:[#allocation152_spill] sm:$0xff]  ;;  %v3437_v56 = vadd.f32 %v3429_v37, %v3389_v12  ;;  %v3479_v37 = vmul.f32 %v9392_v46, %v11972_v1  ;;  %v12138_v46 = vld [vmem:[#allocation135_spill] sm:$0xff] }
 0x6bf   : > { %v3576_v14 = vadd.f32 %v3568_v42, %v3528_v17  ;;  %3869 = vperm.xlu1 %6332, %v12055_v10   ;;  %v12129_v17 = vld [vmem:[#allocation76_spill] sm:$0xff]  ;;  %v12130_v42 = vld [vmem:[#allocation38_spill] sm:$0xff]  ;;  %v3523_v10 = vmul.f32 %v12131_v9, %v11594_v29  ;;  %v3525_v55 = vmul.f32 %v12132_v26, %v11995_v6  ;;  %v3332_v9 = vmul.f32 %v9301_v54, %v7008_v62  ;;  %v12143_v6 = vld [vmem:[#allocation89_spill] sm:$0xff] }
 0x6c0   : > { %v9493_v59 = vpop.permute.xlu1 %3545  ;;  %v3473_v33 = vmul.f32 %v12130_v42, %v11805_v57  ;;  %v3391_v13 = vadd.f32 %v3383_v34, %v3343_v38  ;;  %v3619_v42 = vmul.f32 %v9098_v52, %v11602_v48  ;;  %v3485_v43 = vadd.f32 %v3477_v25, %v3437_v56  ;;  %v12135_v38 = vld [vmem:[#allocation7_spill] sm:$0xff]  ;;  %v12137_v25 = vld [vmem:[#allocation137_spill] sm:$0xff]  ;;  %v12139_v56 = vld [vmem:[#allocation126_spill] sm:$0xff] }
 0x6c1   : > { %v3624_v27 = vadd.f32 %v3616_v20, %v3576_v14  ;;  %4606 = vperm.xlu0 %6362, %v12129_v17   ;;  %v12133_v20 = vmov 50   ;;  %v12134_v14 = vld [vmem:[#allocation154_spill] sm:$0xff]  ;;  %v3531_v12 = vadd.f32 %v3523_v10, %v3483_v5  ;;  %v3621_v52 = vmul.f32 %v9125_v30, %v11658_v15  ;;  %v12141_v30 = vld [vmem:[#allocation71_spill] sm:$0xff] }
 0x6c2   : > { %v3527_v2 = vmul.f32 %v12004_v41, %v12134_v14  ;;  %v3292_v54 = vadd.f32 %v3284_v40, %v3244_v60  ;;  %v3242_v26 = vmul.f32 %v12137_v25, %v11966_v24  ;;  %v3246_v10 = vmul.f32 %v12139_v56, %v12138_v46 }
 0x6c3   : > { %v3640_v35 = vadd.f32 %v3632_v50, %v3624_v27  ;;  %6335 = vset.pattern.permute.xlu1 %v12133_v20  ;;  %v3385_v27 = vadd.f32 %v3377_v32, %v3337_v36  ;;  %v9524_v50 = vpop.permute.xlu0 %4149  ;;  %v3439_v5 = vadd.f32 %v3431_v31, %v3391_v13  ;;  %v12140_v20 = vld [vmem:[#allocation24_spill] sm:$0xff]  ;;  %v3334_v40 = vmul.f32 %v12141_v30, %v11651_v63  ;;  %v12144_v13 = vld [vmem:[#allocation63_spill] sm:$0xff]  ;;  %v12149_v30 = vld [vmem:[#allocation145_spill] sm:$0xff] }
 0x6c4   : > { %3893 = vperm.xlu1 %6335, %v12058_v47   ;;  %v3550_v49 = vpop.permute.xlu1 %3549  ;;  %12136 = vst [vmem:[#allocation18_spill] sm:$0xff] %v9524_v50  ;;  %v3330_v14 = vmul.f32 %v12140_v20, %v11805_v57  ;;  %v3533_v47 = vadd.f32 %v3525_v55, %v3485_v43  ;;  %v3290_v31 = vadd.f32 %v3282_v61, %v3242_v26  ;;  %v12146_v43 = vld [vmem:[#allocation114_spill] sm:$0xff] }
 0x6c5   : > { %3648 = vst [vmem:[#allocation3 + $0x11] sm:$0xff] %v3640_v35  ;;  %v3571_v34 = vmul.f32 %v3550_v49, %v11600_v18  ;;  %4614 = vperm.xlu0 %6362, %v12135_v38   ;;  %v3340_v49 = vadd.f32 %v3332_v9, %v3292_v54  ;;  %v3433_v60 = vadd.f32 %v3425_v0, %v3385_v27  ;;  %v12145_v54 = vld [vmem:[#allocation65_spill] sm:$0xff] }
 0x6c6   : > { %v3487_v36 = vadd.f32 %v3479_v37, %v3439_v5  ;;  %v3521_v9 = vmul.f32 %v9402_v45, %v11782_v23  ;;  %v3294_v0 = vadd.f32 %v9461_v7, %v3246_v10  ;;  %v3428_v27 = vmul.f32 %v12145_v54, %v11600_v18  ;;  %v12156_v54 = vld [vmem:[#allocation155_spill] sm:$0xff] }
 0x6c7   : > { %v3579_v35 = vadd.f32 %v3571_v34, %v3531_v12  ;;  %v3378_v12 = vmul.f32 %v12144_v13, %v11782_v23  ;;  %v3635_v34 = vld [vmem:[#allocation3 + $0x41] sm:$0xff]  ;;  %v3338_v55 = vadd.f32 %v3330_v14, %v3290_v31  ;;  %v3426_v56 = vmul.f32 %v12146_v43, %v11826_v44  ;;  %v9547_v5 = vpop.permute.xlu0 %4161  ;;  %v12157_v43 = vld [vmem:[#allocation159_spill] sm:$0xff] }
 0x6c8   : > { %3897 = vperm.xlu1 %6335, %v12142_v53   ;;  %v3558_v32 = vpop.permute.xlu1 %3557  ;;  %v3388_v61 = vadd.f32 %v9485_v28, %v3340_v49  ;;  %v3481_v26 = vadd.f32 %v3473_v33, %v3433_v60  ;;  %12147 = vst [vmem:[#allocation75_spill] sm:$0xff] %v9547_v5  ;;  %v3342_v20 = vadd.f32 %v3334_v40, %v3294_v0  ;;  %v12151_v28 = vld [vmem:[#allocation14_spill] sm:$0xff]  ;;  %v12152_v33 = vld [vmem:[#allocation161_spill] sm:$0xff]  ;;  %v12153_v13 = vld [vmem:[#allocation104_spill] sm:$0xff] }
 0x6c9   : > { %v3627_v50 = vadd.f32 %v3619_v42, %v3579_v35  ;;  %v3573_v25 = vmul.f32 %v3558_v32, %v11657_v51  ;;  %4622 = vperm.xlu0 %6362, %v12143_v6   ;;  %v12148_v35 = vld [vmem:[#allocation133_spill] sm:$0xff]  ;;  %v3535_v10 = vadd.f32 %v3527_v2, %v3487_v36  ;;  %v3474_v49 = vmul.f32 %v12152_v33, %v12151_v28  ;;  %v12154_v40 = vld [vmem:[#allocation144_spill] sm:$0xff]  ;;  %v12193_v5 = vld [vmem:[#allocation123_spill] sm:$0xff] }
 0x6ca   : > { %v3529_v60 = vadd.f32 %v3521_v9, %v3481_v26  ;;  %v3637_v31 = vld [vmem:[#allocation3 + $0x61] sm:$0xff]  ;;  %v3436_v2 = vadd.f32 %v3428_v27, %v3388_v61  ;;  %v12161_v27 = vld [vmem:[#allocation134_spill] sm:$0xff] }
 0x6cb   : > { %v3643_v37 = vadd.f32 %v3635_v34, %v3627_v50  ;;  %v3581_v42 = vadd.f32 %v3573_v25, %v3533_v47  ;;  %v11283_v50 = vmov 65   ;;  %v12150_v47 = vld [vmem:[#allocation102_spill] sm:$0xff]  ;;  %v3386_v25 = vadd.f32 %v3378_v12, %v3338_v55  ;;  %v12155_v34 = vld [vmem:[#allocation85_spill] sm:$0xff]  ;;  %v12158_v55 = vld [vmem:[#allocation79_spill] sm:$0xff] }
 0x6cc   : > { %3905 = vperm.xlu1 %6335, %v12148_v35   ;;  %v3566_v45 = vpop.permute.xlu1 %3565  ;;  %v3382_v14 = vmul.f32 %v12150_v47, %v11653_v39  ;;  %v3430_v12 = vmul.f32 %v12157_v43, %v11657_v51  ;;  %v12159_v9 = vld [vmem:[#allocation121_spill] sm:$0xff]  ;;  %v3524_v61 = vmul.f32 %v12161_v27, %v11838_v8  ;;  %v12163_v43 = vld [vmem:[#allocation40_spill] sm:$0xff]  ;;  %v12207_v35 = vld [vmem:[#allocation130_spill] sm:$0xff] }
 0x6cd   : > { %3651 = vst [vmem:[#allocation3 + $0x41] sm:$0xff] %v3643_v37  ;;  %v3629_v7 = vadd.f32 %v3621_v52, %v3581_v42  ;;  %v3575_v32 = vmul.f32 %v3566_v45, %v12149_v30  ;;  %6365 = vset.pattern.permute.xlu0 %v11283_v50  ;;  %v3623_v52 = vmul.f32 %v12155_v34, %v12154_v40  ;;  %v12160_v26 = vld [vmem:[#allocation61_spill] sm:$0xff] }
 0x6ce   : > { %4646 = vperm.xlu0 %6365, %v12153_v13   ;;  %v3569_v37 = vmul.f32 %v12156_v54, %v11826_v44  ;;  %v3434_v42 = vadd.f32 %v3426_v56, %v3386_v25  ;;  %v3522_v45 = vmul.f32 %v12158_v55, %v7248_v19  ;;  %v3476_v47 = vmul.f32 %v12160_v26, %v11602_v48  ;;  %v9570_v56 = vpop.permute.xlu0 %4169 }
 0x6cf   : > { %v3645_v36 = vadd.f32 %v3637_v31, %v3629_v7  ;;  %v3583_v0 = vadd.f32 %v3575_v32, %v3535_v10  ;;  %v3390_v33 = vadd.f32 %v3382_v14, %v3342_v20  ;;  %12162 = vst [vmem:[#allocation138_spill] sm:$0xff] %v9570_v56  ;;  %v3570_v25 = vmul.f32 %v9493_v59, %v11974_v16  ;;  %v3639_v31 = vld [vmem:[#allocation3 + $0x81] sm:$0xff] }
 0x6d0   : > { %3913 = vperm.xlu1 %6335, %v12159_v9   ;;  %v3482_v32 = vadd.f32 %v3474_v49, %v3434_v42  ;;  %v3577_v34 = vadd.f32 %v3569_v37, %v3529_v60  ;;  %v3484_v55 = vadd.f32 %v3476_v47, %v3436_v2  ;;  %v12165_v49 = vld [vmem:[#allocation21_spill] sm:$0xff]  ;;  %v12166_v59 = vld [vmem:[#allocation44_spill] sm:$0xff]  ;;  %v12167_v37 = vld [vmem:[#allocation139_spill] sm:$0xff] }
 0x6d1   : > { %3653 = vst [vmem:[#allocation3 + $0x61] sm:$0xff] %v3645_v36  ;;  %v3631_v7 = vadd.f32 %v3623_v52, %v3583_v0  ;;  %v3590_v10 = vpop.permute.xlu1 %3589  ;;  %v3438_v14 = vadd.f32 %v3430_v12, %v3390_v33  ;;  %v12164_v36 = vmov 51   ;;  %v3478_v52 = vmul.f32 %v12165_v49, %v11658_v15  ;;  %v3633_v42 = vld [vmem:[#allocation3 + $0x21] sm:$0xff] }
 0x6d2   : > { %v3617_v54 = vmul.f32 %v3590_v10, %v12151_v28  ;;  %4658 = vperm.xlu0 %6365, %v12163_v43   ;;  %v3530_v26 = vadd.f32 %v3522_v45, %v3482_v32  ;;  %v3532_v0 = vadd.f32 %v3524_v61, %v3484_v55  ;;  %v3526_v10 = vmul.f32 %v12167_v37, %v11661_v22  ;;  %v12168_v45 = vld [vmem:[#allocation124_spill] sm:$0xff]  ;;  %v9586_v32 = vpop.permute.xlu0 %4193 }
 0x6d3   : > { %v3647_v20 = vadd.f32 %v3639_v31, %v3631_v7  ;;  %v12169_v47 = vld [vmem:[#allocation156_spill] sm:$0xff]  ;;  %v3486_v7 = vadd.f32 %v3478_v52, %v3438_v14  ;;  %12170 = vst [vmem:[#allocation95_spill] sm:$0xff] %v9586_v32  ;;  %v3634_v31 = vld [vmem:[#allocation3 + $0x31] sm:$0xff]  ;;  %v12173_v14 = vld [vmem:[#allocation157_spill] sm:$0xff] }
 0x6d4   : > { %v3625_v27 = vadd.f32 %v3617_v54, %v3577_v34  ;;  %6336 = vset.pattern.permute.xlu1 %v12164_v36  ;;  %v3578_v50 = vadd.f32 %v3570_v25, %v3530_v26  ;;  %v3572_v33 = vmul.f32 %v12169_v47, %v11644_v58  ;;  %v12171_v34 = vld [vmem:[#allocation60_spill] sm:$0xff]  ;;  %v12172_v36 = vld [vmem:[#allocation54_spill] sm:$0xff]  ;;  %v3574_v49 = vmul.f32 %v12173_v14, %v11980_v4 }
 0x6d5   : > { %3655 = vst [vmem:[#allocation3 + $0x81] sm:$0xff] %v3647_v20  ;;  %3937 = vperm.xlu1 %6336, %v12166_v59   ;;  %v3594_v60 = vpop.permute.xlu1 %3593  ;;  %v3534_v55 = vadd.f32 %v3526_v10, %v3486_v7  ;;  %v12177_v7 = vld [vmem:[#allocation105_spill] sm:$0xff]  ;;  %v12182_v14 = vmov 52   ;;  %v12195_v32 = vld [vmem:[#allocation58_spill] sm:$0xff] }
 0x6d6   : > { %v3641_v2 = vadd.f32 %v3633_v42, %v3625_v27  ;;  %v3618_v12 = vmul.f32 %v3594_v60, %v7008_v62  ;;  %4666 = vperm.xlu0 %6365, %v12168_v45   ;;  %v3580_v25 = vadd.f32 %v3572_v33, %v3532_v0  ;;  %v11284_v27 = vmov 66   ;;  %v12174_v42 = vld [vmem:[#allocation70_spill] sm:$0xff]  ;;  %v9595_v37 = vpop.permute.xlu0 %4205 }
 0x6d7   : > { %12175 = vst [vmem:[#allocation56_spill] sm:$0xff] %v9595_v37  ;;  %v3582_v0 = vadd.f32 %v3574_v49, %v3534_v55  ;;  %v3638_v33 = vld [vmem:[#allocation3 + $0x71] sm:$0xff] }
 0x6d8   : > { %3649 = vst [vmem:[#allocation3 + $0x21] sm:$0xff] %v3641_v2  ;;  %v3626_v61 = vadd.f32 %v3618_v12, %v3578_v50  ;;  %v3636_v50 = vld [vmem:[#allocation3 + $0x51] sm:$0xff] }
 0x6d9   : > { %3945 = vperm.xlu1 %6336, %v12171_v34   ;;  %v3602_v54 = vpop.permute.xlu1 %3601  ;;  %v12176_v12 = vld [vmem:[#allocation78_spill] sm:$0xff] }
 0x6da   : > { %v3642_v20 = vadd.f32 %v3634_v31, %v3626_v61  ;;  %v3620_v26 = vmul.f32 %v3602_v54, %v11651_v63  ;;  %6366 = vset.pattern.permute.xlu0 %v11284_v27  ;;  %v12178_v54 = vld [vmem:[#allocation108_spill] sm:$0xff]  ;;  %v12190_v27 = vld [vmem:[#allocation125_spill] sm:$0xff]  ;;  %v6456_v37 = vld [vmem:[#allocation2 + $0x31] sm:$0xff] }
 0x6db   : > { %4690 = vperm.xlu0 %6366, %v12172_v36  }
 0x6dc   : > { %3650 = vst [vmem:[#allocation3 + $0x31] sm:$0xff] %v3642_v20  ;;  %v3628_v52 = vadd.f32 %v3620_v26, %v3580_v25  ;;  %v9603_v20 = vpop.permute.xlu0 %4213  ;;  %v12180_v25 = vld [vmem:[#allocation86_spill] sm:$0xff]  ;;  %v12181_v26 = vld [vmem:[#allocation77_spill] sm:$0xff] }
 0x6dd   : > { %3949 = vperm.xlu1 %6336, %v12174_v42   ;;  %v3610_v60 = vpop.permute.xlu1 %3609  ;;  %12179 = vst [vmem:[#allocation111_spill] sm:$0xff] %v9603_v20  ;;  %v5557_v42 = vld [vmem:[#allocation2 + $0x21] sm:$0xff] }
 0x6de   : > { %v3644_v10 = vadd.f32 %v3636_v50, %v3628_v52  ;;  %v3622_v2 = vmul.f32 %v3610_v60, %v11972_v1  ;;  %v12184_v52 = vld [vmem:[#allocation100_spill] sm:$0xff]  ;;  %v11285_v60 = vmov 67  }
 0x6df   : > { %4702 = vperm.xlu0 %6366, %v12176_v12  }
 0x6e0   : > { %3652 = vst [vmem:[#allocation3 + $0x51] sm:$0xff] %v3644_v10  ;;  %v3630_v47 = vadd.f32 %v3622_v2, %v3582_v0  ;;  %v9610_v49 = vpop.permute.xlu0 %4221  ;;  %v12185_v10 = vld [vmem:[#allocation107_spill] sm:$0xff]  ;;  %v12186_v0 = vld [vmem:[#allocation64_spill] sm:$0xff] }
 0x6e1   : > { %3957 = vperm.xlu1 %6336, %v12177_v7   ;;  %12183 = vst [vmem:[#allocation9_spill] sm:$0xff] %v9610_v49  ;;  %v9627_v49 = vld [vmem:[#allocation2 + $0x21] sm:$0xff] }
 0x6e2   : > { %v3646_v61 = vadd.f32 %v3638_v33, %v3630_v47  ;;  %v9600_v31 = vpop.permute.xlu1 %3657  ;;  %v12188_v33 = vld [vmem:[#allocation69_spill] sm:$0xff]  ;;  %12191 = vst [vmem:[#allocation140_spill] sm:$0xff] %v9627_v49 }
 0x6e3   : > { %4710 = vperm.xlu0 %6366, %v12178_v54   ;;  %v9640_v7 = vld [vmem:[#allocation2 + $0x1] sm:$0xff] }
 0x6e4   : > { %3654 = vst [vmem:[#allocation3 + $0x71] sm:$0xff] %v3646_v61  ;;  %v9620_v47 = vpop.permute.xlu0 %4245  ;;  %v12189_v61 = vld [vmem:[#allocation4_spill] sm:$0xff]  ;;  %12197 = vst [vmem:[#allocation142_spill] sm:$0xff] %v9640_v7 }
 0x6e5   : > { %3965 = vperm.xlu1 %6336, %v12180_v25   ;;  %12187 = vst [vmem:[#allocation90_spill] sm:$0xff] %v9620_v47  ;;  %v11287_v47 = vmov 68   ;;  %v12196_v25 = vmov 53  }
 0x6e6   : > { %v9606_v55 = vpop.permute.xlu1 %3665 }
 0x6e7   : > { %4718 = vperm.xlu0 %6366, %v12181_v26  }
 0x6e8   : > { %v9630_v56 = vpop.permute.xlu0 %4257 }
 0x6e9   : > { %6339 = vset.pattern.permute.xlu1 %v12182_v14  ;;  %12192 = vst [vmem:[#allocation149_spill] sm:$0xff] %v9630_v56 }
 0x6ea   : > { %3989 = vperm.xlu1 %6339, %v12184_v52   ;;  %v9613_v50 = vpop.permute.xlu1 %3669  ;;  %v6454_v52 = vld [vmem:[#allocation2 + $0x11] sm:$0xff] }
 0x6eb   : > { %6369 = vset.pattern.permute.xlu0 %v11285_v60  ;;  %v5550_v60 = vmax.f32 %v6454_v52, %v9627_v49  ;;  %v12198_v52 = vld [vmem:[#allocation46_spill] sm:$0xff] }
 0x6ec   : > { %4742 = vperm.xlu0 %6369, %v12185_v10   ;;  %v9646_v56 = vpop.permute.xlu0 %4265 }
 0x6ed   : > { %12199 = vst [vmem:[#allocation98_spill] sm:$0xff] %v9646_v56 }
 0x6ee   : > { %3993 = vperm.xlu1 %6339, %v12186_v0   ;;  %v9618_v2 = vpop.permute.xlu1 %3677  ;;  %v5541_v0 = vld [vmem:[#allocation2 + $0x11] sm:$0xff] }
 0x6f0   : > { %4754 = vperm.xlu0 %6369, %v12188_v33   ;;  %v9657_v59 = vpop.permute.xlu0 %4289 }
 0x6f1   : > { %12204 = vst [vmem:[#allocation151_spill] sm:$0xff] %v9657_v59 }
 0x6f2   : > { %4001 = vperm.xlu1 %6339, %v12189_v61   ;;  %v9624_v14 = vpop.permute.xlu1 %3685  ;;  %v9636_v61 = vmax.f32 %v5550_v60, %v6456_v37  ;;  %v12202_v60 = vld [vmem:[#allocation66_spill] sm:$0xff] }
 0x6f4   : > { %4762 = vperm.xlu0 %6369, %v12190_v27   ;;  %12194 = vst [vmem:[#allocation26_spill] sm:$0xff] %v9636_v61  ;;  %5574 = vst [vmem:[#allocation2 + $0x21] sm:$0xff] %v9636_v61 }
 0x6f6   : > { %4009 = vperm.xlu1 %6339, %v12193_v5   ;;  %v5549_v5 = vmax.f32 %v9640_v7, %v5541_v0  ;;  %v12205_v0 = vld [vmem:[#allocation72_spill] sm:$0xff]  ;;  %v12220_v7 = vld [vmem:[#allocation33_spill] sm:$0xff] }
 0x6f7   : > { %v9633_v20 = vpop.permute.xlu1 %3701 }
 0x6f8   : > { %6370 = vset.pattern.permute.xlu0 %v11287_v47  ;;  %v12200_v47 = vld [vmem:[#allocation80_spill] sm:$0xff]  ;;  %v9649_v37 = vmax.f32 %v5549_v5, %v5557_v42  ;;  %v12206_v5 = vld [vmem:[#allocation82_spill] sm:$0xff] }
 0x6f9   : > { %4786 = vperm.xlu0 %6370, %v12195_v32  }
 0x6fa   : > { %6340 = vset.pattern.permute.xlu1 %v12196_v25  ;;  %12201 = vst [vmem:[#allocation38_spill] sm:$0xff] %v9649_v37  ;;  %5573 = vst [vmem:[#allocation2 + $0x11] sm:$0xff] %v9649_v37 }
 0x6fb   : > { %4033 = vperm.xlu1 %6340, %v12198_v52   ;;  %v9643_v49 = vpop.permute.xlu1 %3705  ;;  %v12203_v52 = vld [vmem:[#allocation132_spill] sm:$0xff] }
 0x6fc   : > { %v5582_v40 = vld [vmem:[#allocation2 + $0x20] sm:$0xff] }
 0x6fd   : > { %4798 = vperm.xlu0 %6370, %v12200_v47   ;;  %v5606_v9 = vld [vmem:[#allocation2 + $0x22] sm:$0xff]  ;;  %v5598_v42 = vmax.f32 %v5582_v40, %v9636_v61  ;;  %v12211_v40 = vld [vmem:[#allocation118_spill] sm:$0xff] }
 0x6fe   : > { %v12213_v61 = vld [vmem:[#allocation73_spill] sm:$0xff] }
 0x6ff   : > { %4041 = vperm.xlu1 %6340, %v12202_v60   ;;  %v9653_v25 = vpop.permute.xlu1 %3713  ;;  %v5614_v4 = vmax.f32 %v5598_v42, %v5606_v9 }
 0x701   : > { %4806 = vperm.xlu0 %6370, %v12203_v52   ;;  %v5581_v30 = vld [vmem:[#allocation2 + $0x10] sm:$0xff]  ;;  %v9666_v52 = vpop.permute.xlu0 %4301  ;;  %5622 = vst [vmem:[#allocation2 + $0x21] sm:$0xff] %v5614_v4 }
 0x702   : > { %v5605_v60 = vld [vmem:[#allocation2 + $0x12] sm:$0xff]  ;;  %v5597_v34 = vmax.f32 %v5581_v30, %v9649_v37  ;;  %12208 = vst [vmem:[#allocation152_spill] sm:$0xff] %v9666_v52  ;;  %v12214_v37 = vmov 54   ;;  %v11294_v30 = vmov 70  }
 0x703   : > { %4045 = vperm.xlu1 %6340, %v12205_v0   ;;  %v9660_v56 = vpop.permute.xlu1 %3721  ;;  %v11291_v0 = vmov 69  }
 0x704   : > { %v9671_v47 = vmax.f32 %v5597_v34, %v5605_v60  ;;  %v12215_v34 = vld [vmem:[#allocation22_spill] sm:$0xff]  ;;  %v12216_v60 = vld [vmem:[#allocation127_spill] sm:$0xff] }
 0x705   : > { %4814 = vperm.xlu0 %6370, %v12206_v5   ;;  %v12210_v5 = vld [vmem:[#allocation110_spill] sm:$0xff]  ;;  %v9680_v42 = vpop.permute.xlu0 %4309 }
 0x706   : > { %12209 = vst [vmem:[#allocation154_spill] sm:$0xff] %v9671_v47  ;;  %5621 = vst [vmem:[#allocation2 + $0x11] sm:$0xff] %v9671_v47  ;;  %v12219_v47 = vld [vmem:[#allocation62_spill] sm:$0xff] }
 0x707   : > { %4053 = vperm.xlu1 %6340, %v12207_v35   ;;  %12212 = vst [vmem:[#allocation137_spill] sm:$0xff] %v9680_v42  ;;  %v12223_v42 = vld [vmem:[#allocation83_spill] sm:$0xff]  ;;  %v12224_v35 = vld [vmem:[#allocation29_spill] sm:$0xff] }
 0x708   : > { %v9668_v59 = vpop.permute.xlu1 %3745 }
 0x709   : > { %6373 = vset.pattern.permute.xlu0 %v11291_v0  ;;  %v9688_v0 = vpop.permute.xlu0 %4317 }
 0x70a   : > { %4838 = vperm.xlu0 %6373, %v12210_v5   ;;  %12217 = vst [vmem:[#allocation126_spill] sm:$0xff] %v9688_v0  ;;  %v12245_v5 = vld [vmem:[#allocation36_spill] sm:$0xff] }
 0x70b   : > { %4061 = vperm.xlu1 %6340, %v12211_v40   ;;  %v12218_v40 = vld [vmem:[#allocation15_spill] sm:$0xff] }
 0x70c   : > { %v9678_v9 = vpop.permute.xlu1 %3753 }
 0x70e   : > { %4850 = vperm.xlu0 %6373, %v12213_v61   ;;  %v12227_v61 = vmov 55  }
 0x70f   : > { %6343 = vset.pattern.permute.xlu1 %v12214_v37 }
 0x710   : > { %4109 = vperm.xlu1 %6343, %v12215_v34   ;;  %v9685_v4 = vpop.permute.xlu1 %3757  ;;  %v9698_v34 = vpop.permute.xlu0 %4341 }
 0x711   : > { %12222 = vst [vmem:[#allocation71_spill] sm:$0xff] %v9698_v34 }
 0x712   : > { %4858 = vperm.xlu0 %6373, %v12216_v60  }
 0x714   : > { %4113 = vperm.xlu1 %6343, %v12218_v40   ;;  %v9691_v52 = vpop.permute.xlu1 %3765  ;;  %v12225_v40 = vld [vmem:[#allocation28_spill] sm:$0xff]  ;;  %v9705_v60 = vpop.permute.xlu0 %4353 }
 0x715   : > { %12226 = vst [vmem:[#allocation63_spill] sm:$0xff] %v9705_v60  ;;  %v12234_v60 = vld [vmem:[#allocation5_spill] sm:$0xff] }
 0x716   : > { %6374 = vset.pattern.permute.xlu0 %v11294_v30 }
 0x717   : > { %4882 = vperm.xlu0 %6374, %v12219_v47   ;;  %v12230_v47 = vld [vmem:[#allocation42_spill] sm:$0xff] }
 0x718   : > { %4121 = vperm.xlu1 %6343, %v12220_v7   ;;  %v9696_v37 = vpop.permute.xlu1 %3773  ;;  %v12229_v7 = vld [vmem:[#allocation84_spill] sm:$0xff] }
 0x719   : > { %12221 = vst [vmem:[#allocation24_spill] sm:$0xff] %v9696_v37 }
 0x71b   : > { %4894 = vperm.xlu0 %6374, %v12223_v42   ;;  %v9715_v42 = vpop.permute.xlu0 %4361 }
 0x71c   : > { %4129 = vperm.xlu1 %6343, %v12224_v35   ;;  %12231 = vst [vmem:[#allocation114_spill] sm:$0xff] %v9715_v42  ;;  %v11296_v35 = vmov 71  }
 0x71d   : > { %v9702_v0 = vpop.permute.xlu1 %3797 }
 0x71f   : > { %4902 = vperm.xlu0 %6374, %v12225_v40   ;;  %v12232_v40 = vld [vmem:[#allocation113_spill] sm:$0xff] }
 0x720   : > { %6344 = vset.pattern.permute.xlu1 %v12227_v61 }
 0x721   : > { %4145 = vperm.xlu1 %6344, %v12120_v21   ;;  %v9709_v30 = vpop.permute.xlu1 %3801  ;;  %v9722_v21 = vpop.permute.xlu0 %4385 }
 0x722   : > { %12228 = vst [vmem:[#allocation65_spill] sm:$0xff] %v9709_v30  ;;  %12233 = vst [vmem:[#allocation102_spill] sm:$0xff] %v9722_v21  ;;  %v12239_v21 = vld [vmem:[#allocation19_spill] sm:$0xff]  ;;  %v12293_v30 = vld [vmem:[#allocation120_spill] sm:$0xff] }
 0x723   : > { %4910 = vperm.xlu0 %6374, %v12229_v7   ;;  %v12235_v7 = vld [vmem:[#allocation128_spill] sm:$0xff] }
 0x725   : > { %4153 = vperm.xlu1 %6344, %v12230_v47   ;;  %v9713_v34 = vpop.permute.xlu1 %3809  ;;  %v9730_v42 = vpop.permute.xlu0 %4397 }
 0x726   : > { %12236 = vst [vmem:[#allocation14_spill] sm:$0xff] %v9730_v42 }
 0x727   : > { %6377 = vset.pattern.permute.xlu0 %v11296_v35 }
 0x728   : > { %4934 = vperm.xlu0 %6377, %v12232_v40   ;;  %v11300_v40 = vmov 72  }
 0x729   : > { %4157 = vperm.xlu1 %6344, %v12129_v17   ;;  %v9720_v61 = vpop.permute.xlu1 %3817  ;;  %v12238_v17 = vmov 56  }
 0x72c   : > { %4946 = vperm.xlu0 %6377, %v12234_v60   ;;  %v9740_v60 = vpop.permute.xlu0 %4405 }
 0x72d   : > { %4165 = vperm.xlu1 %6344, %v12135_v38   ;;  %12241 = vst [vmem:[#allocation155_spill] sm:$0xff] %v9740_v60 }
 0x72e   : > { %v9726_v47 = vpop.permute.xlu1 %3841 }
 0x730   : > { %4954 = vperm.xlu0 %6377, %v12235_v7   ;;  %v12242_v7 = vld [vmem:[#allocation20_spill] sm:$0xff]  ;;  %v9747_v37 = vpop.permute.xlu0 %4413 }
 0x731   : > { %4173 = vperm.xlu1 %6344, %v12143_v6   ;;  %v12243_v6 = vld [vmem:[#allocation45_spill] sm:$0xff]  ;;  %12246 = vst [vmem:[#allocation79_spill] sm:$0xff] %v9747_v37 }
 0x732   : > { %v9732_v35 = vpop.permute.xlu1 %3849 }
 0x733   : > { %12237 = vst [vmem:[#allocation161_spill] sm:$0xff] %v9732_v35  ;;  %v12268_v35 = vld [vmem:[#allocation109_spill] sm:$0xff] }
 0x734   : > { %6378 = vset.pattern.permute.xlu0 %v11300_v40  ;;  %v12248_v40 = vld [vmem:[#allocation35_spill] sm:$0xff]  ;;  %v9754_v60 = vpop.permute.xlu0 %4437 }
 0x735   : > { %6347 = vset.pattern.permute.xlu1 %v12238_v17  ;;  %5002 = vperm.xlu0 %6378, %v12239_v21   ;;  %12249 = vst [vmem:[#allocation134_spill] sm:$0xff] %v9754_v60  ;;  %v12251_v21 = vld [vmem:[#allocation88_spill] sm:$0xff]  ;;  %v12256_v60 = vld [vmem:[#allocation117_spill] sm:$0xff] }
 0x736   : > { %4197 = vperm.xlu1 %6347, %v12153_v13   ;;  %v9738_v38 = vpop.permute.xlu1 %3853 }
 0x737   : > { %12240 = vst [vmem:[#allocation85_spill] sm:$0xff] %v9738_v38  ;;  %v3777_v38 = vmul.f32 %v12268_v35, %v11788_v3  ;;  %v12274_v35 = vld [vmem:[#allocation52_spill] sm:$0xff] }
 0x739   : > { %5014 = vperm.xlu0 %6378, %v12242_v7   ;;  %v11304_v7 = vmov 73  }
 0x73a   : > { %4201 = vperm.xlu1 %6347, %v12243_v6   ;;  %v9744_v42 = vpop.permute.xlu1 %3861  ;;  %v12250_v6 = vmov 57  }
 0x73b   : > { %12244 = vst [vmem:[#allocation159_spill] sm:$0xff] %v9744_v42 }
 0x73d   : > { %5022 = vperm.xlu0 %6378, %v12245_v5   ;;  %v12254_v5 = vld [vmem:[#allocation8_spill] sm:$0xff] }
 0x73e   : > { %4209 = vperm.xlu1 %6347, %v12163_v43   ;;  %v9750_v17 = vpop.permute.xlu1 %3869  ;;  %v9762_v43 = vpop.permute.xlu0 %4449 }
 0x73f   : > { %12247 = vst [vmem:[#allocation61_spill] sm:$0xff] %v9750_v17  ;;  %12253 = vst [vmem:[#allocation139_spill] sm:$0xff] %v9762_v43 }
 0x741   : > { %5030 = vperm.xlu0 %6378, %v12248_v40   ;;  %v12255_v40 = vld [vmem:[#allocation47_spill] sm:$0xff] }
 0x742   : > { %4217 = vperm.xlu1 %6347, %v12168_v45  }
 0x743   : > { %v3894_v13 = vpop.permute.xlu1 %3893 }
 0x745   : > { %6381 = vset.pattern.permute.xlu0 %v11304_v7 }
 0x746   : > { %6348 = vset.pattern.permute.xlu1 %v12250_v6  ;;  %5046 = vperm.xlu0 %6381, %v12251_v21   ;;  %v9772_v6 = vpop.permute.xlu0 %4457  ;;  %v11307_v21 = vmov 74  }
 0x747   : > { %4241 = vperm.xlu1 %6348, %v12172_v36   ;;  %v9760_v37 = vpop.permute.xlu1 %3897  ;;  %12257 = vst [vmem:[#allocation156_spill] sm:$0xff] %v9772_v6  ;;  %v12258_v36 = vld [vmem:[#allocation39_spill] sm:$0xff]  ;;  %v12264_v6 = vld [vmem:[#allocation146_spill] sm:$0xff] }
 0x748   : > { %12252 = vst [vmem:[#allocation21_spill] sm:$0xff] %v9760_v37 }
 0x74a   : > { %5058 = vperm.xlu0 %6381, %v12254_v5   ;;  %v9781_v17 = vpop.permute.xlu0 %4481 }
 0x74b   : > { %4249 = vperm.xlu1 %6348, %v12255_v40   ;;  %v9766_v45 = vpop.permute.xlu1 %3905  ;;  %v12260_v40 = vld [vmem:[#allocation11_spill] sm:$0xff]  ;;  %12261 = vst [vmem:[#allocation166_spill] sm:$0xff] %v9781_v17 }
 0x74c   : > { %v3729_v5 = vmul.f32 %v9633_v20, %v12260_v40  ;;  %v12269_v20 = vld [vmem:[#allocation93_spill] sm:$0xff] }
 0x74d   : > { %v3825_v17 = vmul.f32 %v9702_v0, %v12269_v20  ;;  %v12276_v0 = vld [vmem:[#allocation116_spill] sm:$0xff]  ;;  %v3734_v20 = vmul.f32 %v9660_v56, %v11644_v58  ;;  %v12283_v56 = vld [vmem:[#allocation143_spill] sm:$0xff] }
 0x74e   : > { %5066 = vperm.xlu0 %6381, %v12256_v60   ;;  %v12263_v60 = vld [vmem:[#allocation16_spill] sm:$0xff] }
 0x74f   : > { %4253 = vperm.xlu1 %6348, %v12176_v12   ;;  %v9770_v7 = vpop.permute.xlu1 %3913  ;;  %v12262_v12 = vld [vmem:[#allocation67_spill] sm:$0xff]  ;;  %v3689_v42 = vmul.f32 %v12264_v6, %v12263_v60  ;;  %v3732_v6 = vmul.f32 %v9653_v25, %v11974_v16  ;;  %v12291_v16 = vld [vmem:[#allocation153_spill] sm:$0xff] }
 0x752   : > { %6382 = vset.pattern.permute.xlu0 %v11307_v21  ;;  %v3737_v21 = vadd.f32 %v3729_v5, %v3689_v42  ;;  %v12272_v42 = vld [vmem:[#allocation6_spill] sm:$0xff] }
 0x753   : > { %4261 = vperm.xlu1 %6348, %v12178_v54   ;;  %5090 = vperm.xlu0 %6382, %v12258_v36   ;;  %v12266_v54 = vmov 58   ;;  %v12267_v36 = vld [vmem:[#allocation101_spill] sm:$0xff] }
 0x754   : > { %v9777_v43 = vpop.permute.xlu1 %3937  ;;  %v3785_v5 = vadd.f32 %v3777_v38, %v3737_v21  ;;  %v3921_v21 = vmul.f32 %v3894_v13, %v11805_v57  ;;  %v12278_v38 = vld [vmem:[#allocation27_spill] sm:$0xff]  ;;  %v3828_v13 = vmul.f32 %v9713_v34, %v11594_v29  ;;  %v3688_v34 = vmul.f32 %v12004_v41, %v9600_v31  ;;  %v12295_v41 = vld [vmem:[#allocation57_spill] sm:$0xff] }
 0x755   : > { %12259 = vst [vmem:[#allocation157_spill] sm:$0xff] %v9777_v43  ;;  %v9795_v43 = vpop.permute.xlu0 %4493  ;;  %v3694_v25 = vmul.f32 %v12278_v38, %v12138_v46  ;;  %v12288_v46 = vld [vmem:[#allocation147_spill] sm:$0xff] }
 0x756   : > { %12270 = vst [vmem:[#allocation109_spill] sm:$0xff] %v9795_v43  ;;  %v3873_v43 = vmul.f32 %v12276_v0, %v11801_v11 }
 0x757   : > { %4269 = vperm.xlu1 %6348, %v12181_v26   ;;  %5102 = vperm.xlu0 %6382, %v12262_v12   ;;  %v3833_v12 = vadd.f32 %v3825_v17, %v3785_v5  ;;  %v12280_v17 = vld [vmem:[#allocation148_spill] sm:$0xff] }
 0x758   : > { %v9787_v37 = vpop.permute.xlu1 %3945 }
 0x759   : > { %12265 = vst [vmem:[#allocation146_spill] sm:$0xff] %v9787_v37  ;;  %v3881_v38 = vadd.f32 %v3873_v43, %v3833_v12  ;;  %v12290_v43 = vld [vmem:[#allocation115_spill] sm:$0xff] }
 0x75a   : > { %v9846_v12 = vmul.f32 %v12290_v43, %v7248_v19  ;;  %v3969_v43 = vmul.f32 %v12295_v41, %v11782_v23  ;;  %v3691_v41 = vmul.f32 %v9613_v50, %v11782_v23 }
 0x75b   : > { %6351 = vset.pattern.permute.xlu1 %v12266_v54  ;;  %5110 = vperm.xlu0 %6382, %v12267_v36   ;;  %v12273_v54 = vld [vmem:[#allocation23_spill] sm:$0xff] }
 0x75c   : > { %4293 = vperm.xlu1 %6351, %v12185_v10   ;;  %v9798_v26 = vpop.permute.xlu1 %3949  ;;  %v3692_v36 = vmul.f32 %v12273_v54, %v7248_v19  ;;  %v12279_v54 = vld [vmem:[#allocation51_spill] sm:$0xff] }
 0x75d   : > { %12271 = vst [vmem:[#allocation167_spill] sm:$0xff] %v9798_v26  ;;  %v9812_v26 = vpop.permute.xlu0 %4501  ;;  %v3728_v5 = vmul.f32 %v12280_v17, %v12279_v54  ;;  %v12289_v54 = vld [vmem:[#allocation13_spill] sm:$0xff] }
 0x75e   : > { %v3740_v10 = vadd.f32 %v3732_v6, %v3692_v36  ;;  %12277 = vst [vmem:[#allocation116_spill] sm:$0xff] %v9812_v26  ;;  %v11312_v36 = vmov 75   ;;  %v3780_v6 = vmul.f32 %v12283_v56, %v7008_v62  ;;  %v12285_v26 = vld [vmem:[#allocation92_spill] sm:$0xff]  ;;  %v3824_v56 = vmul.f32 %v12289_v54, %v12263_v60  ;;  %v12294_v60 = vld [vmem:[#allocation50_spill] sm:$0xff] }
 0x75f   : > { %5118 = vperm.xlu0 %6382, %v12272_v42   ;;  %v3878_v54 = vmul.f32 %v12293_v30, %v11657_v51  ;;  %v3776_v31 = vmul.f32 %v9668_v59, %v12294_v60  ;;  %v12299_v30 = vld [vmem:[#allocation81_spill] sm:$0xff]  ;;  %v3736_v59 = vadd.f32 %v3728_v5, %v3688_v34  ;;  %v3779_v5 = vmul.f32 %v9685_v4, %v12151_v28 }
 0x760   : > { %4297 = vperm.xlu1 %6351, %v12274_v35   ;;  %v9806_v37 = vpop.permute.xlu1 %3957  ;;  %v12281_v35 = vld [vmem:[#allocation37_spill] sm:$0xff]  ;;  %v3730_v4 = vmul.f32 %v9643_v49, %v11801_v11  ;;  %v3778_v49 = vmul.f32 %v9678_v9, %v11805_v57 }
 0x761   : > { %12275 = vst [vmem:[#allocation23_spill] sm:$0xff] %v9806_v37  ;;  %v3731_v42 = vmul.f32 %v12281_v35, %v11826_v44  ;;  %v12282_v37 = vld [vmem:[#allocation99_spill] sm:$0xff] }
 0x762   : > { %v9823_v0 = vmul.f32 %v12282_v37, %v11600_v18  ;;  %v12286_v35 = vld [vmem:[#allocation103_spill] sm:$0xff] }
 0x763   : > { %6385 = vset.pattern.permute.xlu0 %v11312_v36  ;;  %v9836_v37 = vmul.f32 %v12286_v35, %v11657_v51  ;;  %v3782_v36 = vmul.f32 %v12288_v46, %v11651_v63  ;;  %v9850_v35 = vmul.f32 %v12291_v16, %v11838_v8  ;;  %v12297_v16 = vld [vmem:[#allocation74_spill] sm:$0xff] }
 0x764   : > { %4305 = vperm.xlu1 %6351, %v12188_v33   ;;  %v9831_v17 = vpop.permute.xlu1 %3965  ;;  %5142 = vperm.xlu0 %6385, %v12285_v26   ;;  %v3742_v33 = vadd.f32 %v3734_v20, %v3694_v25  ;;  %v3929_v26 = vadd.f32 %v3921_v21, %v3881_v38  ;;  %v9862_v20 = vpop.permute.xlu0 %4509  ;;  %v12298_v21 = vld [vmem:[#allocation48_spill] sm:$0xff] }
 0x765   : > { %12284 = vst [vmem:[#allocation27_spill] sm:$0xff] %v9831_v17  ;;  %12287 = vst [vmem:[#allocation148_spill] sm:$0xff] %v9836_v37  ;;  %v3788_v17 = vadd.f32 %v3780_v6, %v3740_v10  ;;  %v12292_v37 = vld [vmem:[#allocation97_spill] sm:$0xff]  ;;  %v3830_v10 = vmul.f32 %v9720_v61, %v11653_v39  ;;  %v3920_v25 = vmul.f32 %v12298_v21, %v11788_v3  ;;  %v12301_v21 = vld [vmem:[#allocation162_spill] sm:$0xff] }
 0x766   : > { %v3876_v46 = vmul.f32 %v12292_v37, %v11600_v18  ;;  %12296 = vst [vmem:[#allocation37_spill] sm:$0xff] %v9862_v20  ;;  %v9870_v6 = vmul.f32 %v12299_v30, %v7008_v62  ;;  %v3790_v38 = vadd.f32 %v3782_v36, %v3742_v33  ;;  %v3924_v61 = vmul.f32 %v9766_v45, %v11602_v48  ;;  %v12303_v36 = vld [vmem:[#allocation119_spill] sm:$0xff] }
 0x767   : > { %v3836_v19 = vadd.f32 %v3828_v13, %v3788_v17  ;;  %v3977_v17 = vadd.f32 %v3969_v43, %v3929_v26  ;;  %v4065_v3 = vmul.f32 %v12301_v21, %v12151_v28  ;;  %v3784_v30 = vadd.f32 %v3776_v31, %v3736_v59  ;;  %v12304_v45 = vld [vmem:[#allocation59_spill] sm:$0xff] }
 0x768   : > { %4313 = vperm.xlu1 %6351, %v12190_v27   ;;  %5154 = vperm.xlu0 %6385, %v12297_v16   ;;  %v12300_v27 = vld [vmem:[#allocation32_spill] sm:$0xff]  ;;  %v3838_v34 = vadd.f32 %v3830_v10, %v3790_v38  ;;  %v12302_v33 = vmov 59   ;;  %v3974_v26 = vmul.f32 %v12304_v45, %v11661_v22  ;;  %v3739_v43 = vadd.f32 %v3731_v42, %v3691_v41  ;;  %v12309_v45 = vld [vmem:[#allocation65_spill] sm:$0xff] }
 0x769   : > { %v3990_v13 = vpop.permute.xlu1 %3989  ;;  %v3972_v20 = vmul.f32 %v12300_v27, %v11838_v8  ;;  %v3884_v50 = vadd.f32 %v3876_v46, %v3836_v19  ;;  %v3872_v27 = vmul.f32 %v9726_v47, %v12260_v40  ;;  %v9894_v19 = vpop.permute.xlu0 %4558  ;;  %v3926_v10 = vmul.f32 %v9770_v7, %v11658_v15 }
 0x76a   : > { %v4017_v37 = vmul.f32 %v3990_v13, %v11826_v44  ;;  %12305 = vst [vmem:[#allocation99_spill] sm:$0xff] %v9894_v19  ;;  %v12306_v13 = vld [vmem:[#allocation163_spill] sm:$0xff]  ;;  %v3690_v47 = vmul.f32 %v9606_v55, %v11966_v24  ;;  %v3693_v41 = vmul.f32 %v9618_v2, %v11594_v29  ;;  %v3832_v38 = vadd.f32 %v3824_v56, %v3784_v30  ;;  %v12308_v56 = vld [vmem:[#allocation41_spill] sm:$0xff] }
 0x76b   : > { %v3932_v46 = vadd.f32 %v3924_v61, %v3884_v50  ;;  %v4068_v42 = vmul.f32 %v12306_v13, %v11651_v63  ;;  %v3886_v61 = vadd.f32 %v3878_v54, %v3838_v34  ;;  %v11321_v50 = vmov 76   ;;  %v12384_v19 = vld [vmem:[#allocation15_spill] sm:$0xff] }
 0x76c   : > { %v4025_v60 = vadd.f32 %v4017_v37, %v3977_v17  ;;  %6352 = vset.pattern.permute.xlu1 %v12302_v33  ;;  %5162 = vperm.xlu0 %6385, %v12303_v36   ;;  %v4081_v17 = vld [vmem:[#allocation3 + $0x22] sm:$0xff]  ;;  %v3787_v37 = vadd.f32 %v3779_v5, %v3739_v43  ;;  %v3781_v55 = vmul.f32 %v9691_v52, %v11602_v48 }
 0x76d   : > { %4337 = vperm.xlu1 %6352, %v12195_v32   ;;  %v9890_v31 = vpop.permute.xlu1 %3993  ;;  %v3738_v30 = vadd.f32 %v3730_v4, %v3690_v47  ;;  %v3934_v9 = vadd.f32 %v3926_v10, %v3886_v61  ;;  %v3980_v54 = vadd.f32 %v3972_v20, %v3932_v46  ;;  %v3741_v34 = vadd.f32 %v9823_v0, %v3693_v41  ;;  %v12310_v43 = vld [vmem:[#allocation157_spill] sm:$0xff]  ;;  %v9921_v13 = vpop.permute.xlu0 %4570  ;;  %v12312_v10 = vld [vmem:[#allocation12_spill] sm:$0xff] }
 0x76e   : > { %v4073_v59 = vadd.f32 %v4065_v3, %v4025_v60  ;;  %v12307_v3 = vld [vmem:[#allocation164_spill] sm:$0xff]  ;;  %v3880_v60 = vadd.f32 %v3872_v27, %v3832_v38  ;;  %v3695_v33 = vmul.f32 %v9624_v14, %v11653_v39  ;;  %v3826_v52 = vmul.f32 %v12309_v45, %v11782_v23  ;;  %12311 = vst [vmem:[#allocation143_spill] sm:$0xff] %v9921_v13  ;;  %v12313_v20 = vld [vmem:[#allocation85_spill] sm:$0xff] }
 0x76f   : > { %v4070_v7 = vmul.f32 %v12307_v3, %v11972_v1  ;;  %v3968_v27 = vmul.f32 %v12310_v43, %v11966_v24  ;;  %v3835_v4 = vadd.f32 %v9846_v12, %v3787_v37  ;;  %v3875_v46 = vmul.f32 %v12313_v20, %v12312_v10  ;;  %v12314_v0 = vld [vmem:[#allocation161_spill] sm:$0xff]  ;;  %v12319_v45 = vld [vmem:[#allocation148_spill] sm:$0xff]  ;;  %v12321_v20 = vld [vmem:[#allocation159_spill] sm:$0xff] }
 0x770   : > { %v4089_v21 = vadd.f32 %v4081_v17, %v4073_v59  ;;  %6386 = vset.pattern.permute.xlu0 %v11321_v50  ;;  %v3786_v59 = vadd.f32 %v3778_v49, %v3738_v30  ;;  %v3789_v38 = vadd.f32 %v3781_v55, %v3741_v34  ;;  %v3874_v41 = vmul.f32 %v12314_v0, %v11826_v44  ;;  %v12315_v17 = vld [vmem:[#allocation80_spill] sm:$0xff]  ;;  %v12318_v12 = vld [vmem:[#allocation25_spill] sm:$0xff] }
 0x771   : > { %4345 = vperm.xlu1 %6352, %v12142_v53   ;;  %v4002_v2 = vpop.permute.xlu1 %4001  ;;  %5186 = vperm.xlu0 %6386, %v12308_v56   ;;  %v3928_v14 = vadd.f32 %v3920_v25, %v3880_v60  ;;  %v12317_v49 = vld [vmem:[#allocation24_spill] sm:$0xff]  ;;  %v3982_v30 = vadd.f32 %v3974_v26, %v3934_v9  ;;  %v3743_v43 = vadd.f32 %v12319_v45, %v3695_v33  ;;  %v12320_v55 = vld [vmem:[#allocation21_spill] sm:$0xff]  ;;  %v4084_v25 = vld [vmem:[#allocation3 + $0x52] sm:$0xff]  ;;  %v11328_v32 = vmov 80  }
 0x772   : > { %4097 = vst [vmem:[#allocation3 + $0x22] sm:$0xff] %v4089_v21  ;;  %v4020_v5 = vmul.f32 %v4002_v2, %v11644_v58  ;;  %v12316_v21 = vld [vmem:[#allocation68_spill] sm:$0xff]  ;;  %v3783_v3 = vmul.f32 %v12317_v49, %v11658_v15  ;;  %v3883_v60 = vadd.f32 %v3875_v46, %v3835_v4  ;;  %v3877_v0 = vmul.f32 %v12321_v20, %v11644_v58  ;;  %v12323_v9 = vld [vmem:[#allocation34_spill] sm:$0xff]  ;;  %v12328_v46 = vld [vmem:[#allocation167_spill] sm:$0xff] }
 0x773   : > { %v3976_v34 = vadd.f32 %v3968_v27, %v3928_v14  ;;  %v12322_v49 = vld [vmem:[#allocation112_spill] sm:$0xff]  ;;  %v9944_v27 = vpop.permute.xlu0 %4578  ;;  %v3837_v4 = vadd.f32 %v9850_v35, %v3789_v38  ;;  %v3971_v14 = vmul.f32 %v12328_v46, %v11594_v29  ;;  %v4086_v45 = vld [vmem:[#allocation3 + $0x72] sm:$0xff]  ;;  %v12330_v20 = vld [vmem:[#allocation61_spill] sm:$0xff]  ;;  %v12381_v13 = vmov 63  }
 0x774   : > { %v4028_v47 = vadd.f32 %v4020_v5, %v3980_v54  ;;  %v3834_v54 = vadd.f32 %v3826_v52, %v3786_v59  ;;  %v3922_v5 = vmul.f32 %v12320_v55, %v12151_v28  ;;  %v12325_v33 = vld [vmem:[#allocation132_spill] sm:$0xff]  ;;  %v12326_v52 = vld [vmem:[#allocation53_spill] sm:$0xff]  ;;  %v3791_v59 = vadd.f32 %v3783_v3, %v3743_v43  ;;  %12327 = vst [vmem:[#allocation103_spill] sm:$0xff] %v9944_v27  ;;  %v12329_v3 = vld [vmem:[#allocation106_spill] sm:$0xff] }
 0x775   : > { %4349 = vperm.xlu1 %6352, %v12315_v17   ;;  %v4010_v61 = vpop.permute.xlu1 %4009  ;;  %5198 = vperm.xlu0 %6386, %v12316_v21   ;;  %v3831_v43 = vmul.f32 %v12329_v3, %v11661_v22  ;;  %v3931_v35 = vadd.f32 %v9870_v6, %v3883_v60  ;;  %v12335_v6 = vld [vmem:[#allocation23_spill] sm:$0xff]  ;;  %v11322_v3 = vmov 77   ;;  %v12380_v27 = vld [vmem:[#allocation86_spill] sm:$0xff]  ;;  %v12414_v53 = vld [vmem:[#allocation16_spill] sm:$0xff] }
 0x776   : > { %v4076_v2 = vadd.f32 %v4068_v42, %v4028_v47  ;;  %v4022_v37 = vmul.f32 %v4010_v61, %v12318_v12  ;;  %v4016_v42 = vmul.f32 %v12322_v49, %v11801_v11  ;;  %v3882_v26 = vadd.f32 %v3874_v41, %v3834_v54  ;;  %v12324_v47 = vld [vmem:[#allocation146_spill] sm:$0xff]  ;;  %v12332_v49 = vld [vmem:[#allocation141_spill] sm:$0xff] }
 0x777   : > { %v3970_v61 = vmul.f32 %v12324_v47, %v12323_v9  ;;  %v4018_v41 = vmul.f32 %v9890_v31, %v12312_v10  ;;  %v12333_v31 = vld [vmem:[#allocation30_spill] sm:$0xff] }
 0x778   : > { %v4092_v50 = vadd.f32 %v4084_v25, %v4076_v2  ;;  %v4030_v17 = vadd.f32 %v4022_v37, %v3982_v30  ;;  %v3930_v37 = vadd.f32 %v3922_v5, %v3882_v26  ;;  %v4024_v54 = vadd.f32 %v4016_v42, %v3976_v34  ;;  %v12331_v5 = vld [vmem:[#allocation82_spill] sm:$0xff] }
 0x779   : > { %4357 = vperm.xlu1 %6352, %v12325_v33   ;;  %5206 = vperm.xlu0 %6386, %v12326_v52   ;;  %v3885_v25 = vadd.f32 %v3877_v0, %v3837_v4  ;;  %v3925_v34 = vmul.f32 %v12333_v31, %v11651_v63  ;;  %v3839_v42 = vadd.f32 %v3831_v43, %v3791_v59  ;;  %v4080_v47 = vld [vmem:[#allocation3 + $0x12] sm:$0xff]  ;;  %v12368_v33 = vmov 62  }
 0x77a   : > { %4100 = vst [vmem:[#allocation3 + $0x52] sm:$0xff] %v4092_v50  ;;  %v4078_v2 = vadd.f32 %v4070_v7, %v4030_v17  ;;  %v4034_v30 = vpop.permute.xlu1 %4033  ;;  %v3879_v50 = vmul.f32 %v12330_v20, %v12318_v12  ;;  %v3978_v7 = vadd.f32 %v3970_v61, %v3930_v37  ;;  %v3979_v26 = vadd.f32 %v3971_v14, %v3931_v35  ;;  %v12334_v4 = vld [vmem:[#allocation150_spill] sm:$0xff]  ;;  %v12339_v43 = vld [vmem:[#allocation131_spill] sm:$0xff] }
 0x77b   : > { %v4064_v55 = vmul.f32 %v4034_v30, %v11805_v57  ;;  %v3973_v60 = vmul.f32 %v12335_v6, %v12334_v4  ;;  %v12336_v30 = vld [vmem:[#allocation43_spill] sm:$0xff]  ;;  %v12338_v14 = vmov 60  }
 0x77c   : > { %v4094_v38 = vadd.f32 %v4086_v45, %v4078_v2  ;;  %v4026_v46 = vadd.f32 %v4018_v41, %v3978_v7  ;;  %v4019_v37 = vmul.f32 %v12336_v30, %v11600_v18  ;;  %v9966_v45 = vpop.permute.xlu0 %4594  ;;  %v3927_v41 = vmul.f32 %v12339_v43, %v11972_v1  ;;  %v4082_v35 = vld [vmem:[#allocation3 + $0x32] sm:$0xff]  ;;  %v4083_v30 = vld [vmem:[#allocation3 + $0x42] sm:$0xff] }
 0x77d   : > { %v4072_v17 = vadd.f32 %v4064_v55, %v4024_v54  ;;  %4365 = vperm.xlu1 %6352, %v12331_v5   ;;  %5214 = vperm.xlu0 %6386, %v12332_v49   ;;  %12337 = vst [vmem:[#allocation147_spill] sm:$0xff] %v9966_v45  ;;  %v3887_v54 = vadd.f32 %v3879_v50, %v3839_v42  ;;  %v12342_v50 = vld [vmem:[#allocation27_spill] sm:$0xff]  ;;  %v12378_v45 = vmov 78  }
 0x77e   : > { %4102 = vst [vmem:[#allocation3 + $0x72] sm:$0xff] %v4094_v38  ;;  %v4042_v0 = vpop.permute.xlu1 %4041  ;;  %v3933_v55 = vadd.f32 %v3925_v34, %v3885_v25  ;;  %v12340_v38 = vld [vmem:[#allocation110_spill] sm:$0xff]  ;;  %v4027_v7 = vadd.f32 %v4019_v37, %v3979_v26  ;;  %v12343_v25 = vld [vmem:[#allocation129_spill] sm:$0xff] }
 0x77f   : > { %v4088_v2 = vadd.f32 %v4080_v47, %v4072_v17  ;;  %v4066_v61 = vmul.f32 %v4042_v0, %v7008_v62  ;;  %v12341_v17 = vld [vmem:[#allocation96_spill] sm:$0xff]  ;;  %v3975_v34 = vmul.f32 %v12343_v25, %v12342_v50  ;;  %v12344_v0 = vld [vmem:[#allocation158_spill] sm:$0xff]  ;;  %v12347_v37 = vld [vmem:[#allocation133_spill] sm:$0xff] }
 0x780   : > { %v3981_v31 = vadd.f32 %v3973_v60, %v3933_v55  ;;  %v4021_v6 = vmul.f32 %v12344_v0, %v11657_v51 }
 0x781   : > { %4096 = vst [vmem:[#allocation3 + $0x12] sm:$0xff] %v4088_v2  ;;  %v4074_v59 = vadd.f32 %v4066_v61, %v4026_v46  ;;  %6355 = vset.pattern.permute.xlu1 %v12338_v14  ;;  %6389 = vset.pattern.permute.xlu0 %v11322_v3  ;;  %v3935_v46 = vadd.f32 %v3927_v41, %v3887_v54  ;;  %v9979_v61 = vpop.permute.xlu0 %4606  ;;  %v12346_v14 = vld [vmem:[#allocation60_spill] sm:$0xff] }
 0x782   : > { %4389 = vperm.xlu1 %6355, %v12340_v38   ;;  %v4046_v20 = vpop.permute.xlu1 %4045  ;;  %5238 = vperm.xlu0 %6389, %v12341_v17   ;;  %12345 = vst [vmem:[#allocation13_spill] sm:$0xff] %v9979_v61  ;;  %v4029_v43 = vadd.f32 %v4021_v6, %v3981_v31  ;;  %v4085_v41 = vld [vmem:[#allocation3 + $0x62] sm:$0xff]  ;;  %v12376_v61 = vld [vmem:[#allocation130_spill] sm:$0xff] }
 0x783   : > { %v4090_v42 = vadd.f32 %v4082_v35, %v4074_v59  ;;  %v4067_v47 = vmul.f32 %v4046_v20, %v11602_v48  ;;  %v3983_v60 = vadd.f32 %v3975_v34, %v3935_v46  ;;  %v12348_v35 = vld [vmem:[#allocation145_spill] sm:$0xff]  ;;  %v12349_v20 = vld [vmem:[#allocation160_spill] sm:$0xff]  ;;  %v12354_v46 = vld [vmem:[#allocation127_spill] sm:$0xff] }
 0x784   : > { %v4023_v50 = vmul.f32 %v12349_v20, %v12348_v35  ;;  %v12352_v38 = vld [vmem:[#allocation144_spill] sm:$0xff] }
 0x785   : > { %4098 = vst [vmem:[#allocation3 + $0x32] sm:$0xff] %v4090_v42  ;;  %v4075_v2 = vadd.f32 %v4067_v47, %v4027_v7  ;;  %v12350_v7 = vld [vmem:[#allocation73_spill] sm:$0xff]  ;;  %v9989_v34 = vpop.permute.xlu0 %4614 }
 0x786   : > { %4393 = vperm.xlu1 %6355, %v12346_v14   ;;  %v4054_v26 = vpop.permute.xlu1 %4053  ;;  %5250 = vperm.xlu0 %6389, %v12347_v37   ;;  %v12351_v47 = vld [vmem:[#allocation121_spill] sm:$0xff]  ;;  %v4031_v3 = vadd.f32 %v4023_v50, %v3983_v60  ;;  %12353 = vst [vmem:[#allocation115_spill] sm:$0xff] %v9989_v34  ;;  %v12357_v60 = vmov 61   ;;  %v12373_v34 = vld [vmem:[#allocation72_spill] sm:$0xff]  ;;  %v12407_v37 = vld [vmem:[#allocation47_spill] sm:$0xff] }
 0x787   : > { %v4091_v55 = vadd.f32 %v4083_v30, %v4075_v2  ;;  %v4069_v59 = vmul.f32 %v4054_v26, %v11658_v15  ;;  %v4087_v6 = vld [vmem:[#allocation3 + $0x82] sm:$0xff]  ;;  %v11323_v2 = vmov 78  }
 0x789   : > { %4099 = vst [vmem:[#allocation3 + $0x42] sm:$0xff] %v4091_v55  ;;  %v4077_v54 = vadd.f32 %v4069_v59, %v4029_v43  ;;  %v12355_v55 = vld [vmem:[#allocation44_spill] sm:$0xff]  ;;  %v9996_v43 = vpop.permute.xlu0 %4622  ;;  %v12358_v59 = vld [vmem:[#allocation62_spill] sm:$0xff] }
 0x78a   : > { %4401 = vperm.xlu1 %6355, %v12350_v7   ;;  %v4062_v42 = vpop.permute.xlu1 %4061  ;;  %5258 = vperm.xlu0 %6389, %v12351_v47   ;;  %12356 = vst [vmem:[#allocation153_spill] sm:$0xff] %v9996_v43  ;;  %v12370_v43 = vld [vmem:[#allocation46_spill] sm:$0xff] }
 0x78b   : > { %v4093_v0 = vadd.f32 %v4085_v41, %v4077_v54  ;;  %v4071_v5 = vmul.f32 %v4062_v42, %v12352_v38  ;;  %v12361_v54 = vld [vmem:[#allocation105_spill] sm:$0xff]  ;;  %v12363_v42 = vld [vmem:[#allocation83_spill] sm:$0xff] }
 0x78d   : > { %4101 = vst [vmem:[#allocation3 + $0x62] sm:$0xff] %v4093_v0  ;;  %v4079_v31 = vadd.f32 %v4071_v5, %v4031_v3  ;;  %v12359_v5 = vld [vmem:[#allocation70_spill] sm:$0xff]  ;;  %v12360_v3 = vld [vmem:[#allocation64_spill] sm:$0xff]  ;;  %v10007_v41 = vpop.permute.xlu0 %4646 }
 0x78e   : > { %4409 = vperm.xlu1 %6355, %v12354_v46   ;;  %6390 = vset.pattern.permute.xlu0 %v11323_v2  ;;  %12362 = vst [vmem:[#allocation97_spill] sm:$0xff] %v10007_v41  ;;  %v12366_v2 = vld [vmem:[#allocation84_spill] sm:$0xff]  ;;  %v12382_v41 = vld [vmem:[#allocation19_spill] sm:$0xff] }
 0x78f   : > { %v4095_v30 = vadd.f32 %v4087_v6, %v4079_v31  ;;  %v9993_v26 = vpop.permute.xlu1 %4109  ;;  %5282 = vperm.xlu0 %6390, %v12355_v55   ;;  %v11325_v31 = vmov 79  }
 0x791   : > { %4103 = vst [vmem:[#allocation3 + $0x82] sm:$0xff] %v4095_v30  ;;  %v10014_v6 = vpop.permute.xlu0 %4658  ;;  %v12365_v30 = vld [vmem:[#allocation28_spill] sm:$0xff] }
 0x792   : > { %6356 = vset.pattern.permute.xlu1 %v12357_v60  ;;  %12364 = vst [vmem:[#allocation120_spill] sm:$0xff] %v10014_v6  ;;  %v12377_v6 = vld [vmem:[#allocation128_spill] sm:$0xff] }
 0x793   : > { %4433 = vperm.xlu1 %6356, %v12358_v59   ;;  %v10000_v20 = vpop.permute.xlu1 %4113  ;;  %5294 = vperm.xlu0 %6390, %v12359_v5   ;;  %v12395_v5 = vmov 65  }
 0x795   : > { %v10021_v46 = vpop.permute.xlu0 %4666 }
 0x796   : > { %12367 = vst [vmem:[#allocation57_spill] sm:$0xff] %v10021_v46 }
 0x797   : > { %4441 = vperm.xlu1 %6356, %v12360_v3   ;;  %v10004_v50 = vpop.permute.xlu1 %4121  ;;  %5302 = vperm.xlu0 %6390, %v12361_v54   ;;  %v12392_v3 = vld [vmem:[#allocation42_spill] sm:$0xff]  ;;  %v12394_v54 = vld [vmem:[#allocation117_spill] sm:$0xff] }
 0x79b   : > { %4445 = vperm.xlu1 %6356, %v12363_v42   ;;  %v10010_v0 = vpop.permute.xlu1 %4129  ;;  %6392 = vset.pattern.permute.xlu0 %v11325_v31  ;;  %v12369_v31 = vld [vmem:[#allocation113_spill] sm:$0xff] }
 0x79c   : > { %5330 = vperm.xlu0 %6392, %v12358_v59  }
 0x79f   : > { %4453 = vperm.xlu1 %6356, %v12365_v30  }
 0x7a0   : > { %v10017_v60 = vpop.permute.xlu1 %4145  ;;  %5342 = vperm.xlu0 %6392, %v12363_v42   ;;  %v10032_v42 = vpop.permute.xlu0 %4690 }
 0x7a1   : > { %12371 = vst [vmem:[#allocation74_spill] sm:$0xff] %v10032_v42 }
 0x7a3   : > { %4461 = vperm.xlu1 %6356, %v12366_v2   ;;  %v12372_v2 = vld [vmem:[#allocation66_spill] sm:$0xff] }
 0x7a4   : > { %v10023_v7 = vpop.permute.xlu1 %4153  ;;  %5350 = vperm.xlu0 %6392, %v12365_v30   ;;  %v10038_v30 = vpop.permute.xlu0 %4702 }
 0x7a5   : > { %12374 = vst [vmem:[#allocation48_spill] sm:$0xff] %v10038_v30 }
 0x7a7   : > { %6359 = vset.pattern.permute.xlu1 %v12368_v33  ;;  %v12375_v33 = vld [vmem:[#allocation5_spill] sm:$0xff] }
 0x7a8   : > { %4485 = vperm.xlu1 %6359, %v12369_v31   ;;  %v10028_v59 = vpop.permute.xlu1 %4157  ;;  %6394 = vset.pattern.permute.xlu0 %v11328_v32  ;;  %v10048_v42 = vpop.permute.xlu0 %4710 }
 0x7a9   : > { %5378 = vperm.xlu0 %6394, %v12370_v43   ;;  %12379 = vst [vmem:[#allocation81_spill] sm:$0xff] %v10048_v42  ;;  %v12391_v43 = vld [vmem:[#allocation88_spill] sm:$0xff] }
 0x7ac   : > { %4489 = vperm.xlu1 %6359, %v12372_v2   ;;  %v10035_v46 = vpop.permute.xlu1 %4165  ;;  %v12388_v2 = vld [vmem:[#allocation35_spill] sm:$0xff] }
 0x7ad   : > { %5390 = vperm.xlu0 %6394, %v12373_v34  }
 0x7b0   : > { %4497 = vperm.xlu1 %6359, %v12375_v33   ;;  %v10041_v31 = vpop.permute.xlu1 %4173  ;;  %v12383_v33 = vmov 80  }
 0x7b1   : > { %5398 = vperm.xlu0 %6394, %v12376_v61  }
 0x7b4   : > { %4505 = vperm.xlu1 %6359, %v12377_v6   ;;  %v12385_v6 = vld [vmem:[#allocation20_spill] sm:$0xff] }
 0x7b5   : > { %v10045_v32 = vpop.permute.xlu1 %4197  ;;  %6396 = vset.pattern.permute.xlu0 %v12378_v45  ;;  %v12387_v45 = vld [vmem:[#allocation36_spill] sm:$0xff] }
 0x7b6   : > { %5310 = vperm.xlu0 %6396, %v12380_v27   ;;  %v12393_v27 = vld [vmem:[#allocation8_spill] sm:$0xff] }
 0x7b8   : > { %6360 = vset.pattern.permute.xlu1 %v12381_v13 }
 0x7b9   : > { %4554 = vperm.xlu1 %6360, %v12382_v41   ;;  %v10053_v30 = vpop.permute.xlu1 %4201  ;;  %v12390_v41 = vmov 64  }
 0x7ba   : > { %6399 = vset.pattern.permute.xlu0 %v12383_v33 }
 0x7bd   : > { %4562 = vperm.xlu1 %6360, %v12384_v19   ;;  %v10057_v61 = vpop.permute.xlu1 %4209 }
 0x7c1   : > { %4566 = vperm.xlu1 %6360, %v12385_v6   ;;  %v10060_v34 = vpop.permute.xlu1 %4217 }
 0x7c2   : > { %12386 = vst [vmem:[#allocation32_spill] sm:$0xff] %v10060_v34 }
 0x7c5   : > { %4574 = vperm.xlu1 %6360, %v12387_v45  }
 0x7c6   : > { %v4242_v42 = vpop.permute.xlu1 %4241 }
 0x7c9   : > { %4582 = vperm.xlu1 %6360, %v12388_v2   ;;  %v12396_v2 = vld [vmem:[#allocation39_spill] sm:$0xff] }
 0x7ca   : > { %v10064_v13 = vpop.permute.xlu1 %4249 }
 0x7cb   : > { %12389 = vst [vmem:[#allocation162_spill] sm:$0xff] %v10064_v13 }
 0x7cd   : > { %6363 = vset.pattern.permute.xlu1 %v12390_v41  ;;  %v12398_v41 = vld [vmem:[#allocation45_spill] sm:$0xff] }
 0x7ce   : > { %4598 = vperm.xlu1 %6363, %v12391_v43   ;;  %v4254_v33 = vpop.permute.xlu1 %4253 }
 0x7d2   : > { %4602 = vperm.xlu1 %6363, %v12392_v3   ;;  %v4262_v19 = vpop.permute.xlu1 %4261  ;;  %v12400_v3 = vld [vmem:[#allocation67_spill] sm:$0xff] }
 0x7d6   : > { %4610 = vperm.xlu1 %6363, %v12393_v27   ;;  %v10070_v6 = vpop.permute.xlu1 %4269  ;;  %v12402_v27 = vld [vmem:[#allocation101_spill] sm:$0xff] }
 0x7da   : > { %4618 = vperm.xlu1 %6363, %v12394_v54   ;;  %v12403_v54 = vld [vmem:[#allocation6_spill] sm:$0xff] }
 0x7db   : > { %v10073_v45 = vpop.permute.xlu1 %4293 }
 0x7de   : > { %6364 = vset.pattern.permute.xlu1 %v12395_v5  ;;  %v12405_v5 = vmov 66  }
 0x7df   : > { %4642 = vperm.xlu1 %6364, %v12396_v2   ;;  %v10077_v14 = vpop.permute.xlu1 %4297  ;;  %v12406_v2 = vld [vmem:[#allocation92_spill] sm:$0xff] }
 0x7e0   : > { %12397 = vst [vmem:[#allocation119_spill] sm:$0xff] %v10077_v14  ;;  %v12411_v14 = vmov 67  }
 0x7e3   : > { %4650 = vperm.xlu1 %6364, %v12398_v41   ;;  %v10080_v43 = vpop.permute.xlu1 %4305 }
 0x7e4   : > { %12399 = vst [vmem:[#allocation59_spill] sm:$0xff] %v10080_v43  ;;  %v12413_v43 = vld [vmem:[#allocation95_spill] sm:$0xff] }
 0x7e7   : > { %4654 = vperm.xlu1 %6364, %v12400_v3   ;;  %v10083_v55 = vpop.permute.xlu1 %4313 }
 0x7e8   : > { %12401 = vst [vmem:[#allocation163_spill] sm:$0xff] %v10083_v55  ;;  %v12408_v55 = vld [vmem:[#allocation51_spill] sm:$0xff] }
 0x7eb   : > { %4662 = vperm.xlu1 %6364, %v12402_v27   ;;  %v4176_v27 = vmul.f32 %v10017_v60, %v12408_v55 }
 0x7ec   : > { %v4338_v47 = vpop.permute.xlu1 %4337 }
 0x7ef   : > { %4670 = vperm.xlu1 %6364, %v12403_v54   ;;  %v12409_v54 = vld [vmem:[#allocation94_spill] sm:$0xff] }
 0x7f0   : > { %v10087_v38 = vpop.permute.xlu1 %4345 }
 0x7f1   : > { %12404 = vst [vmem:[#allocation164_spill] sm:$0xff] %v10087_v38  ;;  %v4136_v38 = vmul.f32 %v12343_v25, %v12409_v54  ;;  %v12416_v54 = vld [vmem:[#allocation165_spill] sm:$0xff] }
 0x7f2   : > { %v4139_v55 = vmul.f32 %v12416_v54, %v11782_v23 }
 0x7f3   : > { %6367 = vset.pattern.permute.xlu1 %v12405_v5 }
 0x7f4   : > { %4694 = vperm.xlu1 %6367, %v12406_v2   ;;  %v4350_v35 = vpop.permute.xlu1 %4349  ;;  %v4184_v2 = vadd.f32 %v4176_v27, %v4136_v38  ;;  %v12417_v38 = vld [vmem:[#allocation52_spill] sm:$0xff] }
 0x7f8   : > { %4698 = vperm.xlu1 %6367, %v12407_v37   ;;  %v10092_v41 = vpop.permute.xlu1 %4357  ;;  %v12412_v37 = vld [vmem:[#allocation50_spill] sm:$0xff] }
 0x7f9   : > { %v4224_v13 = vmul.f32 %v12413_v43, %v12412_v37  ;;  %v4181_v43 = vmul.f32 %v10035_v46, %v11600_v18  ;;  %v12420_v37 = vld [vmem:[#allocation17_spill] sm:$0xff] }
 0x7fb   : > { %v4232_v60 = vadd.f32 %v4224_v13, %v4184_v2  ;;  %v12422_v2 = vld [vmem:[#allocation56_spill] sm:$0xff] }
 0x7fc   : > { %4706 = vperm.xlu1 %6367, %v12297_v16   ;;  %v10095_v3 = vpop.permute.xlu1 %4365  ;;  %v4272_v16 = vmul.f32 %v4242_v42, %v12414_v53  ;;  %v12419_v42 = vld [vmem:[#allocation151_spill] sm:$0xff]  ;;  %v4227_v54 = vmul.f32 %v12422_v2, %v12151_v28  ;;  %v12426_v2 = vld [vmem:[#allocation18_spill] sm:$0xff] }
 0x800   : > { %4714 = vperm.xlu1 %6367, %v12303_v36   ;;  %v4179_v36 = vmul.f32 %v10028_v59, %v11826_v44  ;;  %v12421_v59 = vld [vmem:[#allocation122_spill] sm:$0xff] }
 0x801   : > { %v10102_v5 = vpop.permute.xlu1 %4389  ;;  %v4141_v13 = vmul.f32 %v12421_v59, %v11594_v29  ;;  %v12425_v59 = vld [vmem:[#allocation111_spill] sm:$0xff] }
 0x802   : > { %12410 = vst [vmem:[#allocation41_spill] sm:$0xff] %v10102_v5  ;;  %v4280_v5 = vadd.f32 %v4272_v16, %v4232_v60  ;;  %v4187_v27 = vadd.f32 %v4179_v36, %v4139_v55  ;;  %v4275_v16 = vmul.f32 %v4254_v33, %v12323_v9  ;;  %v4229_v44 = vmul.f32 %v12425_v59, %v11602_v48 }
 0x803   : > { %v4189_v46 = vadd.f32 %v4181_v43, %v4141_v13  ;;  %v4177_v33 = vmul.f32 %v12426_v2, %v12260_v40  ;;  %v4277_v43 = vmul.f32 %v4262_v19, %v11838_v8  ;;  %v4371_v2 = vmul.f32 %v4350_v35, %v7008_v62  ;;  %v12430_v19 = vld [vmem:[#allocation138_spill] sm:$0xff] }
 0x804   : > { %6368 = vset.pattern.permute.xlu1 %v12411_v14  ;;  %v4235_v55 = vadd.f32 %v4227_v54, %v4187_v27  ;;  %v12429_v27 = vld [vmem:[#allocation152_spill] sm:$0xff]  ;;  %v4137_v54 = vmul.f32 %v9993_v26, %v12414_v53  ;;  %v4225_v26 = vmul.f32 %v10045_v32, %v12420_v37 }
 0x805   : > { %4738 = vperm.xlu1 %6368, %v12308_v56   ;;  %v10109_v34 = vpop.permute.xlu1 %4393  ;;  %v4320_v56 = vmul.f32 %v12419_v42, %v12260_v40  ;;  %v4183_v42 = vmul.f32 %v10041_v31, %v11657_v51  ;;  %v12428_v31 = vld [vmem:[#allocation75_spill] sm:$0xff]  ;;  %v4323_v13 = vmul.f32 %v12429_v27, %v12312_v10  ;;  %v12432_v40 = vld [vmem:[#allocation166_spill] sm:$0xff] }
 0x806   : > { %12415 = vst [vmem:[#allocation65_spill] sm:$0xff] %v10109_v34  ;;  %v4368_v34 = vmul.f32 %v4338_v47, %v12420_v37  ;;  %v12424_v47 = vld [vmem:[#allocation87_spill] sm:$0xff]  ;;  %v4512_v27 = vmul.f32 %v12432_v40, %v11805_v57  ;;  %v4185_v53 = vadd.f32 %v4177_v33, %v4137_v54  ;;  %v12439_v33 = vld [vmem:[#allocation14_spill] sm:$0xff] }
 0x807   : > { %v4328_v60 = vadd.f32 %v4320_v56, %v4280_v5  ;;  %v12427_v5 = vld [vmem:[#allocation102_spill] sm:$0xff]  ;;  %v4283_v56 = vadd.f32 %v4275_v16, %v4235_v55  ;;  %v12431_v55 = vld [vmem:[#allocation9_spill] sm:$0xff]  ;;  %v4419_v54 = vmul.f32 %v12439_v33, %v11594_v29 }
 0x809   : > { %4746 = vperm.xlu1 %6368, %v12417_v38   ;;  %v10116_v14 = vpop.permute.xlu1 %4401  ;;  %v4376_v36 = vadd.f32 %v4368_v34, %v4328_v60  ;;  %v4180_v34 = vmul.f32 %v12428_v31, %v12312_v10  ;;  %v4237_v60 = vadd.f32 %v4229_v44, %v4189_v46  ;;  %v4231_v31 = vmul.f32 %v12431_v55, %v11658_v15  ;;  %v12436_v55 = vld [vmem:[#allocation137_spill] sm:$0xff] }
 0x80a   : > { %12418 = vst [vmem:[#allocation157_spill] sm:$0xff] %v10116_v14  ;;  %v4143_v14 = vmul.f32 %v12424_v47, %v11653_v39  ;;  %v4331_v35 = vadd.f32 %v4323_v13, %v4283_v56  ;;  %v4325_v40 = vmul.f32 %v12436_v55, %v11644_v58 }
 0x80b   : > { %v4285_v44 = vadd.f32 %v4277_v43, %v4237_v60  ;;  %v12438_v60 = vld [vmem:[#allocation71_spill] sm:$0xff] }
 0x80c   : > { %v4191_v59 = vadd.f32 %v4183_v42, %v4143_v14  ;;  %v4279_v14 = vmul.f32 %v10070_v6, %v11661_v22  ;;  %v12433_v42 = vld [vmem:[#allocation93_spill] sm:$0xff]  ;;  %v4379_v43 = vadd.f32 %v4371_v2, %v4331_v35  ;;  %v4373_v6 = vmul.f32 %v10092_v41, %v11651_v63  ;;  %v12441_v41 = vld [vmem:[#allocation155_spill] sm:$0xff] }
 0x80d   : > { %4750 = vperm.xlu1 %6368, %v12316_v21   ;;  %v10129_v38 = vpop.permute.xlu1 %4409  ;;  %v4416_v21 = vmul.f32 %v12427_v5, %v11966_v24  ;;  %v4333_v2 = vadd.f32 %v4325_v40, %v4285_v44  ;;  %v12440_v35 = vmov 68   ;;  %v4375_v44 = vmul.f32 %v10095_v3, %v11972_v1 }
 0x80e   : > { %12423 = vst [vmem:[#allocation85_spill] sm:$0xff] %v10129_v38  ;;  %v4239_v32 = vadd.f32 %v4231_v31, %v4191_v59 }
 0x80f   : > { %v4424_v5 = vadd.f32 %v4416_v21, %v4376_v36  ;;  %v12434_v36 = vld [vmem:[#allocation90_spill] sm:$0xff] }
 0x810   : > { %v4273_v21 = vmul.f32 %v12434_v36, %v12433_v42  ;;  %v4233_v36 = vadd.f32 %v4225_v26, %v4185_v53  ;;  %v4287_v59 = vadd.f32 %v4279_v14, %v4239_v32  ;;  %v4321_v53 = vmul.f32 %v10073_v45, %v11801_v11  ;;  %v12443_v32 = vld [vmem:[#allocation109_spill] sm:$0xff]  ;;  %v12444_v45 = vld [vmem:[#allocation135_spill] sm:$0xff] }
 0x811   : > { %4758 = vperm.xlu1 %6368, %v12326_v52   ;;  %v4182_v52 = vmul.f32 %v12430_v19, %v11644_v58  ;;  %v4381_v26 = vadd.f32 %v4373_v6, %v4333_v2  ;;  %v4427_v14 = vadd.f32 %v4419_v54, %v4379_v43  ;;  %v4142_v6 = vmul.f32 %v10010_v0, %v12444_v45  ;;  %v12445_v2 = vld [vmem:[#allocation32_spill] sm:$0xff] }
 0x812   : > { %v4434_v47 = vpop.permute.xlu1 %4433  ;;  %v4226_v43 = vmul.f32 %v10053_v30, %v11805_v57  ;;  %v12447_v0 = vld [vmem:[#allocation116_spill] sm:$0xff] }
 0x813   : > { %v4464_v16 = vmul.f32 %v4434_v47, %v11801_v11  ;;  %v12435_v47 = vld [vmem:[#allocation149_spill] sm:$0xff] }
 0x814   : > { %v4276_v19 = vmul.f32 %v12435_v47, %v11594_v29  ;;  %v4529_v47 = vld [vmem:[#allocation3 + $0x20] sm:$0xff] }
 0x815   : > { %v4472_v46 = vadd.f32 %v4464_v16, %v4424_v5  ;;  %4766 = vperm.xlu1 %6368, %v12332_v49   ;;  %v12437_v49 = vld [vmem:[#allocation126_spill] sm:$0xff]  ;;  %v4369_v5 = vmul.f32 %v12438_v60, %v11805_v57  ;;  %v4140_v16 = vmul.f32 %v10004_v50, %v12323_v9 }
 0x816   : > { %v10168_v38 = vpop.permute.xlu1 %4441  ;;  %v4327_v13 = vmul.f32 %v12437_v49, %v12318_v12  ;;  %v4228_v49 = vmul.f32 %v10057_v61, %v7008_v62  ;;  %v4178_v61 = vmul.f32 %v10023_v7, %v11801_v11 }
 0x817   : > { %v4520_v56 = vadd.f32 %v4512_v27, %v4472_v46  ;;  %v4421_v27 = vmul.f32 %v12441_v41, %v12334_v4  ;;  %v12442_v46 = vld [vmem:[#allocation79_spill] sm:$0xff]  ;;  %v4188_v60 = vadd.f32 %v4180_v34, %v4140_v16  ;;  %v12448_v41 = vld [vmem:[#allocation162_spill] sm:$0xff]  ;;  %v12510_v4 = vmov 74  }
 0x818   : > { %v4423_v55 = vmul.f32 %v12343_v25, %v12442_v46  ;;  %v4335_v33 = vadd.f32 %v4327_v13, %v4287_v59  ;;  %v12446_v16 = vld [vmem:[#allocation55_spill] sm:$0xff]  ;;  %v4517_v13 = vmul.f32 %v12447_v0, %v11658_v15  ;;  %v4274_v30 = vmul.f32 %v12448_v41, %v11782_v23  ;;  %v12449_v46 = vld [vmem:[#allocation41_spill] sm:$0xff] }
 0x819   : > { %v4537_v31 = vadd.f32 %v4529_v47, %v4520_v56  ;;  %6371 = vset.pattern.permute.xlu1 %v12440_v35  ;;  %v4515_v56 = vmul.f32 %v12443_v32, %v11602_v48  ;;  %v4281_v47 = vadd.f32 %v4273_v21, %v4233_v36  ;;  %v4236_v54 = vadd.f32 %v4228_v49, %v4188_v60  ;;  %v12454_v0 = vld [vmem:[#allocation145_spill] sm:$0xff] }
 0x81a   : > { %4790 = vperm.xlu1 %6371, %v12341_v17   ;;  %v4446_v50 = vpop.permute.xlu1 %4445  ;;  %v4138_v17 = vmul.f32 %v10000_v20, %v11966_v24  ;;  %v4383_v21 = vadd.f32 %v4375_v44, %v4335_v33  ;;  %v4429_v35 = vadd.f32 %v4421_v27, %v4381_v26  ;;  %v4417_v49 = vmul.f32 %v12449_v46, %v11782_v23  ;;  %v12451_v26 = vld [vmem:[#allocation10_spill] sm:$0xff]  ;;  %v12550_v24 = vld [vmem:[#allocation120_spill] sm:$0xff] }
 0x81b   : > { %4545 = vst [vmem:[#allocation3 + $0x20] sm:$0xff] %v4537_v31  ;;  %v4467_v40 = vmul.f32 %v4446_v50, %v11600_v18  ;;  %v4230_v31 = vmul.f32 %v12445_v2, %v11651_v63  ;;  %v4329_v34 = vadd.f32 %v4321_v53, %v4281_v47  ;;  %v4532_v50 = vld [vmem:[#allocation3 + $0x50] sm:$0xff]  ;;  %v4190_v53 = vadd.f32 %v4182_v52, %v4142_v6 }
 0x81c   : > { %v4186_v59 = vadd.f32 %v4178_v61, %v4138_v17  ;;  %v4284_v47 = vadd.f32 %v4276_v19, %v4236_v54  ;;  %v12453_v61 = vld [vmem:[#allocation133_spill] sm:$0xff]  ;;  %v12455_v6 = vld [vmem:[#allocation98_spill] sm:$0xff]  ;;  %v12457_v19 = vld [vmem:[#allocation144_spill] sm:$0xff] }
 0x81d   : > { %v4475_v3 = vadd.f32 %v4467_v40, %v4427_v14  ;;  %v12450_v14 = vld [vmem:[#allocation59_spill] sm:$0xff]  ;;  %v4377_v33 = vadd.f32 %v4369_v5, %v4329_v34  ;;  %v4278_v41 = vmul.f32 %v12455_v6, %v11653_v39  ;;  %v12458_v5 = vld [vmem:[#allocation37_spill] sm:$0xff] }
 0x81e   : > { %4794 = vperm.xlu1 %6371, %v12446_v16   ;;  %v4454_v7 = vpop.permute.xlu1 %4453  ;;  %v4324_v40 = vmul.f32 %v12450_v14, %v11600_v18  ;;  %v4234_v27 = vadd.f32 %v4226_v43, %v4186_v59  ;;  %v12456_v43 = vld [vmem:[#allocation164_spill] sm:$0xff]  ;;  %v4534_v59 = vld [vmem:[#allocation3 + $0x70] sm:$0xff]  ;;  %v4519_v54 = vmul.f32 %v12458_v5, %v12457_v19  ;;  %v12530_v16 = vld [vmem:[#allocation77_spill] sm:$0xff] }
 0x81f   : > { %v4523_v36 = vadd.f32 %v4515_v56, %v4475_v3  ;;  %v4469_v20 = vmul.f32 %v4454_v7, %v11657_v51  ;;  %v12452_v56 = vld [vmem:[#allocation119_spill] sm:$0xff]  ;;  %v4238_v3 = vadd.f32 %v4230_v31, %v4190_v53  ;;  %v4431_v7 = vadd.f32 %v4423_v55, %v4383_v21 }
 0x820   : > { %v4322_v60 = vmul.f32 %v12452_v56, %v12451_v26  ;;  %v4332_v34 = vadd.f32 %v4324_v40, %v4284_v47  ;;  %v12464_v40 = vld [vmem:[#allocation157_spill] sm:$0xff] }
 0x821   : > { %v4540_v44 = vadd.f32 %v4532_v50, %v4523_v36  ;;  %v4477_v32 = vadd.f32 %v4469_v20, %v4429_v35  ;;  %v4282_v36 = vadd.f32 %v4274_v30, %v4234_v27  ;;  %v4370_v35 = vmul.f32 %v12456_v43, %v12151_v28  ;;  %v12460_v50 = vld [vmem:[#allocation163_spill] sm:$0xff]  ;;  %v12461_v30 = vld [vmem:[#allocation65_spill] sm:$0xff] }
 0x822   : > { %4802 = vperm.xlu1 %6371, %v12453_v61   ;;  %v4462_v17 = vpop.permute.xlu1 %4461  ;;  %v4425_v20 = vadd.f32 %v4417_v49, %v4377_v33  ;;  %v4326_v53 = vmul.f32 %v12460_v50, %v11657_v51  ;;  %v4418_v14 = vmul.f32 %v12461_v30, %v12323_v9  ;;  %v12463_v49 = vld [vmem:[#allocation63_spill] sm:$0xff]  ;;  %v4286_v27 = vadd.f32 %v4278_v41, %v4238_v3  ;;  %v12466_v41 = vld [vmem:[#allocation114_spill] sm:$0xff]  ;;  %v4531_v30 = vld [vmem:[#allocation3 + $0x40] sm:$0xff] }
 0x823   : > { %4548 = vst [vmem:[#allocation3 + $0x50] sm:$0xff] %v4540_v44  ;;  %v4525_v2 = vadd.f32 %v4517_v13, %v4477_v32  ;;  %v4471_v52 = vmul.f32 %v4462_v17, %v12454_v0  ;;  %v12459_v13 = vld [vmem:[#allocation134_spill] sm:$0xff]  ;;  %v4330_v21 = vadd.f32 %v4322_v60, %v4282_v36  ;;  %v12462_v44 = vld [vmem:[#allocation121_spill] sm:$0xff]  ;;  %v4372_v32 = vmul.f32 %v12463_v49, %v11602_v48  ;;  %v12506_v0 = vld [vmem:[#allocation7_spill] sm:$0xff] }
 0x824   : > { %v4465_v55 = vmul.f32 %v12459_v13, %v12451_v26  ;;  %v4420_v56 = vmul.f32 %v12464_v40, %v11838_v8  ;;  %v4466_v60 = vmul.f32 %v10168_v38, %v12312_v10  ;;  %v4334_v6 = vadd.f32 %v4326_v53, %v4286_v27 }
 0x825   : > { %v4542_v46 = vadd.f32 %v4534_v59, %v4525_v2  ;;  %v4479_v31 = vadd.f32 %v4471_v52, %v4431_v7  ;;  %v4378_v61 = vadd.f32 %v4370_v35, %v4330_v21  ;;  %v4380_v7 = vadd.f32 %v4372_v32, %v4332_v34  ;;  %v4530_v35 = vld [vmem:[#allocation3 + $0x30] sm:$0xff] }
 0x826   : > { %4810 = vperm.xlu1 %6371, %v12462_v44   ;;  %v4473_v17 = vadd.f32 %v4465_v55, %v4425_v20  ;;  %v12465_v3 = vmov 69   ;;  %v4374_v59 = vmul.f32 %v12466_v41, %v11658_v15  ;;  %v12468_v20 = vld [vmem:[#allocation85_spill] sm:$0xff]  ;;  %v12469_v55 = vld [vmem:[#allocation139_spill] sm:$0xff] }
 0x827   : > { %4550 = vst [vmem:[#allocation3 + $0x70] sm:$0xff] %v4542_v46  ;;  %v4527_v47 = vadd.f32 %v4519_v54, %v4479_v31  ;;  %v4486_v33 = vpop.permute.xlu1 %4485  ;;  %v4426_v36 = vadd.f32 %v4418_v14, %v4378_v61  ;;  %v4428_v5 = vadd.f32 %v4420_v56, %v4380_v7  ;;  %v12467_v54 = vld [vmem:[#allocation44_spill] sm:$0xff]  ;;  %v4422_v46 = vmul.f32 %v12468_v20, %v11661_v22 }
 0x828   : > { %v4513_v2 = vmul.f32 %v4486_v33, %v12151_v28  ;;  %v4468_v21 = vmul.f32 %v12469_v55, %v11644_v58  ;;  %v4382_v50 = vadd.f32 %v4374_v59, %v4334_v6  ;;  %v12470_v14 = vld [vmem:[#allocation60_spill] sm:$0xff] }
 0x829   : > { %v4544_v52 = vadd.f32 %v12343_v25, %v4527_v47  ;;  %v4474_v34 = vadd.f32 %v4466_v60, %v4426_v36  ;;  %v12471_v56 = vld [vmem:[#allocation156_spill] sm:$0xff]  ;;  %v12472_v60 = vld [vmem:[#allocation70_spill] sm:$0xff] }
 0x82a   : > { %v4521_v43 = vadd.f32 %v4513_v2, %v4473_v17  ;;  %6372 = vset.pattern.permute.xlu1 %v12465_v3  ;;  %v4430_v49 = vadd.f32 %v4422_v46, %v4382_v50  ;;  %v4476_v27 = vadd.f32 %v4468_v21, %v4428_v5  ;;  %v4470_v47 = vmul.f32 %v12471_v56, %v12318_v12  ;;  %v4533_v61 = vld [vmem:[#allocation3 + $0x60] sm:$0xff]  ;;  %v10256_v3 = vpop.permute.xlu0 %4718  ;;  %v12474_v5 = vld [vmem:[#allocation86_spill] sm:$0xff] }
 0x82b   : > { %4552 = vst [vmem:[#allocation3 + $0x90] sm:$0xff] %v4544_v52  ;;  %4834 = vperm.xlu1 %6372, %v12467_v54   ;;  %v4490_v38 = vpop.permute.xlu1 %4489  ;;  %v4535_v36 = vld [vmem:[#allocation3 + $0x80] sm:$0xff] }
 0x82c   : > { %v4538_v31 = vadd.f32 %v4530_v35, %v4521_v43  ;;  %v4514_v13 = vmul.f32 %v4490_v38, %v7008_v62  ;;  %v4478_v7 = vadd.f32 %v4470_v47, %v4430_v49  ;;  %v12473_v43 = vld [vmem:[#allocation105_spill] sm:$0xff]  ;;  %v12476_v38 = vmov 70   ;;  %v12477_v20 = vld [vmem:[#allocation100_spill] sm:$0xff] }
 0x82d   : > { %v12479_v55 = vld [vmem:[#allocation4_spill] sm:$0xff]  ;;  %v12482_v49 = vmov 71  }
 0x82e   : > { %4546 = vst [vmem:[#allocation3 + $0x30] sm:$0xff] %v4538_v31  ;;  %v4522_v53 = vadd.f32 %v4514_v13, %v4474_v34  ;;  %v10263_v54 = vpop.permute.xlu0 %4742  ;;  %v12478_v31 = vld [vmem:[#allocation64_spill] sm:$0xff] }
 0x82f   : > { %4842 = vperm.xlu1 %6372, %v12470_v14   ;;  %v4498_v44 = vpop.permute.xlu1 %4497  ;;  %v12518_v12 = vld [vmem:[#allocation124_spill] sm:$0xff] }
 0x830   : > { %v4539_v32 = vadd.f32 %v4531_v30, %v4522_v53  ;;  %v4516_v40 = vmul.f32 %v4498_v44, %v11651_v63  ;;  %v12481_v53 = vld [vmem:[#allocation123_spill] sm:$0xff] }
 0x832   : > { %4547 = vst [vmem:[#allocation3 + $0x40] sm:$0xff] %v4539_v32  ;;  %v4524_v33 = vadd.f32 %v4516_v40, %v4476_v27  ;;  %v10269_v34 = vpop.permute.xlu0 %4754  ;;  %v12483_v32 = vld [vmem:[#allocation46_spill] sm:$0xff] }
 0x833   : > { %4846 = vperm.xlu1 %6372, %v12472_v60   ;;  %v4506_v17 = vpop.permute.xlu1 %4505  ;;  %v12484_v40 = vld [vmem:[#allocation66_spill] sm:$0xff] }
 0x834   : > { %v4541_v2 = vadd.f32 %v4533_v61, %v4524_v33  ;;  %v4518_v52 = vmul.f32 %v4506_v17, %v11972_v1  ;;  %v12486_v33 = vld [vmem:[#allocation72_spill] sm:$0xff]  ;;  %v12488_v17 = vld [vmem:[#allocation130_spill] sm:$0xff] }
 0x836   : > { %4549 = vst [vmem:[#allocation3 + $0x60] sm:$0xff] %v4541_v2  ;;  %v4526_v6 = vadd.f32 %v4518_v52, %v4478_v7  ;;  %v10277_v50 = vpop.permute.xlu0 %4762  ;;  %v12489_v7 = vld [vmem:[#allocation118_spill] sm:$0xff] }
 0x837   : > { %4854 = vperm.xlu1 %6372, %v12473_v43   ;;  %v12493_v43 = vld [vmem:[#allocation22_spill] sm:$0xff] }
 0x838   : > { %v4543_v41 = vadd.f32 %v4535_v36, %v4526_v6  ;;  %v10258_v59 = vpop.permute.xlu1 %4554  ;;  %v12492_v36 = vmov 72  }
 0x83a   : > { %4551 = vst [vmem:[#allocation3 + $0x80] sm:$0xff] %v4543_v41  ;;  %v10282_v44 = vpop.permute.xlu0 %4786 }
 0x83b   : > { %4862 = vperm.xlu1 %6372, %v12474_v5  }
 0x83c   : > { %v10261_v35 = vpop.permute.xlu1 %4562 }
 0x83d   : > { %12475 = vst [vmem:[#allocation161_spill] sm:$0xff] %v10261_v35  ;;  %v6457_v35 = vld [vmem:[#allocation2 + $0x41] sm:$0xff] }
 0x83e   : > { %v10291_v47 = vpop.permute.xlu0 %4798 }
 0x83f   : > { %6375 = vset.pattern.permute.xlu1 %v12476_v38  ;;  %12485 = vst [vmem:[#allocation24_spill] sm:$0xff] %v10291_v47  ;;  %v12494_v38 = vld [vmem:[#allocation15_spill] sm:$0xff]  ;;  %v12516_v47 = vld [vmem:[#allocation40_spill] sm:$0xff] }
 0x840   : > { %4886 = vperm.xlu1 %6375, %v12477_v20   ;;  %v10267_v46 = vpop.permute.xlu1 %4566 }
 0x842   : > { %v10296_v60 = vpop.permute.xlu0 %4806 }
 0x843   : > { %12487 = vst [vmem:[#allocation148_spill] sm:$0xff] %v10296_v60  ;;  %v12512_v60 = vld [vmem:[#allocation104_spill] sm:$0xff] }
 0x844   : > { %4890 = vperm.xlu1 %6375, %v12478_v31   ;;  %v10272_v13 = vpop.permute.xlu1 %4574  ;;  %v12503_v31 = vld [vmem:[#allocation42_spill] sm:$0xff] }
 0x846   : > { %v10302_v52 = vpop.permute.xlu0 %4814 }
 0x847   : > { %12490 = vst [vmem:[#allocation21_spill] sm:$0xff] %v10302_v52 }
 0x848   : > { %4898 = vperm.xlu1 %6375, %v12479_v55   ;;  %v10275_v21 = vpop.permute.xlu1 %4582 }
 0x849   : > { %12480 = vst [vmem:[#allocation68_spill] sm:$0xff] %v10275_v21 }
 0x84a   : > { %v10310_v5 = vpop.permute.xlu0 %4838 }
 0x84c   : > { %4906 = vperm.xlu1 %6375, %v12481_v53   ;;  %v12500_v53 = vld [vmem:[#allocation49_spill] sm:$0xff] }
 0x84d   : > { %v10280_v30 = vpop.permute.xlu1 %4598 }
 0x850   : > { %6376 = vset.pattern.permute.xlu1 %v12482_v49 }
 0x851   : > { %4930 = vperm.xlu1 %6376, %v12483_v32   ;;  %v10286_v27 = vpop.permute.xlu1 %4602  ;;  %v10315_v32 = vpop.permute.xlu0 %4850 }
 0x855   : > { %4938 = vperm.xlu1 %6376, %v12484_v40   ;;  %v10289_v56 = vpop.permute.xlu1 %4610 }
 0x859   : > { %4942 = vperm.xlu1 %6376, %v12486_v33   ;;  %v10294_v61 = vpop.permute.xlu1 %4618  ;;  %v12496_v33 = vld [vmem:[#allocation33_spill] sm:$0xff] }
 0x85d   : > { %4950 = vperm.xlu1 %6376, %v12488_v17  }
 0x85e   : > { %v10299_v2 = vpop.permute.xlu1 %4642 }
 0x861   : > { %4958 = vperm.xlu1 %6376, %v12489_v7   ;;  %v12498_v7 = vld [vmem:[#allocation29_spill] sm:$0xff] }
 0x862   : > { %v10304_v6 = vpop.permute.xlu1 %4650 }
 0x863   : > { %12491 = vst [vmem:[#allocation159_spill] sm:$0xff] %v10304_v6  ;;  %v12537_v6 = vld [vmem:[#allocation107_spill] sm:$0xff] }
 0x865   : > { %6379 = vset.pattern.permute.xlu1 %v12492_v36  ;;  %v10321_v36 = vpop.permute.xlu0 %4858 }
 0x866   : > { %5006 = vperm.xlu1 %6379, %v12493_v43   ;;  %v10308_v41 = vpop.permute.xlu1 %4654  ;;  %v12499_v43 = vmov 73  }
 0x86a   : > { %5010 = vperm.xlu1 %6379, %v12494_v38   ;;  %v10313_v49 = vpop.permute.xlu1 %4662  ;;  %v10327_v38 = vpop.permute.xlu0 %4882 }
 0x86b   : > { %12495 = vst [vmem:[#allocation112_spill] sm:$0xff] %v10313_v49  ;;  %12502 = vst [vmem:[#allocation53_spill] sm:$0xff] %v10327_v38  ;;  %v12514_v38 = vld [vmem:[#allocation45_spill] sm:$0xff]  ;;  %v12535_v49 = vmov 76  }
 0x86e   : > { %5018 = vperm.xlu1 %6379, %v12496_v33   ;;  %v10318_v17 = vpop.permute.xlu1 %4670  ;;  %v12504_v33 = vld [vmem:[#allocation76_spill] sm:$0xff] }
 0x86f   : > { %12497 = vst [vmem:[#allocation34_spill] sm:$0xff] %v10318_v17 }
 0x872   : > { %5026 = vperm.xlu1 %6379, %v12498_v7   ;;  %v10335_v7 = vpop.permute.xlu0 %4894 }
 0x873   : > { %v4695_v40 = vpop.permute.xlu1 %4694  ;;  %12505 = vst [vmem:[#allocation167_spill] sm:$0xff] %v10335_v7 }
 0x876   : > { %6380 = vset.pattern.permute.xlu1 %v12499_v43  ;;  %v10340_v43 = vpop.permute.xlu0 %4902 }
 0x877   : > { %5042 = vperm.xlu1 %6380, %v12500_v53   ;;  %v10325_v55 = vpop.permute.xlu1 %4698  ;;  %12507 = vst [vmem:[#allocation106_spill] sm:$0xff] %v10340_v43  ;;  %v12508_v53 = vld [vmem:[#allocation89_spill] sm:$0xff] }
 0x878   : > { %12501 = vst [vmem:[#allocation146_spill] sm:$0xff] %v10325_v55  ;;  %v12532_v55 = vld [vmem:[#allocation99_spill] sm:$0xff] }
 0x87b   : > { %5050 = vperm.xlu1 %6380, %v12503_v31   ;;  %v10330_v20 = vpop.permute.xlu1 %4706  ;;  %v10346_v31 = vpop.permute.xlu0 %4910 }
 0x87c   : > { %12511 = vst [vmem:[#allocation141_spill] sm:$0xff] %v10346_v31  ;;  %v12519_v31 = vmov 75  }
 0x87f   : > { %5054 = vperm.xlu1 %6380, %v12504_v33   ;;  %v10333_v19 = vpop.permute.xlu1 %4714 }
 0x883   : > { %5062 = vperm.xlu1 %6380, %v12506_v0   ;;  %v10354_v0 = vpop.permute.xlu0 %4934 }
 0x884   : > { %v10338_v14 = vpop.permute.xlu1 %4738 }
 0x887   : > { %5070 = vperm.xlu1 %6380, %v12508_v53   ;;  %v10359_v53 = vpop.permute.xlu0 %4946 }
 0x888   : > { %v10343_v52 = vpop.permute.xlu1 %4746 }
 0x889   : > { %12509 = vst [vmem:[#allocation61_spill] sm:$0xff] %v10343_v52 }
 0x88b   : > { %6383 = vset.pattern.permute.xlu1 %v12510_v4 }
 0x88c   : > { %5094 = vperm.xlu1 %6383, %v12512_v60   ;;  %v10349_v33 = vpop.permute.xlu1 %4750  ;;  %v12520_v60 = vld [vmem:[#allocation54_spill] sm:$0xff] }
 0x88d   : > { %12513 = vst [vmem:[#allocation30_spill] sm:$0xff] %v10349_v33 }
 0x890   : > { %5098 = vperm.xlu1 %6383, %v12514_v38   ;;  %v10352_v7 = vpop.permute.xlu1 %4758  ;;  %v10366_v38 = vpop.permute.xlu0 %4954 }
 0x891   : > { %12515 = vst [vmem:[#allocation23_spill] sm:$0xff] %v10352_v7  ;;  %12522 = vst [vmem:[#allocation96_spill] sm:$0xff] %v10366_v38  ;;  %v12523_v7 = vld [vmem:[#allocation47_spill] sm:$0xff] }
 0x894   : > { %5106 = vperm.xlu1 %6383, %v12516_v47   ;;  %v10357_v43 = vpop.permute.xlu1 %4766  ;;  %v10371_v47 = vpop.permute.xlu0 %5002 }
 0x895   : > { %12517 = vst [vmem:[#allocation43_spill] sm:$0xff] %v10357_v43  ;;  %12524 = vst [vmem:[#allocation27_spill] sm:$0xff] %v10371_v47  ;;  %v12525_v43 = vld [vmem:[#allocation78_spill] sm:$0xff] }
 0x898   : > { %5114 = vperm.xlu1 %6383, %v12518_v12   ;;  %v12526_v12 = vld [vmem:[#allocation108_spill] sm:$0xff]  ;;  %v10377_v21 = vpop.permute.xlu0 %5014 }
 0x899   : > { %v4791_v4 = vpop.permute.xlu1 %4790  ;;  %12527 = vst [vmem:[#allocation158_spill] sm:$0xff] %v10377_v21 }
 0x89c   : > { %6384 = vset.pattern.permute.xlu1 %v12519_v31  ;;  %v10388_v47 = vpop.permute.xlu0 %5022 }
 0x89d   : > { %5138 = vperm.xlu1 %6384, %v12520_v60   ;;  %v10364_v17 = vpop.permute.xlu1 %4794  ;;  %v12529_v60 = vld [vmem:[#allocation11_spill] sm:$0xff]  ;;  %12534 = vst [vmem:[#allocation83_spill] sm:$0xff] %v10388_v47 }
 0x89e   : > { %12521 = vst [vmem:[#allocation131_spill] sm:$0xff] %v10364_v17  ;;  %v4626_v17 = vmul.f32 %v10280_v30, %v12529_v60 }
 0x8a1   : > { %5146 = vperm.xlu1 %6384, %v12523_v7   ;;  %v10369_v33 = vpop.permute.xlu1 %4802  ;;  %v12531_v7 = vld [vmem:[#allocation16_spill] sm:$0xff] }
 0x8a2   : > { %v4586_v38 = vmul.f32 %v12532_v55, %v12531_v7 }
 0x8a5   : > { %5150 = vperm.xlu1 %6384, %v12525_v43   ;;  %v10374_v52 = vpop.permute.xlu1 %4810  ;;  %v4634_v43 = vadd.f32 %v4626_v17, %v4586_v38  ;;  %v10402_v38 = vld [vmem:[#allocation2 + $0x71] sm:$0xff] }
 0x8a6   : > { %12540 = vst [vmem:[#allocation20_spill] sm:$0xff] %v10402_v38 }
 0x8a9   : > { %5158 = vperm.xlu1 %6384, %v12526_v12   ;;  %v12536_v12 = vld [vmem:[#allocation97_spill] sm:$0xff] }
 0x8aa   : > { %v10379_v31 = vpop.permute.xlu1 %4834  ;;  %v4674_v21 = vmul.f32 %v12536_v12, %v12420_v37 }
 0x8ab   : > { %12528 = vst [vmem:[#allocation160_spill] sm:$0xff] %v10379_v31  ;;  %v4722_v31 = vmul.f32 %v4695_v40, %v12433_v42  ;;  %v12541_v40 = vld [vmem:[#allocation143_spill] sm:$0xff] }
 0x8ac   : > { %v4682_v55 = vadd.f32 %v4674_v21, %v4634_v43  ;;  %v4589_v42 = vmul.f32 %v12541_v40, %v12323_v9  ;;  %v4770_v21 = vmul.f32 %v10263_v54, %v11801_v11  ;;  %v4677_v54 = vmul.f32 %v12550_v24, %v7008_v62 }
 0x8ad   : > { %5166 = vperm.xlu1 %6384, %v12530_v16   ;;  %v4629_v16 = vmul.f32 %v10289_v56, %v12312_v10  ;;  %v6461_v10 = vld [vmem:[#allocation2 + $0x81] sm:$0xff]  ;;  %v4585_v24 = vmul.f32 %v12343_v25, %v10258_v59  ;;  %v12560_v59 = vld [vmem:[#allocation50_spill] sm:$0xff] }
 0x8ae   : > { %v10386_v1 = vpop.permute.xlu1 %4842  ;;  %v4730_v47 = vadd.f32 %v4722_v31, %v4682_v55  ;;  %v12547_v31 = vld [vmem:[#allocation103_spill] sm:$0xff]  ;;  %v4673_v25 = vmul.f32 %v10299_v2, %v12560_v59 }
 0x8af   : > { %12533 = vst [vmem:[#allocation62_spill] sm:$0xff] %v10386_v1  ;;  %v10399_v1 = vld [vmem:[#allocation2 + $0x51] sm:$0xff]  ;;  %v4637_v43 = vadd.f32 %v4629_v16, %v4589_v42  ;;  %v4591_v55 = vmul.f32 %v12547_v31, %v12444_v45  ;;  %v4725_v42 = vmul.f32 %v10330_v20, %v11594_v29  ;;  %v12551_v16 = vld [vmem:[#allocation69_spill] sm:$0xff] }
 0x8b0   : > { %12539 = vst [vmem:[#allocation19_spill] sm:$0xff] %v10399_v1  ;;  %v5553_v17 = vmax.f32 %v6457_v35, %v10399_v1  ;;  %v4631_v35 = vmul.f32 %v10294_v61, %v11644_v58  ;;  %v4818_v1 = vmul.f32 %v4791_v4, %v11805_v57  ;;  %v4778_v61 = vadd.f32 %v4770_v21, %v4730_v47  ;;  %v12555_v31 = vld [vmem:[#allocation153_spill] sm:$0xff] }
 0x8b1   : > { %6387 = vset.pattern.permute.xlu1 %v12535_v49  ;;  %v6460_v49 = vld [vmem:[#allocation2 + $0x61] sm:$0xff] }
 0x8b2   : > { %5190 = vperm.xlu1 %6387, %v12537_v6   ;;  %v10395_v30 = vpop.permute.xlu1 %4846  ;;  %v5555_v12 = vmax.f32 %v6460_v49, %v10402_v38  ;;  %v10407_v6 = vpop.permute.xlu0 %5030  ;;  %v10417_v38 = vmax.f32 %v5553_v17, %v6460_v49  ;;  %v12554_v49 = vld [vmem:[#allocation115_spill] sm:$0xff]  ;;  %v12556_v20 = vld [vmem:[#allocation57_spill] sm:$0xff]  ;;  %v4826_v45 = vadd.f32 %v4818_v1, %v4778_v61  ;;  %v4866_v1 = vmul.f32 %v10310_v5, %v11782_v23 }
 0x8b3   : > { %12538 = vst [vmem:[#allocation28_spill] sm:$0xff] %v10395_v30  ;;  %12542 = vst [vmem:[#allocation36_spill] sm:$0xff] %v10407_v6  ;;  %v12543_v30 = vld [vmem:[#allocation52_spill] sm:$0xff]  ;;  %v12549_v6 = vld [vmem:[#allocation147_spill] sm:$0xff]  ;;  %v4679_v47 = vmul.f32 %v12556_v20, %v11651_v63  ;;  %v10460_v20 = vmul.f32 %v10256_v3, %v11661_v22  ;;  %v4775_v61 = vmul.f32 %v10277_v50, %v11657_v51 }
 0x8b4   : > { %12545 = vst [vmem:[#allocation88_spill] sm:$0xff] %v10417_v38  ;;  %v10419_v40 = vmax.f32 %v5555_v12, %v6461_v10  ;;  %v12553_v10 = vld [vmem:[#allocation13_spill] sm:$0xff]  ;;  %v4630_v12 = vmul.f32 %v12554_v49, %v11600_v18  ;;  %v12558_v49 = vld [vmem:[#allocation48_spill] sm:$0xff]  ;;  %v4588_v3 = vmul.f32 %v10267_v46, %v11782_v23  ;;  %v4821_v5 = vmul.f32 %v10369_v33, %v11602_v48 }
 0x8b5   : > { %v4628_v17 = vmul.f32 %v12553_v10, %v12451_v26  ;;  %v12557_v10 = vld [vmem:[#allocation74_spill] sm:$0xff]  ;;  %v4962_v50 = vmul.f32 %v10354_v0, %v12151_v28  ;;  %v4676_v46 = vmul.f32 %v10308_v41, %v12151_v28  ;;  %v4590_v41 = vmul.f32 %v10272_v13, %v11594_v29 }
 0x8b6   : > { %5194 = vperm.xlu1 %6387, %v12543_v30   ;;  %v10410_v56 = vpop.permute.xlu1 %4854  ;;  %12546 = vst [vmem:[#allocation8_spill] sm:$0xff] %v10419_v40  ;;  %v12548_v30 = vld [vmem:[#allocation51_spill] sm:$0xff]  ;;  %v10444_v21 = vpop.permute.xlu0 %5046  ;;  %v10450_v40 = vmul.f32 %v12558_v49, %v12323_v9  ;;  %v12563_v0 = vld [vmem:[#allocation58_spill] sm:$0xff] }
 0x8b7   : > { %12544 = vst [vmem:[#allocation35_spill] sm:$0xff] %v10410_v56  ;;  %v4625_v56 = vmul.f32 %v12549_v6, %v12548_v30  ;;  %v10438_v6 = vmul.f32 %v12555_v31, %v11657_v51  ;;  %v4685_v30 = vadd.f32 %v4677_v54, %v4637_v43  ;;  %v12559_v31 = vld [vmem:[#allocation81_spill] sm:$0xff]  ;;  %v4773_v54 = vmul.f32 %v10269_v34, %v11600_v18 }
 0x8b8   : > { %v10454_v38 = vmul.f32 %v12559_v31, %v11838_v8  ;;  %v4869_v34 = vmul.f32 %v10315_v32, %v11838_v8  ;;  %v4636_v31 = vadd.f32 %v4628_v17, %v4588_v3  ;;  %v4627_v32 = vmul.f32 %v10286_v27, %v11801_v11  ;;  %v12564_v17 = vld [vmem:[#allocation91_spill] sm:$0xff]  ;;  %v12565_v27 = vld [vmem:[#allocation161_spill] sm:$0xff] }
 0x8b9   : > { %v4733_v43 = vadd.f32 %v4725_v42, %v4685_v30  ;;  %v4633_v2 = vadd.f32 %v4625_v56, %v4585_v24  ;;  %v4874_v30 = vadd.f32 %v4866_v1, %v4826_v45  ;;  %v4817_v42 = vmul.f32 %v10282_v44, %v12420_v37 }
 0x8ba   : > { %5202 = vperm.xlu1 %6387, %v12551_v16   ;;  %v10430_v4 = vpop.permute.xlu1 %4862  ;;  %v4639_v16 = vadd.f32 %v4631_v35, %v4591_v55  ;;  %v4727_v35 = vmul.f32 %v10333_v19, %v11653_v39  ;;  %v12561_v55 = vld [vmem:[#allocation125_spill] sm:$0xff]  ;;  %v10482_v24 = vpop.permute.xlu0 %5058  ;;  %v4871_v44 = vmul.f32 %v10321_v36, %v11661_v22  ;;  %v4965_v36 = vmul.f32 %v10359_v53, %v11651_v63  ;;  %v12570_v53 = vld [vmem:[#allocation146_spill] sm:$0xff] }
 0x8bb   : > { %12552 = vst [vmem:[#allocation117_spill] sm:$0xff] %v10430_v4  ;;  %v4721_v4 = vmul.f32 %v12557_v10, %v12531_v7  ;;  %v4681_v56 = vadd.f32 %v4673_v25, %v4633_v2  ;;  %v4781_v33 = vadd.f32 %v4773_v54, %v4733_v43  ;;  %v4769_v25 = vmul.f32 %v10338_v14, %v12529_v60  ;;  %v12566_v14 = vld [vmem:[#allocation159_spill] sm:$0xff] }
 0x8bc   : > { %v4687_v49 = vadd.f32 %v4679_v47, %v4639_v16  ;;  %v12562_v16 = vmov 77   ;;  %v4587_v54 = vmul.f32 %v12565_v27, %v12564_v17  ;;  %v4675_v2 = vmul.f32 %v12566_v14, %v11805_v57  ;;  %v12571_v27 = vld [vmem:[#allocation55_spill] sm:$0xff] }
 0x8bd   : > { %v4829_v43 = vadd.f32 %v4821_v5, %v4781_v33  ;;  %v4729_v3 = vadd.f32 %v4721_v4, %v4681_v56  ;;  %v12568_v33 = vld [vmem:[#allocation31_spill] sm:$0xff]  ;;  %v4638_v4 = vadd.f32 %v4630_v12, %v4590_v41  ;;  %v12576_v12 = vld [vmem:[#allocation30_spill] sm:$0xff] }
 0x8be   : > { %5210 = vperm.xlu1 %6387, %v12561_v55   ;;  %v4735_v47 = vadd.f32 %v4727_v35, %v4687_v49  ;;  %v4823_v35 = vmul.f32 %v10374_v52, %v11658_v15  ;;  %v4684_v49 = vadd.f32 %v4676_v46, %v4636_v31  ;;  %v12569_v52 = vld [vmem:[#allocation96_spill] sm:$0xff]  ;;  %v10513_v14 = vpop.permute.xlu0 %5066 }
 0x8bf   : > { %v4887_v10 = vpop.permute.xlu1 %4886  ;;  %v4877_v46 = vadd.f32 %v4869_v34, %v4829_v43  ;;  %v5536_v34 = vld [vmem:[#allocation2 + $0x31] sm:$0xff] }
 0x8c0   : > { %v4914_v19 = vmul.f32 %v4887_v10, %v12451_v26  ;;  %v4978_v10 = vld [vmem:[#allocation3 + $0x31] sm:$0xff]  ;;  %v4783_v5 = vadd.f32 %v4775_v61, %v4735_v47  ;;  %v12572_v47 = vld [vmem:[#allocation68_spill] sm:$0xff] }
 0x8c1   : > { %v4592_v31 = vmul.f32 %v12572_v47, %v11653_v39  ;;  %v12580_v47 = vld [vmem:[#allocation131_spill] sm:$0xff] }
 0x8c2   : > { %v4922_v45 = vadd.f32 %v4914_v19, %v4874_v30  ;;  %6388 = vset.pattern.permute.xlu1 %v12562_v16  ;;  %v12567_v30 = vld [vmem:[#allocation112_spill] sm:$0xff]  ;;  %v4723_v16 = vmul.f32 %v12570_v53, %v11782_v23  ;;  %v4831_v56 = vadd.f32 %v4823_v35, %v4783_v5 }
 0x8c3   : > { %5234 = vperm.xlu1 %6388, %v12563_v0   ;;  %v10494_v1 = vpop.permute.xlu1 %4890  ;;  %v4678_v13 = vmul.f32 %v12567_v30, %v11602_v48  ;;  %v4777_v0 = vadd.f32 %v4769_v25, %v4729_v3  ;;  %v12574_v25 = vld [vmem:[#allocation160_spill] sm:$0xff]  ;;  %v4732_v30 = vadd.f32 %v10450_v40, %v4684_v49  ;;  %v12581_v49 = vld [vmem:[#allocation25_spill] sm:$0xff] }
 0x8c4   : > { %v4970_v55 = vadd.f32 %v4962_v50, %v4922_v45  ;;  %v4967_v50 = vmul.f32 %v12569_v52, %v12568_v33  ;;  %v4635_v45 = vadd.f32 %v4627_v32, %v4587_v54  ;;  %v12573_v32 = vld [vmem:[#allocation61_spill] sm:$0xff]  ;;  %v4865_v3 = vmul.f32 %v12574_v25, %v12564_v17  ;;  %v12575_v52 = vld [vmem:[#allocation12_spill] sm:$0xff] }
 0x8c5   : > { %v4771_v54 = vmul.f32 %v12573_v32, %v12451_v26  ;;  %v4772_v41 = vmul.f32 %v12576_v12, %v12575_v52  ;;  %v12579_v53 = vld [vmem:[#allocation140_spill] sm:$0xff]  ;;  %v4879_v40 = vadd.f32 %v4871_v44, %v4831_v56  ;;  %v12584_v56 = vld [vmem:[#allocation53_spill] sm:$0xff] }
 0x8c6   : > { %v4986_v19 = vadd.f32 %v4978_v10, %v4970_v55  ;;  %v4683_v55 = vadd.f32 %v4675_v2, %v4635_v45  ;;  %v4686_v10 = vadd.f32 %v4678_v13, %v4638_v4  ;;  %v12578_v2 = vld [vmem:[#allocation80_spill] sm:$0xff]  ;;  %v4819_v13 = vmul.f32 %v12580_v47, %v12151_v28 }
 0x8c7   : > { %5242 = vperm.xlu1 %6388, %v12571_v27   ;;  %v4899_v8 = vpop.permute.xlu1 %4898  ;;  %v5551_v27 = vmax.f32 %v12579_v53, %v5536_v34  ;;  %v5559_v25 = vld [vmem:[#allocation2 + $0x41] sm:$0xff] }
 0x8c8   : > { %4994 = vst [vmem:[#allocation3 + $0x31] sm:$0xff] %v4986_v19  ;;  %v4917_v61 = vmul.f32 %v4899_v8, %v11644_v58  ;;  %v12577_v8 = vld [vmem:[#allocation34_spill] sm:$0xff]  ;;  %v4731_v5 = vadd.f32 %v4723_v16, %v4683_v55  ;;  %v4825_v19 = vadd.f32 %v4817_v42, %v4777_v0  ;;  %v10535_v42 = vpop.permute.xlu0 %5090  ;;  %v4780_v0 = vadd.f32 %v4772_v41, %v4732_v30  ;;  %v12582_v55 = vld [vmem:[#allocation23_spill] sm:$0xff]  ;;  %v12583_v44 = vld [vmem:[#allocation24_spill] sm:$0xff] }
 0x8c9   : > { %v4680_v43 = vmul.f32 %v12577_v8, %v11658_v15  ;;  %v4981_v8 = vld [vmem:[#allocation3 + $0x61] sm:$0xff]  ;;  %v10533_v16 = vmax.f32 %v5551_v27, %v5559_v25 }
 0x8ca   : > { %v4925_v35 = vadd.f32 %v4917_v61, %v4877_v46  ;;  %v4640_v46 = vadd.f32 %v10438_v6, %v4592_v31  ;;  %v4779_v61 = vadd.f32 %v4771_v54, %v4731_v5  ;;  %v4873_v12 = vadd.f32 %v4865_v3, %v4825_v19  ;;  %v12585_v31 = vld [vmem:[#allocation62_spill] sm:$0xff]  ;;  %v12586_v3 = vld [vmem:[#allocation132_spill] sm:$0xff] }
 0x8cb   : > { %5246 = vperm.xlu1 %6388, %v12578_v2   ;;  %v4907_v45 = vpop.permute.xlu1 %4906  ;;  %v4774_v2 = vmul.f32 %v12582_v55, %v11644_v58  ;;  %v4734_v6 = vadd.f32 %v10454_v38, %v4686_v10  ;;  %v4867_v54 = vmul.f32 %v12585_v31, %v12323_v9  ;;  %5575 = vst [vmem:[#allocation2 + $0x31] sm:$0xff] %v10533_v16  ;;  %v12587_v5 = vld [vmem:[#allocation28_spill] sm:$0xff]  ;;  %v12588_v55 = vld [vmem:[#allocation43_spill] sm:$0xff] }
 0x8cc   : > { %v4973_v4 = vadd.f32 %v4965_v36, %v4925_v35  ;;  %v4919_v32 = vmul.f32 %v4907_v45, %v12581_v49  ;;  %v4820_v36 = vmul.f32 %v12583_v44, %v7008_v62  ;;  %v4913_v35 = vmul.f32 %v12584_v56, %v11801_v11  ;;  %v12595_v31 = vld [vmem:[#allocation35_spill] sm:$0xff] }
 0x8cd   : > { %v4688_v30 = vadd.f32 %v4680_v43, %v4640_v46  ;;  %v4827_v41 = vadd.f32 %v4819_v13, %v4779_v61  ;;  %v4868_v19 = vmul.f32 %v12587_v5, %v11594_v29  ;;  %v4776_v44 = vmul.f32 %v12588_v55, %v12581_v49  ;;  %v5560_v46 = vld [vmem:[#allocation2 + $0x51] sm:$0xff]  ;;  %v5546_v61 = vld [vmem:[#allocation2 + $0x61] sm:$0xff] }
 0x8ce   : > { %v4989_v53 = vadd.f32 %v4981_v8, %v4973_v4  ;;  %v4927_v47 = vadd.f32 %v4919_v32, %v4879_v40  ;;  %v4915_v4 = vmul.f32 %v10494_v1, %v12575_v52  ;;  %v4983_v40 = vld [vmem:[#allocation3 + $0x81] sm:$0xff]  ;;  %v4921_v38 = vadd.f32 %v4913_v35, %v4873_v12  ;;  %v12592_v12 = vld [vmem:[#allocation19_spill] sm:$0xff] }
 0x8cf   : > { %5254 = vperm.xlu1 %6388, %v12586_v3   ;;  %v5552_v32 = vmax.f32 %v5536_v34, %v5559_v25  ;;  %v4782_v8 = vadd.f32 %v4774_v2, %v4734_v6  ;;  %v4828_v43 = vadd.f32 %v4820_v36, %v4780_v0  ;;  %v4875_v56 = vadd.f32 %v4867_v54, %v4827_v41  ;;  %v12591_v1 = vld [vmem:[#allocation88_spill] sm:$0xff]  ;;  %v10562_v2 = vpop.permute.xlu0 %5102  ;;  %v12594_v6 = vld [vmem:[#allocation150_spill] sm:$0xff] }
 0x8d0   : > { %4997 = vst [vmem:[#allocation3 + $0x61] sm:$0xff] %v4989_v53  ;;  %v4975_v45 = vadd.f32 %v4967_v50, %v4927_v47  ;;  %v4931_v27 = vpop.permute.xlu1 %4930  ;;  %v12589_v50 = vld [vmem:[#allocation82_spill] sm:$0xff]  ;;  %5577 = vst [vmem:[#allocation2 + $0x51] sm:$0xff] %v12591_v1  ;;  %v5554_v35 = vmax.f32 %v12592_v12, %v5546_v61  ;;  %v12593_v34 = vld [vmem:[#allocation148_spill] sm:$0xff]  ;;  %v4736_v0 = vadd.f32 %v10460_v20, %v4688_v30 }
 0x8d1   : > { %v4961_v10 = vmul.f32 %v4931_v27, %v11805_v57  ;;  %v10556_v47 = vmax.f32 %v5552_v32, %v5560_v46  ;;  %v4822_v25 = vmul.f32 %v12593_v34, %v11651_v63  ;;  %v4876_v36 = vadd.f32 %v4868_v19, %v4828_v43  ;;  %v4977_v3 = vld [vmem:[#allocation3 + $0x21] sm:$0xff]  ;;  %v5562_v5 = vld [vmem:[#allocation2 + $0x71] sm:$0xff] }
 0x8d2   : > { %v4991_v13 = vadd.f32 %v4983_v40, %v4975_v45  ;;  %v4870_v54 = vmul.f32 %v12595_v31, %v12594_v6  ;;  %v4923_v45 = vadd.f32 %v4915_v4, %v4875_v56  ;;  %v12598_v20 = vld [vmem:[#allocation167_spill] sm:$0xff]  ;;  %v4784_v19 = vadd.f32 %v4776_v44, %v4736_v0  ;;  %v5583_v55 = vld [vmem:[#allocation2 + $0x30] sm:$0xff]  ;;  %v5548_v43 = vld [vmem:[#allocation2 + $0x81] sm:$0xff] }
 0x8d3   : > { %v4969_v53 = vadd.f32 %v4961_v10, %v4921_v38  ;;  %5262 = vperm.xlu1 %6388, %v12589_v50   ;;  %12590 = vst [vmem:[#allocation39_spill] sm:$0xff] %v10556_v47  ;;  %5576 = vst [vmem:[#allocation2 + $0x41] sm:$0xff] %v10556_v47  ;;  %v10569_v38 = vmax.f32 %v5554_v35, %v5562_v5  ;;  %v12597_v10 = vld [vmem:[#allocation8_spill] sm:$0xff]  ;;  %v4916_v30 = vmul.f32 %v12598_v20, %v11600_v18  ;;  %v6463_v46 = vld [vmem:[#allocation2 + $0x11] sm:$0xff]  ;;  %v12599_v56 = vmov 78  }
 0x8d4   : > { %4999 = vst [vmem:[#allocation3 + $0x81] sm:$0xff] %v4991_v13  ;;  %v4939_v41 = vpop.permute.xlu1 %4938  ;;  %5579 = vst [vmem:[#allocation2 + $0x71] sm:$0xff] %v12597_v10  ;;  %v4830_v32 = vadd.f32 %v4822_v25, %v4782_v8  ;;  %v10574_v13 = vld [vmem:[#allocation2 + $0x21] sm:$0xff] }
 0x8d5   : > { %v4985_v27 = vadd.f32 %v4977_v3, %v4969_v53  ;;  %v4963_v40 = vmul.f32 %v4939_v41, %v7008_v62  ;;  %12596 = vst [vmem:[#allocation67_spill] sm:$0xff] %v10569_v38  ;;  %v5646_v4 = vmax.f32 %v6463_v46, %v10574_v13  ;;  %v5599_v53 = vmax.f32 %v5583_v55, %v10533_v16  ;;  %v12600_v50 = vld [vmem:[#allocation20_spill] sm:$0xff]  ;;  %v12601_v44 = vld [vmem:[#allocation21_spill] sm:$0xff]  ;;  %v12604_v3 = vld [vmem:[#allocation110_spill] sm:$0xff]  ;;  %v10596_v46 = vpop.permute.xlu0 %5110 }
 0x8d6   : > { %5578 = vst [vmem:[#allocation2 + $0x61] sm:$0xff] %v10569_v38  ;;  %v5556_v12 = vmax.f32 %v12600_v50, %v5548_v43  ;;  %v4824_v8 = vmul.f32 %v12601_v44, %v12568_v33  ;;  %v4878_v35 = vadd.f32 %v4870_v54, %v4830_v32  ;;  %v12602_v34 = vld [vmem:[#allocation117_spill] sm:$0xff]  ;;  %v4924_v5 = vadd.f32 %v4916_v30, %v4876_v36  ;;  %v12606_v54 = vld [vmem:[#allocation106_spill] sm:$0xff] }
 0x8d7   : > { %4993 = vst [vmem:[#allocation3 + $0x21] sm:$0xff] %v4985_v27  ;;  %v4971_v61 = vadd.f32 %v4963_v40, %v4923_v45  ;;  %6391 = vset.pattern.permute.xlu1 %v12599_v56  ;;  %v12603_v25 = vld [vmem:[#allocation129_spill] sm:$0xff]  ;;  %v5607_v45 = vld [vmem:[#allocation2 + $0x32] sm:$0xff]  ;;  %v4918_v32 = vmul.f32 %v12606_v54, %v11657_v51 }
 0x8d8   : > { %v4872_v0 = vmul.f32 %v12603_v25, %v12602_v34  ;;  %v4979_v31 = vld [vmem:[#allocation3 + $0x41] sm:$0xff]  ;;  %5286 = vperm.xlu1 %6391, %v12604_v3   ;;  %v4943_v41 = vpop.permute.xlu1 %4942  ;;  %v10586_v27 = vld [vmem:[#allocation2 + $0x91] sm:$0xff]  ;;  %v10589_v55 = vmax.f32 %v5599_v53, %v5607_v45  ;;  %v4832_v56 = vadd.f32 %v4824_v8, %v4784_v19 }
 0x8d9   : > { %v4987_v40 = vadd.f32 %v4979_v31, %v4971_v61  ;;  %v4964_v20 = vmul.f32 %v4943_v41, %v11602_v48  ;;  %v10592_v43 = vmax.f32 %v5556_v12, %v10586_v27  ;;  %v4980_v61 = vld [vmem:[#allocation3 + $0x51] sm:$0xff]  ;;  %v12607_v53 = vld [vmem:[#allocation60_spill] sm:$0xff]  ;;  %v4926_v44 = vadd.f32 %v4918_v32, %v4878_v35  ;;  %v10613_v32 = vpop.permute.xlu0 %5118 }
 0x8da   : > { %5623 = vst [vmem:[#allocation2 + $0x31] sm:$0xff] %v10589_v55  ;;  %v10600_v36 = vmax.f32 %v5646_v4, %v10589_v55  ;;  %v4880_v30 = vadd.f32 %v4872_v0, %v4832_v56  ;;  %v5584_v34 = vld [vmem:[#allocation2 + $0x40] sm:$0xff]  ;;  %v5585_v31 = vld [vmem:[#allocation2 + $0x50] sm:$0xff]  ;;  %v12609_v4 = vld [vmem:[#allocation141_spill] sm:$0xff] }
 0x8db   : > { %12605 = vst [vmem:[#allocation101_spill] sm:$0xff] %v10592_v43  ;;  %4995 = vst [vmem:[#allocation3 + $0x41] sm:$0xff] %v4987_v40  ;;  %v4972_v50 = vadd.f32 %v4964_v20, %v4924_v5  ;;  %v5600_v8 = vmax.f32 %v5584_v34, %v10556_v47  ;;  %v5601_v41 = vmax.f32 %v5585_v31, %v12591_v1  ;;  %v12608_v5 = vld [vmem:[#allocation145_spill] sm:$0xff]  ;;  %v5609_v20 = vld [vmem:[#allocation2 + $0x52] sm:$0xff] }
 0x8dc   : > { %5580 = vst [vmem:[#allocation2 + $0x81] sm:$0xff] %v10592_v43  ;;  %5290 = vperm.xlu1 %6391, %v12607_v53   ;;  %v4951_v12 = vpop.permute.xlu1 %4950  ;;  %v4920_v45 = vmul.f32 %v12609_v4, %v12608_v5  ;;  %v5608_v40 = vld [vmem:[#allocation2 + $0x42] sm:$0xff]  ;;  %v5587_v34 = vld [vmem:[#allocation2 + $0x70] sm:$0xff] }
 0x8dd   : > { %v4988_v3 = vadd.f32 %v4980_v61, %v4972_v50  ;;  %v4966_v19 = vmul.f32 %v4951_v12, %v11658_v15  ;;  %v10609_v54 = vmax.f32 %v5600_v8, %v5608_v40  ;;  %v10611_v56 = vmax.f32 %v5601_v41, %v5609_v20  ;;  %v5586_v35 = vld [vmem:[#allocation2 + $0x60] sm:$0xff]  ;;  %v4982_v50 = vld [vmem:[#allocation3 + $0x71] sm:$0xff]  ;;  %v12610_v61 = vld [vmem:[#allocation73_spill] sm:$0xff] }
 0x8de   : > { %v4928_v12 = vadd.f32 %v4920_v45, %v4880_v30  ;;  %v5602_v31 = vmax.f32 %v5586_v35, %v10569_v38  ;;  %v5610_v4 = vld [vmem:[#allocation2 + $0x62] sm:$0xff]  ;;  %v5611_v8 = vld [vmem:[#allocation2 + $0x72] sm:$0xff] }
 0x8df   : > { %4996 = vst [vmem:[#allocation3 + $0x51] sm:$0xff] %v4988_v3  ;;  %v4974_v0 = vadd.f32 %v4966_v19, %v4926_v44  ;;  %v12611_v5 = vld [vmem:[#allocation144_spill] sm:$0xff]  ;;  %5624 = vst [vmem:[#allocation2 + $0x41] sm:$0xff] %v10609_v54  ;;  %v5603_v44 = vmax.f32 %v5587_v34, %v12597_v10  ;;  %v5649_v19 = vmax.f32 %v10609_v54, %v10611_v56  ;;  %v12612_v35 = vld [vmem:[#allocation127_spill] sm:$0xff] }
 0x8e0   : > { %5298 = vperm.xlu1 %6391, %v12610_v61   ;;  %v4959_v53 = vpop.permute.xlu1 %4958  ;;  %5625 = vst [vmem:[#allocation2 + $0x51] sm:$0xff] %v10611_v56  ;;  %v10623_v41 = vmax.f32 %v5602_v31, %v5610_v4  ;;  %v10640_v4 = vpop.permute.xlu0 %5142  ;;  %v12624_v10 = vld [vmem:[#allocation113_spill] sm:$0xff] }
 0x8e1   : > { %v4990_v47 = vadd.f32 %v4982_v50, %v4974_v0  ;;  %v4968_v3 = vmul.f32 %v4959_v53, %v12611_v5  ;;  %v10625_v40 = vmax.f32 %v5603_v44, %v5611_v8  ;;  %v4984_v0 = vld [vmem:[#allocation3 + $0x91] sm:$0xff]  ;;  %v12615_v8 = vmov 79  }
 0x8e2   : > { %5626 = vst [vmem:[#allocation2 + $0x61] sm:$0xff] %v10623_v41  ;;  %v10631_v50 = vmax.f32 %v5649_v19, %v10623_v41  ;;  %v12623_v5 = vmov 80  }
 0x8e3   : > { %v5588_v30 = vld [vmem:[#allocation2 + $0x80] sm:$0xff]  ;;  %4998 = vst [vmem:[#allocation3 + $0x71] sm:$0xff] %v4990_v47  ;;  %v4976_v45 = vadd.f32 %v4968_v3, %v4928_v12  ;;  %5627 = vst [vmem:[#allocation2 + $0x71] sm:$0xff] %v10625_v40  ;;  %v5651_v47 = vmax.f32 %v10623_v41, %v10625_v40  ;;  %v5074_v12 = vmul.f32 %v10444_v21, %v12529_v60 }
 0x8e4   : > { %v5604_v20 = vmax.f32 %v5588_v30, %v10592_v43  ;;  %5306 = vperm.xlu1 %6391, %v12612_v35   ;;  %12613 = vst [vmem:[#allocation6_spill] sm:$0xff] %v10631_v50  ;;  %v5612_v61 = vld [vmem:[#allocation2 + $0x82] sm:$0xff]  ;;  %v5077_v35 = vmul.f32 %v10482_v24, %v12575_v52  ;;  %v12621_v24 = vld [vmem:[#allocation27_spill] sm:$0xff] }
 0x8e5   : > { %v4992_v53 = vadd.f32 %v4984_v0, %v4976_v45  ;;  %v5007_v34 = vpop.permute.xlu1 %5006  ;;  %v12616_v30 = vld [vmem:[#allocation100_spill] sm:$0xff] }
 0x8e6   : > { %v10634_v31 = vmax.f32 %v5604_v20, %v5612_v61  ;;  %v5034_v3 = vmul.f32 %v5007_v34, %v12531_v7  ;;  %v10649_v20 = vpop.permute.xlu0 %5154  ;;  %v12617_v0 = vld [vmem:[#allocation64_spill] sm:$0xff] }
 0x8e7   : > { %5000 = vst [vmem:[#allocation3 + $0x91] sm:$0xff] %v4992_v53  ;;  %v12618_v34 = vld [vmem:[#allocation4_spill] sm:$0xff] }
 0x8e8   : > { %5628 = vst [vmem:[#allocation2 + $0x81] sm:$0xff] %v10634_v31  ;;  %v10645_v44 = vmax.f32 %v5651_v47, %v10634_v31  ;;  %v5082_v19 = vadd.f32 %v5074_v12, %v5034_v3  ;;  %6393 = vset.pattern.permute.xlu1 %v12615_v8  ;;  %v5079_v12 = vmul.f32 %v10513_v14, %v11644_v58 }
 0x8e9   : > { %5334 = vperm.xlu1 %6393, %v12616_v30   ;;  %v5011_v45 = vpop.permute.xlu1 %5010  ;;  %v12619_v30 = vld [vmem:[#allocation135_spill] sm:$0xff] }
 0x8ea   : > { %12614 = vst [vmem:[#allocation92_spill] sm:$0xff] %v10645_v44  ;;  %v10660_v3 = vpop.permute.xlu0 %5162 }
 0x8ed   : > { %5338 = vperm.xlu1 %6393, %v12617_v0   ;;  %v5019_v21 = vpop.permute.xlu1 %5018  ;;  %v12620_v0 = vld [vmem:[#allocation123_spill] sm:$0xff] }
 0x8ee   : > { %v5037_v61 = vmul.f32 %v5019_v21, %v12323_v9  ;;  %v5033_v21 = vmul.f32 %v12603_v25, %v12621_v24  ;;  %v10669_v38 = vpop.permute.xlu0 %5186  ;;  %v12629_v25 = vld [vmem:[#allocation128_spill] sm:$0xff] }
 0x8f0   : > { %v10655_v53 = vadd.f32 %v5077_v35, %v5037_v61  ;;  %v12622_v35 = vld [vmem:[#allocation51_spill] sm:$0xff] }
 0x8f1   : > { %5346 = vperm.xlu1 %6393, %v12618_v34   ;;  %v5027_v47 = vpop.permute.xlu1 %5026  ;;  %v5121_v34 = vmul.f32 %v10535_v42, %v12560_v59  ;;  %v12626_v59 = vld [vmem:[#allocation158_spill] sm:$0xff] }
 0x8f2   : > { %v5039_v44 = vmul.f32 %v5027_v47, %v12619_v30  ;;  %v5035_v47 = vmul.f32 %v5011_v45, %v12564_v17  ;;  %v10679_v24 = vpop.permute.xlu0 %5198  ;;  %v5036_v42 = vmul.f32 %v12626_v59, %v11782_v23  ;;  %v12627_v45 = vld [vmem:[#allocation5_spill] sm:$0xff]  ;;  %v5126_v59 = vmul.f32 %v10596_v46, %v11602_v48  ;;  %v12631_v46 = vld [vmem:[#allocation84_spill] sm:$0xff] }
 0x8f4   : > { %v10663_v43 = vadd.f32 %v5079_v12, %v5039_v44 }
 0x8f5   : > { %5354 = vperm.xlu1 %6393, %v12620_v0  }
 0x8f6   : > { %v5043_v50 = vpop.permute.xlu1 %5042 }
 0x8f7   : > { %v5073_v61 = vmul.f32 %v5043_v50, %v12622_v35  ;;  %v12625_v50 = vld [vmem:[#allocation66_spill] sm:$0xff] }
 0x8f9   : > { %v5081_v14 = vadd.f32 %v5073_v61, %v5033_v21  ;;  %6395 = vset.pattern.permute.xlu1 %v12623_v5 }
 0x8fa   : > { %5382 = vperm.xlu1 %6395, %v12624_v10   ;;  %v5051_v44 = vpop.permute.xlu1 %5050  ;;  %v5124_v10 = vmul.f32 %v10562_v2, %v12151_v28 }
 0x8fb   : > { %v5075_v12 = vmul.f32 %v5051_v44, %v11801_v11  ;;  %v10677_v30 = vadd.f32 %v5121_v34, %v5081_v14  ;;  %v12628_v34 = vld [vmem:[#allocation83_spill] sm:$0xff] }
 0x8fc   : > { %v5038_v14 = vmul.f32 %v12628_v34, %v11594_v29 }
 0x8fd   : > { %v5083_v0 = vadd.f32 %v5075_v12, %v5035_v47 }
 0x8fe   : > { %5386 = vperm.xlu1 %6395, %v12625_v50   ;;  %v5055_v35 = vpop.permute.xlu1 %5054  ;;  %v10693_v50 = vpop.permute.xlu0 %5206 }
 0x8ff   : > { %v5076_v21 = vmul.f32 %v5055_v35, %v12451_v26 }
 0x901   : > { %v5084_v61 = vadd.f32 %v5076_v21, %v5036_v42  ;;  %v12630_v42 = vld [vmem:[#allocation36_spill] sm:$0xff] }
 0x902   : > { %5394 = vperm.xlu1 %6395, %v12627_v45   ;;  %v5063_v44 = vpop.permute.xlu1 %5062  ;;  %v5040_v21 = vmul.f32 %v12630_v42, %v11653_v39  ;;  %v5215_v34 = vpop.permute.xlu0 %5214 }
 0x903   : > { %v5078_v47 = vmul.f32 %v5063_v44, %v11600_v18  ;;  %v10691_v12 = vadd.f32 %v5124_v10, %v5084_v61  ;;  %v5647_v10 = vmax.f32 %v10574_v13, %v10589_v55  ;;  %v5128_v61 = vmul.f32 %v10613_v32, %v11658_v15 }
 0x905   : > { %v5086_v35 = vadd.f32 %v5078_v47, %v5038_v14 }
 0x906   : > { %5402 = vperm.xlu1 %6395, %v12629_v25   ;;  %v5071_v2 = vpop.permute.xlu1 %5070 }
 0x907   : > { %v5080_v45 = vmul.f32 %v5071_v2, %v11657_v51  ;;  %v10701_v1 = vadd.f32 %v5126_v59, %v5086_v35  ;;  %v5648_v59 = vmax.f32 %v10589_v55, %v10609_v54  ;;  %v10713_v35 = vmax.f32 %v5647_v10, %v10609_v54  ;;  %v12632_v2 = vld [vmem:[#allocation93_spill] sm:$0xff] }
 0x908   : > { %v5170_v42 = vmul.f32 %v10640_v4, %v12632_v2  ;;  %v5650_v54 = vmax.f32 %v10611_v56, %v10623_v41  ;;  %v5175_v41 = vmul.f32 %v10660_v3, %v11653_v39  ;;  %v5224_v39 = vmul.f32 %v5215_v34, %v12581_v49 }
 0x909   : > { %v5088_v44 = vadd.f32 %v5080_v45, %v5040_v21  ;;  %v10718_v21 = vmax.f32 %v5648_v59, %v10611_v56  ;;  %v5239_v45 = vpop.permute.xlu0 %5238  ;;  %v5652_v59 = vmax.f32 %v10625_v40, %v10634_v31 }
 0x90a   : > { %6397 = vset.pattern.permute.xlu1 %v12615_v8 }
 0x90b   : > { %5358 = vperm.xlu1 %6397, %v12631_v46   ;;  %v5095_v25 = vpop.permute.xlu1 %5094  ;;  %v5136_v14 = vadd.f32 %v5128_v61, %v5088_v44  ;;  %v12633_v44 = vld [vmem:[#allocation118_spill] sm:$0xff]  ;;  %v10736_v56 = vmax.f32 %v5652_v59, %v10586_v27 }
 0x90c   : > { %v5122_v47 = vmul.f32 %v5095_v25, %v12420_v37 }
 0x90d   : > { %v5251_v25 = vpop.permute.xlu0 %5250  ;;  %12635 = vst [vmem:[#allocation95_spill] sm:$0xff] %v10736_v56 }
 0x90e   : > { %v5130_v32 = vadd.f32 %v5122_v47, %v5082_v19  ;;  %v10727_v19 = vmax.f32 %v5650_v54, %v10625_v40 }
 0x90f   : > { %6398 = vset.pattern.permute.xlu1 %v12623_v5  ;;  %v5099_v8 = vpop.permute.xlu1 %5098  ;;  %v5173_v5 = vmul.f32 %v10649_v20, %v11594_v29 }
 0x910   : > { %v5123_v61 = vmul.f32 %v5099_v8, %v11805_v57  ;;  %5406 = vperm.xlu1 %6398, %v12633_v44   ;;  %v5178_v46 = vadd.f32 %v5170_v42, %v5130_v32  ;;  %12634 = vst [vmem:[#allocation94_spill] sm:$0xff] %v10727_v19 }
 0x911   : > { %v5259_v8 = vpop.permute.xlu0 %5258 }
 0x912   : > { %v5131_v55 = vadd.f32 %v5123_v61, %v5083_v0 }
 0x913   : > { %v5107_v10 = vpop.permute.xlu1 %5106 }
 0x914   : > { %v5125_v4 = vmul.f32 %v5107_v10, %v7008_v62 }
 0x915   : > { %v5283_v54 = vpop.permute.xlu0 %5282 }
 0x916   : > { %v5133_v47 = vadd.f32 %v5125_v4, %v10655_v53 }
 0x917   : > { %v5115_v2 = vpop.permute.xlu1 %5114 }
 0x918   : > { %v5127_v0 = vmul.f32 %v5115_v2, %v11651_v63  ;;  %v5181_v42 = vadd.f32 %v5173_v5, %v5133_v47 }
 0x919   : > { %v5295_v10 = vpop.permute.xlu0 %5294 }
 0x91a   : > { %v5135_v32 = vadd.f32 %v5127_v0, %v10663_v43  ;;  %v5266_v0 = vmul.f32 %v5239_v45, %v11805_v57 }
 0x91c   : > { %v5139_v20 = vpop.permute.xlu1 %5138  ;;  %v5183_v61 = vadd.f32 %v5175_v41, %v5135_v32 }
 0x91d   : > { %v5303_v47 = vpop.permute.xlu0 %5302  ;;  %v5169_v34 = vmul.f32 %v5139_v20, %v12531_v7  ;;  %v5313_v20 = vmul.f32 %v5283_v54, %v12564_v17 }
 0x91f   : > { %v5177_v45 = vadd.f32 %v5169_v34, %v10677_v30  ;;  %v12636_v34 = vld [vmem:[#allocation136_spill] sm:$0xff] }
 0x920   : > { %v5147_v44 = vpop.permute.xlu1 %5146 }
 0x921   : > { %v5171_v53 = vmul.f32 %v5147_v44, %v11782_v23  ;;  %v5331_v41 = vpop.permute.xlu0 %5330 }
 0x923   : > { %v10742_v40 = vadd.f32 %v5171_v53, %v5131_v55 }
 0x924   : > { %v5151_v31 = vpop.permute.xlu1 %5150 }
 0x925   : > { %v5343_v56 = vpop.permute.xlu0 %5342  ;;  %v5172_v7 = vmul.f32 %v5151_v31, %v12323_v9 }
 0x928   : > { %v5159_v4 = vpop.permute.xlu1 %5158 }
 0x92c   : > { %v5167_v5 = vpop.permute.xlu1 %5166 }
 0x92d   : > { %v5176_v27 = vmul.f32 %v5167_v5, %v11661_v22 }
 0x92f   : > { %v5184_v3 = vadd.f32 %v5176_v27, %v5136_v14  ;;  %v5269_v14 = vmul.f32 %v5251_v25, %v11602_v48 }
 0x931   : > { %v5191_v43 = vpop.permute.xlu1 %5190  ;;  %v10746_v59 = vadd.f32 %v5224_v39, %v5184_v3 }
 0x932   : > { %v5218_v2 = vmul.f32 %v5191_v43, %v11801_v11 }
 0x934   : > { %v5226_v55 = vadd.f32 %v5218_v2, %v5178_v46  ;;  %v5271_v46 = vmul.f32 %v5259_v8, %v11658_v15  ;;  %v5351_v2 = vpop.permute.xlu0 %5350  ;;  %v5361_v8 = vmul.f32 %v5331_v41, %v11801_v11  ;;  %v5425_v41 = vld [vmem:[#allocation3 + $0x22] sm:$0xff] }
 0x935   : > { %v10750_v32 = vpop.permute.xlu1 %5194 }
 0x936   : > { %v10752_v44 = vadd.f32 %v5266_v0, %v5226_v55  ;;  %v5217_v55 = vmul.f32 %v10669_v38, %v12529_v60  ;;  %v5174_v60 = vmul.f32 %v5159_v4, %v12636_v34  ;;  %v5316_v4 = vmul.f32 %v5295_v10, %v11594_v29  ;;  %v12637_v29 = vld [vmem:[#allocation38_spill] sm:$0xff] }
 0x938   : > { %v5225_v25 = vadd.f32 %v5217_v55, %v5177_v45  ;;  %v5182_v17 = vadd.f32 %v5174_v60, %v10701_v1 }
 0x939   : > { %v5203_v53 = vpop.permute.xlu1 %5202 }
 0x93a   : > { %v5221_v5 = vmul.f32 %v5203_v53, %v11600_v18 }
 0x93c   : > { %v5229_v27 = vadd.f32 %v5221_v5, %v5181_v42 }
 0x93d   : > { %v5211_v39 = vpop.permute.xlu1 %5210 }
 0x93e   : > { %v5223_v3 = vmul.f32 %v5211_v39, %v11657_v51  ;;  %v10758_v43 = vadd.f32 %v5269_v14, %v5229_v27  ;;  %v5379_v14 = vpop.permute.xlu0 %5378  ;;  %v5220_v27 = vmul.f32 %v10679_v24, %v12575_v52 }
 0x93f   : > { %v5409_v31 = vmul.f32 %v5379_v14, %v11805_v57 }
 0x940   : > { %v5231_v0 = vadd.f32 %v5223_v3, %v5183_v61  ;;  %v5180_v61 = vadd.f32 %v5172_v7, %v10691_v12  ;;  %v5449_v3 = vld [vmem:[#allocation3 + $0x11] sm:$0xff]  ;;  %v5222_v12 = vmul.f32 %v10693_v50, %v11644_v58 }
 0x941   : > { %v5669_v55 = vmax.f32 %v5449_v3, 0.0 }
 0x942   : > { %v5235_v53 = vpop.permute.xlu1 %5234  ;;  %v10764_v19 = vadd.f32 %v5271_v46, %v5231_v0  ;;  %v5228_v45 = vadd.f32 %v5220_v27, %v5180_v61  ;;  %v5391_v11 = vpop.permute.xlu0 %5390  ;;  %v5230_v1 = vadd.f32 %v5222_v12, %v5182_v17  ;;  %v5366_v61 = vmul.f32 %v5351_v2, %v11657_v51  ;;  %v5430_v2 = vld [vmem:[#allocation3 + $0x72] sm:$0xff] }
 0x943   : > { %v5265_v42 = vmul.f32 %v5235_v53, %v12420_v37  ;;  %v5364_v53 = vmul.f32 %v5343_v56, %v11600_v18  ;;  %v5677_v10 = vadd.f32 %v5669_v55, %v12637_v29  ;;  %v5428_v56 = vld [vmem:[#allocation3 + $0x52] sm:$0xff] }
 0x945   : > { %v5273_v5 = vadd.f32 %v5265_v42, %v5225_v25  ;;  %v5318_v42 = vmul.f32 %v5303_v47, %v12594_v6  ;;  %v12639_v47 = vld [vmem:[#allocation154_spill] sm:$0xff]  ;;  %v5685_v3 = vmax.f32 %v5677_v10, 0.0 }
 0x946   : > { %v10769_v30 = vpop.permute.xlu1 %5242  ;;  %v5399_v50 = vpop.permute.xlu0 %5398 }
 0x947   : > { %v5321_v38 = vadd.f32 %v5313_v20, %v5273_v5  ;;  %v5412_v20 = vmul.f32 %v5391_v11, %v11602_v48  ;;  %v12638_v48 = vld [vmem:[#allocation142_spill] sm:$0xff] }
 0x949   : > { %v5369_v39 = vadd.f32 %v5361_v8, %v5321_v38  ;;  %v5414_v38 = vmul.f32 %v5399_v50, %v11658_v15 }
 0x94a   : > { %v5247_v37 = vpop.permute.xlu1 %5246 }
 0x94b   : > { %v5417_v54 = vadd.f32 %v5409_v31, %v5369_v39  ;;  %v5268_v46 = vmul.f32 %v5247_v37, %v7008_v62  ;;  %v12640_v39 = vmax.f32 %v12638_v48, %v12639_v47  ;;  %v5427_v47 = vld [vmem:[#allocation3 + $0x42] sm:$0xff] }
 0x94d   : > { %v5433_v0 = vadd.f32 %v5425_v41, %v5417_v54  ;;  %v5276_v24 = vadd.f32 %v5268_v46, %v5228_v45  ;;  %v5661_v37 = vmax.f32 %v12640_v39, %v10574_v13  ;;  %v12641_v45 = vld [vmem:[#allocation26_spill] sm:$0xff] }
 0x94e   : > { %v5255_v57 = vpop.permute.xlu1 %5254 }
 0x94f   : > { %5441 = vst [vmem:[#allocation3 + $0x22] sm:$0xff] %v5433_v0  ;;  %v5324_v7 = vadd.f32 %v5316_v4, %v5276_v24  ;;  %v5270_v25 = vmul.f32 %v5255_v57, %v11651_v63  ;;  %v5693_v15 = vadd.f32 %v5685_v3, %v5661_v37 }
 0x951   : > { %v5372_v5 = vadd.f32 %v5364_v53, %v5324_v7  ;;  %v5278_v14 = vadd.f32 %v5270_v25, %v5230_v1  ;;  %v5701_v0 = vmax.f32 %v5693_v15, 0.0 }
 0x952   : > { %v10786_v8 = vpop.permute.xlu1 %5262 }
 0x953   : > { %v5420_v60 = vadd.f32 %v5412_v20, %v5372_v5  ;;  %v5326_v18 = vadd.f32 %v5318_v42, %v5278_v14  ;;  %v5219_v42 = vmul.f32 %v10750_v32, %v12451_v26  ;;  %v5267_v5 = vmul.f32 %v10769_v30, %v12151_v28  ;;  %v5426_v30 = vld [vmem:[#allocation3 + $0x32] sm:$0xff] }
 0x955   : > { %v5436_v27 = vadd.f32 %v5428_v56, %v5420_v60  ;;  %v5374_v31 = vadd.f32 %v5366_v61, %v5326_v18  ;;  %v5227_v50 = vadd.f32 %v5219_v42, %v10742_v40 }
 0x956   : > { %v5450_v6 = vld [vmem:[#allocation3 + $0x21] sm:$0xff] }
 0x957   : > { %v5670_v17 = vmax.f32 %v5450_v6, 0.0  ;;  %5444 = vst [vmem:[#allocation3 + $0x52] sm:$0xff] %v5436_v27  ;;  %v5422_v54 = vadd.f32 %v5414_v38, %v5374_v31  ;;  %v5287_v51 = vpop.permute.xlu1 %5286  ;;  %v5275_v60 = vadd.f32 %v5267_v5, %v5227_v50  ;;  %v12646_v50 = vld [vmem:[#allocation8_spill] sm:$0xff] }
 0x959   : > { %v5678_v46 = vadd.f32 %v5670_v17, %v12641_v45  ;;  %v5438_v11 = vadd.f32 %v5430_v2, %v5422_v54 }
 0x95b   : > { %v5686_v41 = vmax.f32 %v5678_v46, 0.0  ;;  %5446 = vst [vmem:[#allocation3 + $0x72] sm:$0xff] %v5438_v11  ;;  %v5291_v12 = vpop.permute.xlu1 %5290 }
 0x95c   : > { %v5315_v10 = vmul.f32 %v5291_v12, %v12323_v9  ;;  %v5431_v12 = vld [vmem:[#allocation3 + $0x82] sm:$0xff] }
 0x95d   : > { %v5885_v13 = vpack.c.bf16 %v5686_v41, %v5685_v3  ;;  %v5694_v4 = vadd.f32 %v5686_v41, %v10600_v36  ;;  %v5314_v36 = vmul.f32 %v5287_v51, %v11782_v23  ;;  %v5311_v41 = vpop.permute.xlu0 %5310 }
 0x95e   : > { %v5323_v23 = vadd.f32 %v5315_v10, %v5275_v60  ;;  %v5453_v17 = vld [vmem:[#allocation3 + $0x51] sm:$0xff] }
 0x95f   : > { %5886 = vst [vmem:[%s10800_s26] sm:$0xff] %v5885_v13   ;;  %v5299_v24 = vpop.permute.xlu1 %5298  ;;  %v5702_v55 = vmax.f32 %v5694_v4, 0.0  ;;  %v5322_v29 = vadd.f32 %v5314_v36, %v10752_v44  ;;  %v5673_v46 = vmax.f32 %v5453_v17, 0.0  ;;  %v12645_v36 = vld [vmem:[#allocation39_spill] sm:$0xff] }
 0x960   : > { %v5317_v38 = vmul.f32 %v5299_v24, %v12636_v34 }
 0x961   : > { %v5905_v57 = vpack.c.bf16 %v5702_v55, %v5701_v0  ;;  %v12642_v55 = vld [vmem:[#allocation88_spill] sm:$0xff] }
 0x962   : > { %v5325_v9 = vadd.f32 %v5317_v38, %v10758_v43 }
 0x963   : > { %v5307_v53 = vpop.permute.xlu1 %5306  ;;  %5906 = vst [vmem:[%s10808_s28] sm:$0xff] %v5905_v57   ;;  %v5681_v57 = vadd.f32 %v5673_v46, %v12642_v55 }
 0x964   : > { %v5319_v48 = vmul.f32 %v5307_v53, %v11661_v22  ;;  %v5272_v22 = vmul.f32 %v10786_v8, %v12568_v33  ;;  %v12643_v53 = vld [vmem:[#allocation129_spill] sm:$0xff] }
 0x968   : > { %v5335_v7 = vpop.permute.xlu1 %5334 }
 0x969   : > { %v5362_v14 = vmul.f32 %v5335_v7, %v12451_v26 }
 0x96b   : > { %v5370_v18 = vadd.f32 %v5362_v14, %v5322_v29 }
 0x96c   : > { %v5339_v1 = vpop.permute.xlu1 %5338 }
 0x96d   : > { %v5363_v56 = vmul.f32 %v5339_v1, %v12575_v52 }
 0x96f   : > { %v5371_v26 = vadd.f32 %v5363_v56, %v5323_v23  ;;  %v12647_v56 = vld [vmem:[#allocation144_spill] sm:$0xff] }
 0x970   : > { %v5347_v25 = vpop.permute.xlu1 %5346 }
 0x971   : > { %v5365_v40 = vmul.f32 %v5347_v25, %v11644_v58  ;;  %v5327_v58 = vadd.f32 %v5319_v48, %v10764_v19  ;;  %v5280_v19 = vadd.f32 %v5272_v22, %v10746_v59  ;;  %v12644_v25 = vld [vmem:[#allocation145_spill] sm:$0xff] }
 0x973   : > { %v5373_v39 = vadd.f32 %v5365_v40, %v5325_v9  ;;  %v5432_v9 = vld [vmem:[#allocation3 + $0x92] sm:$0xff] }
 0x974   : > { %v5355_v20 = vpop.permute.xlu1 %5354 }
 0x975   : > { %v5367_v34 = vmul.f32 %v5355_v20, %v12581_v49  ;;  %v5455_v49 = vld [vmem:[#allocation3 + $0x71] sm:$0xff] }
 0x976   : > { %v5675_v24 = vmax.f32 %v5455_v49, 0.0 }
 0x977   : > { %v5375_v43 = vadd.f32 %v5367_v34, %v5327_v58 }
 0x978   : > { %v5683_v29 = vadd.f32 %v5675_v24, %v12646_v50 }
 0x979   : > { %v5383_v61 = vpop.permute.xlu1 %5382 }
 0x97a   : > { %v5410_v32 = vmul.f32 %v5383_v61, %v12151_v28 }
 0x97c   : > { %v5418_v27 = vadd.f32 %v5410_v32, %v5370_v18 }
 0x97d   : > { %v5387_v31 = vpop.permute.xlu1 %5386 }
 0x97e   : > { %v5434_v6 = vadd.f32 %v5426_v30, %v5418_v27  ;;  %v5411_v44 = vmul.f32 %v5387_v31, %v7008_v62  ;;  %v5429_v62 = vld [vmem:[#allocation3 + $0x62] sm:$0xff]  ;;  %v12648_v27 = vld [vmem:[#allocation67_spill] sm:$0xff] }
 0x980   : > { %5442 = vst [vmem:[#allocation3 + $0x32] sm:$0xff] %v5434_v6  ;;  %v5419_v52 = vadd.f32 %v5411_v44, %v5371_v26  ;;  %v5691_v44 = vmax.f32 %v5683_v29, 0.0 }
 0x981   : > { %v5395_v28 = vpop.permute.xlu1 %5394 }
 0x982   : > { %v5435_v37 = vadd.f32 %v5427_v47, %v5419_v52  ;;  %v5413_v3 = vmul.f32 %v5395_v28, %v11651_v63 }
 0x984   : > { %5443 = vst [vmem:[#allocation3 + $0x42] sm:$0xff] %v5435_v37  ;;  %v5421_v54 = vadd.f32 %v5413_v3, %v5373_v39  ;;  %v12651_v3 = vld [vmem:[#allocation101_spill] sm:$0xff] }
 0x985   : > { %v5403_v51 = vpop.permute.xlu1 %5402 }
 0x986   : > { %v5437_v2 = vadd.f32 %v5429_v62, %v5421_v54  ;;  %v5415_v45 = vmul.f32 %v5403_v51, %v12568_v33  ;;  %v5320_v33 = vmul.f32 %v12643_v53, %v5311_v41  ;;  %v12652_v51 = vld [vmem:[#allocation92_spill] sm:$0xff] }
 0x987   : > { %v5451_v11 = vld [vmem:[#allocation3 + $0x31] sm:$0xff]  ;;  %v5699_v22 = vadd.f32 %v5691_v44, %v12652_v51 }
 0x988   : > { %v5671_v15 = vmax.f32 %v5451_v11, 0.0  ;;  %5445 = vst [vmem:[#allocation3 + $0x62] sm:$0xff] %v5437_v2  ;;  %v5423_v63 = vadd.f32 %v5415_v45, %v5375_v43  ;;  %v5328_v5 = vadd.f32 %v5320_v33, %v5280_v19  ;;  %v12653_v2 = vld [vmem:[#allocation95_spill] sm:$0xff] }
 0x989   : > { %v5707_v11 = vmax.f32 %v5699_v22, 0.0 }
 0x98a   : > { %v5679_v13 = vadd.f32 %v5671_v15, %v10533_v16  ;;  %v5439_v4 = vadd.f32 %v5431_v12, %v5423_v63  ;;  %v5359_v0 = vpop.permute.xlu1 %5358  ;;  %v5689_v16 = vmax.f32 %v5681_v57, 0.0 }
 0x98b   : > { %v5452_v8 = vld [vmem:[#allocation3 + $0x41] sm:$0xff]  ;;  %v5368_v42 = vmul.f32 %v5359_v0, %v12644_v25 }
 0x98c   : > { %v5687_v7 = vmax.f32 %v5679_v13, 0.0  ;;  %v5672_v1 = vmax.f32 %v5452_v8, 0.0  ;;  %5447 = vst [vmem:[#allocation3 + $0x82] sm:$0xff] %v5439_v4 }
 0x98d   : > { %v5376_v18 = vadd.f32 %v5368_v42, %v5328_v5 }
 0x98e   : > { %v5680_v20 = vadd.f32 %v5672_v1, %v12645_v36  ;;  %v5695_v59 = vadd.f32 %v5687_v7, %v10713_v35  ;;  %v12649_v35 = vld [vmem:[#allocation6_spill] sm:$0xff] }
 0x98f   : > { %v5454_v14 = vld [vmem:[#allocation3 + $0x61] sm:$0xff]  ;;  %v5407_v10 = vpop.permute.xlu1 %5406  ;;  %v5697_v40 = vadd.f32 %v5689_v16, %v12649_v35 }
 0x990   : > { %v5688_v61 = vmax.f32 %v5680_v20, 0.0  ;;  %v5674_v60 = vmax.f32 %v5454_v14, 0.0  ;;  %v5416_v32 = vmul.f32 %v5407_v10, %v12647_v56  ;;  %v5703_v26 = vmax.f32 %v5695_v59, 0.0 }
 0x991   : > { %v5705_v58 = vmax.f32 %v5697_v40, 0.0 }
 0x992   : > { %v5696_v23 = vadd.f32 %v5688_v61, %v10718_v21  ;;  %v5890_v38 = vpack.c.bf16 %v5688_v61, %v5687_v7  ;;  %v5682_v30 = vadd.f32 %v5674_v60, %v12648_v27  ;;  %v5424_v31 = vadd.f32 %v5416_v32, %v5376_v18  ;;  %v12650_v21 = vld [vmem:[#allocation94_spill] sm:$0xff] }
 0x993   : > { %v5456_v6 = vld [vmem:[#allocation3 + $0x81] sm:$0xff] }
 0x994   : > { %v5704_v48 = vmax.f32 %v5696_v23, 0.0  ;;  %5922 = vst [vmem:[%s10800_s26 + $0x8] sm:$0xff] %v5890_v38   ;;  %v5690_v52 = vmax.f32 %v5682_v30, 0.0  ;;  %v5676_v47 = vmax.f32 %v5456_v6, 0.0  ;;  %v5440_v28 = vadd.f32 %v5432_v9, %v5424_v31 }
 0x996   : > { %v5910_v39 = vpack.c.bf16 %v5704_v48, %v5703_v26  ;;  %v5698_v34 = vadd.f32 %v5690_v52, %v12650_v21  ;;  %v5895_v37 = vpack.c.bf16 %v5690_v52, %v5689_v16  ;;  %v5684_v17 = vadd.f32 %v5676_v47, %v12651_v3  ;;  %5448 = vst [vmem:[#allocation3 + $0x92] sm:$0xff] %v5440_v28 }
 0x998   : > { %5925 = vst [vmem:[%s10808_s28 + $0x8] sm:$0xff] %v5910_v39   ;;  %v5706_v54 = vmax.f32 %v5698_v34, 0.0  ;;  %5923 = vst [vmem:[%s10800_s26 + $0x10] sm:$0xff] %v5895_v37   ;;  %v5692_v62 = vmax.f32 %v5684_v17, 0.0 }
 0x99a   : > { %v5915_v43 = vpack.c.bf16 %v5706_v54, %v5705_v58  ;;  %v5700_v45 = vadd.f32 %v5692_v62, %v12653_v2  ;;  %v5900_v46 = vpack.c.bf16 %v5692_v62, %v5691_v44 }
 0x99c   : > { %5926 = vst [vmem:[%s10808_s28 + $0x10] sm:$0xff] %v5915_v43   ;;  %v5708_v49 = vmax.f32 %v5700_v45, 0.0  ;;  %5924 = vst [vmem:[%s10800_s26 + $0x18] sm:$0xff] %v5900_v46  }
 0x99e   : > { %v5920_v15 = vpack.c.bf16 %v5708_v49, %v5707_v11 }
 0x9a0   : > { %5927 = vst [vmem:[%s10808_s28 + $0x18] sm:$0xff] %v5920_v15  }
 0x9a1 PF: > { %s18_s24 = sadd.s32 1, %s6470_s24  }
 0x9a2   : > { %p15_p4 = scmp.ge.s32.totalorder %s18_s24, 4  }
 0x9a4   :  { %17 = sbr.rel (!%p15_p4) target bundleno = 1 (0x1), region = 93 }

</bundles_post_ra>
